<compile_context>
chip_gen: v5e
topology: v5e:2x2
jax: 0.10.0
libtpu: 0.0.40
codegen_flags: <defaults>
</compile_context>

<pallas_src>
import jax
import jax.numpy as jnp
from jax.experimental import pallas as pl
from jax.experimental.pallas import tpu as pltpu

_VMEM_LIMIT = 32 * 1024 * 1024   # valid on v5e/v6e/v7x; kernels use < 8 MiB


# ----------------------------------------------------------------------------
# XLA glue: im2col with the 2x2 pool window exposed as a leading parity axis.
# ----------------------------------------------------------------------------
def im2col_pool_parity(x, k):
    """x NHWC -> (B, 4, Hp*Wp, C*k*k) patches for a VALID kxk conv followed by
    MaxPool2d(2,2).  Axis 1 indexes the pool-window position q = 2*hp + wp,
    rows are ordered (ho*Wp + wo), and features are (Cin, kh, kw)-major, which
    matches w.reshape(Cout,-1).T."""
    B, H, W, _ = x.shape
    Ho, Wo = H - k + 1, W - k + 1
    Hp, Wp = Ho // 2, Wo // 2
    patches = jax.lax.conv_general_dilated_patches(
        x, (k, k), (1, 1), "VALID",
        dimension_numbers=("NHWC", "HWIO", "NHWC"))          # (B, Ho, Wo, F)
    feat = patches.shape[-1]
    patches = patches[:, : Hp * 2, : Wp * 2, :]              # pool floor crop
    p = patches.reshape(B, Hp, 2, Wp, 2, feat).transpose(0, 2, 4, 1, 3, 5)
    return p.reshape(B, 4, Hp * Wp, feat), (Hp, Wp)


# ----------------------------------------------------------------------------
# Kernel 1: conv + BN + ReLU + maxpool(2,2) fused -- one grid step per image.
# ----------------------------------------------------------------------------
def _conv_pool_kernel(a_ref, w_ref, s_ref, o_ref):
    w = w_ref[...]
    s = s_ref[...]

    def branch(q):                                           # (P, N)
        y = jnp.dot(a_ref[q], w, preferred_element_type=jnp.float32) + s
        return jnp.maximum(y, 0.0)

    m = jnp.maximum(jnp.maximum(branch(0), branch(1)),
                    jnp.maximum(branch(2), branch(3)))       # maxpool 2x2
    o_ref[...] = m.astype(o_ref.dtype)


def conv_bn_relu_pool(a, w_mat, shift):
    """a: (B, 4, P, K) parity-ordered patches; returns (B, P, N) pooled map
    with rows ordered (ho*Wp + wo) and channels on lanes."""
    B, _, P, K = a.shape
    N = w_mat.shape[1]
    return pl.pallas_call(
        _conv_pool_kernel,
        out_shape=jax.ShapeDtypeStruct((B, P, N), jnp.float32),
        grid=(B,),
        in_specs=[
            pl.BlockSpec((None, 4, P, K), lambda b: (b, 0, 0, 0)),
            pl.BlockSpec((K, N), lambda b: (0, 0)),
            pl.BlockSpec((1, N), lambda b: (0, 0)),
        ],
        out_specs=pl.BlockSpec((None, P, N), lambda b: (b, 0, 0)),
        compiler_params=pltpu.CompilerParams(
            dimension_semantics=("parallel",),
            vmem_limit_bytes=_VMEM_LIMIT),
    )(a, w_mat, shift)


# ----------------------------------------------------------------------------
# Kernel 2: conv2 + BN + ReLU + maxpool(2,2) + flatten + fc1/fc2/fc3 fused.
# ----------------------------------------------------------------------------
def _tail_kernel(a_ref, wc_ref, sc_ref, fw1_ref, fb1_ref, fw2_ref, fb2_ref,
                 fw3_ref, fb3_ref, o_ref):
    wc = wc_ref[...]
    sc = sc_ref[...]

    def branch(q):                                           # (25, 32)
        y = jnp.dot(a_ref[q], wc, preferred_element_type=jnp.float32) + sc
        return jnp.maximum(y, 0.0)

    pooled = jnp.maximum(jnp.maximum(branch(0), branch(1)),
                         jnp.maximum(branch(2), branch(3)))  # rows (ho*5+wo)

    # fc1: the PyTorch (C,H,W) flatten order is folded into fw1's layout
    # (i, c, n); accumulate 25 small dots instead of doing an in-kernel
    # (25,32) -> (1,800) lane/sublane merge.
    h = fb1_ref[...]                                         # (1, 256)
    for i in range(pooled.shape[0]):
        h = h + jnp.dot(pooled[i:i + 1, :], fw1_ref[i],
                        preferred_element_type=jnp.float32)
    h = jnp.maximum(h, 0.0)
    h = jnp.maximum(
        jnp.dot(h, fw2_ref[...], preferred_element_type=jnp.float32)
        + fb2_ref[...], 0.0)                                 # (1, 32)
    o_ref[...] = (jnp.dot(h, fw3_ref[...], preferred_element_type=jnp.float32)
                  + fb3_ref[...]).astype(o_ref.dtype)        # (1, 2)


def fused_tail(a2, cw2, cs2, fw1, fb1, fw2, fb2, fw3, fb3):
    B, _, P, K = a2.shape
    n_cls = fw3.shape[1]
    out = pl.pallas_call(
        _tail_kernel,
        out_shape=jax.ShapeDtypeStruct((B, 1, n_cls), jnp.float32),
        grid=(B,),
        in_specs=[
            pl.BlockSpec((None, 4, P, K), lambda b: (b, 0, 0, 0)),
            pl.BlockSpec(cw2.shape, lambda b: (0, 0)),
            pl.BlockSpec(cs2.shape, lambda b: (0, 0)),
            pl.BlockSpec(fw1.shape, lambda b: (0, 0, 0)),
            pl.BlockSpec(fb1.shape, lambda b: (0, 0)),
            pl.BlockSpec(fw2.shape, lambda b: (0, 0)),
            pl.BlockSpec(fb2.shape, lambda b: (0, 0)),
            pl.BlockSpec(fw3.shape, lambda b: (0, 0)),
            pl.BlockSpec(fb3.shape, lambda b: (0, 0)),
        ],
        out_specs=pl.BlockSpec((None, 1, n_cls), lambda b: (b, 0, 0)),
        compiler_params=pltpu.CompilerParams(
            dimension_semantics=("parallel",),
            vmem_limit_bytes=_VMEM_LIMIT),
    )(a2, cw2, cs2, fw1, fb1, fw2, fb2, fw3, fb3)
    return out.reshape(B, n_cls)


# ----------------------------------------------------------------------------
# One-time parameter preparation (hoisted out of the forward path).
# ----------------------------------------------------------------------------
def prepare_params(p, eps=1e-5):
    """Weight layout transforms, inference-mode BatchNorm folding (scale into
    the weight columns, rest into an additive shift), and folding of the
    PyTorch (C,H,W) flatten permutation into fc1's weights."""
    def conv_prep(w, b, gamma, beta, mean, var):
        c_out = w.shape[0]
        scale = gamma / jnp.sqrt(var + eps)                  # (Cout,)
        # (Cout,Cin,kh,kw) -> (Cin*kh*kw, Cout), rows in (Cin,kh,kw) order
        w_mat = w.reshape(c_out, -1).T * scale[None, :]
        shift = ((b - mean) * scale + beta)[None, :]         # (1, Cout)
        return w_mat.astype(jnp.float32), shift.astype(jnp.float32)

    cw1, cs1 = conv_prep(p["w1"], p["b1"], p["g1"], p["be1"], p["m1"], p["v1"])
    cw2, cs2 = conv_prep(p["w2"], p["b2"], p["g2"], p["be2"], p["m2"], p["v2"])

    # fc1: fw1 is (256, 800) with column k = c*25 + i (PyTorch NCHW flatten);
    # re-lay it out as fw1p[i, c, n] = fw1[n, c*25 + i]  -> (25, 32, 256).
    n_hidden, flat = p["fw1"].shape
    c_out2 = p["w2"].shape[0]
    hw = flat // c_out2
    fw1p = p["fw1"].reshape(n_hidden, c_out2, hw).transpose(2, 1, 0)

    return dict(
        cw1=cw1, cs1=cs1, cw2=cw2, cs2=cs2,
        fw1=fw1p.astype(jnp.float32),
        fb1=p["fb1"][None, :].astype(jnp.float32),
        fw2=p["fw2"].T.astype(jnp.float32),
        fb2=p["fb2"][None, :].astype(jnp.float32),
        fw3=p["fw3"].T.astype(jnp.float32),
        fb3=p["fb3"][None, :].astype(jnp.float32),
    )


# ----------------------------------------------------------------------------
# Net.forward
# ----------------------------------------------------------------------------
@jax.jit
def net_forward(x_nchw, prep):
    B = x_nchw.shape[0]
    x = jnp.transpose(x_nchw, (0, 2, 3, 1))                  # NCHW -> NHWC
    # layer1: conv1 -> BN -> ReLU -> maxpool(2,2)   (pool fused in the kernel)
    a1, (hp1, wp1) = im2col_pool_parity(x, k=5)              # (B, 4, 484, 75)
    p1 = conv_bn_relu_pool(a1, prep["cw1"], prep["cs1"])     # (B, 484, 16)
    p1 = p1.reshape(B, hp1, wp1, prep["cw1"].shape[1])       # NHWC (B,22,22,16)
    # layer2 + flatten + layer4/5/6 fused into a single kernel
    a2, _ = im2col_pool_parity(p1, k=13)                     # (B, 4, 25, 2704)
    # useCNN3 == False -> layer3 skipped
    return fused_tail(a2, prep["cw2"], prep["cs2"], prep["fw1"], prep["fb1"],
                      prep["fw2"], prep["fb2"], prep["fw3"], prep["fb3"])


# ----------------------------------------------------------------------------
# Deterministic parameter init + demo run
# ----------------------------------------------------------------------------
if __name__ == "__main__":
    # input 48x48 -> conv(5): 44 -> pool: 22 -> conv(13): 10 -> pool: 5
    # => outSize = 5, flattened dim = 32*5*5 = 800
    B, IN_C, H, W = 2, 3, 48, 48
    OUT_SIZE = 5
    FLAT = 32 * OUT_SIZE * OUT_SIZE

    key = jax.random.PRNGKey(0)
    ks = list(jax.random.split(key, 24))

    def uni(k, shape, fan_in):
        bound = 1.0 / jnp.sqrt(float(fan_in))
        return jax.random.uniform(k, shape, jnp.float32, -bound, bound)

    params = dict(
        # cnn1: Conv2d(3, 16, 5) + BatchNorm2d(16)
        w1=uni(ks[0], (16, 3, 5, 5), 3 * 5 * 5),
        b1=uni(ks[1], (16,), 3 * 5 * 5),
        g1=1.0 + 0.1 * jax.random.normal(ks[2], (16,), jnp.float32),
        be1=0.1 * jax.random.normal(ks[3], (16,), jnp.float32),
        m1=0.1 * jax.random.normal(ks[4], (16,), jnp.float32),
        v1=1.0 + 0.1 * jax.random.uniform(ks[5], (16,), jnp.float32),
        # cnn2: Conv2d(16, 32, 13) + BatchNorm2d(32)
        w2=uni(ks[6], (32, 16, 13, 13), 16 * 13 * 13),
        b2=uni(ks[7], (32,), 16 * 13 * 13),
        g2=1.0 + 0.1 * jax.random.normal(ks[8], (32,), jnp.float32),
        be2=0.1 * jax.random.normal(ks[9], (32,), jnp.float32),
        m2=0.1 * jax.random.normal(ks[10], (32,), jnp.float32),
        v2=1.0 + 0.1 * jax.random.uniform(ks[11], (32,), jnp.float32),
        # fc1: Linear(800, 256), fc2: Linear(256, 32), fc3: Linear(32, 2)
        fw1=uni(ks[12], (256, FLAT), FLAT),
        fb1=uni(ks[13], (256,), FLAT),
        fw2=uni(ks[14], (32, 256), 256),
        fb2=uni(ks[15], (32,), 256),
        fw3=uni(ks[16], (2, 32), 32),
        fb3=uni(ks[17], (2,), 32),
    )

    x = jax.random.normal(ks[18], (B, IN_C, H, W), jnp.float32)   # NCHW input

    prep = prepare_params(params)          # one-time parameter prep (hoisted)
    out = net_forward(x, prep)
    out = jax.block_until_ready(out)
    assert out.shape == (B, 2), out.shape
    assert bool(jnp.all(jnp.isfinite(out)))
    print("KERNEL_OK")
</pallas_src>

<mosaic_0001>
module attributes {stable_mosaic.version = 11 : i64} {
  func.func @_conv_pool_kernel(%arg0: i32, %arg1: memref<1x4x484x75xf32, #tpu.memory_space<vmem>>, %arg2: memref<75x16xf32, #tpu.memory_space<vmem>>, %arg3: memref<1x16xf32, #tpu.memory_space<vmem>>, %arg4: memref<1x484x16xf32, #tpu.memory_space<vmem>>) attributes {dimension_semantics = [#tpu.dimension_semantics<parallel>], iteration_bounds = array<i64: 2>, scalar_prefetch = 0 : i64, scratch_operands = 0 : i64, tpu.core_type = #tpu.core_type<tc>, window_params = [{transform_indices = @transform_0, window_bounds = array<i64: 1, 4, 484, 75>}, {pipeline_mode = #tpu.pipeline_mode<synchronous>, transform_indices = @transform_1, window_bounds = array<i64: 75, 16>}, {pipeline_mode = #tpu.pipeline_mode<synchronous>, transform_indices = @transform_2, window_bounds = array<i64: 1, 16>}, {transform_indices = @transform_3, window_bounds = array<i64: 1, 484, 16>}]} {
    %c0 = arith.constant 0 : index
    %c0_0 = arith.constant 0 : index
    %0 = vector.load %arg2[%c0, %c0_0] : memref<75x16xf32, #tpu.memory_space<vmem>>, vector<75x16xf32>
    %c0_1 = arith.constant 0 : index
    %c0_2 = arith.constant 0 : index
    %1 = vector.load %arg3[%c0_1, %c0_2] : memref<1x16xf32, #tpu.memory_space<vmem>>, vector<1x16xf32>
    %c0_3 = arith.constant 0 : index
    %c0_4 = arith.constant 0 : index
    %c0_5 = arith.constant 0 : index
    %c0_6 = arith.constant 0 : index
    %2 = vector.load %arg1[%c0_3, %c0_4, %c0_5, %c0_6] : memref<1x4x484x75xf32, #tpu.memory_space<vmem>>, vector<1x1x484x75xf32>
    %3 = vector.shape_cast %2 : vector<1x1x484x75xf32> to vector<484x75xf32>
    %cst = arith.constant dense<0.000000e+00> : vector<484x16xf32>
    %4 = tpu.matmul %3, %0, %cst {dimension_numbers = #tpu.dot_dimension_numbers<[1], [0], [0], [1], [0, 0, 1, 1], [], []>} : vector<484x75xf32>, vector<75x16xf32>, vector<484x16xf32> -> vector<484x16xf32>
    %5 = vector.broadcast %1 : vector<1x16xf32> to vector<484x16xf32>
    %6 = arith.addf %4, %5 : vector<484x16xf32>
    %cst_7 = arith.constant 0.000000e+00 : f32
    %7 = vector.broadcast %cst_7 : f32 to vector<484x16xf32>
    %8 = arith.maximumf %6, %7 : vector<484x16xf32>
    %c0_8 = arith.constant 0 : index
    %c1 = arith.constant 1 : index
    %c0_9 = arith.constant 0 : index
    %c0_10 = arith.constant 0 : index
    %9 = vector.load %arg1[%c0_8, %c1, %c0_9, %c0_10] : memref<1x4x484x75xf32, #tpu.memory_space<vmem>>, vector<1x1x484x75xf32>
    %10 = vector.shape_cast %9 : vector<1x1x484x75xf32> to vector<484x75xf32>
    %cst_11 = arith.constant dense<0.000000e+00> : vector<484x16xf32>
    %11 = tpu.matmul %10, %0, %cst_11 {dimension_numbers = #tpu.dot_dimension_numbers<[1], [0], [0], [1], [0, 0, 1, 1], [], []>} : vector<484x75xf32>, vector<75x16xf32>, vector<484x16xf32> -> vector<484x16xf32>
    %12 = vector.broadcast %1 : vector<1x16xf32> to vector<484x16xf32>
    %13 = arith.addf %11, %12 : vector<484x16xf32>
    %cst_12 = arith.constant 0.000000e+00 : f32
    %14 = vector.broadcast %cst_12 : f32 to vector<484x16xf32>
    %15 = arith.maximumf %13, %14 : vector<484x16xf32>
    %16 = arith.maximumf %8, %15 : vector<484x16xf32>
    %c0_13 = arith.constant 0 : index
    %c2 = arith.constant 2 : index
    %c0_14 = arith.constant 0 : index
    %c0_15 = arith.constant 0 : index
    %17 = vector.load %arg1[%c0_13, %c2, %c0_14, %c0_15] : memref<1x4x484x75xf32, #tpu.memory_space<vmem>>, vector<1x1x484x75xf32>
    %18 = vector.shape_cast %17 : vector<1x1x484x75xf32> to vector<484x75xf32>
    %cst_16 = arith.constant dense<0.000000e+00> : vector<484x16xf32>
    %19 = tpu.matmul %18, %0, %cst_16 {dimension_numbers = #tpu.dot_dimension_numbers<[1], [0], [0], [1], [0, 0, 1, 1], [], []>} : vector<484x75xf32>, vector<75x16xf32>, vector<484x16xf32> -> vector<484x16xf32>
    %20 = vector.broadcast %1 : vector<1x16xf32> to vector<484x16xf32>
    %21 = arith.addf %19, %20 : vector<484x16xf32>
    %cst_17 = arith.constant 0.000000e+00 : f32
    %22 = vector.broadcast %cst_17 : f32 to vector<484x16xf32>
    %23 = arith.maximumf %21, %22 : vector<484x16xf32>
    %c0_18 = arith.constant 0 : index
    %c3 = arith.constant 3 : index
    %c0_19 = arith.constant 0 : index
    %c0_20 = arith.constant 0 : index
    %24 = vector.load %arg1[%c0_18, %c3, %c0_19, %c0_20] : memref<1x4x484x75xf32, #tpu.memory_space<vmem>>, vector<1x1x484x75xf32>
    %25 = vector.shape_cast %24 : vector<1x1x484x75xf32> to vector<484x75xf32>
    %cst_21 = arith.constant dense<0.000000e+00> : vector<484x16xf32>
    %26 = tpu.matmul %25, %0, %cst_21 {dimension_numbers = #tpu.dot_dimension_numbers<[1], [0], [0], [1], [0, 0, 1, 1], [], []>} : vector<484x75xf32>, vector<75x16xf32>, vector<484x16xf32> -> vector<484x16xf32>
    %27 = vector.broadcast %1 : vector<1x16xf32> to vector<484x16xf32>
    %28 = arith.addf %26, %27 : vector<484x16xf32>
    %cst_22 = arith.constant 0.000000e+00 : f32
    %29 = vector.broadcast %cst_22 : f32 to vector<484x16xf32>
    %30 = arith.maximumf %28, %29 : vector<484x16xf32>
    %31 = arith.maximumf %23, %30 : vector<484x16xf32>
    %32 = arith.maximumf %16, %31 : vector<484x16xf32>
    %c0_23 = arith.constant 0 : index
    %c0_24 = arith.constant 0 : index
    %c0_25 = arith.constant 0 : index
    %33 = vector.load %arg4[%c0_23, %c0_24, %c0_25] : memref<1x484x16xf32, #tpu.memory_space<vmem>>, vector<1x484x16xf32>
    %34 = vector.shape_cast %33 : vector<1x484x16xf32> to vector<484x16xf32>
    %35 = vector.shape_cast %32 : vector<484x16xf32> to vector<1x484x16xf32>
    tpu.vector_store %arg4[%c0_23, %c0_24, %c0_25], %35 {strides = array<i32>} : memref<1x484x16xf32, #tpu.memory_space<vmem>>, vector<1x484x16xf32>,
    return
  }
  func.func @transform_0(%arg0: i32) -> (i32, i32, i32, i32) {
    %c0_i32 = arith.constant 0 : i32
    %c0_i32_0 = arith.constant 0 : i32
    %c0_i32_1 = arith.constant 0 : i32
    %c0_i32_2 = arith.constant 0 : i32
    return %arg0, %c0_i32, %c0_i32_0, %c0_i32_1 : i32, i32, i32, i32
  }
  func.func @transform_1(%arg0: i32) -> (i32, i32) {
    %c0_i32 = arith.constant 0 : i32
    %c0_i32_0 = arith.constant 0 : i32
    %c0_i32_1 = arith.constant 0 : i32
    return %c0_i32, %c0_i32_0 : i32, i32
  }
  func.func @transform_2(%arg0: i32) -> (i32, i32) {
    %c0_i32 = arith.constant 0 : i32
    %c0_i32_0 = arith.constant 0 : i32
    %c0_i32_1 = arith.constant 0 : i32
    return %c0_i32, %c0_i32_0 : i32, i32
  }
  func.func @transform_3(%arg0: i32) -> (i32, i32, i32) {
    %c0_i32 = arith.constant 0 : i32
    %c0_i32_0 = arith.constant 0 : i32
    %c0_i32_1 = arith.constant 0 : i32
    return %arg0, %c0_i32, %c0_i32_0 : i32, i32, i32
  }
}

module attributes {stable_mosaic.version = 11 : i64} {
  func.func @_tail_kernel(%arg0: i32, %arg1: memref<1x4x25x2704xf32, #tpu.memory_space<vmem>>, %arg2: memref<2704x32xf32, #tpu.memory_space<vmem>>, %arg3: memref<1x32xf32, #tpu.memory_space<vmem>>, %arg4: memref<25x32x256xf32, #tpu.memory_space<vmem>>, %arg5: memref<1x256xf32, #tpu.memory_space<vmem>>, %arg6: memref<256x32xf32, #tpu.memory_space<vmem>>, %arg7: memref<1x32xf32, #tpu.memory_space<vmem>>, %arg8: memref<32x2xf32, #tpu.memory_space<vmem>>, %arg9: memref<1x2xf32, #tpu.memory_space<vmem>>, %arg10: memref<1x1x2xf32, #tpu.memory_space<vmem>>) attributes {dimension_semantics = [#tpu.dimension_semantics<parallel>], iteration_bounds = array<i64: 2>, scalar_prefetch = 0 : i64, scratch_operands = 0 : i64, tpu.core_type = #tpu.core_type<tc>, window_params = [{transform_indices = @transform_0, window_bounds = array<i64: 1, 4, 25, 2704>}, {pipeline_mode = #tpu.pipeline_mode<synchronous>, transform_indices = @transform_1, window_bounds = array<i64: 2704, 32>}, {pipeline_mode = #tpu.pipeline_mode<synchronous>, transform_indices = @transform_2, window_bounds = array<i64: 1, 32>}, {pipeline_mode = #tpu.pipeline_mode<synchronous>, transform_indices = @transform_3, window_bounds = array<i64: 25, 32, 256>}, {pipeline_mode = #tpu.pipeline_mode<synchronous>, transform_indices = @transform_4, window_bounds = array<i64: 1, 256>}, {pipeline_mode = #tpu.pipeline_mode<synchronous>, transform_indices = @transform_5, window_bounds = array<i64: 256, 32>}, {pipeline_mode = #tpu.pipeline_mode<synchronous>, transform_indices = @transform_6, window_bounds = array<i64: 1, 32>}, {pipeline_mode = #tpu.pipeline_mode<synchronous>, transform_indices = @transform_7, window_bounds = array<i64: 32, 2>}, {pipeline_mode = #tpu.pipeline_mode<synchronous>, transform_indices = @transform_8, window_bounds = array<i64: 1, 2>}, {transform_indices = @transform_9, window_bounds = array<i64: 1, 1, 2>}]} {
    %c0 = arith.constant 0 : index
    %c0_0 = arith.constant 0 : index
    %0 = vector.load %arg2[%c0, %c0_0] : memref<2704x32xf32, #tpu.memory_space<vmem>>, vector<2704x32xf32>
    %c0_1 = arith.constant 0 : index
    %c0_2 = arith.constant 0 : index
    %1 = vector.load %arg3[%c0_1, %c0_2] : memref<1x32xf32, #tpu.memory_space<vmem>>, vector<1x32xf32>
    %c0_3 = arith.constant 0 : index
    %c0_4 = arith.constant 0 : index
    %c0_5 = arith.constant 0 : index
    %c0_6 = arith.constant 0 : index
    %2 = vector.load %arg1[%c0_3, %c0_4, %c0_5, %c0_6] : memref<1x4x25x2704xf32, #tpu.memory_space<vmem>>, vector<1x1x25x2704xf32>
    %3 = vector.shape_cast %2 : vector<1x1x25x2704xf32> to vector<25x2704xf32>
    %cst = arith.constant dense<0.000000e+00> : vector<25x32xf32>
    %4 = tpu.matmul %3, %0, %cst {dimension_numbers = #tpu.dot_dimension_numbers<[1], [0], [0], [1], [0, 0, 1, 1], [], []>} : vector<25x2704xf32>, vector<2704x32xf32>, vector<25x32xf32> -> vector<25x32xf32>
    %5 = vector.broadcast %1 : vector<1x32xf32> to vector<25x32xf32>
    %6 = arith.addf %4, %5 : vector<25x32xf32>
    %cst_7 = arith.constant 0.000000e+00 : f32
    %7 = vector.broadcast %cst_7 : f32 to vector<25x32xf32>
    %8 = arith.maximumf %6, %7 : vector<25x32xf32>
    %c0_8 = arith.constant 0 : index
    %c1 = arith.constant 1 : index
    %c0_9 = arith.constant 0 : index
    %c0_10 = arith.constant 0 : index
    %9 = vector.load %arg1[%c0_8, %c1, %c0_9, %c0_10] : memref<1x4x25x2704xf32, #tpu.memory_space<vmem>>, vector<1x1x25x2704xf32>
    %10 = vector.shape_cast %9 : vector<1x1x25x2704xf32> to vector<25x2704xf32>
    %cst_11 = arith.constant dense<0.000000e+00> : vector<25x32xf32>
    %11 = tpu.matmul %10, %0, %cst_11 {dimension_numbers = #tpu.dot_dimension_numbers<[1], [0], [0], [1], [0, 0, 1, 1], [], []>} : vector<25x2704xf32>, vector<2704x32xf32>, vector<25x32xf32> -> vector<25x32xf32>
    %12 = vector.broadcast %1 : vector<1x32xf32> to vector<25x32xf32>
    %13 = arith.addf %11, %12 : vector<25x32xf32>
    %cst_12 = arith.constant 0.000000e+00 : f32
    %14 = vector.broadcast %cst_12 : f32 to vector<25x32xf32>
    %15 = arith.maximumf %13, %14 : vector<25x32xf32>
    %16 = arith.maximumf %8, %15 : vector<25x32xf32>
    %c0_13 = arith.constant 0 : index
    %c2 = arith.constant 2 : index
    %c0_14 = arith.constant 0 : index
    %c0_15 = arith.constant 0 : index
    %17 = vector.load %arg1[%c0_13, %c2, %c0_14, %c0_15] : memref<1x4x25x2704xf32, #tpu.memory_space<vmem>>, vector<1x1x25x2704xf32>
    %18 = vector.shape_cast %17 : vector<1x1x25x2704xf32> to vector<25x2704xf32>
    %cst_16 = arith.constant dense<0.000000e+00> : vector<25x32xf32>
    %19 = tpu.matmul %18, %0, %cst_16 {dimension_numbers = #tpu.dot_dimension_numbers<[1], [0], [0], [1], [0, 0, 1, 1], [], []>} : vector<25x2704xf32>, vector<2704x32xf32>, vector<25x32xf32> -> vector<25x32xf32>
    %20 = vector.broadcast %1 : vector<1x32xf32> to vector<25x32xf32>
    %21 = arith.addf %19, %20 : vector<25x32xf32>
    %cst_17 = arith.constant 0.000000e+00 : f32
    %22 = vector.broadcast %cst_17 : f32 to vector<25x32xf32>
    %23 = arith.maximumf %21, %22 : vector<25x32xf32>
    %c0_18 = arith.constant 0 : index
    %c3 = arith.constant 3 : index
    %c0_19 = arith.constant 0 : index
    %c0_20 = arith.constant 0 : index
    %24 = vector.load %arg1[%c0_18, %c3, %c0_19, %c0_20] : memref<1x4x25x2704xf32, #tpu.memory_space<vmem>>, vector<1x1x25x2704xf32>
    %25 = vector.shape_cast %24 : vector<1x1x25x2704xf32> to vector<25x2704xf32>
    %cst_21 = arith.constant dense<0.000000e+00> : vector<25x32xf32>
    %26 = tpu.matmul %25, %0, %cst_21 {dimension_numbers = #tpu.dot_dimension_numbers<[1], [0], [0], [1], [0, 0, 1, 1], [], []>} : vector<25x2704xf32>, vector<2704x32xf32>, vector<25x32xf32> -> vector<25x32xf32>
    %27 = vector.broadcast %1 : vector<1x32xf32> to vector<25x32xf32>
    %28 = arith.addf %26, %27 : vector<25x32xf32>
    %cst_22 = arith.constant 0.000000e+00 : f32
    %29 = vector.broadcast %cst_22 : f32 to vector<25x32xf32>
    %30 = arith.maximumf %28, %29 : vector<25x32xf32>
    %31 = arith.maximumf %23, %30 : vector<25x32xf32>
    %32 = arith.maximumf %16, %31 : vector<25x32xf32>
    %c0_23 = arith.constant 0 : index
    %c0_24 = arith.constant 0 : index
    %33 = vector.load %arg5[%c0_23, %c0_24] : memref<1x256xf32, #tpu.memory_space<vmem>>, vector<1x256xf32>
    %34 = vector.extract_strided_slice %32 {offsets = [0, 0], sizes = [1, 32], strides = [1, 1]} : vector<25x32xf32> to vector<1x32xf32>
    %c0_25 = arith.constant 0 : index
    %c0_26 = arith.constant 0 : index
    %c0_27 = arith.constant 0 : index
    %35 = vector.load %arg4[%c0_25, %c0_26, %c0_27] : memref<25x32x256xf32, #tpu.memory_space<vmem>>, vector<1x32x256xf32>
    %36 = vector.shape_cast %35 : vector<1x32x256xf32> to vector<32x256xf32>
    %cst_28 = arith.constant dense<0.000000e+00> : vector<1x256xf32>
    %37 = tpu.matmul %34, %36, %cst_28 {dimension_numbers = #tpu.dot_dimension_numbers<[1], [0], [0], [1], [0, 0, 1, 1], [], []>} : vector<1x32xf32>, vector<32x256xf32>, vector<1x256xf32> -> vector<1x256xf32>
    %38 = arith.addf %33, %37 : vector<1x256xf32>
    %39 = vector.extract_strided_slice %32 {offsets = [1, 0], sizes = [1, 32], strides = [1, 1]} : vector<25x32xf32> to vector<1x32xf32>
    %c1_29 = arith.constant 1 : index
    %c0_30 = arith.constant 0 : index
    %c0_31 = arith.constant 0 : index
    %40 = vector.load %arg4[%c1_29, %c0_30, %c0_31] : memref<25x32x256xf32, #tpu.memory_space<vmem>>, vector<1x32x256xf32>
    %41 = vector.shape_cast %40 : vector<1x32x256xf32> to vector<32x256xf32>
    %cst_32 = arith.constant dense<0.000000e+00> : vector<1x256xf32>
    %42 = tpu.matmul %39, %41, %cst_32 {dimension_numbers = #tpu.dot_dimension_numbers<[1], [0], [0], [1], [0, 0, 1, 1], [], []>} : vector<1x32xf32>, vector<32x256xf32>, vector<1x256xf32> -> vector<1x256xf32>
    %43 = arith.addf %38, %42 : vector<1x256xf32>
    %44 = vector.extract_strided_slice %32 {offsets = [2, 0], sizes = [1, 32], strides = [1, 1]} : vector<25x32xf32> to vector<1x32xf32>
    %c2_33 = arith.constant 2 : index
    %c0_34 = arith.constant 0 : index
    %c0_35 = arith.constant 0 : index
    %45 = vector.load %arg4[%c2_33, %c0_34, %c0_35] : memref<25x32x256xf32, #tpu.memory_space<vmem>>, vector<1x32x256xf32>
    %46 = vector.shape_cast %45 : vector<1x32x256xf32> to vector<32x256xf32>
    %cst_36 = arith.constant dense<0.000000e+00> : vector<1x256xf32>
    %47 = tpu.matmul %44, %46, %cst_36 {dimension_numbers = #tpu.dot_dimension_numbers<[1], [0], [0], [1], [0, 0, 1, 1], [], []>} : vector<1x32xf32>, vector<32x256xf32>, vector<1x256xf32> -> vector<1x256xf32>
    %48 = arith.addf %43, %47 : vector<1x256xf32>
    %49 = vector.extract_strided_slice %32 {offsets = [3, 0], sizes = [1, 32], strides = [1, 1]} : vector<25x32xf32> to vector<1x32xf32>
    %c3_37 = arith.constant 3 : index
    %c0_38 = arith.constant 0 : index
    %c0_39 = arith.constant 0 : index
    %50 = vector.load %arg4[%c3_37, %c0_38, %c0_39] : memref<25x32x256xf32, #tpu.memory_space<vmem>>, vector<1x32x256xf32>
    %51 = vector.shape_cast %50 : vector<1x32x256xf32> to vector<32x256xf32>
    %cst_40 = arith.constant dense<0.000000e+00> : vector<1x256xf32>
    %52 = tpu.matmul %49, %51, %cst_40 {dimension_numbers = #tpu.dot_dimension_numbers<[1], [0], [0], [1], [0, 0, 1, 1], [], []>} : vector<1x32xf32>, vector<32x256xf32>, vector<1x256xf32> -> vector<1x256xf32>
    %53 = arith.addf %48, %52 : vector<1x256xf32>
    %54 = vector.extract_strided_slice %32 {offsets = [4, 0], sizes = [1, 32], strides = [1, 1]} : vector<25x32xf32> to vector<1x32xf32>
    %c4 = arith.constant 4 : index
    %c0_41 = arith.constant 0 : index
    %c0_42 = arith.constant 0 : index
    %55 = vector.load %arg4[%c4, %c0_41, %c0_42] : memref<25x32x256xf32, #tpu.memory_space<vmem>>, vector<1x32x256xf32>
    %56 = vector.shape_cast %55 : vector<1x32x256xf32> to vector<32x256xf32>
    %cst_43 = arith.constant dense<0.000000e+00> : vector<1x256xf32>
    %57 = tpu.matmul %54, %56, %cst_43 {dimension_numbers = #tpu.dot_dimension_numbers<[1], [0], [0], [1], [0, 0, 1, 1], [], []>} : vector<1x32xf32>, vector<32x256xf32>, vector<1x256xf32> -> vector<1x256xf32>
    %58 = arith.addf %53, %57 : vector<1x256xf32>
    %59 = vector.extract_strided_slice %32 {offsets = [5, 0], sizes = [1, 32], strides = [1, 1]} : vector<25x32xf32> to vector<1x32xf32>
    %c5 = arith.constant 5 : index
    %c0_44 = arith.constant 0 : index
    %c0_45 = arith.constant 0 : index
    %60 = vector.load %arg4[%c5, %c0_44, %c0_45] : memref<25x32x256xf32, #tpu.memory_space<vmem>>, vector<1x32x256xf32>
    %61 = vector.shape_cast %60 : vector<1x32x256xf32> to vector<32x256xf32>
    %cst_46 = arith.constant dense<0.000000e+00> : vector<1x256xf32>
    %62 = tpu.matmul %59, %61, %cst_46 {dimension_numbers = #tpu.dot_dimension_numbers<[1], [0], [0], [1], [0, 0, 1, 1], [], []>} : vector<1x32xf32>, vector<32x256xf32>, vector<1x256xf32> -> vector<1x256xf32>
    %63 = arith.addf %58, %62 : vector<1x256xf32>
    %64 = vector.extract_strided_slice %32 {offsets = [6, 0], sizes = [1, 32], strides = [1, 1]} : vector<25x32xf32> to vector<1x32xf32>
    %c6 = arith.constant 6 : index
    %c0_47 = arith.constant 0 : index
    %c0_48 = arith.constant 0 : index
    %65 = vector.load %arg4[%c6, %c0_47, %c0_48] : memref<25x32x256xf32, #tpu.memory_space<vmem>>, vector<1x32x256xf32>
    %66 = vector.shape_cast %65 : vector<1x32x256xf32> to vector<32x256xf32>
    %cst_49 = arith.constant dense<0.000000e+00> : vector<1x256xf32>
    %67 = tpu.matmul %64, %66, %cst_49 {dimension_numbers = #tpu.dot_dimension_numbers<[1], [0], [0], [1], [0, 0, 1, 1], [], []>} : vector<1x32xf32>, vector<32x256xf32>, vector<1x256xf32> -> vector<1x256xf32>
    %68 = arith.addf %63, %67 : vector<1x256xf32>
    %69 = vector.extract_strided_slice %32 {offsets = [7, 0], sizes = [1, 32], strides = [1, 1]} : vector<25x32xf32> to vector<1x32xf32>
    %c7 = arith.constant 7 : index
    %c0_50 = arith.constant 0 : index
    %c0_51 = arith.constant 0 : index
    %70 = vector.load %arg4[%c7, %c0_50, %c0_51] : memref<25x32x256xf32, #tpu.memory_space<vmem>>, vector<1x32x256xf32>
    %71 = vector.shape_cast %70 : vector<1x32x256xf32> to vector<32x256xf32>
    %cst_52 = arith.constant dense<0.000000e+00> : vector<1x256xf32>
    %72 = tpu.matmul %69, %71, %cst_52 {dimension_numbers = #tpu.dot_dimension_numbers<[1], [0], [0], [1], [0, 0, 1, 1], [], []>} : vector<1x32xf32>, vector<32x256xf32>, vector<1x256xf32> -> vector<1x256xf32>
    %73 = arith.addf %68, %72 : vector<1x256xf32>
    %74 = vector.extract_strided_slice %32 {offsets = [8, 0], sizes = [1, 32], strides = [1, 1]} : vector<25x32xf32> to vector<1x32xf32>
    %c8 = arith.constant 8 : index
    %c0_53 = arith.constant 0 : index
    %c0_54 = arith.constant 0 : index
    %75 = vector.load %arg4[%c8, %c0_53, %c0_54] : memref<25x32x256xf32, #tpu.memory_space<vmem>>, vector<1x32x256xf32>
    %76 = vector.shape_cast %75 : vector<1x32x256xf32> to vector<32x256xf32>
    %cst_55 = arith.constant dense<0.000000e+00> : vector<1x256xf32>
    %77 = tpu.matmul %74, %76, %cst_55 {dimension_numbers = #tpu.dot_dimension_numbers<[1], [0], [0], [1], [0, 0, 1, 1], [], []>} : vector<1x32xf32>, vector<32x256xf32>, vector<1x256xf32> -> vector<1x256xf32>
    %78 = arith.addf %73, %77 : vector<1x256xf32>
    %79 = vector.extract_strided_slice %32 {offsets = [9, 0], sizes = [1, 32], strides = [1, 1]} : vector<25x32xf32> to vector<1x32xf32>
    %c9 = arith.constant 9 : index
    %c0_56 = arith.constant 0 : index
    %c0_57 = arith.constant 0 : index
    %80 = vector.load %arg4[%c9, %c0_56, %c0_57] : memref<25x32x256xf32, #tpu.memory_space<vmem>>, vector<1x32x256xf32>
    %81 = vector.shape_cast %80 : vector<1x32x256xf32> to vector<32x256xf32>
    %cst_58 = arith.constant dense<0.000000e+00> : vector<1x256xf32>
    %82 = tpu.matmul %79, %81, %cst_58 {dimension_numbers = #tpu.dot_dimension_numbers<[1], [0], [0], [1], [0, 0, 1, 1], [], []>} : vector<1x32xf32>, vector<32x256xf32>, vector<1x256xf32> -> vector<1x256xf32>
    %83 = arith.addf %78, %82 : vector<1x256xf32>
    %84 = vector.extract_strided_slice %32 {offsets = [10, 0], sizes = [1, 32], strides = [1, 1]} : vector<25x32xf32> to vector<1x32xf32>
    %c10 = arith.constant 10 : index
    %c0_59 = arith.constant 0 : index
    %c0_60 = arith.constant 0 : index
    %85 = vector.load %arg4[%c10, %c0_59, %c0_60] : memref<25x32x256xf32, #tpu.memory_space<vmem>>, vector<1x32x256xf32>
    %86 = vector.shape_cast %85 : vector<1x32x256xf32> to vector<32x256xf32>
    %cst_61 = arith.constant dense<0.000000e+00> : vector<1x256xf32>
    %87 = tpu.matmul %84, %86, %cst_61 {dimension_numbers = #tpu.dot_dimension_numbers<[1], [0], [0], [1], [0, 0, 1, 1], [], []>} : vector<1x32xf32>, vector<32x256xf32>, vector<1x256xf32> -> vector<1x256xf32>
    %88 = arith.addf %83, %87 : vector<1x256xf32>
    %89 = vector.extract_strided_slice %32 {offsets = [11, 0], sizes = [1, 32], strides = [1, 1]} : vector<25x32xf32> to vector<1x32xf32>
    %c11 = arith.constant 11 : index
    %c0_62 = arith.constant 0 : index
    %c0_63 = arith.constant 0 : index
    %90 = vector.load %arg4[%c11, %c0_62, %c0_63] : memref<25x32x256xf32, #tpu.memory_space<vmem>>, vector<1x32x256xf32>
    %91 = vector.shape_cast %90 : vector<1x32x256xf32> to vector<32x256xf32>
    %cst_64 = arith.constant dense<0.000000e+00> : vector<1x256xf32>
    %92 = tpu.matmul %89, %91, %cst_64 {dimension_numbers = #tpu.dot_dimension_numbers<[1], [0], [0], [1], [0, 0, 1, 1], [], []>} : vector<1x32xf32>, vector<32x256xf32>, vector<1x256xf32> -> vector<1x256xf32>
    %93 = arith.addf %88, %92 : vector<1x256xf32>
    %94 = vector.extract_strided_slice %32 {offsets = [12, 0], sizes = [1, 32], strides = [1, 1]} : vector<25x32xf32> to vector<1x32xf32>
    %c12 = arith.constant 12 : index
    %c0_65 = arith.constant 0 : index
    %c0_66 = arith.constant 0 : index
    %95 = vector.load %arg4[%c12, %c0_65, %c0_66] : memref<25x32x256xf32, #tpu.memory_space<vmem>>, vector<1x32x256xf32>
    %96 = vector.shape_cast %95 : vector<1x32x256xf32> to vector<32x256xf32>
    %cst_67 = arith.constant dense<0.000000e+00> : vector<1x256xf32>
    %97 = tpu.matmul %94, %96, %cst_67 {dimension_numbers = #tpu.dot_dimension_numbers<[1], [0], [0], [1], [0, 0, 1, 1], [], []>} : vector<1x32xf32>, vector<32x256xf32>, vector<1x256xf32> -> vector<1x256xf32>
    %98 = arith.addf %93, %97 : vector<1x256xf32>
    %99 = vector.extract_strided_slice %32 {offsets = [13, 0], sizes = [1, 32], strides = [1, 1]} : vector<25x32xf32> to vector<1x32xf32>
    %c13 = arith.constant 13 : index
    %c0_68 = arith.constant 0 : index
    %c0_69 = arith.constant 0 : index
    %100 = vector.load %arg4[%c13, %c0_68, %c0_69] : memref<25x32x256xf32, #tpu.memory_space<vmem>>, vector<1x32x256xf32>
    %101 = vector.shape_cast %100 : vector<1x32x256xf32> to vector<32x256xf32>
    %cst_70 = arith.constant dense<0.000000e+00> : vector<1x256xf32>
    %102 = tpu.matmul %99, %101, %cst_70 {dimension_numbers = #tpu.dot_dimension_numbers<[1], [0], [0], [1], [0, 0, 1, 1], [], []>} : vector<1x32xf32>, vector<32x256xf32>, vector<1x256xf32> -> vector<1x256xf32>
    %103 = arith.addf %98, %102 : vector<1x256xf32>
    %104 = vector.extract_strided_slice %32 {offsets = [14, 0], sizes = [1, 32], strides = [1, 1]} : vector<25x32xf32> to vector<1x32xf32>
    %c14 = arith.constant 14 : index
    %c0_71 = arith.constant 0 : index
    %c0_72 = arith.constant 0 : index
    %105 = vector.load %arg4[%c14, %c0_71, %c0_72] : memref<25x32x256xf32, #tpu.memory_space<vmem>>, vector<1x32x256xf32>
    %106 = vector.shape_cast %105 : vector<1x32x256xf32> to vector<32x256xf32>
    %cst_73 = arith.constant dense<0.000000e+00> : vector<1x256xf32>
    %107 = tpu.matmul %104, %106, %cst_73 {dimension_numbers = #tpu.dot_dimension_numbers<[1], [0], [0], [1], [0, 0, 1, 1], [], []>} : vector<1x32xf32>, vector<32x256xf32>, vector<1x256xf32> -> vector<1x256xf32>
    %108 = arith.addf %103, %107 : vector<1x256xf32>
    %109 = vector.extract_strided_slice %32 {offsets = [15, 0], sizes = [1, 32], strides = [1, 1]} : vector<25x32xf32> to vector<1x32xf32>
    %c15 = arith.constant 15 : index
    %c0_74 = arith.constant 0 : index
    %c0_75 = arith.constant 0 : index
    %110 = vector.load %arg4[%c15, %c0_74, %c0_75] : memref<25x32x256xf32, #tpu.memory_space<vmem>>, vector<1x32x256xf32>
    %111 = vector.shape_cast %110 : vector<1x32x256xf32> to vector<32x256xf32>
    %cst_76 = arith.constant dense<0.000000e+00> : vector<1x256xf32>
    %112 = tpu.matmul %109, %111, %cst_76 {dimension_numbers = #tpu.dot_dimension_numbers<[1], [0], [0], [1], [0, 0, 1, 1], [], []>} : vector<1x32xf32>, vector<32x256xf32>, vector<1x256xf32> -> vector<1x256xf32>
    %113 = arith.addf %108, %112 : vector<1x256xf32>
    %114 = vector.extract_strided_slice %32 {offsets = [16, 0], sizes = [1, 32], strides = [1, 1]} : vector<25x32xf32> to vector<1x32xf32>
    %c16 = arith.constant 16 : index
    %c0_77 = arith.constant 0 : index
    %c0_78 = arith.constant 0 : index
    %115 = vector.load %arg4[%c16, %c0_77, %c0_78] : memref<25x32x256xf32, #tpu.memory_space<vmem>>, vector<1x32x256xf32>
    %116 = vector.shape_cast %115 : vector<1x32x256xf32> to vector<32x256xf32>
    %cst_79 = arith.constant dense<0.000000e+00> : vector<1x256xf32>
    %117 = tpu.matmul %114, %116, %cst_79 {dimension_numbers = #tpu.dot_dimension_numbers<[1], [0], [0], [1], [0, 0, 1, 1], [], []>} : vector<1x32xf32>, vector<32x256xf32>, vector<1x256xf32> -> vector<1x256xf32>
    %118 = arith.addf %113, %117 : vector<1x256xf32>
    %119 = vector.extract_strided_slice %32 {offsets = [17, 0], sizes = [1, 32], strides = [1, 1]} : vector<25x32xf32> to vector<1x32xf32>
    %c17 = arith.constant 17 : index
    %c0_80 = arith.constant 0 : index
    %c0_81 = arith.constant 0 : index
    %120 = vector.load %arg4[%c17, %c0_80, %c0_81] : memref<25x32x256xf32, #tpu.memory_space<vmem>>, vector<1x32x256xf32>
    %121 = vector.shape_cast %120 : vector<1x32x256xf32> to vector<32x256xf32>
    %cst_82 = arith.constant dense<0.000000e+00> : vector<1x256xf32>
    %122 = tpu.matmul %119, %121, %cst_82 {dimension_numbers = #tpu.dot_dimension_numbers<[1], [0], [0], [1], [0, 0, 1, 1], [], []>} : vector<1x32xf32>, vector<32x256xf32>, vector<1x256xf32> -> vector<1x256xf32>
    %123 = arith.addf %118, %122 : vector<1x256xf32>
    %124 = vector.extract_strided_slice %32 {offsets = [18, 0], sizes = [1, 32], strides = [1, 1]} : vector<25x32xf32> to vector<1x32xf32>
    %c18 = arith.constant 18 : index
    %c0_83 = arith.constant 0 : index
    %c0_84 = arith.constant 0 : index
    %125 = vector.load %arg4[%c18, %c0_83, %c0_84] : memref<25x32x256xf32, #tpu.memory_space<vmem>>, vector<1x32x256xf32>
    %126 = vector.shape_cast %125 : vector<1x32x256xf32> to vector<32x256xf32>
    %cst_85 = arith.constant dense<0.000000e+00> : vector<1x256xf32>
    %127 = tpu.matmul %124, %126, %cst_85 {dimension_numbers = #tpu.dot_dimension_numbers<[1], [0], [0], [1], [0, 0, 1, 1], [], []>} : vector<1x32xf32>, vector<32x256xf32>, vector<1x256xf32> -> vector<1x256xf32>
    %128 = arith.addf %123, %127 : vector<1x256xf32>
    %129 = vector.extract_strided_slice %32 {offsets = [19, 0], sizes = [1, 32], strides = [1, 1]} : vector<25x32xf32> to vector<1x32xf32>
    %c19 = arith.constant 19 : index
    %c0_86 = arith.constant 0 : index
    %c0_87 = arith.constant 0 : index
    %130 = vector.load %arg4[%c19, %c0_86, %c0_87] : memref<25x32x256xf32, #tpu.memory_space<vmem>>, vector<1x32x256xf32>
    %131 = vector.shape_cast %130 : vector<1x32x256xf32> to vector<32x256xf32>
    %cst_88 = arith.constant dense<0.000000e+00> : vector<1x256xf32>
    %132 = tpu.matmul %129, %131, %cst_88 {dimension_numbers = #tpu.dot_dimension_numbers<[1], [0], [0], [1], [0, 0, 1, 1], [], []>} : vector<1x32xf32>, vector<32x256xf32>, vector<1x256xf32> -> vector<1x256xf32>
    %133 = arith.addf %128, %132 : vector<1x256xf32>
    %134 = vector.extract_strided_slice %32 {offsets = [20, 0], sizes = [1, 32], strides = [1, 1]} : vector<25x32xf32> to vector<1x32xf32>
    %c20 = arith.constant 20 : index
    %c0_89 = arith.constant 0 : index
    %c0_90 = arith.constant 0 : index
    %135 = vector.load %arg4[%c20, %c0_89, %c0_90] : memref<25x32x256xf32, #tpu.memory_space<vmem>>, vector<1x32x256xf32>
    %136 = vector.shape_cast %135 : vector<1x32x256xf32> to vector<32x256xf32>
    %cst_91 = arith.constant dense<0.000000e+00> : vector<1x256xf32>
    %137 = tpu.matmul %134, %136, %cst_91 {dimension_numbers = #tpu.dot_dimension_numbers<[1], [0], [0], [1], [0, 0, 1, 1], [], []>} : vector<1x32xf32>, vector<32x256xf32>, vector<1x256xf32> -> vector<1x256xf32>
    %138 = arith.addf %133, %137 : vector<1x256xf32>
    %139 = vector.extract_strided_slice %32 {offsets = [21, 0], sizes = [1, 32], strides = [1, 1]} : vector<25x32xf32> to vector<1x32xf32>
    %c21 = arith.constant 21 : index
    %c0_92 = arith.constant 0 : index
    %c0_93 = arith.constant 0 : index
    %140 = vector.load %arg4[%c21, %c0_92, %c0_93] : memref<25x32x256xf32, #tpu.memory_space<vmem>>, vector<1x32x256xf32>
    %141 = vector.shape_cast %140 : vector<1x32x256xf32> to vector<32x256xf32>
    %cst_94 = arith.constant dense<0.000000e+00> : vector<1x256xf32>
    %142 = tpu.matmul %139, %141, %cst_94 {dimension_numbers = #tpu.dot_dimension_numbers<[1], [0], [0], [1], [0, 0, 1, 1], [], []>} : vector<1x32xf32>, vector<32x256xf32>, vector<1x256xf32> -> vector<1x256xf32>
    %143 = arith.addf %138, %142 : vector<1x256xf32>
    %144 = vector.extract_strided_slice %32 {offsets = [22, 0], sizes = [1, 32], strides = [1, 1]} : vector<25x32xf32> to vector<1x32xf32>
    %c22 = arith.constant 22 : index
    %c0_95 = arith.constant 0 : index
    %c0_96 = arith.constant 0 : index
    %145 = vector.load %arg4[%c22, %c0_95, %c0_96] : memref<25x32x256xf32, #tpu.memory_space<vmem>>, vector<1x32x256xf32>
    %146 = vector.shape_cast %145 : vector<1x32x256xf32> to vector<32x256xf32>
    %cst_97 = arith.constant dense<0.000000e+00> : vector<1x256xf32>
    %147 = tpu.matmul %144, %146, %cst_97 {dimension_numbers = #tpu.dot_dimension_numbers<[1], [0], [0], [1], [0, 0, 1, 1], [], []>} : vector<1x32xf32>, vector<32x256xf32>, vector<1x256xf32> -> vector<1x256xf32>
    %148 = arith.addf %143, %147 : vector<1x256xf32>
    %149 = vector.extract_strided_slice %32 {offsets = [23, 0], sizes = [1, 32], strides = [1, 1]} : vector<25x32xf32> to vector<1x32xf32>
    %c23 = arith.constant 23 : index
    %c0_98 = arith.constant 0 : index
    %c0_99 = arith.constant 0 : index
    %150 = vector.load %arg4[%c23, %c0_98, %c0_99] : memref<25x32x256xf32, #tpu.memory_space<vmem>>, vector<1x32x256xf32>
    %151 = vector.shape_cast %150 : vector<1x32x256xf32> to vector<32x256xf32>
    %cst_100 = arith.constant dense<0.000000e+00> : vector<1x256xf32>
    %152 = tpu.matmul %149, %151, %cst_100 {dimension_numbers = #tpu.dot_dimension_numbers<[1], [0], [0], [1], [0, 0, 1, 1], [], []>} : vector<1x32xf32>, vector<32x256xf32>, vector<1x256xf32> -> vector<1x256xf32>
    %153 = arith.addf %148, %152 : vector<1x256xf32>
    %154 = vector.extract_strided_slice %32 {offsets = [24, 0], sizes = [1, 32], strides = [1, 1]} : vector<25x32xf32> to vector<1x32xf32>
    %c24 = arith.constant 24 : index
    %c0_101 = arith.constant 0 : index
    %c0_102 = arith.constant 0 : index
    %155 = vector.load %arg4[%c24, %c0_101, %c0_102] : memref<25x32x256xf32, #tpu.memory_space<vmem>>, vector<1x32x256xf32>
    %156 = vector.shape_cast %155 : vector<1x32x256xf32> to vector<32x256xf32>
    %cst_103 = arith.constant dense<0.000000e+00> : vector<1x256xf32>
    %157 = tpu.matmul %154, %156, %cst_103 {dimension_numbers = #tpu.dot_dimension_numbers<[1], [0], [0], [1], [0, 0, 1, 1], [], []>} : vector<1x32xf32>, vector<32x256xf32>, vector<1x256xf32> -> vector<1x256xf32>
    %158 = arith.addf %153, %157 : vector<1x256xf32>
    %cst_104 = arith.constant 0.000000e+00 : f32
    %159 = vector.broadcast %cst_104 : f32 to vector<1x256xf32>
    %160 = arith.maximumf %158, %159 : vector<1x256xf32>
    %c0_105 = arith.constant 0 : index
    %c0_106 = arith.constant 0 : index
    %161 = vector.load %arg6[%c0_105, %c0_106] : memref<256x32xf32, #tpu.memory_space<vmem>>, vector<256x32xf32>
    %cst_107 = arith.constant dense<0.000000e+00> : vector<1x32xf32>
    %162 = tpu.matmul %160, %161, %cst_107 {dimension_numbers = #tpu.dot_dimension_numbers<[1], [0], [0], [1], [0, 0, 1, 1], [], []>} : vector<1x256xf32>, vector<256x32xf32>, vector<1x32xf32> -> vector<1x32xf32>
    %c0_108 = arith.constant 0 : index
    %c0_109 = arith.constant 0 : index
    %163 = vector.load %arg7[%c0_108, %c0_109] : memref<1x32xf32, #tpu.memory_space<vmem>>, vector<1x32xf32>
    %164 = arith.addf %162, %163 : vector<1x32xf32>
    %cst_110 = arith.constant 0.000000e+00 : f32
    %165 = vector.broadcast %cst_110 : f32 to vector<1x32xf32>
    %166 = arith.maximumf %164, %165 : vector<1x32xf32>
    %c0_111 = arith.constant 0 : index
    %c0_112 = arith.constant 0 : index
    %167 = vector.load %arg8[%c0_111, %c0_112] : memref<32x2xf32, #tpu.memory_space<vmem>>, vector<32x2xf32>
    %cst_113 = arith.constant dense<0.000000e+00> : vector<1x2xf32>
    %168 = tpu.matmul %166, %167, %cst_113 {dimension_numbers = #tpu.dot_dimension_numbers<[1], [0], [0], [1], [0, 0, 1, 1], [], []>} : vector<1x32xf32>, vector<32x2xf32>, vector<1x2xf32> -> vector<1x2xf32>
    %c0_114 = arith.constant 0 : index
    %c0_115 = arith.constant 0 : index
    %169 = vector.load %arg9[%c0_114, %c0_115] : memref<1x2xf32, #tpu.memory_space<vmem>>, vector<1x2xf32>
    %170 = arith.addf %168, %169 : vector<1x2xf32>
    %c0_116 = arith.constant 0 : index
    %c0_117 = arith.constant 0 : index
    %c0_118 = arith.constant 0 : index
    %171 = vector.load %arg10[%c0_116, %c0_117, %c0_118] : memref<1x1x2xf32, #tpu.memory_space<vmem>>, vector<1x1x2xf32>
    %172 = vector.shape_cast %171 : vector<1x1x2xf32> to vector<1x2xf32>
    %173 = vector.shape_cast %170 : vector<1x2xf32> to vector<1x1x2xf32>
    tpu.vector_store %arg10[%c0_116, %c0_117, %c0_118], %173 {strides = array<i32>} : memref<1x1x2xf32, #tpu.memory_space<vmem>>, vector<1x1x2xf32>,
    return
  }
  func.func @transform_0(%arg0: i32) -> (i32, i32, i32, i32) {
    %c0_i32 = arith.constant 0 : i32
    %c0_i32_0 = arith.constant 0 : i32
    %c0_i32_1 = arith.constant 0 : i32
    %c0_i32_2 = arith.constant 0 : i32
    return %arg0, %c0_i32, %c0_i32_0, %c0_i32_1 : i32, i32, i32, i32
  }
  func.func @transform_1(%arg0: i32) -> (i32, i32) {
    %c0_i32 = arith.constant 0 : i32
    %c0_i32_0 = arith.constant 0 : i32
    %c0_i32_1 = arith.constant 0 : i32
    return %c0_i32, %c0_i32_0 : i32, i32
  }
  func.func @transform_2(%arg0: i32) -> (i32, i32) {
    %c0_i32 = arith.constant 0 : i32
    %c0_i32_0 = arith.constant 0 : i32
    %c0_i32_1 = arith.constant 0 : i32
    return %c0_i32, %c0_i32_0 : i32, i32
  }
  func.func @transform_3(%arg0: i32) -> (i32, i32, i32) {
    %c0_i32 = arith.constant 0 : i32
    %c0_i32_0 = arith.constant 0 : i32
    %c0_i32_1 = arith.constant 0 : i32
    %c0_i32_2 = arith.constant 0 : i32
    return %c0_i32, %c0_i32_0, %c0_i32_1 : i32, i32, i32
  }
  func.func @transform_4(%arg0: i32) -> (i32, i32) {
    %c0_i32 = arith.constant 0 : i32
    %c0_i32_0 = arith.constant 0 : i32
    %c0_i32_1 = arith.constant 0 : i32
    return %c0_i32, %c0_i32_0 : i32, i32
  }
  func.func @transform_5(%arg0: i32) -> (i32, i32) {
    %c0_i32 = arith.constant 0 : i32
    %c0_i32_0 = arith.constant 0 : i32
    %c0_i32_1 = arith.constant 0 : i32
    return %c0_i32, %c0_i32_0 : i32, i32
  }
  func.func @transform_6(%arg0: i32) -> (i32, i32) {
    %c0_i32 = arith.constant 0 : i32
    %c0_i32_0 = arith.constant 0 : i32
    %c0_i32_1 = arith.constant 0 : i32
    return %c0_i32, %c0_i32_0 : i32, i32
  }
  func.func @transform_7(%arg0: i32) -> (i32, i32) {
    %c0_i32 = arith.constant 0 : i32
    %c0_i32_0 = arith.constant 0 : i32
    %c0_i32_1 = arith.constant 0 : i32
    return %c0_i32, %c0_i32_0 : i32, i32
  }
  func.func @transform_8(%arg0: i32) -> (i32, i32) {
    %c0_i32 = arith.constant 0 : i32
    %c0_i32_0 = arith.constant 0 : i32
    %c0_i32_1 = arith.constant 0 : i32
    return %c0_i32, %c0_i32_0 : i32, i32
  }
  func.func @transform_9(%arg0: i32) -> (i32, i32, i32) {
    %c0_i32 = arith.constant 0 : i32
    %c0_i32_0 = arith.constant 0 : i32
    %c0_i32_1 = arith.constant 0 : i32
    return %arg0, %c0_i32, %c0_i32_0 : i32, i32, i32
  }
}

</mosaic_0001>

<bundles_post_ra>
// kernel: net_forward.2
= control target key start
LH: loop header
LB: loop body
LE: loop exit
PB: predicated region body
PF: predicated region fallthrough
CT: control target
= control target key end

     0   :  { %s2995_s12 = smov 0   ;;  %s3918_s0 = inlined_call_operand.vmem [shape: f32[2,4,484,75], index: 0, kind: input, shape index: {}]   ;;  %s3919_s1 = inlined_call_operand.vmem [shape: f32[75,16], index: 1, kind: input, shape index: {}]   ;;  %s3920_s2 = inlined_call_operand.vmem [shape: f32[1,16], index: 2, kind: input, shape index: {}]   ;;  %s3921_s3 = inlined_call_operand.vmem [shape: f32[2,484,16], index: 3, kind: output, shape index: {}]  }
   0x1 LB: > { %s2514_s13 = sadd.s32 4294967295, %s2973_s12   ;;  %p2518_p0 = scmp.ge.s32.totalorder %s2973_s12, 1  ;;  %s2973_s12 = sphi %s2995_s12, %s13_s12  }
   0x2   : > { %p137_p1 = scmp.lt.s32.totalorder %s2973_s12, 3 }
   0x4   : > { %p138_p2 = pnand %p2518_p0, %p137_p1 }
   0x5   : > { %p161_p3 = scmp.lt.s32.totalorder (!%p138_p2), %s2514_s13, 1 }
   0x6   : > { %141 = sbr.rel (%p138_p2) target bundleno = 652 (0x28c), region = 32 }
   0xb   : > { %v180_v0 = vld [vmem:[%s3919_s1 + $0x48] sm:$0x7]  ;;  %vm430_vm0 = vcmask 1042432   ;;  %v179_v1 = vld [vmem:[%s3919_s1 + $0x40] sm:$0xff]  ;;  %v178_v2 = vld [vmem:[%s3919_s1 + $0x38] sm:$0xff]  ;;  %s3923_s13 = smov (!%p161_p3, %s2514_s13), 1 }
   0xc   : > { %2767 = vmatpush.msk.msra.mxu2 %vm430_vm0, %v180_v0  ;;  %2890 = vmatpush.msk.msra.mxu3 %vm430_vm0, %v180_v0  ;;  %v177_v3 = vld [vmem:[%s3919_s1 + $0x30] sm:$0xff]  ;;  %v176_v4 = vld [vmem:[%s3919_s1 + $0x28] sm:$0xff]  ;;  %v175_v5 = vld [vmem:[%s3919_s1 + $0x20] sm:$0xff]  ;;  %s2954_s28 = smul.u32 1952, %s3923_s13  ;;  %vm246_vm1 = vcmask 613376   ;;  %vm2396_vm2 = vcmask 130048  }
   0xd   : > { %2521 = vmatpush.msk.msra.mxu0 %vm430_vm0, %v180_v0  ;;  %2644 = vmatpush.msk.msra.mxu1 %vm430_vm0, %v180_v0  ;;  %v174_v6 = vld [vmem:[%s3919_s1 + $0x18] sm:$0xff]  ;;  %v173_v7 = vld [vmem:[%s3919_s1 + $0x10] sm:$0xff]  ;;  %v172_v8 = vld [vmem:[%s3919_s1 + $0x8] sm:$0xff]  ;;  %s2955_s15 = smul.u32 488, %s3923_s13  ;;  %vm2457_vm3 = vcmask 125952  }
   0xe   : > { %1514 = vmatpush.msra.mxu2 %v179_v1  ;;  %2020 = vmatpush.msra.mxu3 %v179_v1  ;;  %s3036_s8 = scalar_lea.vmem %s3918_s0, %s2954_s28  ;;  %v171_v9 = vld [vmem:[%s3919_s1] sm:$0xff] }
   0xf   : > { %441 = vmatpush.msra.mxu0 %v179_v1  ;;  %947 = vmatpush.msra.mxu1 %v179_v1  ;;  %v2706_v10 = vld [vmem:[%s3036_s8 + $0x3d0] sm:$0xff]  ;;  %v2829_v11 = vld [vmem:[%s3036_s8 + $0x5b8] sm:$0xff]  ;;  %v182_v12 = vld [vmem:[%s3036_s8] sm:$0xff]  ;;  %s3198_s17 = scalar_lea.vmem %s3921_s3, %s2955_s15 }
  0x10   : > { %1515 = vmatpush.msra.mxu2 %v178_v2  ;;  %2021 = vmatpush.msra.mxu3 %v178_v2  ;;  %v2583_v13 = vld [vmem:[%s3036_s8 + $0x1e8] sm:$0xff]  ;;  %v2707_v14 = vld [vmem:[%s3036_s8 + $0x3d8] sm:$0xff]  ;;  %v2830_v15 = vld [vmem:[%s3036_s8 + $0x5c0] sm:$0xff] }
  0x11   : > { %442 = vmatpush.msra.mxu0 %v178_v2  ;;  %948 = vmatpush.msra.mxu1 %v178_v2  ;;  %v183_v16 = vld [vmem:[%s3036_s8 + $0x8] sm:$0xff]  ;;  %v2584_v17 = vld [vmem:[%s3036_s8 + $0x1f0] sm:$0xff]  ;;  %v2708_v18 = vld [vmem:[%s3036_s8 + $0x3e0] sm:$0xff] }
  0x12   : > { %1516 = vmatpush.msra.mxu2 %v177_v3  ;;  %2022 = vmatpush.msra.mxu3 %v177_v3  ;;  %v2831_v19 = vld [vmem:[%s3036_s8 + $0x5c8] sm:$0xff]  ;;  %v184_v20 = vld [vmem:[%s3036_s8 + $0x10] sm:$0xff]  ;;  %v2585_v21 = vld [vmem:[%s3036_s8 + $0x1f8] sm:$0xff] }
  0x13   : > { %443 = vmatpush.msra.mxu0 %v177_v3  ;;  %949 = vmatpush.msra.mxu1 %v177_v3  ;;  %v2709_v22 = vld [vmem:[%s3036_s8 + $0x3e8] sm:$0xff]  ;;  %v2832_v23 = vld [vmem:[%s3036_s8 + $0x5d0] sm:$0xff]  ;;  %v185_v24 = vld [vmem:[%s3036_s8 + $0x18] sm:$0xff] }
  0x14   : > { %1517 = vmatpush.msra.mxu2 %v176_v4  ;;  %2023 = vmatpush.msra.mxu3 %v176_v4  ;;  %v2586_v25 = vld [vmem:[%s3036_s8 + $0x200] sm:$0xff]  ;;  %v2710_v26 = vld [vmem:[%s3036_s8 + $0x3f0] sm:$0xff]  ;;  %v2833_v27 = vld [vmem:[%s3036_s8 + $0x5d8] sm:$0xff] }
  0x15   : > { %444 = vmatpush.msra.mxu0 %v176_v4  ;;  %950 = vmatpush.msra.mxu1 %v176_v4  ;;  %v186_v28 = vld [vmem:[%s3036_s8 + $0x20] sm:$0xff]  ;;  %v2587_v29 = vld [vmem:[%s3036_s8 + $0x208] sm:$0xff]  ;;  %v2711_v30 = vld [vmem:[%s3036_s8 + $0x3f8] sm:$0xff] }
  0x16   : > { %1518 = vmatpush.msra.mxu2 %v175_v5  ;;  %2024 = vmatpush.msra.mxu3 %v175_v5  ;;  %v2834_v31 = vld [vmem:[%s3036_s8 + $0x5e0] sm:$0xff]  ;;  %v187_v32 = vld [vmem:[%s3036_s8 + $0x28] sm:$0xff]  ;;  %v2588_v33 = vld [vmem:[%s3036_s8 + $0x210] sm:$0xff] }
  0x17   : > { %445 = vmatpush.msra.mxu0 %v175_v5  ;;  %951 = vmatpush.msra.mxu1 %v175_v5  ;;  %v2712_v34 = vld [vmem:[%s3036_s8 + $0x400] sm:$0xff]  ;;  %v2835_v35 = vld [vmem:[%s3036_s8 + $0x5e8] sm:$0xff]  ;;  %v188_v36 = vld [vmem:[%s3036_s8 + $0x30] sm:$0xff] }
  0x18   : > { %1519 = vmatpush.msra.mxu2 %v174_v6  ;;  %2025 = vmatpush.msra.mxu3 %v174_v6  ;;  %v2589_v37 = vld [vmem:[%s3036_s8 + $0x218] sm:$0xff]  ;;  %v2713_v38 = vld [vmem:[%s3036_s8 + $0x408] sm:$0xff]  ;;  %v2836_v39 = vld [vmem:[%s3036_s8 + $0x5f0] sm:$0xff] }
  0x19   : > { %446 = vmatpush.msra.mxu0 %v174_v6  ;;  %952 = vmatpush.msra.mxu1 %v174_v6  ;;  %v189_v40 = vld [vmem:[%s3036_s8 + $0x38] sm:$0xff]  ;;  %v2590_v41 = vld [vmem:[%s3036_s8 + $0x220] sm:$0xff]  ;;  %v2714_v42 = vld [vmem:[%s3036_s8 + $0x410] sm:$0xff] }
  0x1a   : > { %1520 = vmatpush.msra.mxu2 %v173_v7  ;;  %2026 = vmatpush.msra.mxu3 %v173_v7  ;;  %v2837_v43 = vld [vmem:[%s3036_s8 + $0x5f8] sm:$0xff]  ;;  %v190_v44 = vld [vmem:[%s3036_s8 + $0x40] sm:$0xff]  ;;  %v2591_v45 = vld [vmem:[%s3036_s8 + $0x228] sm:$0xff] }
  0x1b   : > { %447 = vmatpush.msra.mxu0 %v173_v7  ;;  %953 = vmatpush.msra.mxu1 %v173_v7  ;;  %v2715_v46 = vld [vmem:[%s3036_s8 + $0x418] sm:$0xff]  ;;  %v2838_v47 = vld [vmem:[%s3036_s8 + $0x600] sm:$0xff]  ;;  %v191_v48 = vld [vmem:[%s3036_s8 + $0x48] sm:$0xff] }
  0x1c   : > { %1521 = vmatpush.msra.mxu2 %v172_v8  ;;  %2027 = vmatpush.msra.mxu3 %v172_v8  ;;  %v2592_v49 = vld [vmem:[%s3036_s8 + $0x230] sm:$0xff]  ;;  %v2716_v50 = vld [vmem:[%s3036_s8 + $0x420] sm:$0xff]  ;;  %v2839_v51 = vld [vmem:[%s3036_s8 + $0x608] sm:$0xff] }
  0x1d   : > { %448 = vmatpush.msra.mxu0 %v172_v8  ;;  %954 = vmatpush.msra.mxu1 %v172_v8  ;;  %v192_v52 = vld [vmem:[%s3036_s8 + $0x50] sm:$0xff]  ;;  %v2593_v53 = vld [vmem:[%s3036_s8 + $0x238] sm:$0xff]  ;;  %v2717_v54 = vld [vmem:[%s3036_s8 + $0x428] sm:$0xff] }
  0x1e   : > { %1522 = vmatpush.msra.mxu2 %v171_v9  ;;  %2028 = vmatpush.msra.mxu3 %v171_v9  ;;  %v2840_v55 = vld [vmem:[%s3036_s8 + $0x610] sm:$0xff]  ;;  %v193_v56 = vld [vmem:[%s3036_s8 + $0x58] sm:$0xff]  ;;  %v2594_v57 = vld [vmem:[%s3036_s8 + $0x240] sm:$0xff] }
  0x1f   : > { %2768 = vmatmul.msk.f32.vlgmr.msra.gmra.mxu2 %vm246_vm1, %v2706_v10  ;;  %2891 = vmatmul.msk.f32.vlgmr.msra.gmra.mxu3 %vm246_vm1, %v2829_v11  ;;  %v2718_v58 = vld [vmem:[%s3036_s8 + $0x430] sm:$0xff]  ;;  %v2841_v59 = vld [vmem:[%s3036_s8 + $0x618] sm:$0xff]  ;;  %v194_v60 = vld [vmem:[%s3036_s8 + $0x60] sm:$0xff] }
  0x20   : > { %449 = vmatpush.msra.mxu0 %v171_v9  ;;  %955 = vmatpush.msra.mxu1 %v171_v9  ;;  %v2595_v61 = vld [vmem:[%s3036_s8 + $0x248] sm:$0xff]  ;;  %v2719_v62 = vld [vmem:[%s3036_s8 + $0x438] sm:$0xff]  ;;  %v2842_v63 = vld [vmem:[%s3036_s8 + $0x620] sm:$0xff] }
  0x21   : > { %2522 = vmatmul.msk.f32.vlgmr.msra.gmra.mxu0 %vm246_vm1, %v182_v12  ;;  %2645 = vmatmul.msk.f32.vlgmr.msra.gmra.mxu1 %vm246_vm1, %v2583_v13  ;;  %v195_v0 = vld [vmem:[%s3036_s8 + $0x68] sm:$0xff]  ;;  %v2596_v1 = vld [vmem:[%s3036_s8 + $0x250] sm:$0xff]  ;;  %v2720_v2 = vld [vmem:[%s3036_s8 + $0x440] sm:$0xff] }
  0x22   : > { %v2843_v3 = vld [vmem:[%s3036_s8 + $0x628] sm:$0xff]  ;;  %v196_v4 = vld [vmem:[%s3036_s8 + $0x70] sm:$0xff]  ;;  %v2597_v5 = vld [vmem:[%s3036_s8 + $0x258] sm:$0xff] }
  0x23   : > { %v2721_v6 = vld [vmem:[%s3036_s8 + $0x448] sm:$0xff]  ;;  %v2844_v7 = vld [vmem:[%s3036_s8 + $0x630] sm:$0xff]  ;;  %v197_v8 = vld [vmem:[%s3036_s8 + $0x78] sm:$0xff] }
  0x24   : > { %v2598_v9 = vld [vmem:[%s3036_s8 + $0x260] sm:$0xff]  ;;  %v2722_v11 = vld [vmem:[%s3036_s8 + $0x450] sm:$0xff]  ;;  %v2845_v12 = vld [vmem:[%s3036_s8 + $0x638] sm:$0xff] }
  0x25   : > { %v3172_v10 = vld [vmem:[%s3920_s2] ss:$0 sm:$0xff] }
  0x27   : > { %2769 = vmatmul.msk.f32.gmra.mxu2 %vm246_vm1, %v2707_v14  ;;  %2892 = vmatmul.msk.f32.gmra.mxu3 %vm246_vm1, %v2830_v15  ;;  %v198_v15 = vld [vmem:[%s3036_s8 + $0x80] sm:$0xff] }
  0x29   : > { %2523 = vmatmul.msk.f32.gmra.mxu0 %vm246_vm1, %v183_v16  ;;  %2646 = vmatmul.msk.f32.gmra.mxu1 %vm246_vm1, %v2584_v17  ;;  %v2599_v16 = vld [vmem:[%s3036_s8 + $0x268] sm:$0xff] }
  0x2f   : > { %2770 = vmatmul.msk.f32.gmra.mxu2 %vm246_vm1, %v2708_v18  ;;  %2893 = vmatmul.msk.f32.gmra.mxu3 %vm246_vm1, %v2831_v19 }
  0x31   : > { %2524 = vmatmul.msk.f32.gmra.mxu0 %vm246_vm1, %v184_v20  ;;  %2647 = vmatmul.msk.f32.gmra.mxu1 %vm246_vm1, %v2585_v21 }
  0x37   : > { %2771 = vmatmul.msk.f32.gmra.mxu2 %vm246_vm1, %v2709_v22  ;;  %2894 = vmatmul.msk.f32.gmra.mxu3 %vm246_vm1, %v2832_v23 }
  0x39   : > { %2525 = vmatmul.msk.f32.gmra.mxu0 %vm246_vm1, %v185_v24  ;;  %2648 = vmatmul.msk.f32.gmra.mxu1 %vm246_vm1, %v2586_v25  ;;  %v2723_v25 = vld [vmem:[%s3036_s8 + $0x458] sm:$0xff] }
  0x3f   : > { %2772 = vmatmul.msk.f32.gmra.mxu2 %vm246_vm1, %v2710_v26  ;;  %2895 = vmatmul.msk.f32.gmra.mxu3 %vm246_vm1, %v2833_v27  ;;  %v2846_v26 = vld [vmem:[%s3036_s8 + $0x640] sm:$0xff] }
  0x41   : > { %2526 = vmatmul.msk.f32.gmra.mxu0 %vm246_vm1, %v186_v28  ;;  %2649 = vmatmul.msk.f32.gmra.mxu1 %vm246_vm1, %v2587_v29 }
  0x47   : > { %2773 = vmatmul.msk.f32.gmra.mxu2 %vm246_vm1, %v2711_v30  ;;  %2896 = vmatmul.msk.f32.gmra.mxu3 %vm246_vm1, %v2834_v31 }
  0x49   : > { %2527 = vmatmul.msk.f32.gmra.mxu0 %vm246_vm1, %v187_v32  ;;  %2650 = vmatmul.msk.f32.gmra.mxu1 %vm246_vm1, %v2588_v33  ;;  %v199_v32 = vld [vmem:[%s3036_s8 + $0x88] sm:$0xff]  ;;  %v2600_v33 = vld [vmem:[%s3036_s8 + $0x270] sm:$0xff] }
  0x4f   : > { %2774 = vmatmul.msk.f32.gmra.mxu2 %vm246_vm1, %v2712_v34  ;;  %2897 = vmatmul.msk.f32.gmra.mxu3 %vm246_vm1, %v2835_v35 }
  0x51   : > { %2528 = vmatmul.msk.f32.gmra.mxu0 %vm246_vm1, %v188_v36  ;;  %2651 = vmatmul.msk.f32.gmra.mxu1 %vm246_vm1, %v2589_v37 }
  0x57   : > { %2775 = vmatmul.msk.f32.gmra.mxu2 %vm246_vm1, %v2713_v38  ;;  %2898 = vmatmul.msk.f32.gmra.mxu3 %vm246_vm1, %v2836_v39 }
  0x59   : > { %2529 = vmatmul.msk.f32.gmra.mxu0 %vm246_vm1, %v189_v40  ;;  %2652 = vmatmul.msk.f32.gmra.mxu1 %vm246_vm1, %v2590_v41 }
  0x5f   : > { %2776 = vmatmul.msk.f32.gmra.mxu2 %vm246_vm1, %v2714_v42  ;;  %2899 = vmatmul.msk.f32.gmra.mxu3 %vm246_vm1, %v2837_v43 }
  0x61   : > { %2530 = vmatmul.msk.f32.gmra.mxu0 %vm246_vm1, %v190_v44  ;;  %2653 = vmatmul.msk.f32.gmra.mxu1 %vm246_vm1, %v2591_v45  ;;  %v2724_v44 = vld [vmem:[%s3036_s8 + $0x460] sm:$0xff]  ;;  %v2847_v45 = vld [vmem:[%s3036_s8 + $0x648] sm:$0xff] }
  0x67   : > { %2777 = vmatmul.msk.f32.gmra.mxu2 %vm246_vm1, %v2715_v46  ;;  %2900 = vmatmul.msk.f32.gmra.mxu3 %vm246_vm1, %v2838_v47 }
  0x69   : > { %2531 = vmatmul.msk.f32.gmra.mxu0 %vm246_vm1, %v191_v48  ;;  %2654 = vmatmul.msk.f32.gmra.mxu1 %vm246_vm1, %v2592_v49 }
  0x6f   : > { %2778 = vmatmul.msk.f32.gmra.mxu2 %vm246_vm1, %v2716_v50  ;;  %2901 = vmatmul.msk.f32.gmra.mxu3 %vm246_vm1, %v2839_v51  ;;  %v200_v51 = vld [vmem:[%s3036_s8 + $0x90] sm:$0xff] }
  0x71   : > { %2532 = vmatmul.msk.f32.gmra.mxu0 %vm246_vm1, %v192_v52  ;;  %2655 = vmatmul.msk.f32.gmra.mxu1 %vm246_vm1, %v2593_v53  ;;  %v2601_v52 = vld [vmem:[%s3036_s8 + $0x278] sm:$0xff] }
  0x77   : > { %2779 = vmatmul.msk.f32.gmra.mxu2 %vm246_vm1, %v2717_v54  ;;  %2902 = vmatmul.msk.f32.gmra.mxu3 %vm246_vm1, %v2840_v55 }
  0x79   : > { %2533 = vmatmul.msk.f32.gmra.mxu0 %vm246_vm1, %v193_v56  ;;  %2656 = vmatmul.msk.f32.gmra.mxu1 %vm246_vm1, %v2594_v57 }
  0x7f   : > { %2780 = vmatmul.msk.f32.gmra.mxu2 %vm246_vm1, %v2718_v58  ;;  %2903 = vmatmul.msk.f32.gmra.mxu3 %vm246_vm1, %v2841_v59 }
  0x81   : > { %2534 = vmatmul.msk.f32.gmra.mxu0 %vm246_vm1, %v194_v60  ;;  %2657 = vmatmul.msk.f32.gmra.mxu1 %vm246_vm1, %v2595_v61 }
  0x87   : > { %2781 = vmatmul.msk.f32.gmra.mxu2 %vm246_vm1, %v2719_v62  ;;  %2904 = vmatmul.msk.f32.gmra.mxu3 %vm246_vm1, %v2842_v63  ;;  %v2725_v63 = vld [vmem:[%s3036_s8 + $0x468] sm:$0xff] }
  0x89   : > { %2535 = vmatmul.msk.f32.gmra.mxu0 %vm246_vm1, %v195_v0  ;;  %2658 = vmatmul.msk.f32.gmra.mxu1 %vm246_vm1, %v2596_v1  ;;  %v2848_v0 = vld [vmem:[%s3036_s8 + $0x650] sm:$0xff] }
  0x8f   : > { %2782 = vmatmul.msk.f32.gmra.mxu2 %vm246_vm1, %v2720_v2  ;;  %2905 = vmatmul.msk.f32.gmra.mxu3 %vm246_vm1, %v2843_v3 }
  0x91   : > { %2536 = vmatmul.msk.f32.gmra.mxu0 %vm246_vm1, %v196_v4  ;;  %2659 = vmatmul.msk.f32.gmra.mxu1 %vm246_vm1, %v2597_v5 }
  0x97   : > { %2783 = vmatmul.msk.f32.gmra.mxu2 %vm246_vm1, %v2721_v6  ;;  %2906 = vmatmul.msk.f32.gmra.mxu3 %vm246_vm1, %v2844_v7  ;;  %v201_v6 = vld [vmem:[%s3036_s8 + $0x98] sm:$0xff]  ;;  %v2602_v7 = vld [vmem:[%s3036_s8 + $0x280] sm:$0xff] }
  0x99   : > { %2537 = vmatmul.msk.f32.gmra.mxu0 %vm246_vm1, %v197_v8  ;;  %2660 = vmatmul.msk.f32.gmra.mxu1 %vm246_vm1, %v2598_v9 }
  0x9e   : > { %v451_v13 = vpop.f32.mrf.mxu0  ;;  %v957_v14 = vpop.f32.mrf.mxu1 }
  0x9f   : > { %2784 = vmatmul.msk.f32.gmra.mxu2 %vm246_vm1, %v2722_v11  ;;  %2907 = vmatmul.msk.f32.gmra.mxu3 %vm246_vm1, %v2845_v12  ;;  %v452_v17 = vadd.f32 %v3172_v10, %v451_v13  ;;  %v958_v18 = vadd.f32 %v3172_v10, %v957_v14 }
  0xa1   : > { %v634_v19 = vmax.f32 %v452_v17, 0.0  ;;  %v1140_v20 = vmax.f32 %v958_v18, 0.0  ;;  %2538 = vmatmul.msk.f32.gmra.mxu0 %vm246_vm1, %v198_v15  ;;  %2661 = vmatmul.msk.f32.gmra.mxu1 %vm246_vm1, %v2599_v16 }
  0xa2   : > { %v1524_v21 = vpop.f32.mrf.mxu2  ;;  %v2030_v22 = vpop.f32.mrf.mxu3 }
  0xa3   : > { %v1525_v23 = vadd.f32 %v3172_v10, %v1524_v21  ;;  %v2031_v24 = vadd.f32 %v3172_v10, %v2030_v22  ;;  %v1201_v27 = vmax.f32 %v634_v19, %v1140_v20  ;;  %v2726_v19 = vld [vmem:[%s3036_s8 + $0x470] sm:$0xff]  ;;  %v2849_v20 = vld [vmem:[%s3036_s8 + $0x658] sm:$0xff] }
  0xa5   : > { %v1707_v28 = vmax.f32 %v1525_v23, 0.0  ;;  %v2213_v29 = vmax.f32 %v2031_v24, 0.0 }
  0xa6   : > { %v454_v30 = vpop.f32.mrf.mxu0  ;;  %v960_v31 = vpop.f32.mrf.mxu1 }
  0xa7   : > { %v2274_v34 = vmax.f32 %v1707_v28, %v2213_v29  ;;  %2785 = vmatmul.msk.f32.gmra.mxu2 %vm246_vm1, %v2723_v25  ;;  %2908 = vmatmul.msk.f32.gmra.mxu3 %vm246_vm1, %v2846_v26  ;;  %v455_v35 = vadd.f32 %v3172_v10, %v454_v30  ;;  %v961_v36 = vadd.f32 %v3172_v10, %v960_v31  ;;  %v202_v26 = vld [vmem:[%s3036_s8 + $0xa0] sm:$0xff] }
  0xa9   : > { %v2335_v37 = vmax.f32 %v1201_v27, %v2274_v34  ;;  %v635_v38 = vmax.f32 %v455_v35, 0.0  ;;  %v1141_v39 = vmax.f32 %v961_v36, 0.0  ;;  %2539 = vmatmul.msk.f32.gmra.mxu0 %vm246_vm1, %v199_v32  ;;  %2662 = vmatmul.msk.f32.gmra.mxu1 %vm246_vm1, %v2600_v33  ;;  %v2603_v27 = vld [vmem:[%s3036_s8 + $0x288] sm:$0xff] }
  0xaa   : > { %v1527_v40 = vpop.f32.mrf.mxu2  ;;  %v2033_v41 = vpop.f32.mrf.mxu3 }
  0xab   : > { %2397 = vst.msk [vmem:[%s3198_s17] sm:$0xff] %vm2396_vm2, %v2335_v37  ;;  %v1528_v42 = vadd.f32 %v3172_v10, %v1527_v40  ;;  %v2034_v43 = vadd.f32 %v3172_v10, %v2033_v41  ;;  %v1202_v46 = vmax.f32 %v635_v38, %v1141_v39  ;;  %v2727_v38 = vld [vmem:[%s3036_s8 + $0x478] sm:$0xff]  ;;  %v2850_v39 = vld [vmem:[%s3036_s8 + $0x660] sm:$0xff] }
  0xad   : > { %v1708_v47 = vmax.f32 %v1528_v42, 0.0  ;;  %v2214_v48 = vmax.f32 %v2034_v43, 0.0 }
  0xae   : > { %v457_v49 = vpop.f32.mrf.mxu0  ;;  %v963_v50 = vpop.f32.mrf.mxu1 }
  0xaf   : > { %v2275_v53 = vmax.f32 %v1708_v47, %v2214_v48  ;;  %2786 = vmatmul.msk.f32.gmra.mxu2 %vm246_vm1, %v2724_v44  ;;  %2909 = vmatmul.msk.f32.gmra.mxu3 %vm246_vm1, %v2847_v45  ;;  %v458_v54 = vadd.f32 %v3172_v10, %v457_v49  ;;  %v964_v55 = vadd.f32 %v3172_v10, %v963_v50  ;;  %v203_v45 = vld [vmem:[%s3036_s8 + $0xa8] sm:$0xff] }
  0xb1   : > { %v2336_v56 = vmax.f32 %v1202_v46, %v2275_v53  ;;  %v636_v57 = vmax.f32 %v458_v54, 0.0  ;;  %v1142_v58 = vmax.f32 %v964_v55, 0.0  ;;  %2540 = vmatmul.msk.f32.gmra.mxu0 %vm246_vm1, %v200_v51  ;;  %2663 = vmatmul.msk.f32.gmra.mxu1 %vm246_vm1, %v2601_v52  ;;  %v2604_v46 = vld [vmem:[%s3036_s8 + $0x290] sm:$0xff] }
  0xb2   : > { %v1530_v59 = vpop.f32.mrf.mxu2  ;;  %v2036_v60 = vpop.f32.mrf.mxu3 }
  0xb3   : > { %2398 = vst.msk [vmem:[%s3198_s17 + $0x8] sm:$0xff] %vm2396_vm2, %v2336_v56  ;;  %v1531_v61 = vadd.f32 %v3172_v10, %v1530_v59  ;;  %v2037_v62 = vadd.f32 %v3172_v10, %v2036_v60  ;;  %v1203_v1 = vmax.f32 %v636_v57, %v1142_v58  ;;  %v2728_v57 = vld [vmem:[%s3036_s8 + $0x480] sm:$0xff]  ;;  %v2851_v58 = vld [vmem:[%s3036_s8 + $0x668] sm:$0xff] }
  0xb5   : > { %v1709_v2 = vmax.f32 %v1531_v61, 0.0  ;;  %v2215_v3 = vmax.f32 %v2037_v62, 0.0 }
  0xb6   : > { %v460_v4 = vpop.f32.mrf.mxu0  ;;  %v966_v5 = vpop.f32.mrf.mxu1 }
  0xb7   : > { %v2276_v8 = vmax.f32 %v1709_v2, %v2215_v3  ;;  %2787 = vmatmul.msk.f32.gmra.mxu2 %vm246_vm1, %v2725_v63  ;;  %2910 = vmatmul.msk.f32.gmra.mxu3 %vm246_vm1, %v2848_v0  ;;  %v461_v9 = vadd.f32 %v3172_v10, %v460_v4  ;;  %v967_v11 = vadd.f32 %v3172_v10, %v966_v5  ;;  %v204_v0 = vld [vmem:[%s3036_s8 + $0xb0] sm:$0xff] }
  0xb9   : > { %v2337_v12 = vmax.f32 %v1203_v1, %v2276_v8  ;;  %v637_v13 = vmax.f32 %v461_v9, 0.0  ;;  %v1143_v14 = vmax.f32 %v967_v11, 0.0  ;;  %2541 = vmatmul.msk.f32.gmra.mxu0 %vm246_vm1, %v201_v6  ;;  %2664 = vmatmul.msk.f32.gmra.mxu1 %vm246_vm1, %v2602_v7  ;;  %v2605_v1 = vld [vmem:[%s3036_s8 + $0x298] sm:$0xff] }
  0xba   : > { %v1533_v15 = vpop.f32.mrf.mxu2  ;;  %v2039_v16 = vpop.f32.mrf.mxu3 }
  0xbb   : > { %2399 = vst.msk [vmem:[%s3198_s17 + $0x10] sm:$0xff] %vm2396_vm2, %v2337_v12  ;;  %v1534_v17 = vadd.f32 %v3172_v10, %v1533_v15  ;;  %v2040_v18 = vadd.f32 %v3172_v10, %v2039_v16  ;;  %v1204_v21 = vmax.f32 %v637_v13, %v1143_v14  ;;  %v2729_v13 = vld [vmem:[%s3036_s8 + $0x488] sm:$0xff]  ;;  %v2852_v14 = vld [vmem:[%s3036_s8 + $0x670] sm:$0xff] }
  0xbd   : > { %v1710_v22 = vmax.f32 %v1534_v17, 0.0  ;;  %v2216_v23 = vmax.f32 %v2040_v18, 0.0 }
  0xbe   : > { %v463_v24 = vpop.f32.mrf.mxu0  ;;  %v969_v25 = vpop.f32.mrf.mxu1 }
  0xbf   : > { %v2277_v28 = vmax.f32 %v1710_v22, %v2216_v23  ;;  %2788 = vmatmul.msk.f32.gmra.mxu2 %vm246_vm1, %v2726_v19  ;;  %2911 = vmatmul.msk.f32.gmra.mxu3 %vm246_vm1, %v2849_v20  ;;  %v464_v29 = vadd.f32 %v3172_v10, %v463_v24  ;;  %v970_v30 = vadd.f32 %v3172_v10, %v969_v25  ;;  %v205_v20 = vld [vmem:[%s3036_s8 + $0xb8] sm:$0xff] }
  0xc1   : > { %v2338_v31 = vmax.f32 %v1204_v21, %v2277_v28  ;;  %v638_v32 = vmax.f32 %v464_v29, 0.0  ;;  %v1144_v33 = vmax.f32 %v970_v30, 0.0  ;;  %2542 = vmatmul.msk.f32.gmra.mxu0 %vm246_vm1, %v202_v26  ;;  %2665 = vmatmul.msk.f32.gmra.mxu1 %vm246_vm1, %v2603_v27  ;;  %v2606_v21 = vld [vmem:[%s3036_s8 + $0x2a0] sm:$0xff] }
  0xc2   : > { %v1536_v34 = vpop.f32.mrf.mxu2  ;;  %v2042_v35 = vpop.f32.mrf.mxu3 }
  0xc3   : > { %2400 = vst.msk [vmem:[%s3198_s17 + $0x18] sm:$0xff] %vm2396_vm2, %v2338_v31  ;;  %v1537_v36 = vadd.f32 %v3172_v10, %v1536_v34  ;;  %v2043_v37 = vadd.f32 %v3172_v10, %v2042_v35  ;;  %v1205_v40 = vmax.f32 %v638_v32, %v1144_v33  ;;  %v2730_v32 = vld [vmem:[%s3036_s8 + $0x490] sm:$0xff]  ;;  %v2853_v33 = vld [vmem:[%s3036_s8 + $0x678] sm:$0xff] }
  0xc5   : > { %v1711_v41 = vmax.f32 %v1537_v36, 0.0  ;;  %v2217_v42 = vmax.f32 %v2043_v37, 0.0 }
  0xc6   : > { %v466_v43 = vpop.f32.mrf.mxu0  ;;  %v972_v44 = vpop.f32.mrf.mxu1 }
  0xc7   : > { %v2278_v47 = vmax.f32 %v1711_v41, %v2217_v42  ;;  %2789 = vmatmul.msk.f32.gmra.mxu2 %vm246_vm1, %v2727_v38  ;;  %2912 = vmatmul.msk.f32.gmra.mxu3 %vm246_vm1, %v2850_v39  ;;  %v467_v48 = vadd.f32 %v3172_v10, %v466_v43  ;;  %v973_v49 = vadd.f32 %v3172_v10, %v972_v44  ;;  %v206_v39 = vld [vmem:[%s3036_s8 + $0xc0] sm:$0xff] }
  0xc9   : > { %v2339_v50 = vmax.f32 %v1205_v40, %v2278_v47  ;;  %v639_v51 = vmax.f32 %v467_v48, 0.0  ;;  %v1145_v52 = vmax.f32 %v973_v49, 0.0  ;;  %2543 = vmatmul.msk.f32.gmra.mxu0 %vm246_vm1, %v203_v45  ;;  %2666 = vmatmul.msk.f32.gmra.mxu1 %vm246_vm1, %v2604_v46  ;;  %v2607_v40 = vld [vmem:[%s3036_s8 + $0x2a8] sm:$0xff] }
  0xca   : > { %v1539_v53 = vpop.f32.mrf.mxu2  ;;  %v2045_v54 = vpop.f32.mrf.mxu3 }
  0xcb   : > { %2401 = vst.msk [vmem:[%s3198_s17 + $0x20] sm:$0xff] %vm2396_vm2, %v2339_v50  ;;  %v1540_v55 = vadd.f32 %v3172_v10, %v1539_v53  ;;  %v2046_v56 = vadd.f32 %v3172_v10, %v2045_v54  ;;  %v1206_v59 = vmax.f32 %v639_v51, %v1145_v52  ;;  %v2731_v51 = vld [vmem:[%s3036_s8 + $0x498] sm:$0xff]  ;;  %v2854_v52 = vld [vmem:[%s3036_s8 + $0x680] sm:$0xff] }
  0xcd   : > { %v1712_v60 = vmax.f32 %v1540_v55, 0.0  ;;  %v2218_v61 = vmax.f32 %v2046_v56, 0.0 }
  0xce   : > { %v469_v62 = vpop.f32.mrf.mxu0  ;;  %v975_v63 = vpop.f32.mrf.mxu1 }
  0xcf   : > { %v2279_v2 = vmax.f32 %v1712_v60, %v2218_v61  ;;  %2790 = vmatmul.msk.f32.gmra.mxu2 %vm246_vm1, %v2728_v57  ;;  %2913 = vmatmul.msk.f32.gmra.mxu3 %vm246_vm1, %v2851_v58  ;;  %v470_v3 = vadd.f32 %v3172_v10, %v469_v62  ;;  %v976_v4 = vadd.f32 %v3172_v10, %v975_v63  ;;  %v207_v58 = vld [vmem:[%s3036_s8 + $0xc8] sm:$0xff] }
  0xd1   : > { %v2340_v5 = vmax.f32 %v1206_v59, %v2279_v2  ;;  %v640_v6 = vmax.f32 %v470_v3, 0.0  ;;  %v1146_v7 = vmax.f32 %v976_v4, 0.0  ;;  %2544 = vmatmul.msk.f32.gmra.mxu0 %vm246_vm1, %v204_v0  ;;  %2667 = vmatmul.msk.f32.gmra.mxu1 %vm246_vm1, %v2605_v1  ;;  %v2608_v59 = vld [vmem:[%s3036_s8 + $0x2b0] sm:$0xff] }
  0xd2   : > { %v1542_v8 = vpop.f32.mrf.mxu2  ;;  %v2048_v9 = vpop.f32.mrf.mxu3 }
  0xd3   : > { %2402 = vst.msk [vmem:[%s3198_s17 + $0x28] sm:$0xff] %vm2396_vm2, %v2340_v5  ;;  %v1543_v11 = vadd.f32 %v3172_v10, %v1542_v8  ;;  %v2049_v12 = vadd.f32 %v3172_v10, %v2048_v9  ;;  %v1207_v15 = vmax.f32 %v640_v6, %v1146_v7  ;;  %v2732_v6 = vld [vmem:[%s3036_s8 + $0x4a0] sm:$0xff]  ;;  %v2855_v7 = vld [vmem:[%s3036_s8 + $0x688] sm:$0xff] }
  0xd5   : > { %v1713_v16 = vmax.f32 %v1543_v11, 0.0  ;;  %v2219_v17 = vmax.f32 %v2049_v12, 0.0 }
  0xd6   : > { %v472_v18 = vpop.f32.mrf.mxu0  ;;  %v978_v19 = vpop.f32.mrf.mxu1 }
  0xd7   : > { %v2280_v22 = vmax.f32 %v1713_v16, %v2219_v17  ;;  %2791 = vmatmul.msk.f32.gmra.mxu2 %vm246_vm1, %v2729_v13  ;;  %2914 = vmatmul.msk.f32.gmra.mxu3 %vm246_vm1, %v2852_v14  ;;  %v473_v23 = vadd.f32 %v3172_v10, %v472_v18  ;;  %v979_v24 = vadd.f32 %v3172_v10, %v978_v19  ;;  %v208_v14 = vld [vmem:[%s3036_s8 + $0xd0] sm:$0xff] }
  0xd9   : > { %v2341_v25 = vmax.f32 %v1207_v15, %v2280_v22  ;;  %v641_v26 = vmax.f32 %v473_v23, 0.0  ;;  %v1147_v27 = vmax.f32 %v979_v24, 0.0  ;;  %2545 = vmatmul.msk.f32.gmra.mxu0 %vm246_vm1, %v205_v20  ;;  %2668 = vmatmul.msk.f32.gmra.mxu1 %vm246_vm1, %v2606_v21  ;;  %v2609_v15 = vld [vmem:[%s3036_s8 + $0x2b8] sm:$0xff] }
  0xda   : > { %v1545_v28 = vpop.f32.mrf.mxu2  ;;  %v2051_v29 = vpop.f32.mrf.mxu3 }
  0xdb   : > { %2403 = vst.msk [vmem:[%s3198_s17 + $0x30] sm:$0xff] %vm2396_vm2, %v2341_v25  ;;  %v1546_v30 = vadd.f32 %v3172_v10, %v1545_v28  ;;  %v2052_v31 = vadd.f32 %v3172_v10, %v2051_v29  ;;  %v1208_v34 = vmax.f32 %v641_v26, %v1147_v27  ;;  %v2733_v26 = vld [vmem:[%s3036_s8 + $0x4a8] sm:$0xff]  ;;  %v2856_v27 = vld [vmem:[%s3036_s8 + $0x690] sm:$0xff] }
  0xdd   : > { %v1714_v35 = vmax.f32 %v1546_v30, 0.0  ;;  %v2220_v36 = vmax.f32 %v2052_v31, 0.0 }
  0xde   : > { %v475_v37 = vpop.f32.mrf.mxu0  ;;  %v981_v38 = vpop.f32.mrf.mxu1 }
  0xdf   : > { %v2281_v41 = vmax.f32 %v1714_v35, %v2220_v36  ;;  %2792 = vmatmul.msk.f32.gmra.mxu2 %vm246_vm1, %v2730_v32  ;;  %2915 = vmatmul.msk.f32.gmra.mxu3 %vm246_vm1, %v2853_v33  ;;  %v476_v42 = vadd.f32 %v3172_v10, %v475_v37  ;;  %v982_v43 = vadd.f32 %v3172_v10, %v981_v38  ;;  %v209_v33 = vld [vmem:[%s3036_s8 + $0xd8] sm:$0xff] }
  0xe1   : > { %v2342_v44 = vmax.f32 %v1208_v34, %v2281_v41  ;;  %v642_v45 = vmax.f32 %v476_v42, 0.0  ;;  %v1148_v46 = vmax.f32 %v982_v43, 0.0  ;;  %2546 = vmatmul.msk.f32.gmra.mxu0 %vm246_vm1, %v206_v39  ;;  %2669 = vmatmul.msk.f32.gmra.mxu1 %vm246_vm1, %v2607_v40  ;;  %v2610_v34 = vld [vmem:[%s3036_s8 + $0x2c0] sm:$0xff] }
  0xe2   : > { %v1548_v47 = vpop.f32.mrf.mxu2  ;;  %v2054_v48 = vpop.f32.mrf.mxu3 }
  0xe3   : > { %2404 = vst.msk [vmem:[%s3198_s17 + $0x38] sm:$0xff] %vm2396_vm2, %v2342_v44  ;;  %v1549_v49 = vadd.f32 %v3172_v10, %v1548_v47  ;;  %v2055_v50 = vadd.f32 %v3172_v10, %v2054_v48  ;;  %v1209_v53 = vmax.f32 %v642_v45, %v1148_v46  ;;  %v2734_v45 = vld [vmem:[%s3036_s8 + $0x4b0] sm:$0xff]  ;;  %v2857_v46 = vld [vmem:[%s3036_s8 + $0x698] sm:$0xff] }
  0xe5   : > { %v1715_v54 = vmax.f32 %v1549_v49, 0.0  ;;  %v2221_v55 = vmax.f32 %v2055_v50, 0.0 }
  0xe6   : > { %v478_v56 = vpop.f32.mrf.mxu0  ;;  %v984_v57 = vpop.f32.mrf.mxu1 }
  0xe7   : > { %v2282_v60 = vmax.f32 %v1715_v54, %v2221_v55  ;;  %2793 = vmatmul.msk.f32.gmra.mxu2 %vm246_vm1, %v2731_v51  ;;  %2916 = vmatmul.msk.f32.gmra.mxu3 %vm246_vm1, %v2854_v52  ;;  %v479_v61 = vadd.f32 %v3172_v10, %v478_v56  ;;  %v985_v62 = vadd.f32 %v3172_v10, %v984_v57  ;;  %v210_v52 = vld [vmem:[%s3036_s8 + $0xe0] sm:$0xff] }
  0xe9   : > { %v2343_v63 = vmax.f32 %v1209_v53, %v2282_v60  ;;  %v643_v0 = vmax.f32 %v479_v61, 0.0  ;;  %v1149_v1 = vmax.f32 %v985_v62, 0.0  ;;  %2547 = vmatmul.msk.f32.gmra.mxu0 %vm246_vm1, %v207_v58  ;;  %2670 = vmatmul.msk.f32.gmra.mxu1 %vm246_vm1, %v2608_v59  ;;  %v2611_v53 = vld [vmem:[%s3036_s8 + $0x2c8] sm:$0xff] }
  0xea   : > { %v1551_v2 = vpop.f32.mrf.mxu2  ;;  %v2057_v3 = vpop.f32.mrf.mxu3 }
  0xeb   : > { %2405 = vst.msk [vmem:[%s3198_s17 + $0x40] sm:$0xff] %vm2396_vm2, %v2343_v63  ;;  %v1552_v4 = vadd.f32 %v3172_v10, %v1551_v2  ;;  %v2058_v5 = vadd.f32 %v3172_v10, %v2057_v3  ;;  %v1210_v8 = vmax.f32 %v643_v0, %v1149_v1  ;;  %v2735_v0 = vld [vmem:[%s3036_s8 + $0x4b8] sm:$0xff]  ;;  %v2858_v1 = vld [vmem:[%s3036_s8 + $0x6a0] sm:$0xff] }
  0xed   : > { %v1716_v9 = vmax.f32 %v1552_v4, 0.0  ;;  %v2222_v11 = vmax.f32 %v2058_v5, 0.0 }
  0xee   : > { %v481_v12 = vpop.f32.mrf.mxu0  ;;  %v987_v13 = vpop.f32.mrf.mxu1 }
  0xef   : > { %v2283_v16 = vmax.f32 %v1716_v9, %v2222_v11  ;;  %2794 = vmatmul.msk.f32.gmra.mxu2 %vm246_vm1, %v2732_v6  ;;  %2917 = vmatmul.msk.f32.gmra.mxu3 %vm246_vm1, %v2855_v7  ;;  %v482_v17 = vadd.f32 %v3172_v10, %v481_v12  ;;  %v988_v18 = vadd.f32 %v3172_v10, %v987_v13  ;;  %v211_v7 = vld [vmem:[%s3036_s8 + $0xe8] sm:$0xff] }
  0xf1   : > { %v2344_v19 = vmax.f32 %v1210_v8, %v2283_v16  ;;  %v644_v20 = vmax.f32 %v482_v17, 0.0  ;;  %v1150_v21 = vmax.f32 %v988_v18, 0.0  ;;  %2548 = vmatmul.msk.f32.gmra.mxu0 %vm246_vm1, %v208_v14  ;;  %2671 = vmatmul.msk.f32.gmra.mxu1 %vm246_vm1, %v2609_v15  ;;  %v2612_v8 = vld [vmem:[%s3036_s8 + $0x2d0] sm:$0xff] }
  0xf2   : > { %v1554_v22 = vpop.f32.mrf.mxu2  ;;  %v2060_v23 = vpop.f32.mrf.mxu3 }
  0xf3   : > { %2406 = vst.msk [vmem:[%s3198_s17 + $0x48] sm:$0xff] %vm2396_vm2, %v2344_v19  ;;  %v1555_v24 = vadd.f32 %v3172_v10, %v1554_v22  ;;  %v2061_v25 = vadd.f32 %v3172_v10, %v2060_v23  ;;  %v1211_v28 = vmax.f32 %v644_v20, %v1150_v21  ;;  %v2736_v20 = vld [vmem:[%s3036_s8 + $0x4c0] sm:$0xff]  ;;  %v2859_v21 = vld [vmem:[%s3036_s8 + $0x6a8] sm:$0xff] }
  0xf5   : > { %v1717_v29 = vmax.f32 %v1555_v24, 0.0  ;;  %v2223_v30 = vmax.f32 %v2061_v25, 0.0 }
  0xf6   : > { %v484_v31 = vpop.f32.mrf.mxu0  ;;  %v990_v32 = vpop.f32.mrf.mxu1 }
  0xf7   : > { %v2284_v35 = vmax.f32 %v1717_v29, %v2223_v30  ;;  %2795 = vmatmul.msk.f32.gmra.mxu2 %vm246_vm1, %v2733_v26  ;;  %2918 = vmatmul.msk.f32.gmra.mxu3 %vm246_vm1, %v2856_v27  ;;  %v485_v36 = vadd.f32 %v3172_v10, %v484_v31  ;;  %v991_v37 = vadd.f32 %v3172_v10, %v990_v32  ;;  %v212_v27 = vld [vmem:[%s3036_s8 + $0xf0] sm:$0xff] }
  0xf9   : > { %v2345_v38 = vmax.f32 %v1211_v28, %v2284_v35  ;;  %v645_v39 = vmax.f32 %v485_v36, 0.0  ;;  %v1151_v40 = vmax.f32 %v991_v37, 0.0  ;;  %2549 = vmatmul.msk.f32.gmra.mxu0 %vm246_vm1, %v209_v33  ;;  %2672 = vmatmul.msk.f32.gmra.mxu1 %vm246_vm1, %v2610_v34  ;;  %v2613_v28 = vld [vmem:[%s3036_s8 + $0x2d8] sm:$0xff] }
  0xfa   : > { %v1557_v41 = vpop.f32.mrf.mxu2  ;;  %v2063_v42 = vpop.f32.mrf.mxu3 }
  0xfb   : > { %2407 = vst.msk [vmem:[%s3198_s17 + $0x50] sm:$0xff] %vm2396_vm2, %v2345_v38  ;;  %v1558_v43 = vadd.f32 %v3172_v10, %v1557_v41  ;;  %v2064_v44 = vadd.f32 %v3172_v10, %v2063_v42  ;;  %v1212_v47 = vmax.f32 %v645_v39, %v1151_v40  ;;  %v2737_v39 = vld [vmem:[%s3036_s8 + $0x4c8] sm:$0xff]  ;;  %v2860_v40 = vld [vmem:[%s3036_s8 + $0x6b0] sm:$0xff] }
  0xfd   : > { %v1718_v48 = vmax.f32 %v1558_v43, 0.0  ;;  %v2224_v49 = vmax.f32 %v2064_v44, 0.0 }
  0xfe   : > { %v487_v50 = vpop.f32.mrf.mxu0  ;;  %v993_v51 = vpop.f32.mrf.mxu1 }
  0xff   : > { %v2285_v54 = vmax.f32 %v1718_v48, %v2224_v49  ;;  %2796 = vmatmul.msk.f32.gmra.mxu2 %vm246_vm1, %v2734_v45  ;;  %2919 = vmatmul.msk.f32.gmra.mxu3 %vm246_vm1, %v2857_v46  ;;  %v488_v55 = vadd.f32 %v3172_v10, %v487_v50  ;;  %v994_v56 = vadd.f32 %v3172_v10, %v993_v51  ;;  %v213_v46 = vld [vmem:[%s3036_s8 + $0xf8] sm:$0xff] }
 0x101   : > { %v2346_v57 = vmax.f32 %v1212_v47, %v2285_v54  ;;  %v646_v58 = vmax.f32 %v488_v55, 0.0  ;;  %v1152_v59 = vmax.f32 %v994_v56, 0.0  ;;  %2550 = vmatmul.msk.f32.gmra.mxu0 %vm246_vm1, %v210_v52  ;;  %2673 = vmatmul.msk.f32.gmra.mxu1 %vm246_vm1, %v2611_v53  ;;  %v2614_v47 = vld [vmem:[%s3036_s8 + $0x2e0] sm:$0xff] }
 0x102   : > { %v1560_v60 = vpop.f32.mrf.mxu2  ;;  %v2066_v61 = vpop.f32.mrf.mxu3 }
 0x103   : > { %2408 = vst.msk [vmem:[%s3198_s17 + $0x58] sm:$0xff] %vm2396_vm2, %v2346_v57  ;;  %v1561_v62 = vadd.f32 %v3172_v10, %v1560_v60  ;;  %v2067_v63 = vadd.f32 %v3172_v10, %v2066_v61  ;;  %v1213_v2 = vmax.f32 %v646_v58, %v1152_v59  ;;  %v2738_v58 = vld [vmem:[%s3036_s8 + $0x4d0] sm:$0xff]  ;;  %v2861_v59 = vld [vmem:[%s3036_s8 + $0x6b8] sm:$0xff] }
 0x105   : > { %v1719_v3 = vmax.f32 %v1561_v62, 0.0  ;;  %v2225_v4 = vmax.f32 %v2067_v63, 0.0 }
 0x106   : > { %v490_v5 = vpop.f32.mrf.mxu0  ;;  %v996_v6 = vpop.f32.mrf.mxu1 }
 0x107   : > { %v2286_v9 = vmax.f32 %v1719_v3, %v2225_v4  ;;  %2797 = vmatmul.msk.f32.gmra.mxu2 %vm246_vm1, %v2735_v0  ;;  %2920 = vmatmul.msk.f32.gmra.mxu3 %vm246_vm1, %v2858_v1  ;;  %v491_v11 = vadd.f32 %v3172_v10, %v490_v5  ;;  %v997_v12 = vadd.f32 %v3172_v10, %v996_v6  ;;  %v214_v1 = vld [vmem:[%s3036_s8 + $0x100] sm:$0xff] }
 0x109   : > { %v2347_v13 = vmax.f32 %v1213_v2, %v2286_v9  ;;  %v647_v14 = vmax.f32 %v491_v11, 0.0  ;;  %v1153_v15 = vmax.f32 %v997_v12, 0.0  ;;  %2551 = vmatmul.msk.f32.gmra.mxu0 %vm246_vm1, %v211_v7  ;;  %2674 = vmatmul.msk.f32.gmra.mxu1 %vm246_vm1, %v2612_v8  ;;  %v2615_v2 = vld [vmem:[%s3036_s8 + $0x2e8] sm:$0xff] }
 0x10a   : > { %v1563_v16 = vpop.f32.mrf.mxu2  ;;  %v2069_v17 = vpop.f32.mrf.mxu3 }
 0x10b   : > { %2409 = vst.msk [vmem:[%s3198_s17 + $0x60] sm:$0xff] %vm2396_vm2, %v2347_v13  ;;  %v1564_v18 = vadd.f32 %v3172_v10, %v1563_v16  ;;  %v2070_v19 = vadd.f32 %v3172_v10, %v2069_v17  ;;  %v1214_v22 = vmax.f32 %v647_v14, %v1153_v15  ;;  %v2739_v14 = vld [vmem:[%s3036_s8 + $0x4d8] sm:$0xff]  ;;  %v2862_v15 = vld [vmem:[%s3036_s8 + $0x6c0] sm:$0xff] }
 0x10d   : > { %v1720_v23 = vmax.f32 %v1564_v18, 0.0  ;;  %v2226_v24 = vmax.f32 %v2070_v19, 0.0 }
 0x10e   : > { %v493_v25 = vpop.f32.mrf.mxu0  ;;  %v999_v26 = vpop.f32.mrf.mxu1 }
 0x10f   : > { %v2287_v29 = vmax.f32 %v1720_v23, %v2226_v24  ;;  %2798 = vmatmul.msk.f32.gmra.mxu2 %vm246_vm1, %v2736_v20  ;;  %2921 = vmatmul.msk.f32.gmra.mxu3 %vm246_vm1, %v2859_v21  ;;  %v494_v30 = vadd.f32 %v3172_v10, %v493_v25  ;;  %v1000_v31 = vadd.f32 %v3172_v10, %v999_v26  ;;  %v215_v21 = vld [vmem:[%s3036_s8 + $0x108] sm:$0xff] }
 0x111   : > { %v2348_v32 = vmax.f32 %v1214_v22, %v2287_v29  ;;  %v648_v33 = vmax.f32 %v494_v30, 0.0  ;;  %v1154_v34 = vmax.f32 %v1000_v31, 0.0  ;;  %2552 = vmatmul.msk.f32.gmra.mxu0 %vm246_vm1, %v212_v27  ;;  %2675 = vmatmul.msk.f32.gmra.mxu1 %vm246_vm1, %v2613_v28  ;;  %v2616_v22 = vld [vmem:[%s3036_s8 + $0x2f0] sm:$0xff] }
 0x112   : > { %v1566_v35 = vpop.f32.mrf.mxu2  ;;  %v2072_v36 = vpop.f32.mrf.mxu3 }
 0x113   : > { %2410 = vst.msk [vmem:[%s3198_s17 + $0x68] sm:$0xff] %vm2396_vm2, %v2348_v32  ;;  %v1567_v37 = vadd.f32 %v3172_v10, %v1566_v35  ;;  %v2073_v38 = vadd.f32 %v3172_v10, %v2072_v36  ;;  %v1215_v41 = vmax.f32 %v648_v33, %v1154_v34  ;;  %v2740_v33 = vld [vmem:[%s3036_s8 + $0x4e0] sm:$0xff]  ;;  %v2863_v34 = vld [vmem:[%s3036_s8 + $0x6c8] sm:$0xff] }
 0x115   : > { %v1721_v42 = vmax.f32 %v1567_v37, 0.0  ;;  %v2227_v43 = vmax.f32 %v2073_v38, 0.0 }
 0x116   : > { %v496_v44 = vpop.f32.mrf.mxu0  ;;  %v1002_v45 = vpop.f32.mrf.mxu1 }
 0x117   : > { %v2288_v48 = vmax.f32 %v1721_v42, %v2227_v43  ;;  %2799 = vmatmul.msk.f32.gmra.mxu2 %vm246_vm1, %v2737_v39  ;;  %2922 = vmatmul.msk.f32.gmra.mxu3 %vm246_vm1, %v2860_v40  ;;  %v497_v49 = vadd.f32 %v3172_v10, %v496_v44  ;;  %v1003_v50 = vadd.f32 %v3172_v10, %v1002_v45  ;;  %v216_v40 = vld [vmem:[%s3036_s8 + $0x110] sm:$0xff] }
 0x119   : > { %v2349_v51 = vmax.f32 %v1215_v41, %v2288_v48  ;;  %v649_v52 = vmax.f32 %v497_v49, 0.0  ;;  %v1155_v53 = vmax.f32 %v1003_v50, 0.0  ;;  %2553 = vmatmul.msk.f32.gmra.mxu0 %vm246_vm1, %v213_v46  ;;  %2676 = vmatmul.msk.f32.gmra.mxu1 %vm246_vm1, %v2614_v47  ;;  %v2617_v41 = vld [vmem:[%s3036_s8 + $0x2f8] sm:$0xff] }
 0x11a   : > { %v1569_v54 = vpop.f32.mrf.mxu2  ;;  %v2075_v55 = vpop.f32.mrf.mxu3 }
 0x11b   : > { %2411 = vst.msk [vmem:[%s3198_s17 + $0x70] sm:$0xff] %vm2396_vm2, %v2349_v51  ;;  %v1570_v56 = vadd.f32 %v3172_v10, %v1569_v54  ;;  %v2076_v57 = vadd.f32 %v3172_v10, %v2075_v55  ;;  %v1216_v60 = vmax.f32 %v649_v52, %v1155_v53  ;;  %v2741_v52 = vld [vmem:[%s3036_s8 + $0x4e8] sm:$0xff]  ;;  %v2864_v53 = vld [vmem:[%s3036_s8 + $0x6d0] sm:$0xff] }
 0x11d   : > { %v1722_v61 = vmax.f32 %v1570_v56, 0.0  ;;  %v2228_v62 = vmax.f32 %v2076_v57, 0.0 }
 0x11e   : > { %v499_v63 = vpop.f32.mrf.mxu0  ;;  %v1005_v0 = vpop.f32.mrf.mxu1 }
 0x11f   : > { %v2289_v3 = vmax.f32 %v1722_v61, %v2228_v62  ;;  %2800 = vmatmul.msk.f32.gmra.mxu2 %vm246_vm1, %v2738_v58  ;;  %2923 = vmatmul.msk.f32.gmra.mxu3 %vm246_vm1, %v2861_v59  ;;  %v500_v4 = vadd.f32 %v3172_v10, %v499_v63  ;;  %v1006_v5 = vadd.f32 %v3172_v10, %v1005_v0  ;;  %v217_v59 = vld [vmem:[%s3036_s8 + $0x118] sm:$0xff] }
 0x121   : > { %v2350_v6 = vmax.f32 %v1216_v60, %v2289_v3  ;;  %v650_v7 = vmax.f32 %v500_v4, 0.0  ;;  %v1156_v8 = vmax.f32 %v1006_v5, 0.0  ;;  %2554 = vmatmul.msk.f32.gmra.mxu0 %vm246_vm1, %v214_v1  ;;  %2677 = vmatmul.msk.f32.gmra.mxu1 %vm246_vm1, %v2615_v2  ;;  %v2618_v60 = vld [vmem:[%s3036_s8 + $0x300] sm:$0xff] }
 0x122   : > { %v1572_v9 = vpop.f32.mrf.mxu2  ;;  %v2078_v11 = vpop.f32.mrf.mxu3 }
 0x123   : > { %2412 = vst.msk [vmem:[%s3198_s17 + $0x78] sm:$0xff] %vm2396_vm2, %v2350_v6  ;;  %v1573_v12 = vadd.f32 %v3172_v10, %v1572_v9  ;;  %v2079_v13 = vadd.f32 %v3172_v10, %v2078_v11  ;;  %v1217_v16 = vmax.f32 %v650_v7, %v1156_v8  ;;  %v2742_v7 = vld [vmem:[%s3036_s8 + $0x4f0] sm:$0xff]  ;;  %v2865_v8 = vld [vmem:[%s3036_s8 + $0x6d8] sm:$0xff] }
 0x125   : > { %v1723_v17 = vmax.f32 %v1573_v12, 0.0  ;;  %v2229_v18 = vmax.f32 %v2079_v13, 0.0 }
 0x126   : > { %v502_v19 = vpop.f32.mrf.mxu0  ;;  %v1008_v20 = vpop.f32.mrf.mxu1 }
 0x127   : > { %v2290_v23 = vmax.f32 %v1723_v17, %v2229_v18  ;;  %2801 = vmatmul.msk.f32.gmra.mxu2 %vm246_vm1, %v2739_v14  ;;  %2924 = vmatmul.msk.f32.gmra.mxu3 %vm246_vm1, %v2862_v15  ;;  %v503_v24 = vadd.f32 %v3172_v10, %v502_v19  ;;  %v1009_v25 = vadd.f32 %v3172_v10, %v1008_v20  ;;  %v218_v15 = vld [vmem:[%s3036_s8 + $0x120] sm:$0xff] }
 0x129   : > { %v2351_v26 = vmax.f32 %v1217_v16, %v2290_v23  ;;  %v651_v27 = vmax.f32 %v503_v24, 0.0  ;;  %v1157_v28 = vmax.f32 %v1009_v25, 0.0  ;;  %2555 = vmatmul.msk.f32.gmra.mxu0 %vm246_vm1, %v215_v21  ;;  %2678 = vmatmul.msk.f32.gmra.mxu1 %vm246_vm1, %v2616_v22  ;;  %v2619_v16 = vld [vmem:[%s3036_s8 + $0x308] sm:$0xff] }
 0x12a   : > { %v1575_v29 = vpop.f32.mrf.mxu2  ;;  %v2081_v30 = vpop.f32.mrf.mxu3 }
 0x12b   : > { %2413 = vst.msk [vmem:[%s3198_s17 + $0x80] sm:$0xff] %vm2396_vm2, %v2351_v26  ;;  %v1576_v31 = vadd.f32 %v3172_v10, %v1575_v29  ;;  %v2082_v32 = vadd.f32 %v3172_v10, %v2081_v30  ;;  %v1218_v35 = vmax.f32 %v651_v27, %v1157_v28  ;;  %v2743_v27 = vld [vmem:[%s3036_s8 + $0x4f8] sm:$0xff]  ;;  %v2866_v28 = vld [vmem:[%s3036_s8 + $0x6e0] sm:$0xff] }
 0x12d   : > { %v1724_v36 = vmax.f32 %v1576_v31, 0.0  ;;  %v2230_v37 = vmax.f32 %v2082_v32, 0.0 }
 0x12e   : > { %v505_v38 = vpop.f32.mrf.mxu0  ;;  %v1011_v39 = vpop.f32.mrf.mxu1 }
 0x12f   : > { %v2291_v42 = vmax.f32 %v1724_v36, %v2230_v37  ;;  %2802 = vmatmul.msk.f32.gmra.mxu2 %vm246_vm1, %v2740_v33  ;;  %2925 = vmatmul.msk.f32.gmra.mxu3 %vm246_vm1, %v2863_v34  ;;  %v506_v43 = vadd.f32 %v3172_v10, %v505_v38  ;;  %v1012_v44 = vadd.f32 %v3172_v10, %v1011_v39  ;;  %v219_v34 = vld [vmem:[%s3036_s8 + $0x128] sm:$0xff] }
 0x131   : > { %v2352_v45 = vmax.f32 %v1218_v35, %v2291_v42  ;;  %v652_v46 = vmax.f32 %v506_v43, 0.0  ;;  %v1158_v47 = vmax.f32 %v1012_v44, 0.0  ;;  %2556 = vmatmul.msk.f32.gmra.mxu0 %vm246_vm1, %v216_v40  ;;  %2679 = vmatmul.msk.f32.gmra.mxu1 %vm246_vm1, %v2617_v41  ;;  %v2620_v35 = vld [vmem:[%s3036_s8 + $0x310] sm:$0xff] }
 0x132   : > { %v1578_v48 = vpop.f32.mrf.mxu2  ;;  %v2084_v49 = vpop.f32.mrf.mxu3 }
 0x133   : > { %2414 = vst.msk [vmem:[%s3198_s17 + $0x88] sm:$0xff] %vm2396_vm2, %v2352_v45  ;;  %v1579_v50 = vadd.f32 %v3172_v10, %v1578_v48  ;;  %v2085_v51 = vadd.f32 %v3172_v10, %v2084_v49  ;;  %v1219_v54 = vmax.f32 %v652_v46, %v1158_v47  ;;  %v2744_v46 = vld [vmem:[%s3036_s8 + $0x500] sm:$0xff]  ;;  %v2867_v47 = vld [vmem:[%s3036_s8 + $0x6e8] sm:$0xff] }
 0x135   : > { %v1725_v55 = vmax.f32 %v1579_v50, 0.0  ;;  %v2231_v56 = vmax.f32 %v2085_v51, 0.0 }
 0x136   : > { %v508_v57 = vpop.f32.mrf.mxu0  ;;  %v1014_v58 = vpop.f32.mrf.mxu1 }
 0x137   : > { %v2292_v61 = vmax.f32 %v1725_v55, %v2231_v56  ;;  %2803 = vmatmul.msk.f32.gmra.mxu2 %vm246_vm1, %v2741_v52  ;;  %2926 = vmatmul.msk.f32.gmra.mxu3 %vm246_vm1, %v2864_v53  ;;  %v509_v62 = vadd.f32 %v3172_v10, %v508_v57  ;;  %v1015_v63 = vadd.f32 %v3172_v10, %v1014_v58  ;;  %v220_v53 = vld [vmem:[%s3036_s8 + $0x130] sm:$0xff] }
 0x139   : > { %v2353_v0 = vmax.f32 %v1219_v54, %v2292_v61  ;;  %v653_v1 = vmax.f32 %v509_v62, 0.0  ;;  %v1159_v2 = vmax.f32 %v1015_v63, 0.0  ;;  %2557 = vmatmul.msk.f32.gmra.mxu0 %vm246_vm1, %v217_v59  ;;  %2680 = vmatmul.msk.f32.gmra.mxu1 %vm246_vm1, %v2618_v60  ;;  %v2621_v54 = vld [vmem:[%s3036_s8 + $0x318] sm:$0xff] }
 0x13a   : > { %v1581_v3 = vpop.f32.mrf.mxu2  ;;  %v2087_v4 = vpop.f32.mrf.mxu3 }
 0x13b   : > { %2415 = vst.msk [vmem:[%s3198_s17 + $0x90] sm:$0xff] %vm2396_vm2, %v2353_v0  ;;  %v1582_v5 = vadd.f32 %v3172_v10, %v1581_v3  ;;  %v2088_v6 = vadd.f32 %v3172_v10, %v2087_v4  ;;  %v1220_v9 = vmax.f32 %v653_v1, %v1159_v2  ;;  %v2745_v1 = vld [vmem:[%s3036_s8 + $0x508] sm:$0xff]  ;;  %v2868_v2 = vld [vmem:[%s3036_s8 + $0x6f0] sm:$0xff] }
 0x13d   : > { %v1726_v11 = vmax.f32 %v1582_v5, 0.0  ;;  %v2232_v12 = vmax.f32 %v2088_v6, 0.0 }
 0x13e   : > { %v511_v13 = vpop.f32.mrf.mxu0  ;;  %v1017_v14 = vpop.f32.mrf.mxu1 }
 0x13f   : > { %v2293_v17 = vmax.f32 %v1726_v11, %v2232_v12  ;;  %2804 = vmatmul.msk.f32.gmra.mxu2 %vm246_vm1, %v2742_v7  ;;  %2927 = vmatmul.msk.f32.gmra.mxu3 %vm246_vm1, %v2865_v8  ;;  %v512_v18 = vadd.f32 %v3172_v10, %v511_v13  ;;  %v1018_v19 = vadd.f32 %v3172_v10, %v1017_v14  ;;  %v221_v8 = vld [vmem:[%s3036_s8 + $0x138] sm:$0xff] }
 0x141   : > { %v2354_v20 = vmax.f32 %v1220_v9, %v2293_v17  ;;  %v654_v21 = vmax.f32 %v512_v18, 0.0  ;;  %v1160_v22 = vmax.f32 %v1018_v19, 0.0  ;;  %2558 = vmatmul.msk.f32.gmra.mxu0 %vm246_vm1, %v218_v15  ;;  %2681 = vmatmul.msk.f32.gmra.mxu1 %vm246_vm1, %v2619_v16  ;;  %v2622_v9 = vld [vmem:[%s3036_s8 + $0x320] sm:$0xff] }
 0x142   : > { %v1584_v23 = vpop.f32.mrf.mxu2  ;;  %v2090_v24 = vpop.f32.mrf.mxu3 }
 0x143   : > { %2416 = vst.msk [vmem:[%s3198_s17 + $0x98] sm:$0xff] %vm2396_vm2, %v2354_v20  ;;  %v1585_v25 = vadd.f32 %v3172_v10, %v1584_v23  ;;  %v2091_v26 = vadd.f32 %v3172_v10, %v2090_v24  ;;  %v1221_v29 = vmax.f32 %v654_v21, %v1160_v22  ;;  %v3481_v10 = vld [vmem:[%s3920_s2] ss:$0 sm:$0xff]  ;;  %v2746_v21 = vld [vmem:[%s3036_s8 + $0x510] sm:$0xff]  ;;  %v2869_v22 = vld [vmem:[%s3036_s8 + $0x6f8] sm:$0xff] }
 0x145   : > { %v1727_v30 = vmax.f32 %v1585_v25, 0.0  ;;  %v2233_v31 = vmax.f32 %v2091_v26, 0.0 }
 0x146   : > { %v514_v32 = vpop.f32.mrf.mxu0  ;;  %v1020_v33 = vpop.f32.mrf.mxu1 }
 0x147   : > { %v2294_v36 = vmax.f32 %v1727_v30, %v2233_v31  ;;  %2805 = vmatmul.msk.f32.gmra.mxu2 %vm246_vm1, %v2743_v27  ;;  %2928 = vmatmul.msk.f32.gmra.mxu3 %vm246_vm1, %v2866_v28  ;;  %v515_v37 = vadd.f32 %v3481_v10, %v514_v32  ;;  %v1021_v38 = vadd.f32 %v3481_v10, %v1020_v33  ;;  %v222_v28 = vld [vmem:[%s3036_s8 + $0x140] sm:$0xff] }
 0x149   : > { %v2355_v39 = vmax.f32 %v1221_v29, %v2294_v36  ;;  %v655_v40 = vmax.f32 %v515_v37, 0.0  ;;  %v1161_v41 = vmax.f32 %v1021_v38, 0.0  ;;  %2559 = vmatmul.msk.f32.gmra.mxu0 %vm246_vm1, %v219_v34  ;;  %2682 = vmatmul.msk.f32.gmra.mxu1 %vm246_vm1, %v2620_v35  ;;  %v2623_v29 = vld [vmem:[%s3036_s8 + $0x328] sm:$0xff] }
 0x14a   : > { %v1587_v42 = vpop.f32.mrf.mxu2  ;;  %v2093_v43 = vpop.f32.mrf.mxu3 }
 0x14b   : > { %2417 = vst.msk [vmem:[%s3198_s17 + $0xa0] sm:$0xff] %vm2396_vm2, %v2355_v39  ;;  %v1588_v44 = vadd.f32 %v3481_v10, %v1587_v42  ;;  %v2094_v45 = vadd.f32 %v3481_v10, %v2093_v43  ;;  %v1222_v48 = vmax.f32 %v655_v40, %v1161_v41  ;;  %v2747_v40 = vld [vmem:[%s3036_s8 + $0x518] sm:$0xff]  ;;  %v2870_v41 = vld [vmem:[%s3036_s8 + $0x700] sm:$0xff] }
 0x14d   : > { %v1728_v49 = vmax.f32 %v1588_v44, 0.0  ;;  %v2234_v50 = vmax.f32 %v2094_v45, 0.0 }
 0x14e   : > { %v517_v51 = vpop.f32.mrf.mxu0  ;;  %v1023_v52 = vpop.f32.mrf.mxu1 }
 0x14f   : > { %v2295_v55 = vmax.f32 %v1728_v49, %v2234_v50  ;;  %2806 = vmatmul.msk.f32.gmra.mxu2 %vm246_vm1, %v2744_v46  ;;  %2929 = vmatmul.msk.f32.gmra.mxu3 %vm246_vm1, %v2867_v47  ;;  %v518_v56 = vadd.f32 %v3481_v10, %v517_v51  ;;  %v1024_v57 = vadd.f32 %v3481_v10, %v1023_v52  ;;  %v223_v47 = vld [vmem:[%s3036_s8 + $0x148] sm:$0xff] }
 0x151   : > { %v2356_v58 = vmax.f32 %v1222_v48, %v2295_v55  ;;  %v656_v59 = vmax.f32 %v518_v56, 0.0  ;;  %v1162_v60 = vmax.f32 %v1024_v57, 0.0  ;;  %2560 = vmatmul.msk.f32.gmra.mxu0 %vm246_vm1, %v220_v53  ;;  %2683 = vmatmul.msk.f32.gmra.mxu1 %vm246_vm1, %v2621_v54  ;;  %v2624_v48 = vld [vmem:[%s3036_s8 + $0x330] sm:$0xff] }
 0x152   : > { %v1590_v61 = vpop.f32.mrf.mxu2  ;;  %v2096_v62 = vpop.f32.mrf.mxu3 }
 0x153   : > { %2418 = vst.msk [vmem:[%s3198_s17 + $0xa8] sm:$0xff] %vm2396_vm2, %v2356_v58  ;;  %v1591_v63 = vadd.f32 %v3481_v10, %v1590_v61  ;;  %v2097_v0 = vadd.f32 %v3481_v10, %v2096_v62  ;;  %v1223_v3 = vmax.f32 %v656_v59, %v1162_v60  ;;  %v2748_v59 = vld [vmem:[%s3036_s8 + $0x520] sm:$0xff]  ;;  %v2871_v60 = vld [vmem:[%s3036_s8 + $0x708] sm:$0xff] }
 0x155   : > { %v1729_v4 = vmax.f32 %v1591_v63, 0.0  ;;  %v2235_v5 = vmax.f32 %v2097_v0, 0.0 }
 0x156   : > { %v520_v6 = vpop.f32.mrf.mxu0  ;;  %v1026_v7 = vpop.f32.mrf.mxu1 }
 0x157   : > { %v2296_v11 = vmax.f32 %v1729_v4, %v2235_v5  ;;  %2807 = vmatmul.msk.f32.gmra.mxu2 %vm246_vm1, %v2745_v1  ;;  %2930 = vmatmul.msk.f32.gmra.mxu3 %vm246_vm1, %v2868_v2  ;;  %v521_v12 = vadd.f32 %v3481_v10, %v520_v6  ;;  %v1027_v13 = vadd.f32 %v3481_v10, %v1026_v7  ;;  %v224_v2 = vld [vmem:[%s3036_s8 + $0x150] sm:$0xff] }
 0x159   : > { %v2357_v14 = vmax.f32 %v1223_v3, %v2296_v11  ;;  %v657_v15 = vmax.f32 %v521_v12, 0.0  ;;  %v1163_v16 = vmax.f32 %v1027_v13, 0.0  ;;  %2561 = vmatmul.msk.f32.gmra.mxu0 %vm246_vm1, %v221_v8  ;;  %2684 = vmatmul.msk.f32.gmra.mxu1 %vm246_vm1, %v2622_v9  ;;  %v2625_v3 = vld [vmem:[%s3036_s8 + $0x338] sm:$0xff] }
 0x15a   : > { %v1593_v17 = vpop.f32.mrf.mxu2  ;;  %v2099_v18 = vpop.f32.mrf.mxu3 }
 0x15b   : > { %2419 = vst.msk [vmem:[%s3198_s17 + $0xb0] sm:$0xff] %vm2396_vm2, %v2357_v14  ;;  %v1594_v19 = vadd.f32 %v3481_v10, %v1593_v17  ;;  %v2100_v20 = vadd.f32 %v3481_v10, %v2099_v18  ;;  %v1224_v23 = vmax.f32 %v657_v15, %v1163_v16  ;;  %v2749_v15 = vld [vmem:[%s3036_s8 + $0x528] sm:$0xff]  ;;  %v2872_v16 = vld [vmem:[%s3036_s8 + $0x710] sm:$0xff] }
 0x15d   : > { %v1730_v24 = vmax.f32 %v1594_v19, 0.0  ;;  %v2236_v25 = vmax.f32 %v2100_v20, 0.0 }
 0x15e   : > { %v523_v26 = vpop.f32.mrf.mxu0  ;;  %v1029_v27 = vpop.f32.mrf.mxu1 }
 0x15f   : > { %v2297_v30 = vmax.f32 %v1730_v24, %v2236_v25  ;;  %2808 = vmatmul.msk.f32.gmra.mxu2 %vm246_vm1, %v2746_v21  ;;  %2931 = vmatmul.msk.f32.gmra.mxu3 %vm246_vm1, %v2869_v22  ;;  %v524_v31 = vadd.f32 %v3481_v10, %v523_v26  ;;  %v1030_v32 = vadd.f32 %v3481_v10, %v1029_v27  ;;  %v225_v22 = vld [vmem:[%s3036_s8 + $0x158] sm:$0xff] }
 0x161   : > { %v2358_v33 = vmax.f32 %v1224_v23, %v2297_v30  ;;  %v658_v34 = vmax.f32 %v524_v31, 0.0  ;;  %v1164_v35 = vmax.f32 %v1030_v32, 0.0  ;;  %2562 = vmatmul.msk.f32.gmra.mxu0 %vm246_vm1, %v222_v28  ;;  %2685 = vmatmul.msk.f32.gmra.mxu1 %vm246_vm1, %v2623_v29  ;;  %v2626_v23 = vld [vmem:[%s3036_s8 + $0x340] sm:$0xff] }
 0x162   : > { %v1596_v36 = vpop.f32.mrf.mxu2  ;;  %v2102_v37 = vpop.f32.mrf.mxu3 }
 0x163   : > { %2420 = vst.msk [vmem:[%s3198_s17 + $0xb8] sm:$0xff] %vm2396_vm2, %v2358_v33  ;;  %v1597_v38 = vadd.f32 %v3481_v10, %v1596_v36  ;;  %v2103_v39 = vadd.f32 %v3481_v10, %v2102_v37  ;;  %v1225_v42 = vmax.f32 %v658_v34, %v1164_v35  ;;  %v2750_v34 = vld [vmem:[%s3036_s8 + $0x530] sm:$0xff]  ;;  %v2873_v35 = vld [vmem:[%s3036_s8 + $0x718] sm:$0xff] }
 0x165   : > { %v1731_v43 = vmax.f32 %v1597_v38, 0.0  ;;  %v2237_v44 = vmax.f32 %v2103_v39, 0.0 }
 0x166   : > { %v526_v45 = vpop.f32.mrf.mxu0  ;;  %v1032_v46 = vpop.f32.mrf.mxu1 }
 0x167   : > { %v2298_v49 = vmax.f32 %v1731_v43, %v2237_v44  ;;  %2809 = vmatmul.msk.f32.gmra.mxu2 %vm246_vm1, %v2747_v40  ;;  %2932 = vmatmul.msk.f32.gmra.mxu3 %vm246_vm1, %v2870_v41  ;;  %v527_v50 = vadd.f32 %v3481_v10, %v526_v45  ;;  %v1033_v51 = vadd.f32 %v3481_v10, %v1032_v46  ;;  %v226_v41 = vld [vmem:[%s3036_s8 + $0x160] sm:$0xff] }
 0x169   : > { %v2359_v52 = vmax.f32 %v1225_v42, %v2298_v49  ;;  %v659_v53 = vmax.f32 %v527_v50, 0.0  ;;  %v1165_v54 = vmax.f32 %v1033_v51, 0.0  ;;  %2563 = vmatmul.msk.f32.gmra.mxu0 %vm246_vm1, %v223_v47  ;;  %2686 = vmatmul.msk.f32.gmra.mxu1 %vm246_vm1, %v2624_v48  ;;  %v2627_v42 = vld [vmem:[%s3036_s8 + $0x348] sm:$0xff] }
 0x16a   : > { %v1599_v55 = vpop.f32.mrf.mxu2  ;;  %v2105_v56 = vpop.f32.mrf.mxu3 }
 0x16b   : > { %2421 = vst.msk [vmem:[%s3198_s17 + $0xc0] sm:$0xff] %vm2396_vm2, %v2359_v52  ;;  %v1600_v57 = vadd.f32 %v3481_v10, %v1599_v55  ;;  %v2106_v58 = vadd.f32 %v3481_v10, %v2105_v56  ;;  %v1226_v61 = vmax.f32 %v659_v53, %v1165_v54  ;;  %v2751_v53 = vld [vmem:[%s3036_s8 + $0x538] sm:$0xff]  ;;  %v2874_v54 = vld [vmem:[%s3036_s8 + $0x720] sm:$0xff] }
 0x16d   : > { %v1732_v62 = vmax.f32 %v1600_v57, 0.0  ;;  %v2238_v63 = vmax.f32 %v2106_v58, 0.0 }
 0x16e   : > { %v529_v0 = vpop.f32.mrf.mxu0  ;;  %v1035_v1 = vpop.f32.mrf.mxu1 }
 0x16f   : > { %v2299_v4 = vmax.f32 %v1732_v62, %v2238_v63  ;;  %2810 = vmatmul.msk.f32.gmra.mxu2 %vm246_vm1, %v2748_v59  ;;  %2933 = vmatmul.msk.f32.gmra.mxu3 %vm246_vm1, %v2871_v60  ;;  %v530_v5 = vadd.f32 %v3481_v10, %v529_v0  ;;  %v1036_v6 = vadd.f32 %v3481_v10, %v1035_v1  ;;  %v227_v60 = vld [vmem:[%s3036_s8 + $0x168] sm:$0xff] }
 0x171   : > { %v2360_v7 = vmax.f32 %v1226_v61, %v2299_v4  ;;  %v660_v8 = vmax.f32 %v530_v5, 0.0  ;;  %v1166_v9 = vmax.f32 %v1036_v6, 0.0  ;;  %2564 = vmatmul.msk.f32.gmra.mxu0 %vm246_vm1, %v224_v2  ;;  %2687 = vmatmul.msk.f32.gmra.mxu1 %vm246_vm1, %v2625_v3  ;;  %v2628_v61 = vld [vmem:[%s3036_s8 + $0x350] sm:$0xff] }
 0x172   : > { %v1602_v11 = vpop.f32.mrf.mxu2  ;;  %v2108_v12 = vpop.f32.mrf.mxu3 }
 0x173   : > { %2422 = vst.msk [vmem:[%s3198_s17 + $0xc8] sm:$0xff] %vm2396_vm2, %v2360_v7  ;;  %v1603_v13 = vadd.f32 %v3481_v10, %v1602_v11  ;;  %v2109_v14 = vadd.f32 %v3481_v10, %v2108_v12  ;;  %v1227_v17 = vmax.f32 %v660_v8, %v1166_v9  ;;  %v2752_v8 = vld [vmem:[%s3036_s8 + $0x540] sm:$0xff]  ;;  %v2875_v9 = vld [vmem:[%s3036_s8 + $0x728] sm:$0xff] }
 0x175   : > { %v1733_v18 = vmax.f32 %v1603_v13, 0.0  ;;  %v2239_v19 = vmax.f32 %v2109_v14, 0.0 }
 0x176   : > { %v532_v20 = vpop.f32.mrf.mxu0  ;;  %v1038_v21 = vpop.f32.mrf.mxu1 }
 0x177   : > { %v2300_v24 = vmax.f32 %v1733_v18, %v2239_v19  ;;  %2811 = vmatmul.msk.f32.gmra.mxu2 %vm246_vm1, %v2749_v15  ;;  %2934 = vmatmul.msk.f32.gmra.mxu3 %vm246_vm1, %v2872_v16  ;;  %v533_v25 = vadd.f32 %v3481_v10, %v532_v20  ;;  %v1039_v26 = vadd.f32 %v3481_v10, %v1038_v21  ;;  %v228_v16 = vld [vmem:[%s3036_s8 + $0x170] sm:$0xff] }
 0x179   : > { %v2361_v27 = vmax.f32 %v1227_v17, %v2300_v24  ;;  %v661_v28 = vmax.f32 %v533_v25, 0.0  ;;  %v1167_v29 = vmax.f32 %v1039_v26, 0.0  ;;  %2565 = vmatmul.msk.f32.gmra.mxu0 %vm246_vm1, %v225_v22  ;;  %2688 = vmatmul.msk.f32.gmra.mxu1 %vm246_vm1, %v2626_v23  ;;  %v2629_v17 = vld [vmem:[%s3036_s8 + $0x358] sm:$0xff] }
 0x17a   : > { %v1605_v30 = vpop.f32.mrf.mxu2  ;;  %v2111_v31 = vpop.f32.mrf.mxu3 }
 0x17b   : > { %2423 = vst.msk [vmem:[%s3198_s17 + $0xd0] sm:$0xff] %vm2396_vm2, %v2361_v27  ;;  %v1606_v32 = vadd.f32 %v3481_v10, %v1605_v30  ;;  %v2112_v33 = vadd.f32 %v3481_v10, %v2111_v31  ;;  %v1228_v36 = vmax.f32 %v661_v28, %v1167_v29  ;;  %v2753_v28 = vld [vmem:[%s3036_s8 + $0x548] sm:$0xff]  ;;  %v2876_v29 = vld [vmem:[%s3036_s8 + $0x730] sm:$0xff] }
 0x17d   : > { %v1734_v37 = vmax.f32 %v1606_v32, 0.0  ;;  %v2240_v38 = vmax.f32 %v2112_v33, 0.0 }
 0x17e   : > { %v535_v39 = vpop.f32.mrf.mxu0  ;;  %v1041_v40 = vpop.f32.mrf.mxu1 }
 0x17f   : > { %v2301_v43 = vmax.f32 %v1734_v37, %v2240_v38  ;;  %2812 = vmatmul.msk.f32.gmra.mxu2 %vm246_vm1, %v2750_v34  ;;  %2935 = vmatmul.msk.f32.gmra.mxu3 %vm246_vm1, %v2873_v35  ;;  %v536_v44 = vadd.f32 %v3481_v10, %v535_v39  ;;  %v1042_v45 = vadd.f32 %v3481_v10, %v1041_v40  ;;  %v229_v35 = vld [vmem:[%s3036_s8 + $0x178] sm:$0xff] }
 0x181   : > { %v2362_v46 = vmax.f32 %v1228_v36, %v2301_v43  ;;  %v662_v47 = vmax.f32 %v536_v44, 0.0  ;;  %v1168_v48 = vmax.f32 %v1042_v45, 0.0  ;;  %2566 = vmatmul.msk.f32.gmra.mxu0 %vm246_vm1, %v226_v41  ;;  %2689 = vmatmul.msk.f32.gmra.mxu1 %vm246_vm1, %v2627_v42  ;;  %v2630_v36 = vld [vmem:[%s3036_s8 + $0x360] sm:$0xff] }
 0x182   : > { %v1608_v49 = vpop.f32.mrf.mxu2  ;;  %v2114_v50 = vpop.f32.mrf.mxu3 }
 0x183   : > { %2424 = vst.msk [vmem:[%s3198_s17 + $0xd8] sm:$0xff] %vm2396_vm2, %v2362_v46  ;;  %v1609_v51 = vadd.f32 %v3481_v10, %v1608_v49  ;;  %v2115_v52 = vadd.f32 %v3481_v10, %v2114_v50  ;;  %v1229_v55 = vmax.f32 %v662_v47, %v1168_v48  ;;  %v2754_v47 = vld [vmem:[%s3036_s8 + $0x550] sm:$0xff]  ;;  %v2877_v48 = vld [vmem:[%s3036_s8 + $0x738] sm:$0xff] }
 0x185   : > { %v1735_v56 = vmax.f32 %v1609_v51, 0.0  ;;  %v2241_v57 = vmax.f32 %v2115_v52, 0.0 }
 0x186   : > { %v538_v58 = vpop.f32.mrf.mxu0  ;;  %v1044_v59 = vpop.f32.mrf.mxu1 }
 0x187   : > { %v2302_v62 = vmax.f32 %v1735_v56, %v2241_v57  ;;  %2813 = vmatmul.msk.f32.gmra.mxu2 %vm246_vm1, %v2751_v53  ;;  %2936 = vmatmul.msk.f32.gmra.mxu3 %vm246_vm1, %v2874_v54  ;;  %v539_v63 = vadd.f32 %v3481_v10, %v538_v58  ;;  %v1045_v0 = vadd.f32 %v3481_v10, %v1044_v59  ;;  %v230_v54 = vld [vmem:[%s3036_s8 + $0x180] sm:$0xff] }
 0x189   : > { %v2363_v1 = vmax.f32 %v1229_v55, %v2302_v62  ;;  %v663_v2 = vmax.f32 %v539_v63, 0.0  ;;  %v1169_v3 = vmax.f32 %v1045_v0, 0.0  ;;  %2567 = vmatmul.msk.f32.gmra.mxu0 %vm246_vm1, %v227_v60  ;;  %2690 = vmatmul.msk.f32.gmra.mxu1 %vm246_vm1, %v2628_v61  ;;  %v2631_v55 = vld [vmem:[%s3036_s8 + $0x368] sm:$0xff] }
 0x18a   : > { %v1611_v4 = vpop.f32.mrf.mxu2  ;;  %v2117_v5 = vpop.f32.mrf.mxu3 }
 0x18b   : > { %2425 = vst.msk [vmem:[%s3198_s17 + $0xe0] sm:$0xff] %vm2396_vm2, %v2363_v1  ;;  %v1612_v6 = vadd.f32 %v3481_v10, %v1611_v4  ;;  %v2118_v7 = vadd.f32 %v3481_v10, %v2117_v5  ;;  %v1230_v11 = vmax.f32 %v663_v2, %v1169_v3  ;;  %v2755_v2 = vld [vmem:[%s3036_s8 + $0x558] sm:$0xff]  ;;  %v2878_v3 = vld [vmem:[%s3036_s8 + $0x740] sm:$0xff] }
 0x18d   : > { %v1736_v12 = vmax.f32 %v1612_v6, 0.0  ;;  %v2242_v13 = vmax.f32 %v2118_v7, 0.0 }
 0x18e   : > { %v541_v14 = vpop.f32.mrf.mxu0  ;;  %v1047_v15 = vpop.f32.mrf.mxu1 }
 0x18f   : > { %v2303_v18 = vmax.f32 %v1736_v12, %v2242_v13  ;;  %2814 = vmatmul.msk.f32.gmra.mxu2 %vm246_vm1, %v2752_v8  ;;  %2937 = vmatmul.msk.f32.gmra.mxu3 %vm246_vm1, %v2875_v9  ;;  %v542_v19 = vadd.f32 %v3481_v10, %v541_v14  ;;  %v1048_v20 = vadd.f32 %v3481_v10, %v1047_v15  ;;  %v231_v9 = vld [vmem:[%s3036_s8 + $0x188] sm:$0xff] }
 0x191   : > { %v2364_v21 = vmax.f32 %v1230_v11, %v2303_v18  ;;  %v664_v22 = vmax.f32 %v542_v19, 0.0  ;;  %v1170_v23 = vmax.f32 %v1048_v20, 0.0  ;;  %2568 = vmatmul.msk.f32.gmra.mxu0 %vm246_vm1, %v228_v16  ;;  %2691 = vmatmul.msk.f32.gmra.mxu1 %vm246_vm1, %v2629_v17  ;;  %v2632_v11 = vld [vmem:[%s3036_s8 + $0x370] sm:$0xff] }
 0x192   : > { %v1614_v24 = vpop.f32.mrf.mxu2  ;;  %v2120_v25 = vpop.f32.mrf.mxu3 }
 0x193   : > { %2426 = vst.msk [vmem:[%s3198_s17 + $0xe8] sm:$0xff] %vm2396_vm2, %v2364_v21  ;;  %v1615_v26 = vadd.f32 %v3481_v10, %v1614_v24  ;;  %v2121_v27 = vadd.f32 %v3481_v10, %v2120_v25  ;;  %v1231_v30 = vmax.f32 %v664_v22, %v1170_v23  ;;  %v2756_v22 = vld [vmem:[%s3036_s8 + $0x560] sm:$0xff]  ;;  %v2879_v23 = vld [vmem:[%s3036_s8 + $0x748] sm:$0xff] }
 0x195   : > { %v1737_v31 = vmax.f32 %v1615_v26, 0.0  ;;  %v2243_v32 = vmax.f32 %v2121_v27, 0.0 }
 0x196   : > { %v544_v33 = vpop.f32.mrf.mxu0  ;;  %v1050_v34 = vpop.f32.mrf.mxu1 }
 0x197   : > { %v2304_v37 = vmax.f32 %v1737_v31, %v2243_v32  ;;  %2815 = vmatmul.msk.f32.gmra.mxu2 %vm246_vm1, %v2753_v28  ;;  %2938 = vmatmul.msk.f32.gmra.mxu3 %vm246_vm1, %v2876_v29  ;;  %v545_v38 = vadd.f32 %v3481_v10, %v544_v33  ;;  %v1051_v39 = vadd.f32 %v3481_v10, %v1050_v34  ;;  %v232_v29 = vld [vmem:[%s3036_s8 + $0x190] sm:$0xff] }
 0x199   : > { %v2365_v40 = vmax.f32 %v1231_v30, %v2304_v37  ;;  %v665_v41 = vmax.f32 %v545_v38, 0.0  ;;  %v1171_v42 = vmax.f32 %v1051_v39, 0.0  ;;  %2569 = vmatmul.msk.f32.gmra.mxu0 %vm246_vm1, %v229_v35  ;;  %2692 = vmatmul.msk.f32.gmra.mxu1 %vm246_vm1, %v2630_v36  ;;  %v2633_v30 = vld [vmem:[%s3036_s8 + $0x378] sm:$0xff] }
 0x19a   : > { %v1617_v43 = vpop.f32.mrf.mxu2  ;;  %v2123_v44 = vpop.f32.mrf.mxu3 }
 0x19b   : > { %2427 = vst.msk [vmem:[%s3198_s17 + $0xf0] sm:$0xff] %vm2396_vm2, %v2365_v40  ;;  %v1618_v45 = vadd.f32 %v3481_v10, %v1617_v43  ;;  %v2124_v46 = vadd.f32 %v3481_v10, %v2123_v44  ;;  %v1232_v49 = vmax.f32 %v665_v41, %v1171_v42  ;;  %v2757_v41 = vld [vmem:[%s3036_s8 + $0x568] sm:$0xff]  ;;  %v2880_v42 = vld [vmem:[%s3036_s8 + $0x750] sm:$0xff] }
 0x19d   : > { %v1738_v50 = vmax.f32 %v1618_v45, 0.0  ;;  %v2244_v51 = vmax.f32 %v2124_v46, 0.0 }
 0x19e   : > { %v547_v52 = vpop.f32.mrf.mxu0  ;;  %v1053_v53 = vpop.f32.mrf.mxu1 }
 0x19f   : > { %v2305_v56 = vmax.f32 %v1738_v50, %v2244_v51  ;;  %2816 = vmatmul.msk.f32.gmra.mxu2 %vm246_vm1, %v2754_v47  ;;  %2939 = vmatmul.msk.f32.gmra.mxu3 %vm246_vm1, %v2877_v48  ;;  %v548_v57 = vadd.f32 %v3481_v10, %v547_v52  ;;  %v1054_v58 = vadd.f32 %v3481_v10, %v1053_v53  ;;  %v233_v48 = vld [vmem:[%s3036_s8 + $0x198] sm:$0xff] }
 0x1a1   : > { %v2366_v59 = vmax.f32 %v1232_v49, %v2305_v56  ;;  %v666_v60 = vmax.f32 %v548_v57, 0.0  ;;  %v1172_v61 = vmax.f32 %v1054_v58, 0.0  ;;  %2570 = vmatmul.msk.f32.gmra.mxu0 %vm246_vm1, %v230_v54  ;;  %2693 = vmatmul.msk.f32.gmra.mxu1 %vm246_vm1, %v2631_v55  ;;  %v2634_v49 = vld [vmem:[%s3036_s8 + $0x380] sm:$0xff] }
 0x1a2   : > { %v1620_v62 = vpop.f32.mrf.mxu2  ;;  %v2126_v63 = vpop.f32.mrf.mxu3 }
 0x1a3   : > { %2428 = vst.msk [vmem:[%s3198_s17 + $0xf8] sm:$0xff] %vm2396_vm2, %v2366_v59  ;;  %v1621_v0 = vadd.f32 %v3481_v10, %v1620_v62  ;;  %v2127_v1 = vadd.f32 %v3481_v10, %v2126_v63  ;;  %v1233_v4 = vmax.f32 %v666_v60, %v1172_v61  ;;  %v2758_v60 = vld [vmem:[%s3036_s8 + $0x570] sm:$0xff]  ;;  %v2881_v61 = vld [vmem:[%s3036_s8 + $0x758] sm:$0xff] }
 0x1a5   : > { %v1739_v5 = vmax.f32 %v1621_v0, 0.0  ;;  %v2245_v6 = vmax.f32 %v2127_v1, 0.0 }
 0x1a6   : > { %v550_v7 = vpop.f32.mrf.mxu0  ;;  %v1056_v8 = vpop.f32.mrf.mxu1 }
 0x1a7   : > { %v2306_v12 = vmax.f32 %v1739_v5, %v2245_v6  ;;  %2817 = vmatmul.msk.f32.gmra.mxu2 %vm246_vm1, %v2755_v2  ;;  %2940 = vmatmul.msk.f32.gmra.mxu3 %vm246_vm1, %v2878_v3  ;;  %v551_v13 = vadd.f32 %v3481_v10, %v550_v7  ;;  %v1057_v14 = vadd.f32 %v3481_v10, %v1056_v8  ;;  %v234_v3 = vld [vmem:[%s3036_s8 + $0x1a0] sm:$0xff] }
 0x1a9   : > { %v2367_v15 = vmax.f32 %v1233_v4, %v2306_v12  ;;  %v667_v16 = vmax.f32 %v551_v13, 0.0  ;;  %v1173_v17 = vmax.f32 %v1057_v14, 0.0  ;;  %2571 = vmatmul.msk.f32.gmra.mxu0 %vm246_vm1, %v231_v9  ;;  %2694 = vmatmul.msk.f32.gmra.mxu1 %vm246_vm1, %v2632_v11  ;;  %v2635_v4 = vld [vmem:[%s3036_s8 + $0x388] sm:$0xff] }
 0x1aa   : > { %v1623_v18 = vpop.f32.mrf.mxu2  ;;  %v2129_v19 = vpop.f32.mrf.mxu3 }
 0x1ab   : > { %2429 = vst.msk [vmem:[%s3198_s17 + $0x100] sm:$0xff] %vm2396_vm2, %v2367_v15  ;;  %v1624_v20 = vadd.f32 %v3481_v10, %v1623_v18  ;;  %v2130_v21 = vadd.f32 %v3481_v10, %v2129_v19  ;;  %v1234_v24 = vmax.f32 %v667_v16, %v1173_v17  ;;  %v2759_v16 = vld [vmem:[%s3036_s8 + $0x578] sm:$0xff]  ;;  %v2882_v17 = vld [vmem:[%s3036_s8 + $0x760] sm:$0xff] }
 0x1ad   : > { %v1740_v25 = vmax.f32 %v1624_v20, 0.0  ;;  %v2246_v26 = vmax.f32 %v2130_v21, 0.0 }
 0x1ae   : > { %v553_v27 = vpop.f32.mrf.mxu0  ;;  %v1059_v28 = vpop.f32.mrf.mxu1 }
 0x1af   : > { %v2307_v31 = vmax.f32 %v1740_v25, %v2246_v26  ;;  %2818 = vmatmul.msk.f32.gmra.mxu2 %vm246_vm1, %v2756_v22  ;;  %2941 = vmatmul.msk.f32.gmra.mxu3 %vm246_vm1, %v2879_v23  ;;  %v554_v32 = vadd.f32 %v3481_v10, %v553_v27  ;;  %v1060_v33 = vadd.f32 %v3481_v10, %v1059_v28  ;;  %v235_v23 = vld [vmem:[%s3036_s8 + $0x1a8] sm:$0xff] }
 0x1b1   : > { %v2368_v34 = vmax.f32 %v1234_v24, %v2307_v31  ;;  %v668_v35 = vmax.f32 %v554_v32, 0.0  ;;  %v1174_v36 = vmax.f32 %v1060_v33, 0.0  ;;  %2572 = vmatmul.msk.f32.gmra.mxu0 %vm246_vm1, %v232_v29  ;;  %2695 = vmatmul.msk.f32.gmra.mxu1 %vm246_vm1, %v2633_v30  ;;  %v2636_v24 = vld [vmem:[%s3036_s8 + $0x390] sm:$0xff] }
 0x1b2   : > { %v1626_v37 = vpop.f32.mrf.mxu2  ;;  %v2132_v38 = vpop.f32.mrf.mxu3 }
 0x1b3   : > { %2430 = vst.msk [vmem:[%s3198_s17 + $0x108] sm:$0xff] %vm2396_vm2, %v2368_v34  ;;  %v1627_v39 = vadd.f32 %v3481_v10, %v1626_v37  ;;  %v2133_v40 = vadd.f32 %v3481_v10, %v2132_v38  ;;  %v1235_v43 = vmax.f32 %v668_v35, %v1174_v36  ;;  %v2760_v35 = vld [vmem:[%s3036_s8 + $0x580] sm:$0xff]  ;;  %v2883_v36 = vld [vmem:[%s3036_s8 + $0x768] sm:$0xff] }
 0x1b5   : > { %v1741_v44 = vmax.f32 %v1627_v39, 0.0  ;;  %v2247_v45 = vmax.f32 %v2133_v40, 0.0 }
 0x1b6   : > { %v556_v46 = vpop.f32.mrf.mxu0  ;;  %v1062_v47 = vpop.f32.mrf.mxu1 }
 0x1b7   : > { %v2308_v50 = vmax.f32 %v1741_v44, %v2247_v45  ;;  %2819 = vmatmul.msk.f32.gmra.mxu2 %vm246_vm1, %v2757_v41  ;;  %2942 = vmatmul.msk.f32.gmra.mxu3 %vm246_vm1, %v2880_v42  ;;  %v557_v51 = vadd.f32 %v3481_v10, %v556_v46  ;;  %v1063_v52 = vadd.f32 %v3481_v10, %v1062_v47  ;;  %v236_v42 = vld [vmem:[%s3036_s8 + $0x1b0] sm:$0xff] }
 0x1b9   : > { %v2369_v53 = vmax.f32 %v1235_v43, %v2308_v50  ;;  %v669_v54 = vmax.f32 %v557_v51, 0.0  ;;  %v1175_v55 = vmax.f32 %v1063_v52, 0.0  ;;  %2573 = vmatmul.msk.f32.gmra.mxu0 %vm246_vm1, %v233_v48  ;;  %2696 = vmatmul.msk.f32.gmra.mxu1 %vm246_vm1, %v2634_v49  ;;  %v2637_v43 = vld [vmem:[%s3036_s8 + $0x398] sm:$0xff] }
 0x1ba   : > { %v1629_v56 = vpop.f32.mrf.mxu2  ;;  %v2135_v57 = vpop.f32.mrf.mxu3 }
 0x1bb   : > { %2431 = vst.msk [vmem:[%s3198_s17 + $0x110] sm:$0xff] %vm2396_vm2, %v2369_v53  ;;  %v1630_v58 = vadd.f32 %v3481_v10, %v1629_v56  ;;  %v2136_v59 = vadd.f32 %v3481_v10, %v2135_v57  ;;  %v1236_v62 = vmax.f32 %v669_v54, %v1175_v55  ;;  %v2761_v54 = vld [vmem:[%s3036_s8 + $0x588] sm:$0xff]  ;;  %v2884_v55 = vld [vmem:[%s3036_s8 + $0x770] sm:$0xff] }
 0x1bd   : > { %v1742_v63 = vmax.f32 %v1630_v58, 0.0  ;;  %v2248_v0 = vmax.f32 %v2136_v59, 0.0 }
 0x1be   : > { %v559_v1 = vpop.f32.mrf.mxu0  ;;  %v1065_v2 = vpop.f32.mrf.mxu1 }
 0x1bf   : > { %v2309_v5 = vmax.f32 %v1742_v63, %v2248_v0  ;;  %2820 = vmatmul.msk.f32.gmra.mxu2 %vm246_vm1, %v2758_v60  ;;  %2943 = vmatmul.msk.f32.gmra.mxu3 %vm246_vm1, %v2881_v61  ;;  %v560_v6 = vadd.f32 %v3481_v10, %v559_v1  ;;  %v1066_v7 = vadd.f32 %v3481_v10, %v1065_v2  ;;  %v237_v61 = vld [vmem:[%s3036_s8 + $0x1b8] sm:$0xff] }
 0x1c1   : > { %v2370_v8 = vmax.f32 %v1236_v62, %v2309_v5  ;;  %v670_v9 = vmax.f32 %v560_v6, 0.0  ;;  %v1176_v11 = vmax.f32 %v1066_v7, 0.0  ;;  %2574 = vmatmul.msk.f32.gmra.mxu0 %vm246_vm1, %v234_v3  ;;  %2697 = vmatmul.msk.f32.gmra.mxu1 %vm246_vm1, %v2635_v4  ;;  %v2638_v62 = vld [vmem:[%s3036_s8 + $0x3a0] sm:$0xff] }
 0x1c2   : > { %v1632_v12 = vpop.f32.mrf.mxu2  ;;  %v2138_v13 = vpop.f32.mrf.mxu3 }
 0x1c3   : > { %2432 = vst.msk [vmem:[%s3198_s17 + $0x118] sm:$0xff] %vm2396_vm2, %v2370_v8  ;;  %v1633_v14 = vadd.f32 %v3481_v10, %v1632_v12  ;;  %v2139_v15 = vadd.f32 %v3481_v10, %v2138_v13  ;;  %v1237_v18 = vmax.f32 %v670_v9, %v1176_v11  ;;  %v2762_v9 = vld [vmem:[%s3036_s8 + $0x590] sm:$0xff]  ;;  %v2885_v11 = vld [vmem:[%s3036_s8 + $0x778] sm:$0xff] }
 0x1c5   : > { %v1743_v19 = vmax.f32 %v1633_v14, 0.0  ;;  %v2249_v20 = vmax.f32 %v2139_v15, 0.0 }
 0x1c6   : > { %v562_v21 = vpop.f32.mrf.mxu0  ;;  %v1068_v22 = vpop.f32.mrf.mxu1 }
 0x1c7   : > { %v2310_v25 = vmax.f32 %v1743_v19, %v2249_v20  ;;  %2821 = vmatmul.msk.f32.gmra.mxu2 %vm246_vm1, %v2759_v16  ;;  %2944 = vmatmul.msk.f32.gmra.mxu3 %vm246_vm1, %v2882_v17  ;;  %v563_v26 = vadd.f32 %v3481_v10, %v562_v21  ;;  %v1069_v27 = vadd.f32 %v3481_v10, %v1068_v22  ;;  %v238_v17 = vld [vmem:[%s3036_s8 + $0x1c0] sm:$0xff] }
 0x1c9   : > { %v2371_v28 = vmax.f32 %v1237_v18, %v2310_v25  ;;  %v671_v29 = vmax.f32 %v563_v26, 0.0  ;;  %v1177_v30 = vmax.f32 %v1069_v27, 0.0  ;;  %2575 = vmatmul.msk.f32.gmra.mxu0 %vm246_vm1, %v235_v23  ;;  %2698 = vmatmul.msk.f32.gmra.mxu1 %vm246_vm1, %v2636_v24  ;;  %v2639_v18 = vld [vmem:[%s3036_s8 + $0x3a8] sm:$0xff] }
 0x1ca   : > { %v1635_v31 = vpop.f32.mrf.mxu2  ;;  %v2141_v32 = vpop.f32.mrf.mxu3 }
 0x1cb   : > { %2433 = vst.msk [vmem:[%s3198_s17 + $0x120] sm:$0xff] %vm2396_vm2, %v2371_v28  ;;  %v1636_v33 = vadd.f32 %v3481_v10, %v1635_v31  ;;  %v2142_v34 = vadd.f32 %v3481_v10, %v2141_v32  ;;  %v1238_v37 = vmax.f32 %v671_v29, %v1177_v30  ;;  %v2763_v29 = vld [vmem:[%s3036_s8 + $0x598] sm:$0xff]  ;;  %v2886_v30 = vld [vmem:[%s3036_s8 + $0x780] sm:$0xff] }
 0x1cd   : > { %v1744_v38 = vmax.f32 %v1636_v33, 0.0  ;;  %v2250_v39 = vmax.f32 %v2142_v34, 0.0 }
 0x1ce   : > { %v565_v40 = vpop.f32.mrf.mxu0  ;;  %v1071_v41 = vpop.f32.mrf.mxu1 }
 0x1cf   : > { %v2311_v44 = vmax.f32 %v1744_v38, %v2250_v39  ;;  %2822 = vmatmul.msk.f32.gmra.mxu2 %vm246_vm1, %v2760_v35  ;;  %2945 = vmatmul.msk.f32.gmra.mxu3 %vm246_vm1, %v2883_v36  ;;  %v566_v45 = vadd.f32 %v3481_v10, %v565_v40  ;;  %v1072_v46 = vadd.f32 %v3481_v10, %v1071_v41  ;;  %v239_v36 = vld [vmem:[%s3036_s8 + $0x1c8] sm:$0xff] }
 0x1d1   : > { %v2372_v47 = vmax.f32 %v1238_v37, %v2311_v44  ;;  %v672_v48 = vmax.f32 %v566_v45, 0.0  ;;  %v1178_v49 = vmax.f32 %v1072_v46, 0.0  ;;  %2576 = vmatmul.msk.f32.gmra.mxu0 %vm246_vm1, %v236_v42  ;;  %2699 = vmatmul.msk.f32.gmra.mxu1 %vm246_vm1, %v2637_v43  ;;  %v2640_v37 = vld [vmem:[%s3036_s8 + $0x3b0] sm:$0xff] }
 0x1d2   : > { %v1638_v50 = vpop.f32.mrf.mxu2  ;;  %v2144_v51 = vpop.f32.mrf.mxu3 }
 0x1d3   : > { %2434 = vst.msk [vmem:[%s3198_s17 + $0x128] sm:$0xff] %vm2396_vm2, %v2372_v47  ;;  %v1639_v52 = vadd.f32 %v3481_v10, %v1638_v50  ;;  %v2145_v53 = vadd.f32 %v3481_v10, %v2144_v51  ;;  %v1239_v56 = vmax.f32 %v672_v48, %v1178_v49  ;;  %v2764_v48 = vld [vmem:[%s3036_s8 + $0x5a0] sm:$0xff]  ;;  %v2887_v49 = vld [vmem:[%s3036_s8 + $0x788] sm:$0xff] }
 0x1d5   : > { %v1745_v57 = vmax.f32 %v1639_v52, 0.0  ;;  %v2251_v58 = vmax.f32 %v2145_v53, 0.0 }
 0x1d6   : > { %v568_v59 = vpop.f32.mrf.mxu0  ;;  %v1074_v60 = vpop.f32.mrf.mxu1 }
 0x1d7   : > { %v2312_v63 = vmax.f32 %v1745_v57, %v2251_v58  ;;  %2823 = vmatmul.msk.f32.gmra.mxu2 %vm246_vm1, %v2761_v54  ;;  %2946 = vmatmul.msk.f32.gmra.mxu3 %vm246_vm1, %v2884_v55  ;;  %v569_v0 = vadd.f32 %v3481_v10, %v568_v59  ;;  %v1075_v1 = vadd.f32 %v3481_v10, %v1074_v60  ;;  %v240_v55 = vld [vmem:[%s3036_s8 + $0x1d0] sm:$0xff] }
 0x1d9   : > { %v2373_v2 = vmax.f32 %v1239_v56, %v2312_v63  ;;  %v673_v3 = vmax.f32 %v569_v0, 0.0  ;;  %v1179_v4 = vmax.f32 %v1075_v1, 0.0  ;;  %2577 = vmatmul.msk.f32.gmra.mxu0 %vm246_vm1, %v237_v61  ;;  %2700 = vmatmul.msk.f32.gmra.mxu1 %vm246_vm1, %v2638_v62  ;;  %v2641_v56 = vld [vmem:[%s3036_s8 + $0x3b8] sm:$0xff]  ;;  %v3786_v1 = vld [vmem:[%s3920_s2] ss:$0 sm:$0xff] }
 0x1da   : > { %v1641_v5 = vpop.f32.mrf.mxu2  ;;  %v2147_v6 = vpop.f32.mrf.mxu3 }
 0x1db   : > { %2435 = vst.msk [vmem:[%s3198_s17 + $0x130] sm:$0xff] %vm2396_vm2, %v2373_v2  ;;  %v1642_v7 = vadd.f32 %v3481_v10, %v1641_v5  ;;  %v2148_v8 = vadd.f32 %v3481_v10, %v2147_v6  ;;  %v1240_v12 = vmax.f32 %v673_v3, %v1179_v4  ;;  %v2765_v3 = vld [vmem:[%s3036_s8 + $0x5a8] sm:$0xff]  ;;  %v2888_v4 = vld [vmem:[%s3036_s8 + $0x790] sm:$0xff] }
 0x1dd   : > { %v1746_v13 = vmax.f32 %v1642_v7, 0.0  ;;  %v2252_v14 = vmax.f32 %v2148_v8, 0.0 }
 0x1de   : > { %v571_v15 = vpop.f32.mrf.mxu0  ;;  %v1077_v16 = vpop.f32.mrf.mxu1 }
 0x1df   : > { %v2313_v19 = vmax.f32 %v1746_v13, %v2252_v14  ;;  %2824 = vmatmul.msk.f32.gmra.mxu2 %vm246_vm1, %v2762_v9  ;;  %2947 = vmatmul.msk.f32.gmra.mxu3 %vm246_vm1, %v2885_v11  ;;  %v572_v20 = vadd.f32 %v3481_v10, %v571_v15  ;;  %v1078_v21 = vadd.f32 %v3481_v10, %v1077_v16  ;;  %v241_v11 = vld [vmem:[%s3036_s8 + $0x1d8] sm:$0xff] }
 0x1e1   : > { %v2374_v22 = vmax.f32 %v1240_v12, %v2313_v19  ;;  %v674_v23 = vmax.f32 %v572_v20, 0.0  ;;  %v1180_v24 = vmax.f32 %v1078_v21, 0.0  ;;  %2578 = vmatmul.msk.f32.gmra.mxu0 %vm246_vm1, %v238_v17  ;;  %2701 = vmatmul.msk.f32.gmra.mxu1 %vm246_vm1, %v2639_v18  ;;  %v2642_v12 = vld [vmem:[%s3036_s8 + $0x3c0] sm:$0xff] }
 0x1e2   : > { %v1644_v25 = vpop.f32.mrf.mxu2  ;;  %v2150_v26 = vpop.f32.mrf.mxu3 }
 0x1e3   : > { %2436 = vst.msk [vmem:[%s3198_s17 + $0x138] sm:$0xff] %vm2396_vm2, %v2374_v22  ;;  %v1645_v27 = vadd.f32 %v3481_v10, %v1644_v25  ;;  %v2151_v28 = vadd.f32 %v3481_v10, %v2150_v26  ;;  %v1241_v31 = vmax.f32 %v674_v23, %v1180_v24  ;;  %v2766_v23 = vld [vmem:[%s3036_s8 + $0x5b0] sm:$0xf]  ;;  %v2889_v24 = vld [vmem:[%s3036_s8 + $0x798] sm:$0xf] }
 0x1e5   : > { %v1747_v32 = vmax.f32 %v1645_v27, 0.0  ;;  %v2253_v33 = vmax.f32 %v2151_v28, 0.0 }
 0x1e6   : > { %v574_v34 = vpop.f32.mrf.mxu0  ;;  %v1080_v35 = vpop.f32.mrf.mxu1 }
 0x1e7   : > { %v2314_v38 = vmax.f32 %v1747_v32, %v2253_v33  ;;  %2825 = vmatmul.msk.f32.gmra.mxu2 %vm246_vm1, %v2763_v29  ;;  %2948 = vmatmul.msk.f32.gmra.mxu3 %vm246_vm1, %v2886_v30  ;;  %v575_v39 = vadd.f32 %v3481_v10, %v574_v34  ;;  %v1081_v40 = vadd.f32 %v3481_v10, %v1080_v35  ;;  %v242_v30 = vld [vmem:[%s3036_s8 + $0x1e0] sm:$0xf] }
 0x1e9   : > { %v2375_v41 = vmax.f32 %v1241_v31, %v2314_v38  ;;  %v675_v42 = vmax.f32 %v575_v39, 0.0  ;;  %v1181_v43 = vmax.f32 %v1081_v40, 0.0  ;;  %2579 = vmatmul.msk.f32.gmra.mxu0 %vm246_vm1, %v239_v36  ;;  %2702 = vmatmul.msk.f32.gmra.mxu1 %vm246_vm1, %v2640_v37  ;;  %v2643_v31 = vld [vmem:[%s3036_s8 + $0x3c8] sm:$0xf] }
 0x1ea   : > { %v1647_v44 = vpop.f32.mrf.mxu2  ;;  %v2153_v45 = vpop.f32.mrf.mxu3 }
 0x1eb   : > { %2437 = vst.msk [vmem:[%s3198_s17 + $0x140] sm:$0xff] %vm2396_vm2, %v2375_v41  ;;  %v1648_v46 = vadd.f32 %v3481_v10, %v1647_v44  ;;  %v2154_v47 = vadd.f32 %v3481_v10, %v2153_v45  ;;  %v1242_v50 = vmax.f32 %v675_v42, %v1181_v43 }
 0x1ed   : > { %v1748_v51 = vmax.f32 %v1648_v46, 0.0  ;;  %v2254_v52 = vmax.f32 %v2154_v47, 0.0 }
 0x1ee   : > { %v577_v53 = vpop.f32.mrf.mxu0  ;;  %v1083_v54 = vpop.f32.mrf.mxu1 }
 0x1ef   : > { %v2315_v57 = vmax.f32 %v1748_v51, %v2254_v52  ;;  %2826 = vmatmul.msk.f32.gmra.mxu2 %vm246_vm1, %v2764_v48  ;;  %2949 = vmatmul.msk.f32.gmra.mxu3 %vm246_vm1, %v2887_v49  ;;  %v578_v58 = vadd.f32 %v3481_v10, %v577_v53  ;;  %v1084_v59 = vadd.f32 %v3481_v10, %v1083_v54 }
 0x1f1   : > { %v2376_v60 = vmax.f32 %v1242_v50, %v2315_v57  ;;  %v676_v61 = vmax.f32 %v578_v58, 0.0  ;;  %v1182_v62 = vmax.f32 %v1084_v59, 0.0  ;;  %2580 = vmatmul.msk.f32.gmra.mxu0 %vm246_vm1, %v240_v55  ;;  %2703 = vmatmul.msk.f32.gmra.mxu1 %vm246_vm1, %v2641_v56 }
 0x1f2   : > { %v1650_v63 = vpop.f32.mrf.mxu2  ;;  %v2156_v0 = vpop.f32.mrf.mxu3 }
 0x1f3   : > { %2438 = vst.msk [vmem:[%s3198_s17 + $0x148] sm:$0xff] %vm2396_vm2, %v2376_v60  ;;  %v1651_v10 = vadd.f32 %v3786_v1, %v1650_v63  ;;  %v2157_v2 = vadd.f32 %v3786_v1, %v2156_v0  ;;  %v1243_v5 = vmax.f32 %v676_v61, %v1182_v62 }
 0x1f5   : > { %v1749_v6 = vmax.f32 %v1651_v10, 0.0  ;;  %v2255_v7 = vmax.f32 %v2157_v2, 0.0 }
 0x1f6   : > { %v580_v8 = vpop.f32.mrf.mxu0  ;;  %v1086_v9 = vpop.f32.mrf.mxu1 }
 0x1f7   : > { %v2316_v13 = vmax.f32 %v1749_v6, %v2255_v7  ;;  %2827 = vmatmul.msk.f32.gmra.mxu2 %vm246_vm1, %v2765_v3  ;;  %2950 = vmatmul.msk.f32.gmra.mxu3 %vm246_vm1, %v2888_v4  ;;  %v581_v14 = vadd.f32 %v3786_v1, %v580_v8  ;;  %v1087_v15 = vadd.f32 %v3786_v1, %v1086_v9 }
 0x1f9   : > { %v2377_v16 = vmax.f32 %v1243_v5, %v2316_v13  ;;  %v677_v17 = vmax.f32 %v581_v14, 0.0  ;;  %v1183_v18 = vmax.f32 %v1087_v15, 0.0  ;;  %2581 = vmatmul.msk.f32.gmra.mxu0 %vm246_vm1, %v241_v11  ;;  %2704 = vmatmul.msk.f32.gmra.mxu1 %vm246_vm1, %v2642_v12 }
 0x1fa   : > { %v1653_v19 = vpop.f32.mrf.mxu2  ;;  %v2159_v20 = vpop.f32.mrf.mxu3 }
 0x1fb   : > { %2439 = vst.msk [vmem:[%s3198_s17 + $0x150] sm:$0xff] %vm2396_vm2, %v2377_v16  ;;  %v1654_v21 = vadd.f32 %v3786_v1, %v1653_v19  ;;  %v2160_v22 = vadd.f32 %v3786_v1, %v2159_v20  ;;  %v1244_v25 = vmax.f32 %v677_v17, %v1183_v18 }
 0x1fd   : > { %v1750_v26 = vmax.f32 %v1654_v21, 0.0  ;;  %v2256_v27 = vmax.f32 %v2160_v22, 0.0 }
 0x1fe   : > { %v583_v28 = vpop.f32.mrf.mxu0  ;;  %v1089_v29 = vpop.f32.mrf.mxu1 }
 0x1ff   : > { %v2317_v32 = vmax.f32 %v1750_v26, %v2256_v27  ;;  %2828 = vmatmul.msk.f32.gmra.mxu2 %vm246_vm1, %v2766_v23  ;;  %2951 = vmatmul.msk.f32.gmra.mxu3 %vm246_vm1, %v2889_v24  ;;  %v584_v33 = vadd.f32 %v3786_v1, %v583_v28  ;;  %v1090_v34 = vadd.f32 %v3786_v1, %v1089_v29 }
 0x201   : > { %v2378_v35 = vmax.f32 %v1244_v25, %v2317_v32  ;;  %v678_v36 = vmax.f32 %v584_v33, 0.0  ;;  %v1184_v37 = vmax.f32 %v1090_v34, 0.0  ;;  %2582 = vmatmul.msk.f32.gmra.mxu0 %vm246_vm1, %v242_v30  ;;  %2705 = vmatmul.msk.f32.gmra.mxu1 %vm246_vm1, %v2643_v31 }
 0x202   : > { %v1656_v38 = vpop.f32.mrf.mxu2  ;;  %v2162_v39 = vpop.f32.mrf.mxu3 }
 0x203   : > { %2440 = vst.msk [vmem:[%s3198_s17 + $0x158] sm:$0xff] %vm2396_vm2, %v2378_v35  ;;  %v1657_v40 = vadd.f32 %v3786_v1, %v1656_v38  ;;  %v2163_v41 = vadd.f32 %v3786_v1, %v2162_v39  ;;  %v1245_v42 = vmax.f32 %v678_v36, %v1184_v37 }
 0x205   : > { %v1751_v43 = vmax.f32 %v1657_v40, 0.0  ;;  %v2257_v44 = vmax.f32 %v2163_v41, 0.0 }
 0x206   : > { %v586_v45 = vpop.f32.mrf.mxu0  ;;  %v1092_v46 = vpop.f32.mrf.mxu1 }
 0x207   : > { %v2318_v47 = vmax.f32 %v1751_v43, %v2257_v44  ;;  %v587_v48 = vadd.f32 %v3786_v1, %v586_v45  ;;  %v1093_v49 = vadd.f32 %v3786_v1, %v1092_v46 }
 0x209   : > { %v2379_v50 = vmax.f32 %v1245_v42, %v2318_v47  ;;  %v679_v51 = vmax.f32 %v587_v48, 0.0  ;;  %v1185_v52 = vmax.f32 %v1093_v49, 0.0 }
 0x20a   : > { %v1659_v53 = vpop.f32.mrf.mxu2  ;;  %v2165_v54 = vpop.f32.mrf.mxu3 }
 0x20b   : > { %2441 = vst.msk [vmem:[%s3198_s17 + $0x160] sm:$0xff] %vm2396_vm2, %v2379_v50  ;;  %v1660_v55 = vadd.f32 %v3786_v1, %v1659_v53  ;;  %v2166_v56 = vadd.f32 %v3786_v1, %v2165_v54  ;;  %v1246_v57 = vmax.f32 %v679_v51, %v1185_v52 }
 0x20d   : > { %v1752_v58 = vmax.f32 %v1660_v55, 0.0  ;;  %v2258_v59 = vmax.f32 %v2166_v56, 0.0 }
 0x20e   : > { %v589_v60 = vpop.f32.mrf.mxu0  ;;  %v1095_v61 = vpop.f32.mrf.mxu1 }
 0x20f   : > { %v2319_v62 = vmax.f32 %v1752_v58, %v2258_v59  ;;  %v590_v63 = vadd.f32 %v3786_v1, %v589_v60  ;;  %v1096_v0 = vadd.f32 %v3786_v1, %v1095_v61 }
 0x211   : > { %v2380_v10 = vmax.f32 %v1246_v57, %v2319_v62  ;;  %v680_v2 = vmax.f32 %v590_v63, 0.0  ;;  %v1186_v3 = vmax.f32 %v1096_v0, 0.0 }
 0x212   : > { %v1662_v4 = vpop.f32.mrf.mxu2  ;;  %v2168_v5 = vpop.f32.mrf.mxu3 }
 0x213   : > { %2442 = vst.msk [vmem:[%s3198_s17 + $0x168] sm:$0xff] %vm2396_vm2, %v2380_v10  ;;  %v1663_v6 = vadd.f32 %v3786_v1, %v1662_v4  ;;  %v2169_v7 = vadd.f32 %v3786_v1, %v2168_v5  ;;  %v1247_v8 = vmax.f32 %v680_v2, %v1186_v3 }
 0x215   : > { %v1753_v9 = vmax.f32 %v1663_v6, 0.0  ;;  %v2259_v11 = vmax.f32 %v2169_v7, 0.0 }
 0x216   : > { %v592_v12 = vpop.f32.mrf.mxu0  ;;  %v1098_v13 = vpop.f32.mrf.mxu1 }
 0x217   : > { %v2320_v14 = vmax.f32 %v1753_v9, %v2259_v11  ;;  %v593_v15 = vadd.f32 %v3786_v1, %v592_v12  ;;  %v1099_v16 = vadd.f32 %v3786_v1, %v1098_v13 }
 0x219   : > { %v2381_v17 = vmax.f32 %v1247_v8, %v2320_v14  ;;  %v681_v18 = vmax.f32 %v593_v15, 0.0  ;;  %v1187_v19 = vmax.f32 %v1099_v16, 0.0 }
 0x21a   : > { %v1665_v20 = vpop.f32.mrf.mxu2  ;;  %v2171_v21 = vpop.f32.mrf.mxu3 }
 0x21b   : > { %2443 = vst.msk [vmem:[%s3198_s17 + $0x170] sm:$0xff] %vm2396_vm2, %v2381_v17  ;;  %v1666_v22 = vadd.f32 %v3786_v1, %v1665_v20  ;;  %v2172_v23 = vadd.f32 %v3786_v1, %v2171_v21  ;;  %v1248_v24 = vmax.f32 %v681_v18, %v1187_v19 }
 0x21d   : > { %v1754_v25 = vmax.f32 %v1666_v22, 0.0  ;;  %v2260_v26 = vmax.f32 %v2172_v23, 0.0 }
 0x21e   : > { %v595_v27 = vpop.f32.mrf.mxu0  ;;  %v1101_v28 = vpop.f32.mrf.mxu1 }
 0x21f   : > { %v2321_v29 = vmax.f32 %v1754_v25, %v2260_v26  ;;  %v596_v30 = vadd.f32 %v3786_v1, %v595_v27  ;;  %v1102_v31 = vadd.f32 %v3786_v1, %v1101_v28 }
 0x221   : > { %v2382_v32 = vmax.f32 %v1248_v24, %v2321_v29  ;;  %v682_v33 = vmax.f32 %v596_v30, 0.0  ;;  %v1188_v34 = vmax.f32 %v1102_v31, 0.0 }
 0x222   : > { %v1668_v35 = vpop.f32.mrf.mxu2  ;;  %v2174_v36 = vpop.f32.mrf.mxu3 }
 0x223   : > { %2444 = vst.msk [vmem:[%s3198_s17 + $0x178] sm:$0xff] %vm2396_vm2, %v2382_v32  ;;  %v1669_v37 = vadd.f32 %v3786_v1, %v1668_v35  ;;  %v2175_v38 = vadd.f32 %v3786_v1, %v2174_v36  ;;  %v1249_v39 = vmax.f32 %v682_v33, %v1188_v34 }
 0x225   : > { %v1755_v40 = vmax.f32 %v1669_v37, 0.0  ;;  %v2261_v41 = vmax.f32 %v2175_v38, 0.0 }
 0x226   : > { %v598_v42 = vpop.f32.mrf.mxu0  ;;  %v1104_v43 = vpop.f32.mrf.mxu1 }
 0x227   : > { %v2322_v44 = vmax.f32 %v1755_v40, %v2261_v41  ;;  %v599_v45 = vadd.f32 %v3786_v1, %v598_v42  ;;  %v1105_v46 = vadd.f32 %v3786_v1, %v1104_v43 }
 0x229   : > { %v2383_v47 = vmax.f32 %v1249_v39, %v2322_v44  ;;  %v683_v48 = vmax.f32 %v599_v45, 0.0  ;;  %v1189_v49 = vmax.f32 %v1105_v46, 0.0 }
 0x22a   : > { %v1671_v50 = vpop.f32.mrf.mxu2  ;;  %v2177_v51 = vpop.f32.mrf.mxu3 }
 0x22b   : > { %2445 = vst.msk [vmem:[%s3198_s17 + $0x180] sm:$0xff] %vm2396_vm2, %v2383_v47  ;;  %v1672_v52 = vadd.f32 %v3786_v1, %v1671_v50  ;;  %v2178_v53 = vadd.f32 %v3786_v1, %v2177_v51  ;;  %v1250_v54 = vmax.f32 %v683_v48, %v1189_v49 }
 0x22d   : > { %v1756_v55 = vmax.f32 %v1672_v52, 0.0  ;;  %v2262_v56 = vmax.f32 %v2178_v53, 0.0 }
 0x22e   : > { %v601_v57 = vpop.f32.mrf.mxu0  ;;  %v1107_v58 = vpop.f32.mrf.mxu1 }
 0x22f   : > { %v2323_v59 = vmax.f32 %v1756_v55, %v2262_v56  ;;  %v602_v60 = vadd.f32 %v3786_v1, %v601_v57  ;;  %v1108_v61 = vadd.f32 %v3786_v1, %v1107_v58 }
 0x231   : > { %v2384_v62 = vmax.f32 %v1250_v54, %v2323_v59  ;;  %v684_v63 = vmax.f32 %v602_v60, 0.0  ;;  %v1190_v0 = vmax.f32 %v1108_v61, 0.0 }
 0x232   : > { %v1674_v10 = vpop.f32.mrf.mxu2  ;;  %v2180_v2 = vpop.f32.mrf.mxu3 }
 0x233   : > { %2446 = vst.msk [vmem:[%s3198_s17 + $0x188] sm:$0xff] %vm2396_vm2, %v2384_v62  ;;  %v1675_v3 = vadd.f32 %v3786_v1, %v1674_v10  ;;  %v2181_v4 = vadd.f32 %v3786_v1, %v2180_v2  ;;  %v1251_v5 = vmax.f32 %v684_v63, %v1190_v0 }
 0x235   : > { %v1757_v6 = vmax.f32 %v1675_v3, 0.0  ;;  %v2263_v7 = vmax.f32 %v2181_v4, 0.0 }
 0x236   : > { %v604_v8 = vpop.f32.mrf.mxu0  ;;  %v1110_v9 = vpop.f32.mrf.mxu1 }
 0x237   : > { %v2324_v11 = vmax.f32 %v1757_v6, %v2263_v7  ;;  %v605_v12 = vadd.f32 %v3786_v1, %v604_v8  ;;  %v1111_v13 = vadd.f32 %v3786_v1, %v1110_v9 }
 0x239   : > { %v2385_v14 = vmax.f32 %v1251_v5, %v2324_v11  ;;  %v685_v15 = vmax.f32 %v605_v12, 0.0  ;;  %v1191_v16 = vmax.f32 %v1111_v13, 0.0 }
 0x23a   : > { %v1677_v17 = vpop.f32.mrf.mxu2  ;;  %v2183_v18 = vpop.f32.mrf.mxu3 }
 0x23b   : > { %2447 = vst.msk [vmem:[%s3198_s17 + $0x190] sm:$0xff] %vm2396_vm2, %v2385_v14  ;;  %v1678_v19 = vadd.f32 %v3786_v1, %v1677_v17  ;;  %v2184_v20 = vadd.f32 %v3786_v1, %v2183_v18  ;;  %v1252_v21 = vmax.f32 %v685_v15, %v1191_v16 }
 0x23d   : > { %v1758_v22 = vmax.f32 %v1678_v19, 0.0  ;;  %v2264_v23 = vmax.f32 %v2184_v20, 0.0 }
 0x23e   : > { %v607_v24 = vpop.f32.mrf.mxu0  ;;  %v1113_v25 = vpop.f32.mrf.mxu1 }
 0x23f   : > { %v2325_v26 = vmax.f32 %v1758_v22, %v2264_v23  ;;  %v608_v27 = vadd.f32 %v3786_v1, %v607_v24  ;;  %v1114_v28 = vadd.f32 %v3786_v1, %v1113_v25 }
 0x241   : > { %v2386_v29 = vmax.f32 %v1252_v21, %v2325_v26  ;;  %v686_v30 = vmax.f32 %v608_v27, 0.0  ;;  %v1192_v31 = vmax.f32 %v1114_v28, 0.0 }
 0x242   : > { %v1680_v32 = vpop.f32.mrf.mxu2  ;;  %v2186_v33 = vpop.f32.mrf.mxu3 }
 0x243   : > { %2448 = vst.msk [vmem:[%s3198_s17 + $0x198] sm:$0xff] %vm2396_vm2, %v2386_v29  ;;  %v1681_v34 = vadd.f32 %v3786_v1, %v1680_v32  ;;  %v2187_v35 = vadd.f32 %v3786_v1, %v2186_v33  ;;  %v1253_v36 = vmax.f32 %v686_v30, %v1192_v31 }
 0x245   : > { %v1759_v37 = vmax.f32 %v1681_v34, 0.0  ;;  %v2265_v38 = vmax.f32 %v2187_v35, 0.0 }
 0x246   : > { %v610_v39 = vpop.f32.mrf.mxu0  ;;  %v1116_v40 = vpop.f32.mrf.mxu1 }
 0x247   : > { %v2326_v41 = vmax.f32 %v1759_v37, %v2265_v38  ;;  %v611_v42 = vadd.f32 %v3786_v1, %v610_v39  ;;  %v1117_v43 = vadd.f32 %v3786_v1, %v1116_v40 }
 0x249   : > { %v2387_v44 = vmax.f32 %v1253_v36, %v2326_v41  ;;  %v687_v45 = vmax.f32 %v611_v42, 0.0  ;;  %v1193_v46 = vmax.f32 %v1117_v43, 0.0 }
 0x24a   : > { %v1683_v47 = vpop.f32.mrf.mxu2  ;;  %v2189_v48 = vpop.f32.mrf.mxu3 }
 0x24b   : > { %2449 = vst.msk [vmem:[%s3198_s17 + $0x1a0] sm:$0xff] %vm2396_vm2, %v2387_v44  ;;  %v1684_v49 = vadd.f32 %v3786_v1, %v1683_v47  ;;  %v2190_v50 = vadd.f32 %v3786_v1, %v2189_v48  ;;  %v1254_v51 = vmax.f32 %v687_v45, %v1193_v46 }
 0x24d   : > { %v1760_v52 = vmax.f32 %v1684_v49, 0.0  ;;  %v2266_v53 = vmax.f32 %v2190_v50, 0.0 }
 0x24e   : > { %v613_v54 = vpop.f32.mrf.mxu0  ;;  %v1119_v55 = vpop.f32.mrf.mxu1 }
 0x24f   : > { %v2327_v56 = vmax.f32 %v1760_v52, %v2266_v53  ;;  %v614_v57 = vadd.f32 %v3786_v1, %v613_v54  ;;  %v1120_v58 = vadd.f32 %v3786_v1, %v1119_v55 }
 0x251   : > { %v2388_v59 = vmax.f32 %v1254_v51, %v2327_v56  ;;  %v688_v60 = vmax.f32 %v614_v57, 0.0  ;;  %v1194_v61 = vmax.f32 %v1120_v58, 0.0 }
 0x252   : > { %v1686_v62 = vpop.f32.mrf.mxu2  ;;  %v2192_v63 = vpop.f32.mrf.mxu3 }
 0x253   : > { %2450 = vst.msk [vmem:[%s3198_s17 + $0x1a8] sm:$0xff] %vm2396_vm2, %v2388_v59  ;;  %v1687_v0 = vadd.f32 %v3786_v1, %v1686_v62  ;;  %v2193_v10 = vadd.f32 %v3786_v1, %v2192_v63  ;;  %v1255_v2 = vmax.f32 %v688_v60, %v1194_v61 }
 0x255   : > { %v1761_v3 = vmax.f32 %v1687_v0, 0.0  ;;  %v2267_v4 = vmax.f32 %v2193_v10, 0.0 }
 0x256   : > { %v616_v5 = vpop.f32.mrf.mxu0  ;;  %v1122_v6 = vpop.f32.mrf.mxu1 }
 0x257   : > { %v2328_v7 = vmax.f32 %v1761_v3, %v2267_v4  ;;  %v617_v8 = vadd.f32 %v3786_v1, %v616_v5  ;;  %v1123_v9 = vadd.f32 %v3786_v1, %v1122_v6 }
 0x259   : > { %v2389_v11 = vmax.f32 %v1255_v2, %v2328_v7  ;;  %v689_v12 = vmax.f32 %v617_v8, 0.0  ;;  %v1195_v13 = vmax.f32 %v1123_v9, 0.0 }
 0x25a   : > { %v1689_v14 = vpop.f32.mrf.mxu2  ;;  %v2195_v15 = vpop.f32.mrf.mxu3 }
 0x25b   : > { %2451 = vst.msk [vmem:[%s3198_s17 + $0x1b0] sm:$0xff] %vm2396_vm2, %v2389_v11  ;;  %v1690_v16 = vadd.f32 %v3786_v1, %v1689_v14  ;;  %v2196_v17 = vadd.f32 %v3786_v1, %v2195_v15  ;;  %v1256_v18 = vmax.f32 %v689_v12, %v1195_v13 }
 0x25d   : > { %v1762_v19 = vmax.f32 %v1690_v16, 0.0  ;;  %v2268_v20 = vmax.f32 %v2196_v17, 0.0 }
 0x25e   : > { %v619_v21 = vpop.f32.mrf.mxu0  ;;  %v1125_v22 = vpop.f32.mrf.mxu1 }
 0x25f   : > { %v2329_v23 = vmax.f32 %v1762_v19, %v2268_v20  ;;  %v620_v24 = vadd.f32 %v3786_v1, %v619_v21  ;;  %v1126_v25 = vadd.f32 %v3786_v1, %v1125_v22 }
 0x261   : > { %v2390_v26 = vmax.f32 %v1256_v18, %v2329_v23  ;;  %v690_v27 = vmax.f32 %v620_v24, 0.0  ;;  %v1196_v28 = vmax.f32 %v1126_v25, 0.0 }
 0x262   : > { %v1692_v29 = vpop.f32.mrf.mxu2  ;;  %v2198_v30 = vpop.f32.mrf.mxu3 }
 0x263   : > { %2452 = vst.msk [vmem:[%s3198_s17 + $0x1b8] sm:$0xff] %vm2396_vm2, %v2390_v26  ;;  %v1693_v31 = vadd.f32 %v3786_v1, %v1692_v29  ;;  %v2199_v32 = vadd.f32 %v3786_v1, %v2198_v30  ;;  %v1257_v33 = vmax.f32 %v690_v27, %v1196_v28 }
 0x265   : > { %v1763_v34 = vmax.f32 %v1693_v31, 0.0  ;;  %v2269_v35 = vmax.f32 %v2199_v32, 0.0 }
 0x266   : > { %v622_v36 = vpop.f32.mrf.mxu0  ;;  %v1128_v37 = vpop.f32.mrf.mxu1 }
 0x267   : > { %v2330_v38 = vmax.f32 %v1763_v34, %v2269_v35  ;;  %v623_v39 = vadd.f32 %v3786_v1, %v622_v36  ;;  %v1129_v40 = vadd.f32 %v3786_v1, %v1128_v37 }
 0x269   : > { %v2391_v41 = vmax.f32 %v1257_v33, %v2330_v38  ;;  %v691_v42 = vmax.f32 %v623_v39, 0.0  ;;  %v1197_v43 = vmax.f32 %v1129_v40, 0.0 }
 0x26a   : > { %v1695_v44 = vpop.f32.mrf.mxu2  ;;  %v2201_v45 = vpop.f32.mrf.mxu3 }
 0x26b   : > { %2453 = vst.msk [vmem:[%s3198_s17 + $0x1c0] sm:$0xff] %vm2396_vm2, %v2391_v41  ;;  %v1696_v46 = vadd.f32 %v3786_v1, %v1695_v44  ;;  %v2202_v47 = vadd.f32 %v3786_v1, %v2201_v45  ;;  %v1258_v48 = vmax.f32 %v691_v42, %v1197_v43 }
 0x26d   : > { %v1764_v49 = vmax.f32 %v1696_v46, 0.0  ;;  %v2270_v50 = vmax.f32 %v2202_v47, 0.0 }
 0x26e   : > { %v625_v51 = vpop.f32.mrf.mxu0  ;;  %v1131_v52 = vpop.f32.mrf.mxu1 }
 0x26f   : > { %v2331_v53 = vmax.f32 %v1764_v49, %v2270_v50  ;;  %v626_v54 = vadd.f32 %v3786_v1, %v625_v51  ;;  %v1132_v55 = vadd.f32 %v3786_v1, %v1131_v52 }
 0x271   : > { %v2392_v56 = vmax.f32 %v1258_v48, %v2331_v53  ;;  %v692_v57 = vmax.f32 %v626_v54, 0.0  ;;  %v1198_v58 = vmax.f32 %v1132_v55, 0.0 }
 0x272   : > { %v1698_v59 = vpop.f32.mrf.mxu2  ;;  %v2204_v60 = vpop.f32.mrf.mxu3 }
 0x273   : > { %2454 = vst.msk [vmem:[%s3198_s17 + $0x1c8] sm:$0xff] %vm2396_vm2, %v2392_v56  ;;  %v1699_v61 = vadd.f32 %v3786_v1, %v1698_v59  ;;  %v2205_v62 = vadd.f32 %v3786_v1, %v2204_v60  ;;  %v1259_v63 = vmax.f32 %v692_v57, %v1198_v58 }
 0x275   : > { %v1765_v0 = vmax.f32 %v1699_v61, 0.0  ;;  %v2271_v10 = vmax.f32 %v2205_v62, 0.0 }
 0x276   : > { %v628_v2 = vpop.f32.mrf.mxu0  ;;  %v1134_v3 = vpop.f32.mrf.mxu1 }
 0x277   : > { %v2332_v4 = vmax.f32 %v1765_v0, %v2271_v10  ;;  %v629_v5 = vadd.f32 %v3786_v1, %v628_v2  ;;  %v1135_v6 = vadd.f32 %v3786_v1, %v1134_v3 }
 0x279   : > { %v2393_v7 = vmax.f32 %v1259_v63, %v2332_v4  ;;  %v693_v8 = vmax.f32 %v629_v5, 0.0  ;;  %v1199_v9 = vmax.f32 %v1135_v6, 0.0 }
 0x27a   : > { %v1701_v11 = vpop.f32.mrf.mxu2  ;;  %v2207_v12 = vpop.f32.mrf.mxu3 }
 0x27b   : > { %2455 = vst.msk [vmem:[%s3198_s17 + $0x1d0] sm:$0xff] %vm2396_vm2, %v2393_v7  ;;  %v1702_v13 = vadd.f32 %v3786_v1, %v1701_v11  ;;  %v2208_v14 = vadd.f32 %v3786_v1, %v2207_v12  ;;  %v1260_v15 = vmax.f32 %v693_v8, %v1199_v9 }
 0x27d   : > { %v1766_v16 = vmax.f32 %v1702_v13, 0.0  ;;  %v2272_v17 = vmax.f32 %v2208_v14, 0.0 }
 0x27e   : > { %v631_v18 = vpop.f32.mrf.mxu0  ;;  %v1137_v19 = vpop.f32.mrf.mxu1 }
 0x27f   : > { %v2333_v20 = vmax.f32 %v1766_v16, %v2272_v17  ;;  %v632_v21 = vadd.f32 %v3786_v1, %v631_v18  ;;  %v1138_v22 = vadd.f32 %v3786_v1, %v1137_v19 }
 0x281   : > { %v2394_v23 = vmax.f32 %v1260_v15, %v2333_v20  ;;  %v694_v24 = vmax.f32 %v632_v21, 0.0  ;;  %v1200_v25 = vmax.f32 %v1138_v22, 0.0 }
 0x282   : > { %v1704_v26 = vpop.f32.mrf.mxu2  ;;  %v2210_v27 = vpop.f32.mrf.mxu3 }
 0x283   : > { %2456 = vst.msk [vmem:[%s3198_s17 + $0x1d8] sm:$0xff] %vm2396_vm2, %v2394_v23  ;;  %v1705_v28 = vadd.f32 %v3786_v1, %v1704_v26  ;;  %v2211_v29 = vadd.f32 %v3786_v1, %v2210_v27  ;;  %v1261_v30 = vmax.f32 %v694_v24, %v1200_v25 }
 0x285   : > { %v1767_v31 = vmax.f32 %v1705_v28, 0.0  ;;  %v2273_v32 = vmax.f32 %v2211_v29, 0.0 }
 0x287   : > { %v2334_v33 = vmax.f32 %v1767_v31, %v2273_v32 }
 0x289   : > { %v2395_v34 = vmax.f32 %v1261_v30, %v2334_v33 }
 0x28b   : > { %2458 = vst.msk [vmem:[%s3198_s17 + $0x1e0] sm:$0xf] %vm2457_vm3, %v2395_v34 }
 0x28c PF: > { %s13_s12 = sadd.s32 1, %s2973_s12  }
 0x28d   : > { %p10_p4 = scmp.ge.s32.totalorder %s13_s12, 4  }
 0x28f   :  { %12 = sbr.rel (!%p10_p4) target bundleno = 1 (0x1), region = 65 }

// kernel: net_forward.3
= control target key start
LH: loop header
LB: loop body
LE: loop exit
PB: predicated region body
PF: predicated region fallthrough
CT: control target
= control target key end

     0   :  { %14 = vsyncpa [#allocation3], 0  ;;  %s13414_s0 = inlined_call_operand.vmem [shape: f32[2,4,25,2704], index: 0, kind: input, shape index: {}]   ;;  %s13415_s1 = inlined_call_operand.vmem [shape: f32[2704,32], index: 1, kind: input, shape index: {}]   ;;  %s13416_s2 = inlined_call_operand.vmem [shape: f32[1,32], index: 2, kind: input, shape index: {}]   ;;  %s13417_s3 = inlined_call_operand.vmem [shape: f32[25,32,256], index: 3, kind: input, shape index: {}]   ;;  %s13418_s4 = inlined_call_operand.vmem [shape: f32[1,256], index: 4, kind: input, shape index: {}]   ;;  %s13419_s5 = inlined_call_operand.vmem [shape: f32[256,32], index: 5, kind: input, shape index: {}]   ;;  %s13420_s6 = inlined_call_operand.vmem [shape: f32[1,32], index: 6, kind: input, shape index: {}]   ;;  %s13421_s7 = inlined_call_operand.vmem [shape: f32[32,2], index: 7, kind: input, shape index: {}]   ;;  %s13422_s8 = inlined_call_operand.vmem [shape: f32[1,2], index: 8, kind: input, shape index: {}]   ;;  %s13423_s9 = inlined_call_operand.hbm [shape: f32[2,1,2], index: 9, kind: output, shape index: {}]  }
   0x1   :  { %16 = vsyncpa [#allocation3 + $0x1], 0  ;;  %s7004_s30 = smov 0   ;;  %s7006_s10 = smov 0  }
   0x2   :  { %s7008_s11 = smov 0   ;;  %s7010_s12 = smov 0  }
   0x3 LB: > { %s7025_s13 = sadd.s32 4294967295, %s6952_s12   ;;  %s5286_s14 = sadd.s32 4294967294, %s6952_s12   ;;  %s6952_s12 = sphi %s7010_s12, %s13933_s12   ;;  %s6948_s11 = sphi %s7008_s11, %s13932_s11   ;;  %s6944_s10 = sphi %s7006_s10, %s13931_s10   ;;  %s6940_s30 = sphi %s7004_s30, %s13930_s30  }
   0x4   : > { %s7029_s15 = sadd.s32 1, %s6952_s12   ;;  %s223_s16 = sadd.s32 1, %s6948_s11 }
   0x5   : > { %s220_s17 = ssub.s32 %s6952_s12, %s7029_s15  ;;  %p233_p0 = scmp.ne.s32.totalorder %s6948_s11, %s6944_s10 }
   0x6   : > { %p221_p1 = scmp.eq.s32.totalorder %s220_s17, 0  ;;  %p234_p2 = scmp.eq.s32.totalorder %s7025_s13, 1 }
   0x7   : > { %p239_p3 = scmp.ne.s32.totalorder %s6944_s10, %s6940_s30  ;;  %p240_p4 = scmp.eq.s32.totalorder %s5286_s14, 1 }
   0x8   : > { %s7040_s18 = scalar_select %p221_p1, %s6948_s11, %s223_s16  }
   0x9   : > { %p7042_p5 = por %p234_p2, %p233_p0  ;;  %p7046_p6 = por %p240_p4, %p239_p3 }
   0xa   : > { %p5289_p7 = scmp.ge.s32.totalorder %s6952_s12, 1  ;;  %p290_p8 = scmp.lt.s32.totalorder %s6952_s12, 3 }
   0xc   : > { %p291_p9 = pnand %p5289_p7, %p290_p8 }
   0xe   : > { %294 = sbr.rel (%p291_p9) target bundleno = 1552 (0x610), region = 56 }
  0x13   : > { %v345_v0 = vld [vmem:[%s13415_s1 + $0x78] sm:$0xff]  ;;  %v344_v3 = vld [vmem:[%s13415_s1 + $0x70] sm:$0xff]  ;;  %v343_v7 = vld [vmem:[%s13415_s1 + $0x68] sm:$0xff]  ;;  %p325_p10 = scmp.lt.s32.totalorder %s7025_s13, 1  ;;  %vm760_vm0 = vcmask 130048   ;;  %vm3665_vm1 = vcmask 261120   ;;  %s5227_s14 = scalar_lea.hbm %s13423_s9, %s7025_s13 }
  0x14   : > { %v361_v1 = vld [vmem:[%s13415_s1 + $0xf8] sm:$0xff]  ;;  %773 = vmatpush.msra.mxu0 %v345_v0  ;;  %v360_v4 = vld [vmem:[%s13415_s1 + $0xf0] sm:$0xff]  ;;  %v359_v8 = vld [vmem:[%s13415_s1 + $0xe8] sm:$0xff]  ;;  %vm3712_vm2 = vcmask 1040384   ;;  %s323_s27 = sand.u32 1, %s6944_s10   ;;  %s5231_s22 = sshll.u32 %s5227_s14, 4  ;;  %s5232_s22 = int_to_ptr.hbm [resolvable:$true] %s5231_s22 }
  0x15   : > { %v377_v2 = vld [vmem:[%s13415_s1 + $0x178] sm:$0xff]  ;;  %802 = vmatpush.msra.mxu1 %v361_v1  ;;  %v376_v5 = vld [vmem:[%s13415_s1 + $0x170] sm:$0xff]  ;;  %v375_v9 = vld [vmem:[%s13415_s1 + $0x168] sm:$0xff]  ;;  %s7185_s23 = scalar_select %p325_p10, %s7025_s13, 1  ;;  %vm5216_vm3 = vcmask 8192  }
  0x16   : > { %831 = vmatpush.msra.mxu2 %v377_v2  ;;  %v393_v6 = vld [vmem:[%s13415_s1 + $0x1f8] sm:$0xff]  ;;  %774 = vmatpush.msra.mxu0 %v344_v3  ;;  %v392_v10 = vld [vmem:[%s13415_s1 + $0x1f0] sm:$0xff]  ;;  %v342_v11 = vld [vmem:[%s13415_s1 + $0x60] sm:$0xff]  ;;  %s5219_s24 = scalar_lea.sflag [#allocation3], %s323_s27  ;;  %s6904_s25 = sshra.s32 %s5232_s22, 4  ;;  %s6905_s25 = int_to_ptr.hbm [resolvable:$true] %s6904_s25 }
  0x17   : > { %803 = vmatpush.msra.mxu1 %v360_v4  ;;  %860 = vmatpush.msra.mxu3 %v393_v6  ;;  %v358_v12 = vld [vmem:[%s13415_s1 + $0xe0] sm:$0xff]  ;;  %v391_v14 = vld [vmem:[%s13415_s1 + $0x1e8] sm:$0xff]  ;;  %v341_v15 = vld [vmem:[%s13415_s1 + $0x58] sm:$0xff]  ;;  %s5834_s29 = smul.u32 2816, %s7185_s23  ;;  %s6906_s23 = scalar_lea.hbm %s6905_s25, 1 }
  0x18   : > { %832 = vmatpush.msra.mxu2 %v376_v5  ;;  %775 = vmatpush.msra.mxu0 %v343_v7  ;;  %v374_v13 = vld [vmem:[%s13415_s1 + $0x160] sm:$0xff]  ;;  %v357_v16 = vld [vmem:[%s13415_s1 + $0xd8] sm:$0xff]  ;;  %v340_v19 = vld [vmem:[%s13415_s1 + $0x50] sm:$0xff]  ;;  %p6907_p11 = scmp.ne.s32.totalorder %s6905_s25, %s6906_s23  ;;  %p6911_p0 = scmp.lt.s32.totalorder %s6905_s25, %s13423_s9 }
  0x19   : > { %804 = vmatpush.msra.mxu1 %v359_v8  ;;  %861 = vmatpush.msra.mxu3 %v392_v10  ;;  %v373_v17 = vld [vmem:[%s13415_s1 + $0x158] sm:$0xff]  ;;  %v390_v18 = vld [vmem:[%s13415_s1 + $0x1e0] sm:$0xff]  ;;  %v356_v20 = vld [vmem:[%s13415_s1 + $0xd0] sm:$0xff]  ;;  %s7239_s26 = scalar_lea.vmem %s13414_s0, %s5834_s29  ;;  %s324_s29 = scalar_lea.vmem [#allocation2], %s323_s27 }
  0x1a   : > { %833 = vmatpush.msra.mxu2 %v375_v9  ;;  %776 = vmatpush.msra.mxu0 %v342_v11  ;;  %v372_v21 = vld [vmem:[%s13415_s1 + $0x150] sm:$0xff]  ;;  %v389_v22 = vld [vmem:[%s13415_s1 + $0x1d8] sm:$0xff]  ;;  %v339_v23 = vld [vmem:[%s13415_s1 + $0x48] sm:$0xff]  ;;  %s5229_s21 = sshll.u32 %s324_s29, 4  ;;  %p6908_p12 = pnand %p6907_p11, %p7042_p5  ;;  %s5230_s21 = int_to_ptr.vmem [resolvable:$true] %s5229_s21 }
  0x1b   : > { %805 = vmatpush.msra.mxu1 %v358_v12  ;;  %862 = vmatpush.msra.mxu3 %v391_v14  ;;  %v355_v24 = vld [vmem:[%s13415_s1 + $0xc8] sm:$0xff]  ;;  %v388_v26 = vld [vmem:[%s13415_s1 + $0x1d0] sm:$0xff]  ;;  %v338_v27 = vld [vmem:[%s13415_s1 + $0x40] sm:$0xff] }
  0x1c   : > { %834 = vmatpush.msra.mxu2 %v374_v13  ;;  %777 = vmatpush.msra.mxu0 %v341_v15  ;;  %v371_v25 = vld [vmem:[%s13415_s1 + $0x148] sm:$0xff]  ;;  %v354_v28 = vld [vmem:[%s13415_s1 + $0xc0] sm:$0xff]  ;;  %v337_v31 = vld [vmem:[%s13415_s1 + $0x38] sm:$0xff]  ;;  %p6909_p13 = pneg %p6908_p12 }
  0x1d   : > { %806 = vmatpush.msra.mxu1 %v357_v16  ;;  %863 = vmatpush.msra.mxu3 %v390_v18  ;;  %v370_v29 = vld [vmem:[%s13415_s1 + $0x140] sm:$0xff]  ;;  %v387_v30 = vld [vmem:[%s13415_s1 + $0x1c8] sm:$0xff]  ;;  %v353_v32 = vld [vmem:[%s13415_s1 + $0xb8] sm:$0xff] }
  0x1e   : > { %835 = vmatpush.msra.mxu2 %v373_v17  ;;  %778 = vmatpush.msra.mxu0 %v340_v19  ;;  %v369_v33 = vld [vmem:[%s13415_s1 + $0x138] sm:$0xff]  ;;  %v386_v34 = vld [vmem:[%s13415_s1 + $0x1c0] sm:$0xff]  ;;  %v336_v35 = vld [vmem:[%s13415_s1 + $0x30] sm:$0xff] }
  0x1f   : > { %807 = vmatpush.msra.mxu1 %v356_v20  ;;  %864 = vmatpush.msra.mxu3 %v389_v22  ;;  %v352_v36 = vld [vmem:[%s13415_s1 + $0xb0] sm:$0xff]  ;;  %v385_v38 = vld [vmem:[%s13415_s1 + $0x1b8] sm:$0xff]  ;;  %v335_v39 = vld [vmem:[%s13415_s1 + $0x28] sm:$0xff] }
  0x20   : > { %836 = vmatpush.msra.mxu2 %v372_v21  ;;  %779 = vmatpush.msra.mxu0 %v339_v23  ;;  %v368_v37 = vld [vmem:[%s13415_s1 + $0x130] sm:$0xff]  ;;  %v351_v40 = vld [vmem:[%s13415_s1 + $0xa8] sm:$0xff]  ;;  %v334_v43 = vld [vmem:[%s13415_s1 + $0x20] sm:$0xff] }
  0x21   : > { %808 = vmatpush.msra.mxu1 %v355_v24  ;;  %865 = vmatpush.msra.mxu3 %v388_v26  ;;  %v367_v41 = vld [vmem:[%s13415_s1 + $0x128] sm:$0xff]  ;;  %v384_v42 = vld [vmem:[%s13415_s1 + $0x1b0] sm:$0xff]  ;;  %v350_v44 = vld [vmem:[%s13415_s1 + $0xa0] sm:$0xff] }
  0x22   : > { %837 = vmatpush.msra.mxu2 %v371_v25  ;;  %780 = vmatpush.msra.mxu0 %v338_v27  ;;  %v366_v45 = vld [vmem:[%s13415_s1 + $0x120] sm:$0xff]  ;;  %v383_v46 = vld [vmem:[%s13415_s1 + $0x1a8] sm:$0xff]  ;;  %v333_v47 = vld [vmem:[%s13415_s1 + $0x18] sm:$0xff] }
  0x23   : > { %809 = vmatpush.msra.mxu1 %v354_v28  ;;  %866 = vmatpush.msra.mxu3 %v387_v30  ;;  %v349_v48 = vld [vmem:[%s13415_s1 + $0x98] sm:$0xff]  ;;  %v382_v50 = vld [vmem:[%s13415_s1 + $0x1a0] sm:$0xff]  ;;  %v332_v51 = vld [vmem:[%s13415_s1 + $0x10] sm:$0xff] }
  0x24   : > { %838 = vmatpush.msra.mxu2 %v370_v29  ;;  %781 = vmatpush.msra.mxu0 %v337_v31  ;;  %v365_v49 = vld [vmem:[%s13415_s1 + $0x118] sm:$0xff]  ;;  %v348_v52 = vld [vmem:[%s13415_s1 + $0x90] sm:$0xff]  ;;  %v331_v55 = vld [vmem:[%s13415_s1 + $0x8] sm:$0xff] }
  0x25   : > { %810 = vmatpush.msra.mxu1 %v353_v32  ;;  %867 = vmatpush.msra.mxu3 %v386_v34  ;;  %v364_v53 = vld [vmem:[%s13415_s1 + $0x110] sm:$0xff]  ;;  %v381_v54 = vld [vmem:[%s13415_s1 + $0x198] sm:$0xff]  ;;  %v347_v56 = vld [vmem:[%s13415_s1 + $0x88] sm:$0xff] }
  0x26   : > { %839 = vmatpush.msra.mxu2 %v369_v33  ;;  %782 = vmatpush.msra.mxu0 %v336_v35  ;;  %v363_v57 = vld [vmem:[%s13415_s1 + $0x108] sm:$0xff]  ;;  %v380_v58 = vld [vmem:[%s13415_s1 + $0x190] sm:$0xff]  ;;  %v330_v59 = vld [vmem:[%s13415_s1] sm:$0xff] }
  0x27   : > { %811 = vmatpush.msra.mxu1 %v352_v36  ;;  %868 = vmatpush.msra.mxu3 %v385_v38  ;;  %v346_v60 = vld [vmem:[%s13415_s1 + $0x80] sm:$0xff]  ;;  %v379_v62 = vld [vmem:[%s13415_s1 + $0x188] sm:$0xff]  ;;  %v671_v1 = vld [vmem:[%s7239_s26 + $0x10] sm:$0xff] }
  0x28   : > { %840 = vmatpush.msra.mxu2 %v368_v37  ;;  %783 = vmatpush.msra.mxu0 %v335_v39  ;;  %v362_v61 = vld [vmem:[%s13415_s1 + $0x100] sm:$0xff]  ;;  %v670_v0 = vld [vmem:[%s7239_s26 + $0x8] sm:$0xff]  ;;  %v425_v2 = vld [vmem:[%s13415_s1 + $0x2f8] sm:$0xff] }
  0x29   : > { %812 = vmatpush.msra.mxu1 %v351_v40  ;;  %869 = vmatpush.msra.mxu3 %v384_v42  ;;  %v669_v63 = vld [vmem:[%s7239_s26] sm:$0xff]  ;;  %v409_v4 = vld [vmem:[%s13415_s1 + $0x278] sm:$0xff]  ;;  %v424_v7 = vld [vmem:[%s13415_s1 + $0x2f0] sm:$0xff] }
  0x2a   : > { %841 = vmatpush.msra.mxu2 %v367_v41  ;;  %784 = vmatpush.msra.mxu0 %v334_v43  ;;  %v378_v3 = vld [vmem:[%s13415_s1 + $0x180] sm:$0xff]  ;;  %v441_v5 = vld [vmem:[%s13415_s1 + $0x378] sm:$0xff]  ;;  %v408_v8 = vld [vmem:[%s13415_s1 + $0x270] sm:$0xff] }
  0x2b   : > { %813 = vmatpush.msra.mxu1 %v350_v44  ;;  %870 = vmatpush.msra.mxu3 %v383_v46  ;;  %v672_v6 = vld [vmem:[%s7239_s26 + $0x18] sm:$0xff]  ;;  %v440_v9 = vld [vmem:[%s13415_s1 + $0x370] sm:$0xff]  ;;  %v423_v11 = vld [vmem:[%s13415_s1 + $0x2e8] sm:$0xff] }
  0x2c   : > { %842 = vmatpush.msra.mxu2 %v366_v45  ;;  %785 = vmatpush.msra.mxu0 %v333_v47  ;;  %v457_v10 = vld [vmem:[%s13415_s1 + $0x3f8] sm:$0xff]  ;;  %v407_v12 = vld [vmem:[%s13415_s1 + $0x268] sm:$0xff]  ;;  %v456_v14 = vld [vmem:[%s13415_s1 + $0x3f0] sm:$0xff] }
  0x2d   : > { %814 = vmatpush.msra.mxu1 %v349_v48  ;;  %871 = vmatpush.msra.mxu3 %v382_v50  ;;  %v439_v13 = vld [vmem:[%s13415_s1 + $0x368] sm:$0xff]  ;;  %v422_v15 = vld [vmem:[%s13415_s1 + $0x2e0] sm:$0xff]  ;;  %v691_v19 = vld [vmem:[%s7239_s26 + $0xb0] sm:$0xff] }
  0x2e   : > { %843 = vmatpush.msra.mxu2 %v365_v49  ;;  %786 = vmatpush.msra.mxu0 %v332_v51  ;;  %v406_v16 = vld [vmem:[%s13415_s1 + $0x260] sm:$0xff]  ;;  %v455_v18 = vld [vmem:[%s13415_s1 + $0x3e8] sm:$0xff]  ;;  %v692_v20 = vld [vmem:[%s7239_s26 + $0xb8] sm:$0xff] }
  0x2f   : > { %815 = vmatpush.msra.mxu1 %v348_v52  ;;  %872 = vmatpush.msra.mxu3 %v381_v54  ;;  %v438_v17 = vld [vmem:[%s13415_s1 + $0x360] sm:$0xff]  ;;  %v421_v22 = vld [vmem:[%s13415_s1 + $0x2d8] sm:$0xff]  ;;  %v420_v26 = vld [vmem:[%s13415_s1 + $0x2d0] sm:$0xff] }
  0x30   : > { %844 = vmatpush.msra.mxu2 %v364_v53  ;;  %787 = vmatpush.msra.mxu0 %v331_v55  ;;  %v693_v21 = vld [vmem:[%s7239_s26 + $0xc0] sm:$0xff]  ;;  %v405_v23 = vld [vmem:[%s13415_s1 + $0x258] sm:$0xff]  ;;  %v694_v27 = vld [vmem:[%s7239_s26 + $0xc8] sm:$0xff] }
  0x31   : > { %816 = vmatpush.msra.mxu1 %v347_v56  ;;  %873 = vmatpush.msra.mxu3 %v380_v58  ;;  %v437_v24 = vld [vmem:[%s13415_s1 + $0x358] sm:$0xff]  ;;  %v454_v25 = vld [vmem:[%s13415_s1 + $0x3e0] sm:$0xff]  ;;  %v404_v28 = vld [vmem:[%s13415_s1 + $0x250] sm:$0xff] }
  0x32   : > { %845 = vmatpush.msra.mxu2 %v363_v57  ;;  %788 = vmatpush.msra.mxu0 %v330_v59  ;;  %v436_v29 = vld [vmem:[%s13415_s1 + $0x350] sm:$0xff]  ;;  %v453_v30 = vld [vmem:[%s13415_s1 + $0x3d8] sm:$0xff]  ;;  %v419_v31 = vld [vmem:[%s13415_s1 + $0x2c8] sm:$0xff] }
  0x33   : > { %817 = vmatpush.msra.mxu1 %v346_v60  ;;  %874 = vmatpush.msra.mxu3 %v379_v62  ;;  %v403_v32 = vld [vmem:[%s13415_s1 + $0x248] sm:$0xff]  ;;  %v452_v34 = vld [vmem:[%s13415_s1 + $0x3d0] sm:$0xff]  ;;  %v418_v35 = vld [vmem:[%s13415_s1 + $0x2c0] sm:$0xff] }
  0x34   : > { %846 = vmatpush.msra.mxu2 %v362_v61  ;;  %789 = vmatmul.f32.vlgmr.msra.gmra.mxu0 %v669_v63  ;;  %v435_v33 = vld [vmem:[%s13415_s1 + $0x348] sm:$0xff]  ;;  %v402_v36 = vld [vmem:[%s13415_s1 + $0x240] sm:$0xff]  ;;  %v715_v41 = vld [vmem:[%s7239_s26 + $0x170] sm:$0xff] }
  0x35   : > { %818 = vmatmul.f32.vlgmr.msra.gmra.mxu1 %v670_v0  ;;  %847 = vmatmul.f32.vlgmr.msra.gmra.mxu2 %v671_v1  ;;  %v434_v37 = vld [vmem:[%s13415_s1 + $0x340] sm:$0xff]  ;;  %v451_v38 = vld [vmem:[%s13415_s1 + $0x3c8] sm:$0xff]  ;;  %v417_v42 = vld [vmem:[%s13415_s1 + $0x2b8] sm:$0xff] }
  0x36   : > { %918 = vmatpush.msrb.mxu1 %v425_v2  ;;  %875 = vmatpush.msra.mxu3 %v378_v3  ;;  %v713_v39 = vld [vmem:[%s7239_s26 + $0x160] sm:$0xff]  ;;  %v714_v40 = vld [vmem:[%s7239_s26 + $0x168] sm:$0xff]  ;;  %v401_v43 = vld [vmem:[%s13415_s1 + $0x238] sm:$0xff] }
  0x37   : > { %889 = vmatpush.msrb.mxu0 %v409_v4  ;;  %947 = vmatpush.msrb.mxu2 %v441_v5  ;;  %v433_v44 = vld [vmem:[%s13415_s1 + $0x338] sm:$0xff]  ;;  %v450_v45 = vld [vmem:[%s13415_s1 + $0x3c0] sm:$0xff]  ;;  %v416_v46 = vld [vmem:[%s13415_s1 + $0x2b0] sm:$0xff] }
  0x38   : > { %876 = vmatmul.f32.vlgmr.msra.gmra.mxu3 %v672_v6  ;;  %919 = vmatpush.msrb.mxu1 %v424_v7  ;;  %v716_v47 = vld [vmem:[%s7239_s26 + $0x178] sm:$0xff]  ;;  %v400_v48 = vld [vmem:[%s13415_s1 + $0x230] sm:$0xff]  ;;  %v415_v51 = vld [vmem:[%s13415_s1 + $0x2a8] sm:$0xff] }
  0x39   : > { %890 = vmatpush.msrb.mxu0 %v408_v8  ;;  %948 = vmatpush.msrb.mxu2 %v440_v9  ;;  %v432_v49 = vld [vmem:[%s13415_s1 + $0x330] sm:$0xff]  ;;  %v449_v50 = vld [vmem:[%s13415_s1 + $0x3b8] sm:$0xff]  ;;  %v399_v52 = vld [vmem:[%s13415_s1 + $0x228] sm:$0xff] }
  0x3a   : > { %976 = vmatpush.msrb.mxu3 %v457_v10  ;;  %920 = vmatpush.msrb.mxu1 %v423_v11  ;;  %v431_v53 = vld [vmem:[%s13415_s1 + $0x328] sm:$0xff]  ;;  %v448_v54 = vld [vmem:[%s13415_s1 + $0x3b0] sm:$0xff]  ;;  %v414_v55 = vld [vmem:[%s13415_s1 + $0x2a0] sm:$0xff] }
  0x3b   : > { %891 = vmatpush.msrb.mxu0 %v407_v12  ;;  %949 = vmatpush.msrb.mxu2 %v439_v13  ;;  %v398_v56 = vld [vmem:[%s13415_s1 + $0x220] sm:$0xff]  ;;  %v447_v58 = vld [vmem:[%s13415_s1 + $0x3a8] sm:$0xff]  ;;  %v735_v59 = vld [vmem:[%s7239_s26 + $0x210] sm:$0x1] }
  0x3c   : > { %977 = vmatpush.msrb.mxu3 %v456_v14  ;;  %921 = vmatpush.msrb.mxu1 %v422_v15  ;;  %v430_v57 = vld [vmem:[%s13415_s1 + $0x320] sm:$0xff]  ;;  %v736_v60 = vld [vmem:[%s7239_s26 + $0x218] sm:$0x1]  ;;  %v412_v2 = vld [vmem:[%s13415_s1 + $0x290] sm:$0xff] }
  0x3d   : > { %892 = vmatpush.msrb.mxu0 %v406_v16  ;;  %950 = vmatpush.msrb.mxu2 %v438_v17  ;;  %v737_v61 = vld [vmem:[%s7239_s26 + $0x220] sm:$0x1]  ;;  %v413_v62 = vld [vmem:[%s13415_s1 + $0x298] sm:$0xff]  ;;  %v738_v3 = vld [vmem:[%s7239_s26 + $0x228] sm:$0x1] }
  0x3e   : > { %978 = vmatpush.msrb.mxu3 %v455_v18  ;;  %792 = vmatmul.f32.gmra.mxu0 %v691_v19  ;;  %v397_v63 = vld [vmem:[%s13415_s1 + $0x218] sm:$0xff]  ;;  %v446_v1 = vld [vmem:[%s13415_s1 + $0x3a0] sm:$0xff]  ;;  %v396_v4 = vld [vmem:[%s13415_s1 + $0x210] sm:$0xff] }
  0x3f   : > { %821 = vmatmul.f32.gmra.mxu1 %v692_v20  ;;  %850 = vmatmul.f32.gmra.mxu2 %v693_v21  ;;  %v429_v0 = vld [vmem:[%s13415_s1 + $0x318] sm:$0xff]  ;;  %v428_v5 = vld [vmem:[%s13415_s1 + $0x310] sm:$0xff]  ;;  %v411_v7 = vld [vmem:[%s13415_s1 + $0x288] sm:$0xff] }
  0x40   : > { %922 = vmatpush.msrb.mxu1 %v421_v22  ;;  %893 = vmatpush.msrb.mxu0 %v405_v23  ;;  %v445_v6 = vld [vmem:[%s13415_s1 + $0x398] sm:$0xff]  ;;  %v395_v8 = vld [vmem:[%s13415_s1 + $0x208] sm:$0xff]  ;;  %v444_v10 = vld [vmem:[%s13415_s1 + $0x390] sm:$0xff] }
  0x41   : > { %951 = vmatpush.msrb.mxu2 %v437_v24  ;;  %979 = vmatpush.msrb.mxu3 %v454_v25  ;;  %v427_v9 = vld [vmem:[%s13415_s1 + $0x308] sm:$0xff]  ;;  %v410_v11 = vld [vmem:[%s13415_s1 + $0x280] sm:$0xff]  ;;  %v675_v17 = vld [vmem:[%s7239_s26 + $0x30] sm:$0xff] }
  0x42   : > { %923 = vmatpush.msrb.mxu1 %v420_v26  ;;  %879 = vmatmul.f32.gmra.mxu3 %v694_v27  ;;  %v394_v12 = vld [vmem:[%s13415_s1 + $0x200] sm:$0xff]  ;;  %v443_v14 = vld [vmem:[%s13415_s1 + $0x388] sm:$0xff]  ;;  %v489_v18 = vld [vmem:[%s13415_s1 + $0x4f8] sm:$0xff] }
  0x43   : > { %894 = vmatpush.msrb.mxu0 %v404_v28  ;;  %952 = vmatpush.msrb.mxu2 %v436_v29  ;;  %v426_v13 = vld [vmem:[%s13415_s1 + $0x300] sm:$0xff]  ;;  %v674_v16 = vld [vmem:[%s7239_s26 + $0x28] sm:$0xff]  ;;  %v473_v20 = vld [vmem:[%s13415_s1 + $0x478] sm:$0xff] }
  0x44   : > { %980 = vmatpush.msrb.mxu3 %v453_v30  ;;  %924 = vmatpush.msrb.mxu1 %v419_v31  ;;  %v673_v15 = vld [vmem:[%s7239_s26 + $0x20] sm:$0xff]  ;;  %v505_v21 = vld [vmem:[%s13415_s1 + $0x578] sm:$0xff]  ;;  %v488_v23 = vld [vmem:[%s13415_s1 + $0x4f0] sm:$0xff] }
  0x45   : > { %895 = vmatpush.msrb.mxu0 %v403_v32  ;;  %953 = vmatpush.msrb.mxu2 %v435_v33  ;;  %v442_v19 = vld [vmem:[%s13415_s1 + $0x380] sm:$0xff]  ;;  %v676_v22 = vld [vmem:[%s7239_s26 + $0x38] sm:$0xff]  ;;  %v472_v24 = vld [vmem:[%s13415_s1 + $0x470] sm:$0xff] }
  0x46   : > { %981 = vmatpush.msrb.mxu3 %v452_v34  ;;  %925 = vmatpush.msrb.mxu1 %v418_v35  ;;  %v504_v25 = vld [vmem:[%s13415_s1 + $0x570] sm:$0xff]  ;;  %v521_v26 = vld [vmem:[%s13415_s1 + $0x5f8] sm:$0xff]  ;;  %v487_v27 = vld [vmem:[%s13415_s1 + $0x4e8] sm:$0xff] }
  0x47   : > { %896 = vmatpush.msrb.mxu0 %v402_v36  ;;  %954 = vmatpush.msrb.mxu2 %v434_v37  ;;  %v471_v28 = vld [vmem:[%s13415_s1 + $0x468] sm:$0xff]  ;;  %v520_v30 = vld [vmem:[%s13415_s1 + $0x5f0] sm:$0xff]  ;;  %v486_v31 = vld [vmem:[%s13415_s1 + $0x4e0] sm:$0xff] }
  0x48   : > { %982 = vmatpush.msrb.mxu3 %v451_v38  ;;  %795 = vmatmul.f32.gmra.mxu0 %v713_v39  ;;  %v503_v29 = vld [vmem:[%s13415_s1 + $0x568] sm:$0xff]  ;;  %v470_v32 = vld [vmem:[%s13415_s1 + $0x460] sm:$0xff]  ;;  %v695_v35 = vld [vmem:[%s7239_s26 + $0xd0] sm:$0xff] }
  0x49   : > { %824 = vmatmul.f32.gmra.mxu1 %v714_v40  ;;  %853 = vmatmul.f32.gmra.mxu2 %v715_v41  ;;  %v502_v33 = vld [vmem:[%s13415_s1 + $0x560] sm:$0xff]  ;;  %v519_v34 = vld [vmem:[%s13415_s1 + $0x5e8] sm:$0xff]  ;;  %v696_v36 = vld [vmem:[%s7239_s26 + $0xd8] sm:$0xff] }
  0x4a   : > { %926 = vmatpush.msrb.mxu1 %v417_v42  ;;  %897 = vmatpush.msrb.mxu0 %v401_v43  ;;  %v697_v37 = vld [vmem:[%s7239_s26 + $0xe0] sm:$0xff]  ;;  %v485_v38 = vld [vmem:[%s13415_s1 + $0x4d8] sm:$0xff]  ;;  %v484_v42 = vld [vmem:[%s13415_s1 + $0x4d0] sm:$0xff] }
  0x4b   : > { %955 = vmatpush.msrb.mxu2 %v433_v44  ;;  %983 = vmatpush.msrb.mxu3 %v450_v45  ;;  %v469_v39 = vld [vmem:[%s13415_s1 + $0x458] sm:$0xff]  ;;  %v518_v41 = vld [vmem:[%s13415_s1 + $0x5e0] sm:$0xff]  ;;  %v698_v43 = vld [vmem:[%s7239_s26 + $0xe8] sm:$0xff] }
  0x4c   : > { %927 = vmatpush.msrb.mxu1 %v416_v46  ;;  %882 = vmatmul.f32.gmra.mxu3 %v716_v47  ;;  %v501_v40 = vld [vmem:[%s13415_s1 + $0x558] sm:$0xff]  ;;  %v468_v44 = vld [vmem:[%s13415_s1 + $0x450] sm:$0xff]  ;;  %v483_v47 = vld [vmem:[%s13415_s1 + $0x4c8] sm:$0xff] }
  0x4d   : > { %898 = vmatpush.msrb.mxu0 %v400_v48  ;;  %956 = vmatpush.msrb.mxu2 %v432_v49  ;;  %v500_v45 = vld [vmem:[%s13415_s1 + $0x550] sm:$0xff]  ;;  %v517_v46 = vld [vmem:[%s13415_s1 + $0x5d8] sm:$0xff]  ;;  %v467_v48 = vld [vmem:[%s13415_s1 + $0x448] sm:$0xff] }
  0x4e   : > { %984 = vmatpush.msrb.mxu3 %v449_v50  ;;  %928 = vmatpush.msrb.mxu1 %v415_v51  ;;  %v499_v49 = vld [vmem:[%s13415_s1 + $0x548] sm:$0xff]  ;;  %v516_v50 = vld [vmem:[%s13415_s1 + $0x5d0] sm:$0xff]  ;;  %v482_v51 = vld [vmem:[%s13415_s1 + $0x4c0] sm:$0xff] }
  0x4f   : > { %899 = vmatpush.msrb.mxu0 %v399_v52  ;;  %957 = vmatpush.msrb.mxu2 %v431_v53  ;;  %v466_v52 = vld [vmem:[%s13415_s1 + $0x440] sm:$0xff] }
  0x50   : > { %985 = vmatpush.msrb.mxu3 %v448_v54  ;;  %929 = vmatpush.msrb.mxu1 %v414_v55  ;;  %v498_v53 = vld [vmem:[%s13415_s1 + $0x540] sm:$0xff]  ;;  %v515_v54 = vld [vmem:[%s13415_s1 + $0x5c8] sm:$0xff] }
  0x51   : > { %900 = vmatpush.msrb.mxu0 %v398_v56  ;;  %958 = vmatpush.msrb.mxu2 %v430_v57  ;;  %v717_v55 = vld [vmem:[%s7239_s26 + $0x180] sm:$0xff]  ;;  %v718_v56 = vld [vmem:[%s7239_s26 + $0x188] sm:$0xff]  ;;  %v719_v57 = vld [vmem:[%s7239_s26 + $0x190] sm:$0xff] }
  0x52   : > { %986 = vmatpush.msrb.mxu3 %v447_v58  ;;  %798 = vmatmul.f32.gmra.mxu0 %v735_v59  ;;  %v481_v58 = vld [vmem:[%s13415_s1 + $0x4b8] sm:$0xff] }
  0x53   : > { %827 = vmatmul.f32.gmra.mxu1 %v736_v60  ;;  %856 = vmatmul.f32.gmra.mxu2 %v737_v61  ;;  %v465_v59 = vld [vmem:[%s13415_s1 + $0x438] sm:$0xff]  ;;  %v514_v61 = vld [vmem:[%s13415_s1 + $0x5c0] sm:$0xff] }
  0x54   : > { %930 = vmatpush.msrb.mxu1 %v413_v62  ;;  %901 = vmatpush.msrb.mxu0 %v397_v63  ;;  %v497_v60 = vld [vmem:[%s13415_s1 + $0x538] sm:$0xff]  ;;  %v480_v62 = vld [vmem:[%s13415_s1 + $0x4b0] sm:$0xff] }
  0x55   : > { %959 = vmatpush.msrb.mxu2 %v429_v0  ;;  %987 = vmatpush.msrb.mxu3 %v446_v1  ;;  %v720_v63 = vld [vmem:[%s7239_s26 + $0x198] sm:$0xff]  ;;  %v464_v0 = vld [vmem:[%s13415_s1 + $0x430] sm:$0xff] }
  0x56   : > { %931 = vmatpush.msrb.mxu1 %v412_v2  ;;  %885 = vmatmul.f32.gmra.mxu3 %v738_v3  ;;  %v496_v1 = vld [vmem:[%s13415_s1 + $0x530] sm:$0xff]  ;;  %v513_v2 = vld [vmem:[%s13415_s1 + $0x5b8] sm:$0xff]  ;;  %v479_v3 = vld [vmem:[%s13415_s1 + $0x4a8] sm:$0xff] }
  0x57   : > { %902 = vmatpush.msrb.mxu0 %v396_v4  ;;  %960 = vmatpush.msrb.mxu2 %v428_v5  ;;  %v463_v4 = vld [vmem:[%s13415_s1 + $0x428] sm:$0xff] }
  0x58   : > { %988 = vmatpush.msrb.mxu3 %v445_v6  ;;  %932 = vmatpush.msrb.mxu1 %v411_v7  ;;  %v495_v5 = vld [vmem:[%s13415_s1 + $0x528] sm:$0xff]  ;;  %v512_v6 = vld [vmem:[%s13415_s1 + $0x5b0] sm:$0xff]  ;;  %v478_v7 = vld [vmem:[%s13415_s1 + $0x4a0] sm:$0xff] }
  0x59   : > { %903 = vmatpush.msrb.mxu0 %v395_v8  ;;  %961 = vmatpush.msrb.mxu2 %v427_v9  ;;  %v462_v8 = vld [vmem:[%s13415_s1 + $0x420] sm:$0xff] }
  0x5a   : > { %989 = vmatpush.msrb.mxu3 %v444_v10  ;;  %933 = vmatpush.msrb.mxu1 %v410_v11  ;;  %v494_v9 = vld [vmem:[%s13415_s1 + $0x520] sm:$0xff]  ;;  %v511_v10 = vld [vmem:[%s13415_s1 + $0x5a8] sm:$0xff]  ;;  %v739_v11 = vld [vmem:[%s7239_s26 + $0x230] sm:$0x1] }
  0x5b   : > { %904 = vmatpush.msrb.mxu0 %v394_v12  ;;  %962 = vmatpush.msrb.mxu2 %v426_v13  ;;  %v740_v12 = vld [vmem:[%s7239_s26 + $0x238] sm:$0x1]  ;;  %v741_v13 = vld [vmem:[%s7239_s26 + $0x240] sm:$0x1] }
  0x5c   : > { %990 = vmatpush.msrb.mxu3 %v443_v14  ;;  %905 = vmatmul.f32.vlgmr.msrb.gmra.mxu0 %v673_v15  ;;  %v477_v14 = vld [vmem:[%s13415_s1 + $0x498] sm:$0xff] }
  0x5d   : > { %934 = vmatmul.f32.vlgmr.msrb.gmra.mxu1 %v674_v16  ;;  %963 = vmatmul.f32.vlgmr.msrb.gmra.mxu2 %v675_v17  ;;  %v461_v15 = vld [vmem:[%s13415_s1 + $0x418] sm:$0xff]  ;;  %v510_v17 = vld [vmem:[%s13415_s1 + $0x5a0] sm:$0xff] }
  0x5e   : > { %1034 = vmatpush.msra.mxu1 %v489_v18  ;;  %991 = vmatpush.msrb.mxu3 %v442_v19  ;;  %v493_v16 = vld [vmem:[%s13415_s1 + $0x518] sm:$0xff]  ;;  %v476_v18 = vld [vmem:[%s13415_s1 + $0x490] sm:$0xff]  ;;  %v742_v19 = vld [vmem:[%s7239_s26 + $0x248] sm:$0x1] }
  0x5f   : > { %1005 = vmatpush.msra.mxu0 %v473_v20  ;;  %1063 = vmatpush.msra.mxu2 %v505_v21  ;;  %v460_v20 = vld [vmem:[%s13415_s1 + $0x410] sm:$0xff] }
  0x60   : > { %992 = vmatmul.f32.vlgmr.msrb.gmra.mxu3 %v676_v22  ;;  %1035 = vmatpush.msra.mxu1 %v488_v23  ;;  %v492_v21 = vld [vmem:[%s13415_s1 + $0x510] sm:$0xff]  ;;  %v509_v22 = vld [vmem:[%s13415_s1 + $0x598] sm:$0xff]  ;;  %v475_v23 = vld [vmem:[%s13415_s1 + $0x488] sm:$0xff] }
  0x61   : > { %1006 = vmatpush.msra.mxu0 %v472_v24  ;;  %1064 = vmatpush.msra.mxu2 %v504_v25  ;;  %v459_v24 = vld [vmem:[%s13415_s1 + $0x408] sm:$0xff] }
  0x62   : > { %1092 = vmatpush.msra.mxu3 %v521_v26  ;;  %1036 = vmatpush.msra.mxu1 %v487_v27  ;;  %v491_v25 = vld [vmem:[%s13415_s1 + $0x508] sm:$0xff]  ;;  %v508_v26 = vld [vmem:[%s13415_s1 + $0x590] sm:$0xff]  ;;  %v474_v27 = vld [vmem:[%s13415_s1 + $0x480] sm:$0xff] }
  0x63   : > { %1007 = vmatpush.msra.mxu0 %v471_v28  ;;  %1065 = vmatpush.msra.mxu2 %v503_v29  ;;  %v458_v28 = vld [vmem:[%s13415_s1 + $0x400] sm:$0xff] }
  0x64   : > { %1093 = vmatpush.msra.mxu3 %v520_v30  ;;  %1037 = vmatpush.msra.mxu1 %v486_v31  ;;  %v490_v29 = vld [vmem:[%s13415_s1 + $0x500] sm:$0xff]  ;;  %v507_v30 = vld [vmem:[%s13415_s1 + $0x588] sm:$0xff] }
  0x65   : > { %1008 = vmatpush.msra.mxu0 %v470_v32  ;;  %1066 = vmatpush.msra.mxu2 %v502_v33  ;;  %v677_v31 = vld [vmem:[%s7239_s26 + $0x40] sm:$0xff]  ;;  %v678_v32 = vld [vmem:[%s7239_s26 + $0x48] sm:$0xff]  ;;  %v679_v33 = vld [vmem:[%s7239_s26 + $0x50] sm:$0xff] }
  0x66   : > { %1094 = vmatpush.msra.mxu3 %v519_v34  ;;  %908 = vmatmul.f32.gmra.mxu0 %v695_v35  ;;  %v553_v34 = vld [vmem:[%s13415_s1 + $0x6f8] sm:$0xff]  ;;  %v506_v35 = vld [vmem:[%s13415_s1 + $0x580] sm:$0xff] }
  0x67   : > { %937 = vmatmul.f32.gmra.mxu1 %v696_v36  ;;  %966 = vmatmul.f32.gmra.mxu2 %v697_v37  ;;  %v537_v36 = vld [vmem:[%s13415_s1 + $0x678] sm:$0xff] }
  0x68   : > { %1038 = vmatpush.msra.mxu1 %v485_v38  ;;  %1009 = vmatpush.msra.mxu0 %v469_v39  ;;  %v569_v37 = vld [vmem:[%s13415_s1 + $0x778] sm:$0xff]  ;;  %v552_v39 = vld [vmem:[%s13415_s1 + $0x6f0] sm:$0xff] }
  0x69   : > { %1067 = vmatpush.msra.mxu2 %v501_v40  ;;  %1095 = vmatpush.msra.mxu3 %v518_v41  ;;  %v680_v38 = vld [vmem:[%s7239_s26 + $0x58] sm:$0xff]  ;;  %v536_v40 = vld [vmem:[%s13415_s1 + $0x670] sm:$0xff] }
  0x6a   : > { %1039 = vmatpush.msra.mxu1 %v484_v42  ;;  %995 = vmatmul.f32.gmra.mxu3 %v698_v43  ;;  %v568_v41 = vld [vmem:[%s13415_s1 + $0x770] sm:$0xff]  ;;  %v585_v42 = vld [vmem:[%s13415_s1 + $0x7f8] sm:$0xff]  ;;  %v551_v43 = vld [vmem:[%s13415_s1 + $0x6e8] sm:$0xff] }
  0x6b   : > { %1010 = vmatpush.msra.mxu0 %v468_v44  ;;  %1068 = vmatpush.msra.mxu2 %v500_v45  ;;  %v535_v44 = vld [vmem:[%s13415_s1 + $0x668] sm:$0xff] }
  0x6c   : > { %1096 = vmatpush.msra.mxu3 %v517_v46  ;;  %1040 = vmatpush.msra.mxu1 %v483_v47  ;;  %v567_v45 = vld [vmem:[%s13415_s1 + $0x768] sm:$0xff]  ;;  %v584_v46 = vld [vmem:[%s13415_s1 + $0x7f0] sm:$0xff]  ;;  %v550_v47 = vld [vmem:[%s13415_s1 + $0x6e0] sm:$0xff] }
  0x6d   : > { %1011 = vmatpush.msra.mxu0 %v467_v48  ;;  %1069 = vmatpush.msra.mxu2 %v499_v49  ;;  %v534_v48 = vld [vmem:[%s13415_s1 + $0x660] sm:$0xff] }
  0x6e   : > { %1097 = vmatpush.msra.mxu3 %v516_v50  ;;  %1041 = vmatpush.msra.mxu1 %v482_v51  ;;  %v566_v49 = vld [vmem:[%s13415_s1 + $0x760] sm:$0xff]  ;;  %v583_v50 = vld [vmem:[%s13415_s1 + $0x7e8] sm:$0xff]  ;;  %v699_v51 = vld [vmem:[%s7239_s26 + $0xf0] sm:$0xff] }
  0x6f   : > { %1012 = vmatpush.msra.mxu0 %v466_v52  ;;  %1070 = vmatpush.msra.mxu2 %v498_v53  ;;  %v700_v52 = vld [vmem:[%s7239_s26 + $0xf8] sm:$0xff]  ;;  %v701_v53 = vld [vmem:[%s7239_s26 + $0x100] sm:$0xff] }
  0x70   : > { %1098 = vmatpush.msra.mxu3 %v515_v54  ;;  %911 = vmatmul.f32.gmra.mxu0 %v717_v55  ;;  %v549_v54 = vld [vmem:[%s13415_s1 + $0x6d8] sm:$0xff] }
  0x71   : > { %940 = vmatmul.f32.gmra.mxu1 %v718_v56  ;;  %969 = vmatmul.f32.gmra.mxu2 %v719_v57  ;;  %v533_v55 = vld [vmem:[%s13415_s1 + $0x658] sm:$0xff]  ;;  %v582_v57 = vld [vmem:[%s13415_s1 + $0x7e0] sm:$0xff] }
  0x72   : > { %1042 = vmatpush.msra.mxu1 %v481_v58  ;;  %1013 = vmatpush.msra.mxu0 %v465_v59  ;;  %v565_v56 = vld [vmem:[%s13415_s1 + $0x758] sm:$0xff]  ;;  %v548_v58 = vld [vmem:[%s13415_s1 + $0x6d0] sm:$0xff]  ;;  %v702_v59 = vld [vmem:[%s7239_s26 + $0x108] sm:$0xff] }
  0x73   : > { %1071 = vmatpush.msra.mxu2 %v497_v60  ;;  %1099 = vmatpush.msra.mxu3 %v514_v61  ;;  %v532_v60 = vld [vmem:[%s13415_s1 + $0x650] sm:$0xff] }
  0x74   : > { %1043 = vmatpush.msra.mxu1 %v480_v62  ;;  %998 = vmatmul.f32.gmra.mxu3 %v720_v63  ;;  %v564_v61 = vld [vmem:[%s13415_s1 + $0x750] sm:$0xff]  ;;  %v581_v62 = vld [vmem:[%s13415_s1 + $0x7d8] sm:$0xff]  ;;  %v547_v63 = vld [vmem:[%s13415_s1 + $0x6c8] sm:$0xff] }
  0x75   : > { %1014 = vmatpush.msra.mxu0 %v464_v0  ;;  %1072 = vmatpush.msra.mxu2 %v496_v1  ;;  %v531_v0 = vld [vmem:[%s13415_s1 + $0x648] sm:$0xff] }
  0x76   : > { %1100 = vmatpush.msra.mxu3 %v513_v2  ;;  %1044 = vmatpush.msra.mxu1 %v479_v3  ;;  %v563_v1 = vld [vmem:[%s13415_s1 + $0x748] sm:$0xff]  ;;  %v580_v2 = vld [vmem:[%s13415_s1 + $0x7d0] sm:$0xff]  ;;  %v546_v3 = vld [vmem:[%s13415_s1 + $0x6c0] sm:$0xff] }
  0x77   : > { %1015 = vmatpush.msra.mxu0 %v463_v4  ;;  %1073 = vmatpush.msra.mxu2 %v495_v5  ;;  %v530_v4 = vld [vmem:[%s13415_s1 + $0x640] sm:$0xff] }
  0x78   : > { %1101 = vmatpush.msra.mxu3 %v512_v6  ;;  %1045 = vmatpush.msra.mxu1 %v478_v7  ;;  %v562_v5 = vld [vmem:[%s13415_s1 + $0x740] sm:$0xff]  ;;  %v579_v6 = vld [vmem:[%s13415_s1 + $0x7c8] sm:$0xff] }
  0x79   : > { %1016 = vmatpush.msra.mxu0 %v462_v8  ;;  %1074 = vmatpush.msra.mxu2 %v494_v9  ;;  %v721_v7 = vld [vmem:[%s7239_s26 + $0x1a0] sm:$0xff]  ;;  %v722_v8 = vld [vmem:[%s7239_s26 + $0x1a8] sm:$0xff]  ;;  %v723_v9 = vld [vmem:[%s7239_s26 + $0x1b0] sm:$0xff] }
  0x7a   : > { %1102 = vmatpush.msra.mxu3 %v511_v10  ;;  %914 = vmatmul.f32.gmra.mxu0 %v739_v11  ;;  %v545_v10 = vld [vmem:[%s13415_s1 + $0x6b8] sm:$0xff] }
  0x7b   : > { %943 = vmatmul.f32.gmra.mxu1 %v740_v12  ;;  %972 = vmatmul.f32.gmra.mxu2 %v741_v13  ;;  %v529_v11 = vld [vmem:[%s13415_s1 + $0x638] sm:$0xff]  ;;  %v578_v13 = vld [vmem:[%s13415_s1 + $0x7c0] sm:$0xff] }
  0x7c   : > { %1046 = vmatpush.msra.mxu1 %v477_v14  ;;  %1017 = vmatpush.msra.mxu0 %v461_v15  ;;  %v561_v12 = vld [vmem:[%s13415_s1 + $0x738] sm:$0xff]  ;;  %v544_v14 = vld [vmem:[%s13415_s1 + $0x6b0] sm:$0xff] }
  0x7d   : > { %1075 = vmatpush.msra.mxu2 %v493_v16  ;;  %1103 = vmatpush.msra.mxu3 %v510_v17  ;;  %v724_v15 = vld [vmem:[%s7239_s26 + $0x1b8] sm:$0xff]  ;;  %v528_v16 = vld [vmem:[%s13415_s1 + $0x630] sm:$0xff] }
  0x7e   : > { %1047 = vmatpush.msra.mxu1 %v476_v18  ;;  %1001 = vmatmul.f32.gmra.mxu3 %v742_v19  ;;  %v560_v17 = vld [vmem:[%s13415_s1 + $0x730] sm:$0xff]  ;;  %v577_v18 = vld [vmem:[%s13415_s1 + $0x7b8] sm:$0xff]  ;;  %v543_v19 = vld [vmem:[%s13415_s1 + $0x6a8] sm:$0xff] }
  0x7f   : > { %1018 = vmatpush.msra.mxu0 %v460_v20  ;;  %1076 = vmatpush.msra.mxu2 %v492_v21  ;;  %v527_v20 = vld [vmem:[%s13415_s1 + $0x628] sm:$0xff] }
  0x80   : > { %1104 = vmatpush.msra.mxu3 %v509_v22  ;;  %1048 = vmatpush.msra.mxu1 %v475_v23  ;;  %v559_v21 = vld [vmem:[%s13415_s1 + $0x728] sm:$0xff]  ;;  %v576_v22 = vld [vmem:[%s13415_s1 + $0x7b0] sm:$0xff]  ;;  %v542_v23 = vld [vmem:[%s13415_s1 + $0x6a0] sm:$0xff] }
  0x81   : > { %1019 = vmatpush.msra.mxu0 %v459_v24  ;;  %1077 = vmatpush.msra.mxu2 %v491_v25  ;;  %v526_v24 = vld [vmem:[%s13415_s1 + $0x620] sm:$0xff] }
  0x82   : > { %1105 = vmatpush.msra.mxu3 %v508_v26  ;;  %1049 = vmatpush.msra.mxu1 %v474_v27  ;;  %v558_v25 = vld [vmem:[%s13415_s1 + $0x720] sm:$0xff]  ;;  %v575_v26 = vld [vmem:[%s13415_s1 + $0x7a8] sm:$0xff]  ;;  %v743_v27 = vld [vmem:[%s7239_s26 + $0x250] sm:$0x1] }
  0x83   : > { %1020 = vmatpush.msra.mxu0 %v458_v28  ;;  %1078 = vmatpush.msra.mxu2 %v490_v29  ;;  %v744_v28 = vld [vmem:[%s7239_s26 + $0x258] sm:$0x1]  ;;  %v745_v29 = vld [vmem:[%s7239_s26 + $0x260] sm:$0x1] }
  0x84   : > { %1106 = vmatpush.msra.mxu3 %v507_v30  ;;  %1021 = vmatmul.f32.vlgmr.msra.gmra.mxu0 %v677_v31  ;;  %v541_v30 = vld [vmem:[%s13415_s1 + $0x698] sm:$0xff] }
  0x85   : > { %1050 = vmatmul.f32.vlgmr.msra.gmra.mxu1 %v678_v32  ;;  %1079 = vmatmul.f32.vlgmr.msra.gmra.mxu2 %v679_v33  ;;  %v525_v31 = vld [vmem:[%s13415_s1 + $0x618] sm:$0xff]  ;;  %v574_v33 = vld [vmem:[%s13415_s1 + $0x7a0] sm:$0xff] }
  0x86   : > { %1150 = vmatpush.msrb.mxu1 %v553_v34  ;;  %1107 = vmatpush.msra.mxu3 %v506_v35  ;;  %v557_v32 = vld [vmem:[%s13415_s1 + $0x718] sm:$0xff]  ;;  %v540_v34 = vld [vmem:[%s13415_s1 + $0x690] sm:$0xff]  ;;  %v746_v35 = vld [vmem:[%s7239_s26 + $0x268] sm:$0x1] }
  0x87   : > { %1121 = vmatpush.msrb.mxu0 %v537_v36  ;;  %1179 = vmatpush.msrb.mxu2 %v569_v37  ;;  %v524_v36 = vld [vmem:[%s13415_s1 + $0x610] sm:$0xff] }
  0x88   : > { %1108 = vmatmul.f32.vlgmr.msra.gmra.mxu3 %v680_v38  ;;  %1151 = vmatpush.msrb.mxu1 %v552_v39  ;;  %v556_v37 = vld [vmem:[%s13415_s1 + $0x710] sm:$0xff]  ;;  %v573_v38 = vld [vmem:[%s13415_s1 + $0x798] sm:$0xff]  ;;  %v539_v39 = vld [vmem:[%s13415_s1 + $0x688] sm:$0xff] }
  0x89   : > { %1122 = vmatpush.msrb.mxu0 %v536_v40  ;;  %1180 = vmatpush.msrb.mxu2 %v568_v41  ;;  %v523_v40 = vld [vmem:[%s13415_s1 + $0x608] sm:$0xff] }
  0x8a   : > { %1208 = vmatpush.msrb.mxu3 %v585_v42  ;;  %1152 = vmatpush.msrb.mxu1 %v551_v43  ;;  %v555_v41 = vld [vmem:[%s13415_s1 + $0x708] sm:$0xff]  ;;  %v572_v42 = vld [vmem:[%s13415_s1 + $0x790] sm:$0xff]  ;;  %v538_v43 = vld [vmem:[%s13415_s1 + $0x680] sm:$0xff] }
  0x8b   : > { %1123 = vmatpush.msrb.mxu0 %v535_v44  ;;  %1181 = vmatpush.msrb.mxu2 %v567_v45  ;;  %v522_v44 = vld [vmem:[%s13415_s1 + $0x600] sm:$0xff] }
  0x8c   : > { %1209 = vmatpush.msrb.mxu3 %v584_v46  ;;  %1153 = vmatpush.msrb.mxu1 %v550_v47  ;;  %v554_v45 = vld [vmem:[%s13415_s1 + $0x700] sm:$0xff]  ;;  %v571_v46 = vld [vmem:[%s13415_s1 + $0x788] sm:$0xff] }
  0x8d   : > { %1124 = vmatpush.msrb.mxu0 %v534_v48  ;;  %1182 = vmatpush.msrb.mxu2 %v566_v49  ;;  %v681_v47 = vld [vmem:[%s7239_s26 + $0x60] sm:$0xff]  ;;  %v682_v48 = vld [vmem:[%s7239_s26 + $0x68] sm:$0xff]  ;;  %v683_v49 = vld [vmem:[%s7239_s26 + $0x70] sm:$0xff] }
  0x8e   : > { %1210 = vmatpush.msrb.mxu3 %v583_v50  ;;  %1024 = vmatmul.f32.gmra.mxu0 %v699_v51  ;;  %v617_v50 = vld [vmem:[%s13415_s1 + $0x8f8] sm:$0xff]  ;;  %v570_v51 = vld [vmem:[%s13415_s1 + $0x780] sm:$0xff] }
  0x8f   : > { %1053 = vmatmul.f32.gmra.mxu1 %v700_v52  ;;  %1082 = vmatmul.f32.gmra.mxu2 %v701_v53  ;;  %v601_v52 = vld [vmem:[%s13415_s1 + $0x878] sm:$0xff] }
  0x90   : > { %1154 = vmatpush.msrb.mxu1 %v549_v54  ;;  %1125 = vmatpush.msrb.mxu0 %v533_v55  ;;  %v633_v53 = vld [vmem:[%s13415_s1 + $0x978] sm:$0xff]  ;;  %v616_v55 = vld [vmem:[%s13415_s1 + $0x8f0] sm:$0xff] }
  0x91   : > { %1183 = vmatpush.msrb.mxu2 %v565_v56  ;;  %1211 = vmatpush.msrb.mxu3 %v582_v57  ;;  %v684_v54 = vld [vmem:[%s7239_s26 + $0x78] sm:$0xff]  ;;  %v600_v56 = vld [vmem:[%s13415_s1 + $0x870] sm:$0xff] }
  0x92   : > { %1155 = vmatpush.msrb.mxu1 %v548_v58  ;;  %1111 = vmatmul.f32.gmra.mxu3 %v702_v59  ;;  %v632_v57 = vld [vmem:[%s13415_s1 + $0x970] sm:$0xff]  ;;  %v649_v58 = vld [vmem:[%s13415_s1 + $0x9f8] sm:$0xff]  ;;  %v615_v59 = vld [vmem:[%s13415_s1 + $0x8e8] sm:$0xff] }
  0x93   : > { %1126 = vmatpush.msrb.mxu0 %v532_v60  ;;  %1184 = vmatpush.msrb.mxu2 %v564_v61  ;;  %v599_v60 = vld [vmem:[%s13415_s1 + $0x868] sm:$0xff] }
  0x94   : > { %1212 = vmatpush.msrb.mxu3 %v581_v62  ;;  %1156 = vmatpush.msrb.mxu1 %v547_v63  ;;  %v631_v61 = vld [vmem:[%s13415_s1 + $0x968] sm:$0xff]  ;;  %v648_v62 = vld [vmem:[%s13415_s1 + $0x9f0] sm:$0xff]  ;;  %v614_v63 = vld [vmem:[%s13415_s1 + $0x8e0] sm:$0xff] }
  0x95   : > { %1127 = vmatpush.msrb.mxu0 %v531_v0  ;;  %1185 = vmatpush.msrb.mxu2 %v563_v1  ;;  %v598_v0 = vld [vmem:[%s13415_s1 + $0x860] sm:$0xff] }
  0x96   : > { %1213 = vmatpush.msrb.mxu3 %v580_v2  ;;  %1157 = vmatpush.msrb.mxu1 %v546_v3  ;;  %v630_v2 = vld [vmem:[%s13415_s1 + $0x960] sm:$0xff]  ;;  %v647_v3 = vld [vmem:[%s13415_s1 + $0x9e8] sm:$0xff] }
  0x97   : > { %1128 = vmatpush.msrb.mxu0 %v530_v4  ;;  %1186 = vmatpush.msrb.mxu2 %v562_v5  ;;  %v703_v5 = vld [vmem:[%s7239_s26 + $0x110] sm:$0xff] }
  0x98   : > { %1214 = vmatpush.msrb.mxu3 %v579_v6  ;;  %1027 = vmatmul.f32.gmra.mxu0 %v721_v7  ;;  %v704_v6 = vld [vmem:[%s7239_s26 + $0x118] sm:$0xff]  ;;  %v705_v7 = vld [vmem:[%s7239_s26 + $0x120] sm:$0xff] }
  0x99   : > { %1056 = vmatmul.f32.gmra.mxu1 %v722_v8  ;;  %1085 = vmatmul.f32.gmra.mxu2 %v723_v9  ;;  %v613_v8 = vld [vmem:[%s13415_s1 + $0x8d8] sm:$0xff] }
  0x9a   : > { %1158 = vmatpush.msrb.mxu1 %v545_v10  ;;  %1129 = vmatpush.msrb.mxu0 %v529_v11  ;;  %v597_v9 = vld [vmem:[%s13415_s1 + $0x858] sm:$0xff]  ;;  %v646_v11 = vld [vmem:[%s13415_s1 + $0x9e0] sm:$0xff] }
  0x9b   : > { %1187 = vmatpush.msrb.mxu2 %v561_v12  ;;  %1215 = vmatpush.msrb.mxu3 %v578_v13  ;;  %v629_v10 = vld [vmem:[%s13415_s1 + $0x958] sm:$0xff]  ;;  %v612_v12 = vld [vmem:[%s13415_s1 + $0x8d0] sm:$0xff]  ;;  %v706_v13 = vld [vmem:[%s7239_s26 + $0x128] sm:$0xff] }
  0x9c   : > { %1159 = vmatpush.msrb.mxu1 %v544_v14  ;;  %1114 = vmatmul.f32.gmra.mxu3 %v724_v15  ;;  %v596_v14 = vld [vmem:[%s13415_s1 + $0x850] sm:$0xff] }
  0x9d   : > { %1130 = vmatpush.msrb.mxu0 %v528_v16  ;;  %1188 = vmatpush.msrb.mxu2 %v560_v17  ;;  %v628_v15 = vld [vmem:[%s13415_s1 + $0x950] sm:$0xff]  ;;  %v645_v16 = vld [vmem:[%s13415_s1 + $0x9d8] sm:$0xff] }
  0x9e   : > { %1216 = vmatpush.msrb.mxu3 %v577_v18  ;;  %1160 = vmatpush.msrb.mxu1 %v543_v19  ;;  %v611_v18 = vld [vmem:[%s13415_s1 + $0x8c8] sm:$0xff] }
  0x9f   : > { %1131 = vmatpush.msrb.mxu0 %v527_v20  ;;  %1189 = vmatpush.msrb.mxu2 %v559_v21  ;;  %v595_v19 = vld [vmem:[%s13415_s1 + $0x848] sm:$0xff]  ;;  %v644_v21 = vld [vmem:[%s13415_s1 + $0x9d0] sm:$0xff] }
  0xa0   : > { %1217 = vmatpush.msrb.mxu3 %v576_v22  ;;  %1161 = vmatpush.msrb.mxu1 %v542_v23  ;;  %v627_v20 = vld [vmem:[%s13415_s1 + $0x948] sm:$0xff]  ;;  %v610_v22 = vld [vmem:[%s13415_s1 + $0x8c0] sm:$0xff] }
  0xa1   : > { %1132 = vmatpush.msrb.mxu0 %v526_v24  ;;  %1190 = vmatpush.msrb.mxu2 %v558_v25  ;;  %v594_v23 = vld [vmem:[%s13415_s1 + $0x840] sm:$0xff] }
  0xa2   : > { %1218 = vmatpush.msrb.mxu3 %v575_v26  ;;  %1030 = vmatmul.f32.gmra.mxu0 %v743_v27  ;;  %v626_v25 = vld [vmem:[%s13415_s1 + $0x940] sm:$0xff]  ;;  %v643_v26 = vld [vmem:[%s13415_s1 + $0x9c8] sm:$0xff] }
  0xa3   : > { %1059 = vmatmul.f32.gmra.mxu1 %v744_v28  ;;  %1088 = vmatmul.f32.gmra.mxu2 %v745_v29  ;;  %v725_v29 = vld [vmem:[%s7239_s26 + $0x1c0] sm:$0xff] }
  0xa4   : > { %1162 = vmatpush.msrb.mxu1 %v541_v30  ;;  %1133 = vmatpush.msrb.mxu0 %v525_v31  ;;  %v726_v30 = vld [vmem:[%s7239_s26 + $0x1c8] sm:$0xff]  ;;  %v727_v31 = vld [vmem:[%s7239_s26 + $0x1d0] sm:$0xff] }
  0xa5   : > { %1191 = vmatpush.msrb.mxu2 %v557_v32  ;;  %1219 = vmatpush.msrb.mxu3 %v574_v33  ;;  %v609_v32 = vld [vmem:[%s13415_s1 + $0x8b8] sm:$0xff] }
  0xa6   : > { %1163 = vmatpush.msrb.mxu1 %v540_v34  ;;  %1117 = vmatmul.f32.gmra.mxu3 %v746_v35  ;;  %v593_v33 = vld [vmem:[%s13415_s1 + $0x838] sm:$0xff]  ;;  %v642_v35 = vld [vmem:[%s13415_s1 + $0x9c0] sm:$0xff] }
  0xa7   : > { %1134 = vmatpush.msrb.mxu0 %v524_v36  ;;  %1192 = vmatpush.msrb.mxu2 %v556_v37  ;;  %v625_v34 = vld [vmem:[%s13415_s1 + $0x938] sm:$0xff]  ;;  %v608_v36 = vld [vmem:[%s13415_s1 + $0x8b0] sm:$0xff] }
  0xa8   : > { %1220 = vmatpush.msrb.mxu3 %v573_v38  ;;  %1164 = vmatpush.msrb.mxu1 %v539_v39  ;;  %v728_v37 = vld [vmem:[%s7239_s26 + $0x1d8] sm:$0xff]  ;;  %v592_v38 = vld [vmem:[%s13415_s1 + $0x830] sm:$0xff] }
  0xa9   : > { %1135 = vmatpush.msrb.mxu0 %v523_v40  ;;  %1193 = vmatpush.msrb.mxu2 %v555_v41  ;;  %v624_v39 = vld [vmem:[%s13415_s1 + $0x930] sm:$0xff]  ;;  %v641_v40 = vld [vmem:[%s13415_s1 + $0x9b8] sm:$0xff] }
  0xaa   : > { %1221 = vmatpush.msrb.mxu3 %v572_v42  ;;  %1165 = vmatpush.msrb.mxu1 %v538_v43  ;;  %v607_v42 = vld [vmem:[%s13415_s1 + $0x8a8] sm:$0xff] }
  0xab   : > { %1136 = vmatpush.msrb.mxu0 %v522_v44  ;;  %1194 = vmatpush.msrb.mxu2 %v554_v45  ;;  %v591_v43 = vld [vmem:[%s13415_s1 + $0x828] sm:$0xff]  ;;  %v640_v45 = vld [vmem:[%s13415_s1 + $0x9b0] sm:$0xff] }
  0xac   : > { %1222 = vmatpush.msrb.mxu3 %v571_v46  ;;  %1137 = vmatmul.f32.vlgmr.msrb.gmra.mxu0 %v681_v47  ;;  %v623_v44 = vld [vmem:[%s13415_s1 + $0x928] sm:$0xff]  ;;  %v606_v46 = vld [vmem:[%s13415_s1 + $0x8a0] sm:$0xff] }
  0xad   : > { %1166 = vmatmul.f32.vlgmr.msrb.gmra.mxu1 %v682_v48  ;;  %1195 = vmatmul.f32.vlgmr.msrb.gmra.mxu2 %v683_v49  ;;  %v590_v47 = vld [vmem:[%s13415_s1 + $0x820] sm:$0xff] }
  0xae   : > { %1266 = vmatpush.msra.mxu1 %v617_v50  ;;  %1223 = vmatpush.msrb.mxu3 %v570_v51  ;;  %v622_v49 = vld [vmem:[%s13415_s1 + $0x920] sm:$0xff]  ;;  %v639_v50 = vld [vmem:[%s13415_s1 + $0x9a8] sm:$0xff] }
  0xaf   : > { %1237 = vmatpush.msra.mxu0 %v601_v52  ;;  %1295 = vmatpush.msra.mxu2 %v633_v53  ;;  %v747_v53 = vld [vmem:[%s7239_s26 + $0x270] sm:$0x1] }
  0xb0   : > { %1224 = vmatmul.f32.vlgmr.msrb.gmra.mxu3 %v684_v54  ;;  %1267 = vmatpush.msra.mxu1 %v616_v55  ;;  %v748_v54 = vld [vmem:[%s7239_s26 + $0x278] sm:$0x1]  ;;  %v749_v55 = vld [vmem:[%s7239_s26 + $0x280] sm:$0x1] }
  0xb1   : > { %1238 = vmatpush.msra.mxu0 %v600_v56  ;;  %1296 = vmatpush.msra.mxu2 %v632_v57  ;;  %v7923_v1 = vpop.f32.mrf.mxu0  ;;  %v605_v56 = vld [vmem:[%s13415_s1 + $0x898] sm:$0xff] }
  0xb2   : > { %1324 = vmatpush.msra.mxu3 %v649_v58  ;;  %1268 = vmatpush.msra.mxu1 %v615_v59  ;;  %v7931_v4 = vpop.f32.mrf.mxu1  ;;  %v589_v57 = vld [vmem:[%s13415_s1 + $0x818] sm:$0xff]  ;;  %v638_v59 = vld [vmem:[%s13415_s1 + $0x9a0] sm:$0xff] }
  0xb3   : > { %1239 = vmatpush.msra.mxu0 %v599_v60  ;;  %1297 = vmatpush.msra.mxu2 %v631_v61  ;;  %v621_v58 = vld [vmem:[%s13415_s1 + $0x918] sm:$0xff]  ;;  %v604_v60 = vld [vmem:[%s13415_s1 + $0x890] sm:$0xff]  ;;  %v750_v61 = vld [vmem:[%s7239_s26 + $0x288] sm:$0x1] }
  0xb4   : > { %1325 = vmatpush.msra.mxu3 %v648_v62  ;;  %1269 = vmatpush.msra.mxu1 %v614_v63  ;;  %v588_v62 = vld [vmem:[%s13415_s1 + $0x810] sm:$0xff] }
  0xb5   : > { %1240 = vmatpush.msra.mxu0 %v598_v0  ;;  %1298 = vmatpush.msra.mxu2 %v630_v2  ;;  %v620_v63 = vld [vmem:[%s13415_s1 + $0x910] sm:$0xff]  ;;  %v637_v0 = vld [vmem:[%s13415_s1 + $0x998] sm:$0xff] }
  0xb6   : > { %1326 = vmatpush.msra.mxu3 %v647_v3  ;;  %1140 = vmatmul.f32.gmra.mxu0 %v703_v5  ;;  %v603_v3 = vld [vmem:[%s13415_s1 + $0x888] sm:$0xff] }
  0xb7   : > { %1169 = vmatmul.f32.gmra.mxu1 %v704_v6  ;;  %1198 = vmatmul.f32.gmra.mxu2 %v705_v7  ;;  %v587_v5 = vld [vmem:[%s13415_s1 + $0x808] sm:$0xff]  ;;  %v636_v7 = vld [vmem:[%s13415_s1 + $0x990] sm:$0xff] }
  0xb8   : > { %1270 = vmatpush.msra.mxu1 %v613_v8  ;;  %1241 = vmatpush.msra.mxu0 %v597_v9  ;;  %v7961_v17 = vpop.f32.mrf.mxu2  ;;  %v619_v6 = vld [vmem:[%s13415_s1 + $0x908] sm:$0xff]  ;;  %v602_v8 = vld [vmem:[%s13415_s1 + $0x880] sm:$0xff] }
  0xb9   : > { %1299 = vmatpush.msra.mxu2 %v629_v10  ;;  %1327 = vmatpush.msra.mxu3 %v646_v11  ;;  %v586_v9 = vld [vmem:[%s13415_s1 + $0x800] sm:$0xff] }
  0xba   : > { %1271 = vmatpush.msra.mxu1 %v612_v12  ;;  %1227 = vmatmul.f32.gmra.mxu3 %v706_v13  ;;  %v618_v11 = vld [vmem:[%s13415_s1 + $0x900] sm:$0xff]  ;;  %v635_v12 = vld [vmem:[%s13415_s1 + $0x988] sm:$0xff] }
  0xbb   : > { %1242 = vmatpush.msra.mxu0 %v596_v14  ;;  %1300 = vmatpush.msra.mxu2 %v628_v15  ;;  %v7981_v24 = vpop.f32.mrf.mxu0  ;;  %v7991_v28 = vpop.f32.mrf.mxu3  ;;  %v685_v15 = vld [vmem:[%s7239_s26 + $0x80] sm:$0xff] }
  0xbc   : > { %1328 = vmatpush.msra.mxu3 %v645_v16  ;;  %13426 = vst [vmem:[#allocation5_spill] sm:$0xff] %v7981_v24  ;;  %1272 = vmatpush.msra.mxu1 %v611_v18  ;;  %v7989_v27 = vpop.f32.mrf.mxu1  ;;  %v686_v16 = vld [vmem:[%s7239_s26 + $0x88] sm:$0xff]  ;;  %v687_v18 = vld [vmem:[%s7239_s26 + $0x90] sm:$0xff] }
  0xbd   : > { %1243 = vmatpush.msra.mxu0 %v595_v19  ;;  %13427 = vst [vmem:[#allocation6_spill] sm:$0xff] %v7989_v27  ;;  %1301 = vmatpush.msra.mxu2 %v627_v20  ;;  %v667_v19 = vld [vmem:[%s13415_s1 + $0xa88] sm:$0xff]  ;;  %v634_v20 = vld [vmem:[%s13415_s1 + $0x980] sm:$0xff] }
  0xbe   : > { %1329 = vmatpush.msra.mxu3 %v644_v21  ;;  %1273 = vmatpush.msra.mxu1 %v610_v22  ;;  %v665_v21 = vld [vmem:[%s13415_s1 + $0xa78] sm:$0xff]  ;;  %v5540_v27 = vld [vmem:[%s7239_s26 + $0xa28] sm:$0xff] }
  0xbf   : > { %1244 = vmatpush.msra.mxu0 %v594_v23  ;;  %1302 = vmatpush.msra.mxu2 %v626_v25  ;;  %v688_v22 = vld [vmem:[%s7239_s26 + $0x98] sm:$0xff]  ;;  %v664_v23 = vld [vmem:[%s13415_s1 + $0xa70] sm:$0xff]  ;;  %v666_v25 = vld [vmem:[%s13415_s1 + $0xa80] sm:$0xff] }
  0xc0   : > { %1330 = vmatpush.msra.mxu3 %v643_v26  ;;  %1143 = vmatmul.f32.gmra.mxu0 %v725_v29  ;;  %v5875_v29 = vld [vmem:[%s13415_s1 + $0x78] sm:$0xff] }
  0xc1   : > { %1172 = vmatmul.f32.gmra.mxu1 %v726_v30  ;;  %1201 = vmatmul.f32.gmra.mxu2 %v727_v31  ;;  %v663_v30 = vld [vmem:[%s13415_s1 + $0xa68] sm:$0xff]  ;;  %v5876_v31 = vld [vmem:[%s13415_s1 + $0xf8] sm:$0xff] }
  0xc2   : > { %1274 = vmatpush.msra.mxu1 %v609_v32  ;;  %1245 = vmatpush.msra.mxu0 %v593_v33  ;;  %v8021_v41 = vpop.f32.mrf.mxu2  ;;  %v5877_v32 = vld [vmem:[%s13415_s1 + $0x70] sm:$0xff]  ;;  %v662_v33 = vld [vmem:[%s13415_s1 + $0xa60] sm:$0xff] }
  0xc3   : > { %1303 = vmatpush.msra.mxu2 %v625_v34  ;;  %13428 = vst [vmem:[#allocation7_spill] sm:$0xff] %v8021_v41  ;;  %1331 = vmatpush.msra.mxu3 %v642_v35  ;;  %v5878_v35 = vld [vmem:[%s13415_s1 + $0xf0] sm:$0xff]  ;;  %v5539_v41 = vld [vmem:[%s7239_s26 + $0xa20] sm:$0xff] }
  0xc4   : > { %1275 = vmatpush.msra.mxu1 %v608_v36  ;;  %1230 = vmatmul.f32.gmra.mxu3 %v728_v37  ;;  %v707_v36 = vld [vmem:[%s7239_s26 + $0x130] sm:$0xff] }
  0xc5   : > { %1246 = vmatpush.msra.mxu0 %v592_v38  ;;  %1304 = vmatpush.msra.mxu2 %v624_v39  ;;  %v8041_v48 = vpop.f32.mrf.mxu0  ;;  %v8051_v52 = vpop.f32.mrf.mxu3  ;;  %v5879_v39 = vld [vmem:[%s13415_s1 + $0x68] sm:$0xff] }
  0xc6   : > { %1332 = vmatpush.msra.mxu3 %v641_v40  ;;  %13429 = vst [vmem:[#allocation8_spill] sm:$0xff] %v8041_v48  ;;  %1276 = vmatpush.msra.mxu1 %v607_v42  ;;  %v8049_v51 = vpop.f32.mrf.mxu1  ;;  %v708_v40 = vld [vmem:[%s7239_s26 + $0x138] sm:$0xff]  ;;  %v709_v42 = vld [vmem:[%s7239_s26 + $0x140] sm:$0xff] }
  0xc7   : > { %1247 = vmatpush.msra.mxu0 %v591_v43  ;;  %13430 = vst [vmem:[#allocation9_spill] sm:$0xff] %v8049_v51  ;;  %1305 = vmatpush.msra.mxu2 %v623_v44  ;;  %v5880_v43 = vld [vmem:[%s13415_s1 + $0x1f8] sm:$0xff]  ;;  %v5881_v44 = vld [vmem:[%s13415_s1 + $0xe8] sm:$0xff] }
  0xc8   : > { %13431 = vst [vmem:[#allocation10_spill] sm:$0xff] %v8051_v52  ;;  %1333 = vmatpush.msra.mxu3 %v640_v45  ;;  %1277 = vmatpush.msra.mxu1 %v606_v46  ;;  %v661_v45 = vld [vmem:[%s13415_s1 + $0xa58] sm:$0xff]  ;;  %v5882_v46 = vld [vmem:[%s13415_s1 + $0x60] sm:$0xff] }
  0xc9   : > { %1248 = vmatpush.msra.mxu0 %v590_v47  ;;  %1306 = vmatpush.msra.mxu2 %v622_v49  ;;  %v710_v47 = vld [vmem:[%s7239_s26 + $0x148] sm:$0xff]  ;;  %v660_v49 = vld [vmem:[%s13415_s1 + $0xa50] sm:$0xff] }
  0xca   : > { %1334 = vmatpush.msra.mxu3 %v639_v50  ;;  %1146 = vmatmul.f32.gmra.mxu0 %v747_v53  ;;  %v5883_v50 = vld [vmem:[%s13415_s1 + $0x58] sm:$0xff]  ;;  %v5884_v53 = vld [vmem:[%s13415_s1 + $0xe0] sm:$0xff] }
  0xcb   : > { %1175 = vmatmul.f32.gmra.mxu1 %v748_v54  ;;  %1204 = vmatmul.f32.gmra.mxu2 %v749_v55  ;;  %v659_v54 = vld [vmem:[%s13415_s1 + $0xa48] sm:$0xff]  ;;  %v5885_v55 = vld [vmem:[%s13415_s1 + $0x1f0] sm:$0xff] }
  0xcc   : > { %1278 = vmatpush.msra.mxu1 %v605_v56  ;;  %1249 = vmatpush.msra.mxu0 %v589_v57  ;;  %v8081_v2 = vpop.f32.mrf.mxu2  ;;  %v5886_v57 = vld [vmem:[%s13415_s1 + $0x50] sm:$0xff] }
  0xcd   : > { %1307 = vmatpush.msra.mxu2 %v621_v58  ;;  %13432 = vst [vmem:[#allocation11_spill] sm:$0xff] %v8081_v2  ;;  %1335 = vmatpush.msra.mxu3 %v638_v59  ;;  %v5887_v58 = vld [vmem:[%s13415_s1 + $0xd8] sm:$0xff]  ;;  %v658_v59 = vld [vmem:[%s13415_s1 + $0xa40] sm:$0xff] }
  0xce   : > { %1279 = vmatpush.msra.mxu1 %v604_v60  ;;  %1233 = vmatmul.f32.gmra.mxu3 %v750_v61  ;;  %v5888_v60 = vld [vmem:[%s13415_s1 + $0x1e8] sm:$0xff] }
  0xcf   : > { %1250 = vmatpush.msra.mxu0 %v588_v62  ;;  %1308 = vmatpush.msra.mxu2 %v620_v63  ;;  %v8101_v10 = vpop.f32.mrf.mxu0  ;;  %v8111_v14 = vpop.f32.mrf.mxu3  ;;  %v5889_v62 = vld [vmem:[%s13415_s1 + $0x48] sm:$0xff]  ;;  %v5890_v63 = vld [vmem:[%s13415_s1 + $0xd0] sm:$0xff] }
  0xd0   : > { %1336 = vmatpush.msra.mxu3 %v637_v0  ;;  %13433 = vst [vmem:[#allocation12_spill] sm:$0xff] %v8101_v10  ;;  %1280 = vmatpush.msra.mxu1 %v603_v3  ;;  %v8109_v13 = vpop.f32.mrf.mxu1  ;;  %v729_v0 = vld [vmem:[%s7239_s26 + $0x1e0] sm:$0xff]  ;;  %v730_v3 = vld [vmem:[%s7239_s26 + $0x1e8] sm:$0xff] }
  0xd1   : > { %1251 = vmatpush.msra.mxu0 %v587_v5  ;;  %13434 = vst [vmem:[#allocation13_spill] sm:$0xff] %v8109_v13  ;;  %1309 = vmatpush.msra.mxu2 %v619_v6  ;;  %v6129_v10 = vld [vmem:[%s13415_s1 + $0x8c8] sm:$0xff] }
  0xd2   : > { %13435 = vst [vmem:[#allocation14_spill] sm:$0xff] %v8111_v14  ;;  %1337 = vmatpush.msra.mxu3 %v636_v7  ;;  %1281 = vmatpush.msra.mxu1 %v602_v8  ;;  %v731_v7 = vld [vmem:[%s7239_s26 + $0x1f0] sm:$0xff]  ;;  %v657_v8 = vld [vmem:[%s13415_s1 + $0xa38] sm:$0xff] }
  0xd3   : > { %1252 = vmatpush.msra.mxu0 %v586_v9  ;;  %1310 = vmatpush.msra.mxu2 %v618_v11  ;;  %v5891_v9 = vld [vmem:[%s13415_s1 + $0x1e0] sm:$0xff] }
  0xd4   : > { %1338 = vmatpush.msra.mxu3 %v635_v12  ;;  %1253 = vmatmul.f32.vlgmr.msra.gmra.mxu0 %v685_v15  ;;  %v5892_v11 = vld [vmem:[%s13415_s1 + $0x40] sm:$0xff]  ;;  %v5893_v12 = vld [vmem:[%s13415_s1 + $0xc8] sm:$0xff]  ;;  %v732_v15 = vld [vmem:[%s7239_s26 + $0x1f8] sm:$0xff] }
  0xd5   : > { %1282 = vmatmul.f32.vlgmr.msra.gmra.mxu1 %v686_v16  ;;  %1311 = vmatmul.f32.vlgmr.msra.gmra.mxu2 %v687_v18  ;;  %v656_v16 = vld [vmem:[%s13415_s1 + $0xa30] sm:$0xff]  ;;  %v5894_v18 = vld [vmem:[%s13415_s1 + $0x38] sm:$0xff] }
  0xd6   : > { %1396 = vmatpush.msrb.mxu1 %v667_v19  ;;  %1339 = vmatpush.msra.mxu3 %v634_v20  ;;  %v8132_v26 = vpop.f32.mrf.mxu2  ;;  %v5895_v19 = vld [vmem:[%s13415_s1 + $0xc0] sm:$0xff]  ;;  %v655_v20 = vld [vmem:[%s13415_s1 + $0xa28] sm:$0xff] }
  0xd7   : > { %1353 = vmatpush.msrb.mxu0 %v665_v21  ;;  %13436 = vst [vmem:[#allocation15_spill] sm:$0xff] %v8132_v26  ;;  %1516 = vmatpush.msrb.mxu2 %v5875_v29  ;;  %v5898_v29 = vld [vmem:[%s13415_s1 + $0x1d8] sm:$0xff] }
  0xd8   : > { %1340 = vmatmul.f32.vlgmr.msra.gmra.mxu3 %v688_v22  ;;  %1397 = vmatpush.msrb.mxu1 %v666_v25  ;;  %v5896_v22 = vld [vmem:[%s13415_s1 + $0x30] sm:$0xff]  ;;  %v654_v25 = vld [vmem:[%s13415_s1 + $0xa20] sm:$0xff] }
  0xd9   : > { %1354 = vmatpush.msrb.mxu0 %v664_v23  ;;  %1545 = vmatpush.msrb.mxu3 %v5876_v31  ;;  %v8149_v34 = vpop.f32.mrf.mxu0  ;;  %v8155_v37 = vpop.f32.mrf.mxu3  ;;  %v5897_v23 = vld [vmem:[%s13415_s1 + $0xb8] sm:$0xff]  ;;  %v5900_v31 = vld [vmem:[%s13415_s1 + $0xb0] sm:$0xff] }
  0xda   : > { %1517 = vmatpush.msrb.mxu2 %v5877_v32  ;;  %13437 = vst [vmem:[#allocation16_spill] sm:$0xff] %v8155_v37  ;;  %v8157_v38 = vpop.f32.mrf.mxu1  ;;  %1603 = vmatpush.msra.mxu1 %v5880_v43  ;;  %v751_v32 = vld [vmem:[%s7239_s26 + $0x290] sm:$0x1] }
  0xdb   : > { %1355 = vmatpush.msrb.mxu0 %v663_v30  ;;  %1546 = vmatpush.msrb.mxu3 %v5878_v35  ;;  %v5899_v30 = vld [vmem:[%s13415_s1 + $0x28] sm:$0xff]  ;;  %v5369_v37 = vld [vmem:[%s7239_s26 + $0x510] sm:$0x1] }
  0xdc   : > { %1518 = vmatpush.msrb.mxu2 %v5879_v39  ;;  %1256 = vmatmul.f32.gmra.mxu0 %v707_v36  ;;  %v753_v36 = vld [vmem:[%s7239_s26 + $0x2a0] sm:$0x1]  ;;  %v653_v39 = vld [vmem:[%s13415_s1 + $0xa18] sm:$0xff] }
  0xdd   : > { %1356 = vmatpush.msrb.mxu0 %v662_v33  ;;  %1547 = vmatpush.msrb.mxu3 %v5881_v44  ;;  %v752_v33 = vld [vmem:[%s7239_s26 + $0x298] sm:$0x1]  ;;  %v5902_v44 = vld [vmem:[%s13415_s1 + $0x20] sm:$0xff] }
  0xde   : > { %1519 = vmatpush.msrb.mxu2 %v5882_v46  ;;  %1285 = vmatmul.f32.gmra.mxu1 %v708_v40  ;;  %v5901_v40 = vld [vmem:[%s13415_s1 + $0x1d0] sm:$0xff]  ;;  %v754_v46 = vld [vmem:[%s7239_s26 + $0x2a8] sm:$0x1] }
  0xdf   : > { %1314 = vmatmul.f32.gmra.mxu2 %v709_v42  ;;  %1357 = vmatpush.msrb.mxu0 %v661_v45  ;;  %v5903_v45 = vld [vmem:[%s13415_s1 + $0xa8] sm:$0xff] }
  0xe0   : > { %1520 = vmatpush.msrb.mxu2 %v5883_v50  ;;  %1548 = vmatpush.msrb.mxu3 %v5884_v53  ;;  %v8192_v56 = vpop.f32.mrf.mxu2  ;;  %v5905_v50 = vld [vmem:[%s13415_s1 + $0xa0] sm:$0xff]  ;;  %v651_v53 = vld [vmem:[%s13415_s1 + $0xa08] sm:$0xff] }
  0xe1   : > { %1604 = vmatpush.msra.mxu1 %v5885_v55  ;;  %1343 = vmatmul.f32.gmra.mxu3 %v710_v47  ;;  %v652_v47 = vld [vmem:[%s13415_s1 + $0xa10] sm:$0xff]  ;;  %v5907_v55 = vld [vmem:[%s13415_s1 + $0x98] sm:$0xff] }
  0xe2   : > { %1358 = vmatpush.msrb.mxu0 %v660_v49  ;;  %1521 = vmatpush.msrb.mxu2 %v5886_v57  ;;  %v5904_v49 = vld [vmem:[%s13415_s1 + $0x18] sm:$0xff]  ;;  %v650_v57 = vld [vmem:[%s13415_s1 + $0xa00] sm:$0xff] }
  0xe3   : > { %1549 = vmatpush.msrb.mxu3 %v5887_v58  ;;  %1605 = vmatpush.msra.mxu1 %v5888_v60  ;;  %v8206_v61 = vpop.f32.mrf.mxu0  ;;  %v8218_v6 = vpop.f32.mrf.mxu3  ;;  %v5909_v60 = vld [vmem:[%s13415_s1 + $0x8] sm:$0xff] }
  0xe4   : > { %1359 = vmatpush.msrb.mxu0 %v659_v54  ;;  %13438 = vst [vmem:[#allocation17_spill] sm:$0xff] %v8206_v61  ;;  %1522 = vmatpush.msrb.mxu2 %v5889_v62  ;;  %v8216_v5 = vpop.f32.mrf.mxu1  ;;  %v5906_v54 = vld [vmem:[%s13415_s1 + $0x10] sm:$0xff] }
  0xe5   : > { %1550 = vmatpush.msrb.mxu3 %v5890_v63  ;;  %13439 = vst [vmem:[#allocation18_spill] sm:$0xff] %v8216_v5  ;;  %1606 = vmatpush.msra.mxu1 %v5891_v9  ;;  %v5910_v62 = vld [vmem:[%s13415_s1 + $0x90] sm:$0xff]  ;;  %v689_v63 = vld [vmem:[%s7239_s26 + $0xa0] sm:$0xff] }
  0xe6   : > { %13440 = vst [vmem:[#allocation19_spill] sm:$0xff] %v8218_v6  ;;  %1360 = vmatpush.msrb.mxu0 %v658_v59  ;;  %1523 = vmatpush.msrb.mxu2 %v5892_v11  ;;  %v5908_v59 = vld [vmem:[%s13415_s1 + $0x1c8] sm:$0xff]  ;;  %v5912_v9 = vld [vmem:[%s13415_s1] sm:$0xff] }
  0xe7   : > { %1551 = vmatpush.msrb.mxu3 %v5893_v12  ;;  %1259 = vmatmul.f32.gmra.mxu0 %v729_v0  ;;  %v690_v0 = vld [vmem:[%s7239_s26 + $0xa8] sm:$0xff] }
  0xe8   : > { %1288 = vmatmul.f32.gmra.mxu1 %v730_v3  ;;  %1317 = vmatmul.f32.gmra.mxu2 %v731_v7  ;;  %v5295_v3 = vld [vmem:[%s7239_s26 + $0x2c0] sm:$0xff]  ;;  %v5913_v11 = vld [vmem:[%s13415_s1 + $0x88] sm:$0xff] }
  0xe9   : > { %1361 = vmatpush.msrb.mxu0 %v657_v8  ;;  %1524 = vmatpush.msrb.mxu2 %v5894_v18  ;;  %v5911_v7 = vld [vmem:[%s13415_s1 + $0x1c0] sm:$0xff] }
  0xea   : > { %1552 = vmatpush.msrb.mxu3 %v5895_v19  ;;  %v8246_v21 = vpop.f32.mrf.mxu2  ;;  %1607 = vmatpush.msra.mxu1 %v5898_v29  ;;  %v5914_v18 = vld [vmem:[%s13415_s1 + $0x80] sm:$0xff]  ;;  %v5915_v19 = vld [vmem:[%s13415_s1 + $0x178] sm:$0xff] }
  0xeb   : > { %1346 = vmatmul.f32.gmra.mxu3 %v732_v15  ;;  %1362 = vmatpush.msrb.mxu0 %v656_v16  ;;  %13441 = vst [vmem:[#allocation20_spill] sm:$0xff] %v8246_v21  ;;  %v5296_v16 = vld [vmem:[%s7239_s26 + $0x2c8] sm:$0xff]  ;;  %v5920_v29 = vld [vmem:[%s13415_s1 + $0x2f8] sm:$0xff] }
  0xec   : > { %1525 = vmatpush.msrb.mxu2 %v5896_v22  ;;  %1553 = vmatpush.msrb.mxu3 %v5897_v23  ;;  %v5917_v22 = vld [vmem:[%s13415_s1 + $0x1b8] sm:$0xff]  ;;  %v5918_v23 = vld [vmem:[%s13415_s1 + $0x170] sm:$0xff]  ;;  %v5428_v21 = vld [vmem:[%s7239_s26 + $0x6c8] sm:$0xff] }
  0xed   : > { %1363 = vmatpush.msrb.mxu0 %v655_v20  ;;  %v8268_v35 = vpop.f32.mrf.mxu0  ;;  %1608 = vmatpush.msra.mxu1 %v5901_v40  ;;  %v8279_v43 = vpop.f32.mrf.mxu3  ;;  %v5916_v20 = vld [vmem:[%s13415_s1 + $0x278] sm:$0xff] }
  0xee   : > { %1526 = vmatpush.msrb.mxu2 %v5899_v30  ;;  %1554 = vmatpush.msrb.mxu3 %v5900_v31  ;;  %13442 = vst [vmem:[#allocation21_spill] sm:$0xff] %v8268_v35  ;;  %v8277_v42 = vpop.f32.mrf.mxu1  ;;  %v5921_v30 = vld [vmem:[%s13415_s1 + $0x1b0] sm:$0xff]  ;;  %v712_v40 = vld [vmem:[%s7239_s26 + $0x158] sm:$0xff]  ;;  %v6203_v35 = vld [vmem:[%s13415_s1 + $0x920] sm:$0xff] }
  0xef   : > { %1364 = vmatpush.msrb.mxu0 %v654_v25  ;;  %13443 = vst [vmem:[#allocation22_spill] sm:$0xff] %v8277_v42  ;;  %1609 = vmatpush.msra.mxu1 %v5908_v59  ;;  %v5919_v25 = vld [vmem:[%s13415_s1 + $0x270] sm:$0xff]  ;;  %v5930_v59 = vld [vmem:[%s13415_s1 + $0x258] sm:$0xff] }
  0xf0   : > { %13444 = vst [vmem:[#allocation23_spill] sm:$0xff] %v8279_v43  ;;  %1527 = vmatpush.msrb.mxu2 %v5902_v44  ;;  %1555 = vmatpush.msrb.mxu3 %v5903_v45  ;;  %v5317_v44 = vld [vmem:[%s7239_s26 + $0x370] sm:$0xff]  ;;  %v5925_v45 = vld [vmem:[%s13415_s1 + $0x1a8] sm:$0xff]  ;;  %v6501_v43 = vld [vmem:[%s13415_s1 + $0x838] sm:$0xff] }
  0xf1   : > { %1262 = vmatmul.f32.gmra.mxu0 %v751_v32  ;;  %1291 = vmatmul.f32.gmra.mxu1 %v752_v33  ;;  %v5922_v32 = vld [vmem:[%s13415_s1 + $0x168] sm:$0xff] }
  0xf2   : > { %1320 = vmatmul.f32.gmra.mxu2 %v753_v36  ;;  %1365 = vmatpush.msrb.mxu0 %v653_v39  ;;  %v5923_v33 = vld [vmem:[%s13415_s1 + $0x268] sm:$0xff]  ;;  %v711_v36 = vld [vmem:[%s7239_s26 + $0x150] sm:$0xff] }
  0xf3   : > { %1528 = vmatpush.msrb.mxu2 %v5904_v49  ;;  %1556 = vmatpush.msrb.mxu3 %v5905_v50  ;;  %v5924_v39 = vld [vmem:[%s13415_s1 + $0x2f0] sm:$0xff]  ;;  %v5928_v50 = vld [vmem:[%s13415_s1 + $0x2e8] sm:$0xff] }
  0xf4   : > { %1349 = vmatmul.f32.gmra.mxu3 %v754_v46  ;;  %1366 = vmatpush.msrb.mxu0 %v652_v47  ;;  %v8309_v58 = vpop.f32.mrf.mxu2  ;;  %v5926_v46 = vld [vmem:[%s13415_s1 + $0x160] sm:$0xff] }
  0xf5   : > { %1529 = vmatpush.msrb.mxu2 %v5906_v54  ;;  %1557 = vmatpush.msrb.mxu3 %v5907_v55  ;;  %13445 = vst [vmem:[#allocation24_spill] sm:$0xff] %v8309_v58  ;;  %v5927_v47 = vld [vmem:[%s13415_s1 + $0x260] sm:$0xff]  ;;  %v5318_v55 = vld [vmem:[%s7239_s26 + $0x378] sm:$0xff] }
  0xf6   : > { %1367 = vmatpush.msrb.mxu0 %v651_v53  ;;  %1610 = vmatpush.msra.mxu1 %v5911_v7  ;;  %v5936_v7 = vld [vmem:[%s13415_s1 + $0x148] sm:$0xff] }
  0xf7   : > { %1530 = vmatpush.msrb.mxu2 %v5909_v60  ;;  %1558 = vmatpush.msrb.mxu3 %v5910_v62  ;;  %v8326_v8 = vpop.f32.mrf.mxu0  ;;  %v8336_v15 = vpop.f32.mrf.mxu3  ;;  %v5931_v60 = vld [vmem:[%s13415_s1 + $0x2e0] sm:$0xff] }
  0xf8   : > { %1368 = vmatpush.msrb.mxu0 %v650_v57  ;;  %13446 = vst [vmem:[#allocation25_spill] sm:$0xff] %v8326_v8  ;;  %v8334_v12 = vpop.f32.mrf.mxu1  ;;  %1611 = vmatpush.msra.mxu1 %v5917_v22  ;;  %v5929_v57 = vld [vmem:[%s13415_s1 + $0x158] sm:$0xff]  ;;  %v5932_v62 = vld [vmem:[%s13415_s1 + $0x1a0] sm:$0xff]  ;;  %v5368_v8 = vld [vmem:[%s7239_s26 + $0x508] sm:$0x1] }
  0xf9   : > { %1531 = vmatpush.msrb.mxu2 %v5912_v9  ;;  %1559 = vmatpush.msrb.mxu3 %v5913_v11  ;;  %13447 = vst [vmem:[#allocation26_spill] sm:$0xff] %v8334_v12  ;;  %v5937_v9 = vld [vmem:[%s13415_s1 + $0x198] sm:$0xff]  ;;  %v5940_v22 = vld [vmem:[%s13415_s1 + $0x140] sm:$0xff] }
  0xfa   : > { %13448 = vst [vmem:[#allocation27_spill] sm:$0xff] %v8336_v15  ;;  %1369 = vmatmul.f32.vlgmr.msrb.gmra.mxu0 %v689_v63  ;;  %5291 = vmatmul.msk.f32.vlgmr.msrb.gmra.mxu1 %vm760_vm0, %v690_v0  ;;  %v5933_v63 = vld [vmem:[%s13415_s1 + $0x150] sm:$0xff] }
  0xfb   : > { %1532 = vmatmul.f32.vlgmr.msrb.gmra.mxu2 %v5295_v3  ;;  %1560 = vmatpush.msrb.mxu3 %v5914_v18  ;;  %v5934_v0 = vld [vmem:[%s13415_s1 + $0x250] sm:$0xff]  ;;  %v5935_v3 = vld [vmem:[%s13415_s1 + $0x2d8] sm:$0xff] }
  0xfc   : > { %1574 = vmatpush.msra.mxu0 %v5915_v19  ;;  %1632 = vmatpush.msra.mxu2 %v5916_v20  ;;  %v5939_v18 = vld [vmem:[%s13415_s1 + $0x2d0] sm:$0xff]  ;;  %v733_v19 = vld [vmem:[%s7239_s26 + $0x200] sm:$0xff]  ;;  %v734_v20 = vld [vmem:[%s7239_s26 + $0x208] sm:$0xff] }
  0xfd   : > { %1561 = vmatmul.f32.vlgmr.msrb.gmra.mxu3 %v5296_v16  ;;  %1612 = vmatpush.msra.mxu1 %v5921_v30  ;;  %v5938_v16 = vld [vmem:[%s13415_s1 + $0x248] sm:$0xff] }
  0xfe   : > { %1575 = vmatpush.msra.mxu0 %v5918_v23  ;;  %1633 = vmatpush.msra.mxu2 %v5919_v25  ;;  %v8364_v31 = vpop.f32.mrf.mxu2  ;;  %v5339_v23 = vld [vmem:[%s7239_s26 + $0x420] sm:$0xff]  ;;  %v5941_v25 = vld [vmem:[%s13415_s1 + $0x190] sm:$0xff]  ;;  %v5943_v30 = vld [vmem:[%s13415_s1 + $0x2c8] sm:$0xff] }
  0xff   : > { %1661 = vmatpush.msra.mxu3 %v5920_v29  ;;  %13449 = vst [vmem:[#allocation28_spill] sm:$0xff] %v8364_v31  ;;  %1613 = vmatpush.msra.mxu1 %v5925_v45  ;;  %v5942_v29 = vld [vmem:[%s13415_s1 + $0x240] sm:$0xff] }
 0x100   : > { %1576 = vmatpush.msra.mxu0 %v5922_v32  ;;  %1634 = vmatpush.msra.mxu2 %v5923_v33  ;;  %v5340_v33 = vld [vmem:[%s7239_s26 + $0x428] sm:$0xff]  ;;  %v5946_v45 = vld [vmem:[%s13415_s1 + $0x2c0] sm:$0xff] }
 0x101   : > { %1662 = vmatpush.msra.mxu3 %v5924_v39  ;;  %v8387_v49 = vpop.f32.mrf.mxu0  ;;  %v8392_v53 = vpop.f32.mrf.mxu3  ;;  %1614 = vmatpush.msra.mxu1 %v5932_v62  ;;  %v755_v62 = vld [vmem:[%s7239_s26 + $0x2b0] sm:$0x1] }
 0x102   : > { %1577 = vmatpush.msra.mxu0 %v5926_v46  ;;  %1635 = vmatpush.msra.mxu2 %v5927_v47  ;;  %13450 = vst [vmem:[#allocation29_spill] sm:$0xff] %v8387_v49  ;;  %v8394_v54 = vpop.f32.mrf.mxu1  ;;  %v5947_v46 = vld [vmem:[%s13415_s1 + $0x130] sm:$0xff] }
 0x103   : > { %1663 = vmatpush.msra.mxu3 %v5928_v50  ;;  %1372 = vmatmul.f32.gmra.mxu0 %v711_v36  ;;  %13451 = vst [vmem:[#allocation30_spill] sm:$0xff] %v8392_v53  ;;  %v5948_v47 = vld [vmem:[%s13415_s1 + $0x230] sm:$0xff]  ;;  %v5949_v50 = vld [vmem:[%s13415_s1 + $0x2b8] sm:$0xff]  ;;  %v5347_v53 = vld [vmem:[%s7239_s26 + $0x460] sm:$0xff] }
 0x104   : > { %13452 = vst [vmem:[#allocation31_spill] sm:$0xff] %v8394_v54  ;;  %5292 = vmatmul.msk.f32.gmra.mxu1 %vm760_vm0, %v712_v40  ;;  %1535 = vmatmul.f32.gmra.mxu2 %v5317_v44  ;;  %v5944_v40 = vld [vmem:[%s13415_s1 + $0x138] sm:$0xff] }
 0x105   : > { %1578 = vmatpush.msra.mxu0 %v5929_v57  ;;  %1636 = vmatpush.msra.mxu2 %v5930_v59  ;;  %v5945_v44 = vld [vmem:[%s13415_s1 + $0x238] sm:$0xff]  ;;  %v5951_v57 = vld [vmem:[%s13415_s1 + $0x188] sm:$0xff] }
 0x106   : > { %1664 = vmatpush.msra.mxu3 %v5931_v60  ;;  %1615 = vmatpush.msra.mxu1 %v5937_v9  ;;  %v5952_v59 = vld [vmem:[%s13415_s1 + $0x228] sm:$0xff]  ;;  %v5953_v60 = vld [vmem:[%s13415_s1 + $0x2b0] sm:$0xff]  ;;  %v5955_v9 = vld [vmem:[%s13415_s1 + $0x180] sm:$0xff] }
 0x107   : > { %1564 = vmatmul.f32.gmra.mxu3 %v5318_v55  ;;  %1579 = vmatpush.msra.mxu0 %v5933_v63  ;;  %v5950_v55 = vld [vmem:[%s13415_s1 + $0x128] sm:$0xff]  ;;  %v756_v63 = vld [vmem:[%s7239_s26 + $0x2b8] sm:$0x1] }
 0x108   : > { %1637 = vmatpush.msra.mxu2 %v5934_v0  ;;  %1665 = vmatpush.msra.mxu3 %v5935_v3  ;;  %v8425_v11 = vpop.f32.mrf.mxu2  ;;  %v5954_v3 = vld [vmem:[%s13415_s1 + $0x120] sm:$0xff] }
 0x109   : > { %1580 = vmatpush.msra.mxu0 %v5936_v7  ;;  %13453 = vst [vmem:[#allocation32_spill] sm:$0xff] %v8425_v11  ;;  %1616 = vmatpush.msra.mxu1 %v5941_v25  ;;  %v5361_v7 = vld [vmem:[%s7239_s26 + $0x4d0] sm:$0x1]  ;;  %v5562_v11 = vld [vmem:[%s7239_s26 + $0xad8] sm:$0x1] }
 0x10a   : > { %1638 = vmatpush.msra.mxu2 %v5938_v16  ;;  %1666 = vmatpush.msra.mxu3 %v5939_v18  ;;  %v5956_v16 = vld [vmem:[%s13415_s1 + $0x220] sm:$0xff]  ;;  %v5957_v18 = vld [vmem:[%s13415_s1 + $0x2a8] sm:$0xff] }
 0x10b   : > { %1581 = vmatpush.msra.mxu0 %v5940_v22  ;;  %v8448_v32 = vpop.f32.mrf.mxu0  ;;  %v8454_v39 = vpop.f32.mrf.mxu3  ;;  %1617 = vmatpush.msra.mxu1 %v5951_v57  ;;  %v5958_v22 = vld [vmem:[%s13415_s1 + $0x118] sm:$0xff] }
 0x10c   : > { %1639 = vmatpush.msra.mxu2 %v5942_v29  ;;  %1667 = vmatpush.msra.mxu3 %v5943_v30  ;;  %13454 = vst [vmem:[#allocation33_spill] sm:$0xff] %v8448_v32  ;;  %v8452_v36 = vpop.f32.mrf.mxu1  ;;  %v5959_v29 = vld [vmem:[%s13415_s1 + $0x218] sm:$0xff]  ;;  %v5960_v30 = vld [vmem:[%s13415_s1 + $0x2a0] sm:$0xff] }
 0x10d   : > { %1375 = vmatmul.f32.gmra.mxu0 %v733_v19  ;;  %5293 = vmatmul.msk.f32.gmra.mxu1 %vm760_vm0, %v734_v20  ;;  %13455 = vst [vmem:[#allocation34_spill] sm:$0xff] %v8452_v36  ;;  %v5362_v19 = vld [vmem:[%s7239_s26 + $0x4d8] sm:$0x1] }
 0x10e   : > { %13456 = vst [vmem:[#allocation35_spill] sm:$0xff] %v8454_v39  ;;  %1538 = vmatmul.f32.gmra.mxu2 %v5339_v23  ;;  %1582 = vmatpush.msra.mxu0 %v5944_v40  ;;  %v5962_v40 = vld [vmem:[%s13415_s1 + $0x210] sm:$0xff]  ;;  %v5298_v57 = vld [vmem:[%s7239_s26 + $0x2d8] sm:$0xff] }
 0x10f   : > { %1640 = vmatpush.msra.mxu2 %v5945_v44  ;;  %1668 = vmatpush.msra.mxu3 %v5946_v45  ;;  %v5963_v44 = vld [vmem:[%s13415_s1 + $0x298] sm:$0xff]  ;;  %v5964_v45 = vld [vmem:[%s13415_s1 + $0x108] sm:$0xff] }
 0x110   : > { %1567 = vmatmul.f32.gmra.mxu3 %v5340_v33  ;;  %1583 = vmatpush.msra.mxu0 %v5947_v46  ;;  %v5961_v33 = vld [vmem:[%s13415_s1 + $0x110] sm:$0xff]  ;;  %v5965_v46 = vld [vmem:[%s13415_s1 + $0x3f8] sm:$0xff] }
 0x111   : > { %1641 = vmatpush.msra.mxu2 %v5948_v47  ;;  %1669 = vmatpush.msra.mxu3 %v5949_v50  ;;  %v5966_v47 = vld [vmem:[%s13415_s1 + $0x208] sm:$0xff]  ;;  %v5967_v50 = vld [vmem:[%s13415_s1 + $0x290] sm:$0xff]  ;;  %v6485_v32 = vld [vmem:[%s13415_s1 + $0x858] sm:$0xff] }
 0x112   : > { %1584 = vmatpush.msra.mxu0 %v5950_v55  ;;  %v8488_v0 = vpop.f32.mrf.mxu2  ;;  %1618 = vmatpush.msra.mxu1 %v5955_v9  ;;  %v5297_v55 = vld [vmem:[%s7239_s26 + $0x2d0] sm:$0xff]  ;;  %v5300_v9 = vld [vmem:[%s7239_s26 + $0x2e8] sm:$0xff] }
 0x113   : > { %1642 = vmatpush.msra.mxu2 %v5952_v59  ;;  %1670 = vmatpush.msra.mxu3 %v5953_v60  ;;  %13457 = vst [vmem:[#allocation36_spill] sm:$0xff] %v8488_v0  ;;  %v5968_v59 = vld [vmem:[%s13415_s1 + $0x100] sm:$0xff] }
 0x114   : > { %1585 = vmatpush.msra.mxu0 %v5954_v3  ;;  %1719 = vmatpush.msrb.mxu1 %v5965_v46  ;;  %v5299_v60 = vld [vmem:[%s7239_s26 + $0x2e0] sm:$0xff] }
 0x115   : > { %1643 = vmatpush.msra.mxu2 %v5956_v16  ;;  %1671 = vmatpush.msra.mxu3 %v5957_v18  ;;  %v8505_v20 = vpop.f32.mrf.mxu0  ;;  %v8512_v25 = vpop.f32.mrf.mxu3  ;;  %v5970_v3 = vld [vmem:[%s13415_s1 + $0x200] sm:$0xff] }
 0x116   : > { %1378 = vmatmul.f32.gmra.mxu0 %v755_v62  ;;  %5294 = vmatmul.msk.f32.gmra.mxu1 %vm760_vm0, %v756_v63  ;;  %13458 = vst [vmem:[#allocation37_spill] sm:$0xff] %v8505_v20  ;;  %v8510_v23 = vpop.f32.mrf.mxu1  ;;  %v5969_v62 = vld [vmem:[%s13415_s1 + $0x3f0] sm:$0xff]  ;;  %v5972_v16 = vld [vmem:[%s13415_s1 + $0x280] sm:$0xff] }
 0x117   : > { %1541 = vmatmul.f32.gmra.mxu2 %v5361_v7  ;;  %1586 = vmatpush.msra.mxu0 %v5958_v22  ;;  %13459 = vst [vmem:[#allocation38_spill] sm:$0xff] %v8510_v23  ;;  %v5971_v7 = vld [vmem:[%s13415_s1 + $0x288] sm:$0xff]  ;;  %v5974_v22 = vld [vmem:[%s13415_s1 + $0x478] sm:$0xff]  ;;  %v5979_v46 = vld [vmem:[%s13415_s1 + $0x3e0] sm:$0xff] }
 0x118   : > { %13460 = vst [vmem:[#allocation39_spill] sm:$0xff] %v8512_v25  ;;  %1644 = vmatpush.msra.mxu2 %v5959_v29  ;;  %1672 = vmatpush.msra.mxu3 %v5960_v30  ;;  %v5311_v20 = vld [vmem:[%s7239_s26 + $0x340] sm:$0xff] }
 0x119   : > { %1570 = vmatmul.f32.gmra.mxu3 %v5362_v19  ;;  %1587 = vmatpush.msra.mxu0 %v5961_v33  ;;  %v5973_v19 = vld [vmem:[%s13415_s1 + $0x378] sm:$0xff]  ;;  %v5975_v33 = vld [vmem:[%s13415_s1 + $0x3e8] sm:$0xff] }
 0x11a   : > { %1645 = vmatpush.msra.mxu2 %v5962_v40  ;;  %1673 = vmatpush.msra.mxu3 %v5963_v44  ;;  %v5976_v40 = vld [vmem:[%s13415_s1 + $0x370] sm:$0xff] }
 0x11b   : > { %1588 = vmatpush.msra.mxu0 %v5964_v45  ;;  %1720 = vmatpush.msrb.mxu1 %v5969_v62  ;;  %v5977_v44 = vld [vmem:[%s13415_s1 + $0x470] sm:$0xff]  ;;  %v5978_v45 = vld [vmem:[%s13415_s1 + $0x4f8] sm:$0xff] }
 0x11c   : > { %1646 = vmatpush.msra.mxu2 %v5966_v47  ;;  %1674 = vmatpush.msra.mxu3 %v5967_v50  ;;  %v8550_v63 = vpop.f32.mrf.mxu2  ;;  %v5980_v47 = vld [vmem:[%s13415_s1 + $0x368] sm:$0xff]  ;;  %v5983_v62 = vld [vmem:[%s13415_s1 + $0x3d8] sm:$0xff] }
 0x11d   : > { %1589 = vmatpush.msra.mxu0 %v5968_v59  ;;  %13461 = vst [vmem:[#allocation40_spill] sm:$0xff] %v8550_v63  ;;  %1721 = vmatpush.msrb.mxu1 %v5975_v33  ;;  %v5981_v50 = vld [vmem:[%s13415_s1 + $0x468] sm:$0xff]  ;;  %v5988_v33 = vld [vmem:[%s13415_s1 + $0x458] sm:$0xff]  ;;  %v5373_v63 = vld [vmem:[%s7239_s26 + $0x530] sm:$0x1] }
 0x11e   : > { %1647 = vmatpush.msra.mxu2 %v5970_v3  ;;  %1675 = vmatpush.msra.mxu3 %v5971_v7  ;;  %v5320_v59 = vld [vmem:[%s7239_s26 + $0x388] sm:$0xff]  ;;  %v5984_v3 = vld [vmem:[%s13415_s1 + $0x360] sm:$0xff] }
 0x11f   : > { %1590 = vmatmul.f32.vlgmr.msra.gmra.mxu0 %v5297_v55  ;;  %1619 = vmatmul.f32.vlgmr.msra.gmra.mxu1 %v5298_v57  ;;  %v8562_v18 = vpop.f32.mrf.mxu0  ;;  %v8572_v30 = vpop.f32.mrf.mxu3  ;;  %v5319_v55 = vld [vmem:[%s7239_s26 + $0x380] sm:$0xff]  ;;  %v5982_v57 = vld [vmem:[%s13415_s1 + $0x4f0] sm:$0xff] }
 0x120   : > { %1648 = vmatmul.f32.vlgmr.msra.gmra.mxu2 %v5299_v60  ;;  %1676 = vmatpush.msra.mxu3 %v5972_v16  ;;  %13462 = vst [vmem:[#allocation41_spill] sm:$0xff] %v8562_v18  ;;  %v8570_v29 = vpop.f32.mrf.mxu1  ;;  %v5321_v60 = vld [vmem:[%s7239_s26 + $0x390] sm:$0xff]  ;;  %v5985_v7 = vld [vmem:[%s13415_s1 + $0x460] sm:$0xff]  ;;  %v5986_v16 = vld [vmem:[%s13415_s1 + $0x4e8] sm:$0xff] }
 0x121   : > { %1690 = vmatpush.msrb.mxu0 %v5973_v19  ;;  %1748 = vmatpush.msrb.mxu2 %v5974_v22  ;;  %13463 = vst [vmem:[#allocation42_spill] sm:$0xff] %v8570_v29  ;;  %v5322_v19 = vld [vmem:[%s7239_s26 + $0x398] sm:$0xff] }
 0x122   : > { %13464 = vst [vmem:[#allocation43_spill] sm:$0xff] %v8572_v30  ;;  %1677 = vmatmul.f32.vlgmr.msra.gmra.mxu3 %v5300_v9  ;;  %1722 = vmatpush.msrb.mxu1 %v5979_v46  ;;  %v5987_v22 = vld [vmem:[%s13415_s1 + $0x358] sm:$0xff]  ;;  %v5352_v30 = vld [vmem:[%s7239_s26 + $0x488] sm:$0xff] }
 0x123   : > { %1691 = vmatpush.msrb.mxu0 %v5976_v40  ;;  %1749 = vmatpush.msrb.mxu2 %v5977_v44  ;;  %v5989_v44 = vld [vmem:[%s13415_s1 + $0x4e0] sm:$0xff] }
 0x124   : > { %1777 = vmatpush.msrb.mxu3 %v5978_v45  ;;  %1723 = vmatpush.msrb.mxu1 %v5983_v62  ;;  %v5990_v45 = vld [vmem:[%s13415_s1 + $0x3d0] sm:$0xff]  ;;  %v5996_v62 = vld [vmem:[%s13415_s1 + $0x448] sm:$0xff] }
 0x125   : > { %1692 = vmatpush.msrb.mxu0 %v5980_v47  ;;  %1750 = vmatpush.msrb.mxu2 %v5981_v50  ;;  %v5991_v50 = vld [vmem:[%s13415_s1 + $0x350] sm:$0xff] }
 0x126   : > { %1778 = vmatpush.msrb.mxu3 %v5982_v57  ;;  %v8610_v9 = vpop.f32.mrf.mxu2  ;;  %1724 = vmatpush.msrb.mxu1 %v5990_v45  ;;  %v5993_v57 = vld [vmem:[%s13415_s1 + $0x4d8] sm:$0xff]  ;;  %v6001_v45 = vld [vmem:[%s13415_s1 + $0x4c8] sm:$0xff] }
 0x127   : > { %1693 = vmatpush.msrb.mxu0 %v5984_v3  ;;  %1751 = vmatpush.msrb.mxu2 %v5985_v7  ;;  %13465 = vst [vmem:[#allocation44_spill] sm:$0xff] %v8610_v9  ;;  %v5997_v3 = vld [vmem:[%s13415_s1 + $0x4d0] sm:$0xff] }
 0x128   : > { %1779 = vmatpush.msrb.mxu3 %v5986_v16  ;;  %1593 = vmatmul.f32.gmra.mxu0 %v5319_v55  ;;  %v5992_v55 = vld [vmem:[%s13415_s1 + $0x450] sm:$0xff]  ;;  %v5342_v16 = vld [vmem:[%s7239_s26 + $0x438] sm:$0xff] }
 0x129   : > { %1622 = vmatmul.f32.gmra.mxu1 %v5320_v59  ;;  %1651 = vmatmul.f32.gmra.mxu2 %v5321_v60  ;;  %v8622_v40 = vpop.f32.mrf.mxu0  ;;  %v8630_v46 = vpop.f32.mrf.mxu3  ;;  %v5994_v59 = vld [vmem:[%s13415_s1 + $0x3c8] sm:$0xff]  ;;  %v5341_v7 = vld [vmem:[%s7239_s26 + $0x430] sm:$0xff] }
 0x12a   : > { %1694 = vmatpush.msrb.mxu0 %v5987_v22  ;;  %1752 = vmatpush.msrb.mxu2 %v5988_v33  ;;  %13466 = vst [vmem:[#allocation45_spill] sm:$0xff] %v8622_v40  ;;  %v8632_v47 = vpop.f32.mrf.mxu1  ;;  %v5995_v60 = vld [vmem:[%s13415_s1 + $0x348] sm:$0xff]  ;;  %v5999_v22 = vld [vmem:[%s13415_s1 + $0x340] sm:$0xff]  ;;  %v5518_v40 = vld [vmem:[%s7239_s26 + $0x978] sm:$0xff] }
 0x12b   : > { %1780 = vmatpush.msrb.mxu3 %v5989_v44  ;;  %13467 = vst [vmem:[#allocation46_spill] sm:$0xff] %v8630_v46  ;;  %1725 = vmatpush.msrb.mxu1 %v5994_v59  ;;  %v5343_v33 = vld [vmem:[%s7239_s26 + $0x440] sm:$0xff]  ;;  %v6003_v59 = vld [vmem:[%s13415_s1 + $0x338] sm:$0xff] }
 0x12c   : > { %13468 = vst [vmem:[#allocation47_spill] sm:$0xff] %v8632_v47  ;;  %1680 = vmatmul.f32.gmra.mxu3 %v5322_v19  ;;  %1695 = vmatpush.msrb.mxu0 %v5991_v50  ;;  %v5998_v19 = vld [vmem:[%s13415_s1 + $0x3c0] sm:$0xff] }
 0x12d   : > { %1753 = vmatpush.msrb.mxu2 %v5992_v55  ;;  %1781 = vmatpush.msrb.mxu3 %v5993_v57  ;;  %v6000_v44 = vld [vmem:[%s13415_s1 + $0x440] sm:$0xff]  ;;  %v6002_v55 = vld [vmem:[%s13415_s1 + $0x3b8] sm:$0xff]  ;;  %v5344_v57 = vld [vmem:[%s7239_s26 + $0x448] sm:$0xff] }
 0x12e   : > { %1696 = vmatpush.msrb.mxu0 %v5995_v60  ;;  %1726 = vmatpush.msrb.mxu1 %v5998_v19  ;;  %v6004_v60 = vld [vmem:[%s13415_s1 + $0x438] sm:$0xff]  ;;  %v5303_v46 = vld [vmem:[%s7239_s26 + $0x300] sm:$0xff] }
 0x12f   : > { %1754 = vmatpush.msrb.mxu2 %v5996_v62  ;;  %1782 = vmatpush.msrb.mxu3 %v5997_v3  ;;  %v6005_v3 = vld [vmem:[%s13415_s1 + $0x4c0] sm:$0xff] }
 0x130   : > { %1697 = vmatpush.msrb.mxu0 %v5999_v22  ;;  %v8670_v50 = vpop.f32.mrf.mxu2  ;;  %1727 = vmatpush.msrb.mxu1 %v6002_v55  ;;  %v6007_v22 = vld [vmem:[%s13415_s1 + $0x330] sm:$0xff]  ;;  %v6011_v55 = vld [vmem:[%s13415_s1 + $0x328] sm:$0xff]  ;;  %v5495_v47 = vld [vmem:[%s7239_s26 + $0x8c0] sm:$0xff] }
 0x131   : > { %1755 = vmatpush.msrb.mxu2 %v6000_v44  ;;  %1783 = vmatpush.msrb.mxu3 %v6001_v45  ;;  %13469 = vst [vmem:[#allocation48_spill] sm:$0xff] %v8670_v50  ;;  %v6009_v44 = vld [vmem:[%s13415_s1 + $0x4b8] sm:$0xff]  ;;  %v6010_v45 = vld [vmem:[%s13415_s1 + $0x3a8] sm:$0xff] }
 0x132   : > { %1596 = vmatmul.f32.gmra.mxu0 %v5341_v7  ;;  %1625 = vmatmul.f32.gmra.mxu1 %v5342_v16  ;;  %v6006_v7 = vld [vmem:[%s13415_s1 + $0x3b0] sm:$0xff] }
 0x133   : > { %1654 = vmatmul.f32.gmra.mxu2 %v5343_v33  ;;  %1698 = vmatpush.msrb.mxu0 %v6003_v59  ;;  %v8682_v62 = vpop.f32.mrf.mxu0  ;;  %v8692_v19 = vpop.f32.mrf.mxu3  ;;  %v6008_v33 = vld [vmem:[%s13415_s1 + $0x430] sm:$0xff] }
 0x134   : > { %1756 = vmatpush.msrb.mxu2 %v6004_v60  ;;  %13470 = vst [vmem:[#allocation49_spill] sm:$0xff] %v8682_v62  ;;  %1784 = vmatpush.msrb.mxu3 %v6005_v3  ;;  %v8690_v16 = vpop.f32.mrf.mxu1  ;;  %v6013_v59 = vld [vmem:[%s13415_s1 + $0x4b0] sm:$0xff]  ;;  %v5363_v60 = vld [vmem:[%s7239_s26 + $0x4e0] sm:$0x1]  ;;  %v5364_v3 = vld [vmem:[%s7239_s26 + $0x4e8] sm:$0x1] }
 0x135   : > { %1728 = vmatpush.msrb.mxu1 %v6006_v7  ;;  %13471 = vst [vmem:[#allocation50_spill] sm:$0xff] %v8690_v16  ;;  %1683 = vmatmul.f32.gmra.mxu3 %v5344_v57  ;;  %v6012_v57 = vld [vmem:[%s13415_s1 + $0x428] sm:$0xff]  ;;  %v6014_v7 = vld [vmem:[%s13415_s1 + $0x3a0] sm:$0xff]  ;;  %v5433_v62 = vld [vmem:[%s7239_s26 + $0x6f0] sm:$0xff] }
 0x136   : > { %13472 = vst [vmem:[#allocation51_spill] sm:$0xff] %v8692_v19  ;;  %1699 = vmatpush.msrb.mxu0 %v6007_v22  ;;  %1757 = vmatpush.msrb.mxu2 %v6008_v33  ;;  %v6015_v22 = vld [vmem:[%s13415_s1 + $0x320] sm:$0xff]  ;;  %v5365_v33 = vld [vmem:[%s7239_s26 + $0x4f0] sm:$0x1]  ;;  %v5450_v19 = vld [vmem:[%s7239_s26 + $0x778] sm:$0xff] }
 0x137   : > { %1785 = vmatpush.msrb.mxu3 %v6009_v44  ;;  %1729 = vmatpush.msrb.mxu1 %v6010_v45  ;;  %v6016_v44 = vld [vmem:[%s13415_s1 + $0x420] sm:$0xff]  ;;  %v6017_v45 = vld [vmem:[%s13415_s1 + $0x4a8] sm:$0xff] }
 0x138   : > { %1700 = vmatpush.msrb.mxu0 %v6011_v55  ;;  %1758 = vmatpush.msrb.mxu2 %v6012_v57  ;;  %v6018_v57 = vld [vmem:[%s13415_s1 + $0x398] sm:$0xff] }
 0x139   : > { %1786 = vmatpush.msrb.mxu3 %v6013_v59  ;;  %1730 = vmatpush.msrb.mxu1 %v6014_v7  ;;  %v5366_v59 = vld [vmem:[%s7239_s26 + $0x4f8] sm:$0x1] }
 0x13a   : > { %1701 = vmatpush.msrb.mxu0 %v6015_v22  ;;  %1759 = vmatpush.msrb.mxu2 %v6016_v44  ;;  %v8730_v55 = vpop.f32.mrf.mxu2  ;;  %v6019_v7 = vld [vmem:[%s13415_s1 + $0x318] sm:$0xff] }
 0x13b   : > { %1787 = vmatpush.msrb.mxu3 %v6017_v45  ;;  %13473 = vst [vmem:[#allocation52_spill] sm:$0xff] %v8730_v55  ;;  %1599 = vmatmul.f32.gmra.mxu0 %v5363_v60  ;;  %v6020_v22 = vld [vmem:[%s13415_s1 + $0x418] sm:$0xff]  ;;  %v6021_v60 = vld [vmem:[%s13415_s1 + $0x4a0] sm:$0xff] }
 0x13c   : > { %1628 = vmatmul.f32.gmra.mxu1 %v5364_v3  ;;  %1657 = vmatmul.f32.gmra.mxu2 %v5365_v33  ;;  %v6022_v3 = vld [vmem:[%s13415_s1 + $0x390] sm:$0xff] }
 0x13d   : > { %1731 = vmatpush.msrb.mxu1 %v6018_v57  ;;  %1702 = vmatpush.msrb.mxu0 %v6019_v7  ;;  %v8742_v44 = vpop.f32.mrf.mxu0  ;;  %v8752_v45 = vpop.f32.mrf.mxu3  ;;  %v6023_v57 = vld [vmem:[%s13415_s1 + $0x310] sm:$0xff] }
 0x13e   : > { %1760 = vmatpush.msrb.mxu2 %v6020_v22  ;;  %13474 = vst [vmem:[#allocation53_spill] sm:$0xff] %v8742_v44  ;;  %1788 = vmatpush.msrb.mxu3 %v6021_v60  ;;  %v8750_v33 = vpop.f32.mrf.mxu1  ;;  %v6024_v7 = vld [vmem:[%s13415_s1 + $0x410] sm:$0xff]  ;;  %v6025_v22 = vld [vmem:[%s13415_s1 + $0x498] sm:$0xff]  ;;  %v6027_v60 = vld [vmem:[%s13415_s1 + $0x308] sm:$0xff] }
 0x13f   : > { %1732 = vmatpush.msrb.mxu1 %v6022_v3  ;;  %13475 = vst [vmem:[#allocation54_spill] sm:$0xff] %v8750_v33  ;;  %1686 = vmatmul.f32.gmra.mxu3 %v5366_v59  ;;  %v6026_v59 = vld [vmem:[%s13415_s1 + $0x388] sm:$0xff] }
 0x140   : > { %13476 = vst [vmem:[#allocation55_spill] sm:$0xff] %v8752_v45  ;;  %1703 = vmatpush.msrb.mxu0 %v6023_v57  ;;  %1761 = vmatpush.msrb.mxu2 %v6024_v7  ;;  %v6028_v3 = vld [vmem:[%s13415_s1 + $0x408] sm:$0xff]  ;;  %v6029_v57 = vld [vmem:[%s13415_s1 + $0x490] sm:$0xff] }
 0x141   : > { %1789 = vmatpush.msrb.mxu3 %v6025_v22  ;;  %1733 = vmatpush.msrb.mxu1 %v6026_v59  ;;  %v5301_v7 = vld [vmem:[%s7239_s26 + $0x2f0] sm:$0xff]  ;;  %v5302_v22 = vld [vmem:[%s7239_s26 + $0x2f8] sm:$0xff]  ;;  %v6030_v59 = vld [vmem:[%s13415_s1 + $0x380] sm:$0xff] }
 0x142   : > { %1704 = vmatpush.msrb.mxu0 %v6027_v60  ;;  %1762 = vmatpush.msrb.mxu2 %v6028_v3  ;;  %v6031_v60 = vld [vmem:[%s13415_s1 + $0x300] sm:$0xff]  ;;  %v5316_v45 = vld [vmem:[%s7239_s26 + $0x368] sm:$0xff] }
 0x143   : > { %1790 = vmatpush.msrb.mxu3 %v6029_v57  ;;  %1734 = vmatpush.msrb.mxu1 %v6030_v59  ;;  %v6032_v3 = vld [vmem:[%s13415_s1 + $0x400] sm:$0xff]  ;;  %v6033_v57 = vld [vmem:[%s13415_s1 + $0x488] sm:$0xff] }
 0x144   : > { %1705 = vmatpush.msrb.mxu0 %v6031_v60  ;;  %1763 = vmatpush.msrb.mxu2 %v6032_v3  ;;  %v8790_v9 = vpop.f32.mrf.mxu2  ;;  %v5304_v59 = vld [vmem:[%s7239_s26 + $0x308] sm:$0xff]  ;;  %v6034_v60 = vld [vmem:[%s13415_s1 + $0x5f8] sm:$0xff]  ;;  %v6035_v3 = vld [vmem:[%s13415_s1 + $0x480] sm:$0xff] }
 0x145   : > { %1791 = vmatpush.msrb.mxu3 %v6033_v57  ;;  %13477 = vst [vmem:[#allocation56_spill] sm:$0xff] %v8790_v9  ;;  %1706 = vmatmul.f32.vlgmr.msrb.gmra.mxu0 %v5301_v7  ;;  %v6036_v57 = vld [vmem:[%s13415_s1 + $0x578] sm:$0xff] }
 0x146   : > { %1735 = vmatmul.f32.vlgmr.msrb.gmra.mxu1 %v5302_v22  ;;  %1764 = vmatmul.f32.vlgmr.msrb.gmra.mxu2 %v5303_v46  ;;  %v6037_v46 = vld [vmem:[%s13415_s1 + $0x678] sm:$0xff] }
 0x147   : > { %1835 = vmatpush.msra.mxu1 %v6034_v60  ;;  %1792 = vmatpush.msrb.mxu3 %v6035_v3  ;;  %v8802_v29 = vpop.f32.mrf.mxu0  ;;  %v8809_v22 = vpop.f32.mrf.mxu3  ;;  %v6038_v60 = vld [vmem:[%s13415_s1 + $0x5f0] sm:$0xff] }
 0x148   : > { %1806 = vmatpush.msra.mxu0 %v6036_v57  ;;  %13478 = vst [vmem:[#allocation57_spill] sm:$0xff] %v8802_v29  ;;  %1864 = vmatpush.msra.mxu2 %v6037_v46  ;;  %v8807_v7 = vpop.f32.mrf.mxu1  ;;  %v6039_v3 = vld [vmem:[%s13415_s1 + $0x570] sm:$0xff]  ;;  %v6041_v57 = vld [vmem:[%s13415_s1 + $0x6f8] sm:$0xff]  ;;  %v6042_v46 = vld [vmem:[%s13415_s1 + $0x5e8] sm:$0xff] }
 0x149   : > { %1793 = vmatmul.f32.vlgmr.msrb.gmra.mxu3 %v5304_v59  ;;  %13479 = vst [vmem:[#allocation58_spill] sm:$0xff] %v8807_v7  ;;  %1836 = vmatpush.msra.mxu1 %v6038_v60  ;;  %v6040_v59 = vld [vmem:[%s13415_s1 + $0x670] sm:$0xff]  ;;  %v6043_v60 = vld [vmem:[%s13415_s1 + $0x568] sm:$0xff] }
 0x14a   : > { %13480 = vst [vmem:[#allocation59_spill] sm:$0xff] %v8809_v22  ;;  %1807 = vmatpush.msra.mxu0 %v6039_v3  ;;  %1865 = vmatpush.msra.mxu2 %v6040_v59  ;;  %v6044_v3 = vld [vmem:[%s13415_s1 + $0x668] sm:$0xff]  ;;  %v6045_v59 = vld [vmem:[%s13415_s1 + $0x6f0] sm:$0xff] }
 0x14b   : > { %1893 = vmatpush.msra.mxu3 %v6041_v57  ;;  %1837 = vmatpush.msra.mxu1 %v6042_v46  ;;  %v5323_v57 = vld [vmem:[%s7239_s26 + $0x3a0] sm:$0xff]  ;;  %v5324_v7 = vld [vmem:[%s7239_s26 + $0x3a8] sm:$0xff]  ;;  %v5325_v29 = vld [vmem:[%s7239_s26 + $0x3b0] sm:$0xff] }
 0x14c   : > { %1808 = vmatpush.msra.mxu0 %v6043_v60  ;;  %1866 = vmatpush.msra.mxu2 %v6044_v3  ;;  %v6046_v46 = vld [vmem:[%s13415_s1 + $0x5e0] sm:$0xff]  ;;  %v6081_v22 = vld [vmem:[%s13415_s1 + $0x6a8] sm:$0xff] }
 0x14d   : > { %1894 = vmatpush.msra.mxu3 %v6045_v59  ;;  %1838 = vmatpush.msra.mxu1 %v6046_v46  ;;  %v6047_v60 = vld [vmem:[%s13415_s1 + $0x560] sm:$0xff]  ;;  %v6049_v59 = vld [vmem:[%s13415_s1 + $0x6e8] sm:$0xff]  ;;  %v6050_v46 = vld [vmem:[%s13415_s1 + $0x5d8] sm:$0xff] }
 0x14e   : > { %1809 = vmatpush.msra.mxu0 %v6047_v60  ;;  %v6048_v3 = vld [vmem:[%s13415_s1 + $0x660] sm:$0xff]  ;;  %v8850_v18 = vpop.f32.mrf.mxu2  ;;  %1738 = vmatmul.f32.gmra.mxu1 %v5324_v7  ;;  %v5326_v60 = vld [vmem:[%s7239_s26 + $0x3b8] sm:$0xff] }
 0x14f   : > { %1867 = vmatpush.msra.mxu2 %v6048_v3  ;;  %1895 = vmatpush.msra.mxu3 %v6049_v59  ;;  %13481 = vst [vmem:[#allocation60_spill] sm:$0xff] %v8850_v18  ;;  %v6051_v3 = vld [vmem:[%s13415_s1 + $0x558] sm:$0xff] }
 0x150   : > { %1709 = vmatmul.f32.gmra.mxu0 %v5323_v57  ;;  %1767 = vmatmul.f32.gmra.mxu2 %v5325_v29  ;;  %v6052_v59 = vld [vmem:[%s13415_s1 + $0x658] sm:$0xff]  ;;  %v6053_v29 = vld [vmem:[%s13415_s1 + $0x6e0] sm:$0xff]  ;;  %v6054_v57 = vld [vmem:[%s13415_s1 + $0x5d0] sm:$0xff] }
 0x151   : > { %1839 = vmatpush.msra.mxu1 %v6050_v46  ;;  %1810 = vmatpush.msra.mxu0 %v6051_v3  ;;  %v8862_v18 = vpop.f32.mrf.mxu3  ;;  %v8864_v7 = vpop.f32.mrf.mxu0  ;;  %v6055_v3 = vld [vmem:[%s13415_s1 + $0x550] sm:$0xff] }
 0x152   : > { %1868 = vmatpush.msra.mxu2 %v6052_v59  ;;  %13482 = vst [vmem:[#allocation61_spill] sm:$0xff] %v8862_v18  ;;  %1896 = vmatpush.msra.mxu3 %v6053_v29  ;;  %v8872_v46 = vpop.f32.mrf.mxu1  ;;  %v6056_v59 = vld [vmem:[%s13415_s1 + $0x650] sm:$0xff]  ;;  %v6057_v29 = vld [vmem:[%s13415_s1 + $0x6d8] sm:$0xff] }
 0x153   : > { %13483 = vst [vmem:[#allocation62_spill] sm:$0xff] %v8864_v7  ;;  %1840 = vmatpush.msra.mxu1 %v6054_v57  ;;  %1796 = vmatmul.f32.gmra.mxu3 %v5326_v60  ;;  %v6058_v60 = vld [vmem:[%s13415_s1 + $0x5c8] sm:$0xff]  ;;  %v5346_v18 = vld [vmem:[%s7239_s26 + $0x458] sm:$0xff]  ;;  %v5427_v7 = vld [vmem:[%s7239_s26 + $0x6c0] sm:$0xff] }
 0x154   : > { %13484 = vst [vmem:[#allocation63_spill] sm:$0xff] %v8872_v46  ;;  %1811 = vmatpush.msra.mxu0 %v6055_v3  ;;  %1869 = vmatpush.msra.mxu2 %v6056_v59  ;;  %v6059_v57 = vld [vmem:[%s13415_s1 + $0x548] sm:$0xff]  ;;  %v6061_v59 = vld [vmem:[%s13415_s1 + $0x6d0] sm:$0xff] }
 0x155   : > { %1897 = vmatpush.msra.mxu3 %v6057_v29  ;;  %1841 = vmatpush.msra.mxu1 %v6058_v60  ;;  %v6060_v3 = vld [vmem:[%s13415_s1 + $0x648] sm:$0xff]  ;;  %v5345_v29 = vld [vmem:[%s7239_s26 + $0x450] sm:$0xff]  ;;  %v6062_v60 = vld [vmem:[%s13415_s1 + $0x5c0] sm:$0xff] }
 0x156   : > { %1812 = vmatpush.msra.mxu0 %v6059_v57  ;;  %1870 = vmatpush.msra.mxu2 %v6060_v3  ;;  %v6063_v57 = vld [vmem:[%s13415_s1 + $0x540] sm:$0xff]  ;;  %v5445_v46 = vld [vmem:[%s7239_s26 + $0x750] sm:$0xff] }
 0x157   : > { %1898 = vmatpush.msra.mxu3 %v6061_v59  ;;  %1842 = vmatpush.msra.mxu1 %v6062_v60  ;;  %v6064_v3 = vld [vmem:[%s13415_s1 + $0x640] sm:$0xff]  ;;  %v6065_v59 = vld [vmem:[%s13415_s1 + $0x6c8] sm:$0xff]  ;;  %v6066_v60 = vld [vmem:[%s13415_s1 + $0x5b8] sm:$0xff] }
 0x158   : > { %1813 = vmatpush.msra.mxu0 %v6063_v57  ;;  %1871 = vmatpush.msra.mxu2 %v6064_v3  ;;  %v8910_v31 = vpop.f32.mrf.mxu2  ;;  %v5348_v57 = vld [vmem:[%s7239_s26 + $0x468] sm:$0xff]  ;;  %v6067_v3 = vld [vmem:[%s13415_s1 + $0x538] sm:$0xff] }
 0x159   : > { %1899 = vmatpush.msra.mxu3 %v6065_v59  ;;  %13485 = vst [vmem:[#allocation64_spill] sm:$0xff] %v8910_v31  ;;  %1712 = vmatmul.f32.gmra.mxu0 %v5345_v29  ;;  %v8916_v12 = vpop.f32.mrf.mxu0  ;;  %v6068_v59 = vld [vmem:[%s13415_s1 + $0x638] sm:$0xff]  ;;  %v6069_v29 = vld [vmem:[%s13415_s1 + $0x6c0] sm:$0xff] }
 0x15a   : > { %1741 = vmatmul.f32.gmra.mxu1 %v5346_v18  ;;  %1770 = vmatmul.f32.gmra.mxu2 %v5347_v53  ;;  %13486 = vst [vmem:[#allocation65_spill] sm:$0xff] %v8916_v12  ;;  %v5378_v12 = vld [vmem:[%s7239_s26 + $0x558] sm:$0x1] }
 0x15b   : > { %1843 = vmatpush.msra.mxu1 %v6066_v60  ;;  %1814 = vmatpush.msra.mxu0 %v6067_v3  ;;  %v8924_v18 = vpop.f32.mrf.mxu1  ;;  %v8926_v53 = vpop.f32.mrf.mxu3  ;;  %v6070_v60 = vld [vmem:[%s13415_s1 + $0x5b0] sm:$0xff] }
 0x15c   : > { %1872 = vmatpush.msra.mxu2 %v6068_v59  ;;  %13487 = vst [vmem:[#allocation66_spill] sm:$0xff] %v8924_v18  ;;  %1900 = vmatpush.msra.mxu3 %v6069_v29  ;;  %v6071_v3 = vld [vmem:[%s13415_s1 + $0x530] sm:$0xff]  ;;  %v6073_v29 = vld [vmem:[%s13415_s1 + $0x6b8] sm:$0xff]  ;;  %v5356_v18 = vld [vmem:[%s7239_s26 + $0x4a8] sm:$0xff] }
 0x15d   : > { %13488 = vst [vmem:[#allocation67_spill] sm:$0xff] %v8926_v53  ;;  %1844 = vmatpush.msra.mxu1 %v6070_v60  ;;  %1799 = vmatmul.f32.gmra.mxu3 %v5348_v57  ;;  %v6072_v59 = vld [vmem:[%s13415_s1 + $0x630] sm:$0xff]  ;;  %v6074_v57 = vld [vmem:[%s13415_s1 + $0x5a8] sm:$0xff] }
 0x15e   : > { %1815 = vmatpush.msra.mxu0 %v6071_v3  ;;  %1873 = vmatpush.msra.mxu2 %v6072_v59  ;;  %v6075_v60 = vld [vmem:[%s13415_s1 + $0x528] sm:$0xff]  ;;  %v6077_v59 = vld [vmem:[%s13415_s1 + $0x6b0] sm:$0xff] }
 0x15f   : > { %1901 = vmatpush.msra.mxu3 %v6073_v29  ;;  %1845 = vmatpush.msra.mxu1 %v6074_v57  ;;  %v6076_v3 = vld [vmem:[%s13415_s1 + $0x628] sm:$0xff]  ;;  %v5367_v29 = vld [vmem:[%s7239_s26 + $0x500] sm:$0x1] }
 0x160   : > { %1816 = vmatpush.msra.mxu0 %v6075_v60  ;;  %1874 = vmatpush.msra.mxu2 %v6076_v3  ;;  %v6078_v57 = vld [vmem:[%s13415_s1 + $0x5a0] sm:$0xff] }
 0x161   : > { %1902 = vmatpush.msra.mxu3 %v6077_v59  ;;  %1846 = vmatpush.msra.mxu1 %v6078_v57  ;;  %v6079_v60 = vld [vmem:[%s13415_s1 + $0x520] sm:$0xff]  ;;  %v6082_v57 = vld [vmem:[%s13415_s1 + $0x598] sm:$0xff] }
 0x162   : > { %1817 = vmatpush.msra.mxu0 %v6079_v60  ;;  %v8964_v3 = vpop.f32.mrf.mxu2  ;;  %v6080_v59 = vld [vmem:[%s13415_s1 + $0x620] sm:$0xff]  ;;  %1744 = vmatmul.f32.gmra.mxu1 %v5368_v8  ;;  %v5370_v60 = vld [vmem:[%s7239_s26 + $0x518] sm:$0x1] }
 0x163   : > { %13489 = vst [vmem:[#allocation68_spill] sm:$0xff] %v8964_v3  ;;  %1875 = vmatpush.msra.mxu2 %v6080_v59  ;;  %1903 = vmatpush.msra.mxu3 %v6081_v22  ;;  %v6083_v59 = vld [vmem:[%s13415_s1 + $0x518] sm:$0xff]  ;;  %v6085_v22 = vld [vmem:[%s13415_s1 + $0x6a0] sm:$0xff] }
 0x164   : > { %1715 = vmatmul.f32.gmra.mxu0 %v5367_v29  ;;  %1773 = vmatmul.f32.gmra.mxu2 %v5369_v37  ;;  %v8976_v26 = vpop.f32.mrf.mxu0  ;;  %v6084_v8 = vld [vmem:[%s13415_s1 + $0x618] sm:$0xff]  ;;  %v8986_v37 = vpop.f32.mrf.mxu3  ;;  %v6086_v29 = vld [vmem:[%s13415_s1 + $0x590] sm:$0xff]  ;;  %v6190_v3 = vld [vmem:[%s13415_s1 + $0xa40] sm:$0xff] }
 0x165   : > { %1847 = vmatpush.msra.mxu1 %v6082_v57  ;;  %13490 = vst [vmem:[#allocation69_spill] sm:$0xff] %v8976_v26  ;;  %v8978_v13 = vpop.f32.mrf.mxu1  ;;  %1818 = vmatpush.msra.mxu0 %v6083_v59  ;;  %v6087_v57 = vld [vmem:[%s13415_s1 + $0x510] sm:$0xff]  ;;  %v6096_v26 = vld [vmem:[%s13415_s1 + $0x600] sm:$0xff] }
 0x166   : > { %13491 = vst [vmem:[#allocation70_spill] sm:$0xff] %v8978_v13  ;;  %1876 = vmatpush.msra.mxu2 %v6084_v8  ;;  %1904 = vmatpush.msra.mxu3 %v6085_v22  ;;  %v6088_v59 = vld [vmem:[%s13415_s1 + $0x610] sm:$0xff]  ;;  %v6089_v8 = vld [vmem:[%s13415_s1 + $0x698] sm:$0xff]  ;;  %v6091_v22 = vld [vmem:[%s13415_s1 + $0x508] sm:$0xff] }
 0x167   : > { %13492 = vst [vmem:[#allocation71_spill] sm:$0xff] %v8986_v37  ;;  %1848 = vmatpush.msra.mxu1 %v6086_v29  ;;  %1802 = vmatmul.f32.gmra.mxu3 %v5370_v60  ;;  %v6090_v60 = vld [vmem:[%s13415_s1 + $0x588] sm:$0xff]  ;;  %v5307_v13 = vld [vmem:[%s7239_s26 + $0x320] sm:$0xff]  ;;  %v5334_v37 = vld [vmem:[%s7239_s26 + $0x3f8] sm:$0xff] }
 0x168   : > { %1819 = vmatpush.msra.mxu0 %v6087_v57  ;;  %1877 = vmatpush.msra.mxu2 %v6088_v59  ;;  %v6092_v29 = vld [vmem:[%s13415_s1 + $0x608] sm:$0xff]  ;;  %v6093_v57 = vld [vmem:[%s13415_s1 + $0x690] sm:$0xff] }
 0x169   : > { %1905 = vmatpush.msra.mxu3 %v6089_v8  ;;  %1849 = vmatpush.msra.mxu1 %v6090_v60  ;;  %v5305_v59 = vld [vmem:[%s7239_s26 + $0x310] sm:$0xff]  ;;  %v5306_v8 = vld [vmem:[%s7239_s26 + $0x318] sm:$0xff]  ;;  %v6094_v60 = vld [vmem:[%s13415_s1 + $0x580] sm:$0xff] }
 0x16a   : > { %1820 = vmatpush.msra.mxu0 %v6091_v22  ;;  %1878 = vmatpush.msra.mxu2 %v6092_v29  ;;  %v6095_v22 = vld [vmem:[%s13415_s1 + $0x500] sm:$0xff] }
 0x16b   : > { %1906 = vmatpush.msra.mxu3 %v6093_v57  ;;  %1850 = vmatpush.msra.mxu1 %v6094_v60  ;;  %v9024_v29 = vpop.f32.mrf.mxu2  ;;  %v6097_v57 = vld [vmem:[%s13415_s1 + $0x688] sm:$0xff] }
 0x16c   : > { %1821 = vmatpush.msra.mxu0 %v6095_v22  ;;  %13493 = vst [vmem:[#allocation72_spill] sm:$0xff] %v9024_v29  ;;  %1879 = vmatpush.msra.mxu2 %v6096_v26  ;;  %v5308_v60 = vld [vmem:[%s7239_s26 + $0x328] sm:$0xff]  ;;  %v6098_v22 = vld [vmem:[%s13415_s1 + $0x7f8] sm:$0xff]  ;;  %v6099_v26 = vld [vmem:[%s13415_s1 + $0x680] sm:$0xff] }
 0x16d   : > { %1907 = vmatpush.msra.mxu3 %v6097_v57  ;;  %1822 = vmatmul.f32.vlgmr.msra.gmra.mxu0 %v5305_v59  ;;  %v6100_v59 = vld [vmem:[%s13415_s1 + $0x778] sm:$0xff]  ;;  %v6103_v57 = vld [vmem:[%s13415_s1 + $0x770] sm:$0xff] }
 0x16e   : > { %1851 = vmatmul.f32.vlgmr.msra.gmra.mxu1 %v5306_v8  ;;  %v9033_v9 = vpop.f32.mrf.mxu0  ;;  %v9035_v33 = vpop.f32.mrf.mxu1  ;;  %1880 = vmatmul.f32.vlgmr.msra.gmra.mxu2 %v5307_v13  ;;  %v6101_v13 = vld [vmem:[%s13415_s1 + $0x878] sm:$0xff]  ;;  %v6102_v8 = vld [vmem:[%s13415_s1 + $0x7f0] sm:$0xff] }
 0x16f   : > { %13494 = vst [vmem:[#allocation73_spill] sm:$0xff] %v9033_v9  ;;  %1951 = vmatpush.msrb.mxu1 %v6098_v22  ;;  %v9040_v29 = vpop.f32.mrf.mxu3  ;;  %1908 = vmatpush.msra.mxu3 %v6099_v26  ;;  %v6104_v22 = vld [vmem:[%s13415_s1 + $0x870] sm:$0xff]  ;;  %v6106_v26 = vld [vmem:[%s13415_s1 + $0x7e8] sm:$0xff] }
 0x170   : > { %13495 = vst [vmem:[#allocation74_spill] sm:$0xff] %v9035_v33  ;;  %1922 = vmatpush.msrb.mxu0 %v6100_v59  ;;  %1980 = vmatpush.msrb.mxu2 %v6101_v13  ;;  %v6107_v59 = vld [vmem:[%s13415_s1 + $0x768] sm:$0xff] }
 0x171   : > { %13496 = vst [vmem:[#allocation75_spill] sm:$0xff] %v9040_v29  ;;  %1909 = vmatmul.f32.vlgmr.msra.gmra.mxu3 %v5308_v60  ;;  %1952 = vmatpush.msrb.mxu1 %v6102_v8  ;;  %v6105_v60 = vld [vmem:[%s13415_s1 + $0x8f8] sm:$0xff]  ;;  %v6108_v13 = vld [vmem:[%s13415_s1 + $0x868] sm:$0xff]  ;;  %v6109_v8 = vld [vmem:[%s13415_s1 + $0x8f0] sm:$0xff] }
 0x172   : > { %1923 = vmatpush.msrb.mxu0 %v6103_v57  ;;  %1981 = vmatpush.msrb.mxu2 %v6104_v22  ;;  %v5327_v57 = vld [vmem:[%s7239_s26 + $0x3c0] sm:$0xff]  ;;  %v5328_v22 = vld [vmem:[%s7239_s26 + $0x3c8] sm:$0xff]  ;;  %v6115_v29 = vld [vmem:[%s13415_s1 + $0x758] sm:$0xff] }
 0x173   : > { %2009 = vmatpush.msrb.mxu3 %v6105_v60  ;;  %1953 = vmatpush.msrb.mxu1 %v6106_v26  ;;  %v6110_v26 = vld [vmem:[%s13415_s1 + $0x7e0] sm:$0xff] }
 0x174   : > { %1924 = vmatpush.msrb.mxu0 %v6107_v59  ;;  %1982 = vmatpush.msrb.mxu2 %v6108_v13  ;;  %v6111_v59 = vld [vmem:[%s13415_s1 + $0x760] sm:$0xff]  ;;  %v5329_v13 = vld [vmem:[%s7239_s26 + $0x3d0] sm:$0xff] }
 0x175   : > { %2010 = vmatpush.msrb.mxu3 %v6109_v8  ;;  %v9077_v60 = vpop.f32.mrf.mxu2  ;;  %1954 = vmatpush.msrb.mxu1 %v6110_v26  ;;  %v6112_v8 = vld [vmem:[%s13415_s1 + $0x860] sm:$0xff] }
 0x176   : > { %13497 = vst [vmem:[#allocation76_spill] sm:$0xff] %v9077_v60  ;;  %1925 = vmatpush.msrb.mxu0 %v6111_v59  ;;  %1983 = vmatpush.msrb.mxu2 %v6112_v8  ;;  %v6113_v60 = vld [vmem:[%s13415_s1 + $0x8e8] sm:$0xff]  ;;  %v6114_v59 = vld [vmem:[%s13415_s1 + $0x7d8] sm:$0xff] }
 0x177   : > { %2011 = vmatpush.msrb.mxu3 %v6113_v60  ;;  %v9092_v33 = vpop.f32.mrf.mxu3  ;;  %v9094_v26 = vpop.f32.mrf.mxu0  ;;  %1825 = vmatmul.f32.gmra.mxu0 %v5327_v57  ;;  %v5330_v8 = vld [vmem:[%s7239_s26 + $0x3d8] sm:$0xff]  ;;  %v6117_v57 = vld [vmem:[%s13415_s1 + $0x8e0] sm:$0xff] }
 0x178   : > { %13498 = vst [vmem:[#allocation77_spill] sm:$0xff] %v9092_v33  ;;  %1854 = vmatmul.f32.gmra.mxu1 %v5328_v22  ;;  %v9096_v9 = vpop.f32.mrf.mxu1  ;;  %1883 = vmatmul.f32.gmra.mxu2 %v5329_v13  ;;  %v6116_v60 = vld [vmem:[%s13415_s1 + $0x858] sm:$0xff]  ;;  %v6118_v22 = vld [vmem:[%s13415_s1 + $0x7d0] sm:$0xff]  ;;  %v5351_v33 = vld [vmem:[%s7239_s26 + $0x480] sm:$0xff] }
 0x179   : > { %13499 = vst [vmem:[#allocation78_spill] sm:$0xff] %v9094_v26  ;;  %1955 = vmatpush.msrb.mxu1 %v6114_v59  ;;  %1926 = vmatpush.msrb.mxu0 %v6115_v29  ;;  %v6119_v29 = vld [vmem:[%s13415_s1 + $0x750] sm:$0xff]  ;;  %v6121_v59 = vld [vmem:[%s13415_s1 + $0x8d8] sm:$0xff] }
 0x17a   : > { %13500 = vst [vmem:[#allocation79_spill] sm:$0xff] %v9096_v9  ;;  %1984 = vmatpush.msrb.mxu2 %v6116_v60  ;;  %2012 = vmatpush.msrb.mxu3 %v6117_v57  ;;  %v6120_v13 = vld [vmem:[%s13415_s1 + $0x850] sm:$0xff]  ;;  %v6123_v60 = vld [vmem:[%s13415_s1 + $0x748] sm:$0xff]  ;;  %v5454_v9 = vld [vmem:[%s7239_s26 + $0x798] sm:$0x1] }
 0x17b   : > { %1956 = vmatpush.msrb.mxu1 %v6118_v22  ;;  %1912 = vmatmul.f32.gmra.mxu3 %v5330_v8  ;;  %v6122_v8 = vld [vmem:[%s13415_s1 + $0x7c8] sm:$0xff]  ;;  %v5437_v26 = vld [vmem:[%s7239_s26 + $0x710] sm:$0xff] }
 0x17c   : > { %1927 = vmatpush.msrb.mxu0 %v6119_v29  ;;  %1985 = vmatpush.msrb.mxu2 %v6120_v13  ;;  %v6124_v22 = vld [vmem:[%s13415_s1 + $0x848] sm:$0xff]  ;;  %v6125_v29 = vld [vmem:[%s13415_s1 + $0x8d0] sm:$0xff] }
 0x17d   : > { %2013 = vmatpush.msrb.mxu3 %v6121_v59  ;;  %1957 = vmatpush.msrb.mxu1 %v6122_v8  ;;  %v5349_v13 = vld [vmem:[%s7239_s26 + $0x470] sm:$0xff]  ;;  %v5350_v59 = vld [vmem:[%s7239_s26 + $0x478] sm:$0xff]  ;;  %v6126_v8 = vld [vmem:[%s13415_s1 + $0x7c0] sm:$0xff] }
 0x17e   : > { %1928 = vmatpush.msrb.mxu0 %v6123_v60  ;;  %v9129_v57 = vpop.f32.mrf.mxu2  ;;  %1986 = vmatpush.msrb.mxu2 %v6124_v22  ;;  %v6127_v60 = vld [vmem:[%s13415_s1 + $0x740] sm:$0xff] }
 0x17f   : > { %2014 = vmatpush.msrb.mxu3 %v6125_v29  ;;  %1958 = vmatpush.msrb.mxu1 %v6126_v8  ;;  %v6128_v29 = vld [vmem:[%s13415_s1 + $0x840] sm:$0xff] }
 0x180   : > { %1929 = vmatpush.msrb.mxu0 %v6127_v60  ;;  %v9146_v22 = vpop.f32.mrf.mxu0  ;;  %1987 = vmatpush.msrb.mxu2 %v6128_v29  ;;  %v9156_v44 = vpop.f32.mrf.mxu3  ;;  %v6130_v60 = vld [vmem:[%s13415_s1 + $0x7b8] sm:$0xff] }
 0x181   : > { %13501 = vst [vmem:[#allocation80_spill] sm:$0xff] %v9146_v22  ;;  %2015 = vmatpush.msrb.mxu3 %v6129_v10  ;;  %v9154_v8 = vpop.f32.mrf.mxu1  ;;  %1828 = vmatmul.f32.gmra.mxu0 %v5349_v13  ;;  %v6131_v29 = vld [vmem:[%s13415_s1 + $0x738] sm:$0xff]  ;;  %v6134_v13 = vld [vmem:[%s13415_s1 + $0x7b0] sm:$0xff] }
 0x182   : > { %13502 = vst [vmem:[#allocation81_spill] sm:$0xff] %v9154_v8  ;;  %1857 = vmatmul.f32.gmra.mxu1 %v5350_v59  ;;  %1886 = vmatmul.f32.gmra.mxu2 %v5351_v33  ;;  %v6132_v10 = vld [vmem:[%s13415_s1 + $0x838] sm:$0xff]  ;;  %v6133_v33 = vld [vmem:[%s13415_s1 + $0x8c0] sm:$0xff]  ;;  %v6135_v59 = vld [vmem:[%s13415_s1 + $0x730] sm:$0xff] }
 0x183   : > { %1959 = vmatpush.msrb.mxu1 %v6130_v60  ;;  %1930 = vmatpush.msrb.mxu0 %v6131_v29  ;;  %v6136_v60 = vld [vmem:[%s13415_s1 + $0x830] sm:$0xff]  ;;  %v6137_v29 = vld [vmem:[%s13415_s1 + $0x8b8] sm:$0xff] }
 0x184   : > { %1988 = vmatpush.msrb.mxu2 %v6132_v10  ;;  %2016 = vmatpush.msrb.mxu3 %v6133_v33  ;;  %v6139_v33 = vld [vmem:[%s13415_s1 + $0x728] sm:$0xff] }
 0x185   : > { %1960 = vmatpush.msrb.mxu1 %v6134_v13  ;;  %1915 = vmatmul.f32.gmra.mxu3 %v5352_v30  ;;  %v6138_v30 = vld [vmem:[%s13415_s1 + $0x7a8] sm:$0xff] }
 0x186   : > { %1931 = vmatpush.msrb.mxu0 %v6135_v59  ;;  %1989 = vmatpush.msrb.mxu2 %v6136_v60  ;;  %v6140_v13 = vld [vmem:[%s13415_s1 + $0x828] sm:$0xff]  ;;  %v6141_v59 = vld [vmem:[%s13415_s1 + $0x8b0] sm:$0xff]  ;;  %v5371_v60 = vld [vmem:[%s7239_s26 + $0x520] sm:$0x1] }
 0x187   : > { %2017 = vmatpush.msrb.mxu3 %v6137_v29  ;;  %v9183_v10 = vpop.f32.mrf.mxu2  ;;  %1961 = vmatpush.msrb.mxu1 %v6138_v30  ;;  %v5372_v29 = vld [vmem:[%s7239_s26 + $0x528] sm:$0x1]  ;;  %v6142_v30 = vld [vmem:[%s13415_s1 + $0x7a0] sm:$0xff] }
 0x188   : > { %13503 = vst [vmem:[#allocation82_spill] sm:$0xff] %v9183_v10  ;;  %1932 = vmatpush.msrb.mxu0 %v6139_v33  ;;  %1990 = vmatpush.msrb.mxu2 %v6140_v13  ;;  %v6143_v33 = vld [vmem:[%s13415_s1 + $0x720] sm:$0xff]  ;;  %v5498_v10 = vld [vmem:[%s7239_s26 + $0x8d8] sm:$0xff] }
 0x189   : > { %2018 = vmatpush.msrb.mxu3 %v6141_v59  ;;  %1962 = vmatpush.msrb.mxu1 %v6142_v30  ;;  %v6144_v59 = vld [vmem:[%s13415_s1 + $0x820] sm:$0xff]  ;;  %v6145_v30 = vld [vmem:[%s13415_s1 + $0x8a8] sm:$0xff] }
 0x18a   : > { %1933 = vmatpush.msrb.mxu0 %v6143_v33  ;;  %v9206_v13 = vpop.f32.mrf.mxu0  ;;  %v9208_v23 = vpop.f32.mrf.mxu1  ;;  %1991 = vmatpush.msrb.mxu2 %v6144_v59  ;;  %v6146_v33 = vld [vmem:[%s13415_s1 + $0x798] sm:$0xff] }
 0x18b   : > { %13504 = vst [vmem:[#allocation83_spill] sm:$0xff] %v9206_v13  ;;  %2019 = vmatpush.msrb.mxu3 %v6145_v30  ;;  %v9216_v8 = vpop.f32.mrf.mxu3  ;;  %1831 = vmatmul.f32.gmra.mxu0 %v5371_v60  ;;  %v6147_v59 = vld [vmem:[%s13415_s1 + $0x718] sm:$0xff]  ;;  %v6150_v60 = vld [vmem:[%s13415_s1 + $0x790] sm:$0xff] }
 0x18c   : > { %13505 = vst [vmem:[#allocation84_spill] sm:$0xff] %v9208_v23  ;;  %1860 = vmatmul.f32.gmra.mxu1 %v5372_v29  ;;  %1889 = vmatmul.f32.gmra.mxu2 %v5373_v63  ;;  %v5374_v23 = vld [vmem:[%s7239_s26 + $0x538] sm:$0x1]  ;;  %v6149_v63 = vld [vmem:[%s13415_s1 + $0x8a0] sm:$0xff]  ;;  %v6151_v29 = vld [vmem:[%s13415_s1 + $0x710] sm:$0xff] }
 0x18d   : > { %13506 = vst [vmem:[#allocation85_spill] sm:$0xff] %v9216_v8  ;;  %1963 = vmatpush.msrb.mxu1 %v6146_v33  ;;  %1934 = vmatpush.msrb.mxu0 %v6147_v59  ;;  %v6148_v30 = vld [vmem:[%s13415_s1 + $0x818] sm:$0xff]  ;;  %v6152_v33 = vld [vmem:[%s13415_s1 + $0x810] sm:$0xff]  ;;  %v5560_v8 = vld [vmem:[%s7239_s26 + $0xac8] sm:$0x1] }
 0x18e   : > { %1992 = vmatpush.msrb.mxu2 %v6148_v30  ;;  %2020 = vmatpush.msrb.mxu3 %v6149_v63  ;;  %v6153_v59 = vld [vmem:[%s13415_s1 + $0x898] sm:$0xff]  ;;  %v6155_v63 = vld [vmem:[%s13415_s1 + $0x708] sm:$0xff] }
 0x18f   : > { %1964 = vmatpush.msrb.mxu1 %v6150_v60  ;;  %1918 = vmatmul.f32.gmra.mxu3 %v5374_v23  ;;  %v6154_v23 = vld [vmem:[%s13415_s1 + $0x788] sm:$0xff] }
 0x190   : > { %1935 = vmatpush.msrb.mxu0 %v6151_v29  ;;  %1993 = vmatpush.msrb.mxu2 %v6152_v33  ;;  %v6156_v60 = vld [vmem:[%s13415_s1 + $0x808] sm:$0xff]  ;;  %v6157_v29 = vld [vmem:[%s13415_s1 + $0x890] sm:$0xff] }
 0x191   : > { %2021 = vmatpush.msrb.mxu3 %v6153_v59  ;;  %v9243_v30 = vpop.f32.mrf.mxu2  ;;  %1965 = vmatpush.msrb.mxu1 %v6154_v23  ;;  %v5309_v33 = vld [vmem:[%s7239_s26 + $0x330] sm:$0xff]  ;;  %v5310_v59 = vld [vmem:[%s7239_s26 + $0x338] sm:$0xff] }
 0x192   : > { %13507 = vst [vmem:[#allocation86_spill] sm:$0xff] %v9243_v30  ;;  %1936 = vmatpush.msrb.mxu0 %v6155_v63  ;;  %1994 = vmatpush.msrb.mxu2 %v6156_v60  ;;  %v6158_v63 = vld [vmem:[%s13415_s1 + $0x780] sm:$0xff] }
 0x193   : > { %2022 = vmatpush.msrb.mxu3 %v6157_v29  ;;  %v9259_v13 = vpop.f32.mrf.mxu0  ;;  %v9261_v23 = vpop.f32.mrf.mxu1  ;;  %1966 = vmatpush.msrb.mxu1 %v6158_v63  ;;  %v6159_v60 = vld [vmem:[%s13415_s1 + $0x700] sm:$0xff]  ;;  %v5312_v63 = vld [vmem:[%s7239_s26 + $0x348] sm:$0xff] }
 0x194   : > { %13508 = vst [vmem:[#allocation87_spill] sm:$0xff] %v9259_v13  ;;  %1937 = vmatpush.msrb.mxu0 %v6159_v60  ;;  %v9270_v15 = vpop.f32.mrf.mxu3  ;;  %v6160_v29 = vld [vmem:[%s13415_s1 + $0x800] sm:$0xff]  ;;  %1967 = vmatmul.f32.vlgmr.msrb.gmra.mxu1 %v5310_v59  ;;  %v6162_v60 = vld [vmem:[%s13415_s1 + $0x9f8] sm:$0xff] }
 0x195   : > { %13509 = vst [vmem:[#allocation88_spill] sm:$0xff] %v9261_v23  ;;  %1995 = vmatpush.msrb.mxu2 %v6160_v29  ;;  %v6161_v23 = vld [vmem:[%s13415_s1 + $0x888] sm:$0xff]  ;;  %1938 = vmatmul.f32.vlgmr.msrb.gmra.mxu0 %v5309_v33  ;;  %v6163_v13 = vld [vmem:[%s13415_s1 + $0x880] sm:$0xff]  ;;  %v6164_v29 = vld [vmem:[%s13415_s1 + $0x978] sm:$0xff] }
 0x196   : > { %13510 = vst [vmem:[#allocation89_spill] sm:$0xff] %v9270_v15  ;;  %2023 = vmatpush.msrb.mxu3 %v6161_v23  ;;  %1996 = vmatmul.f32.vlgmr.msrb.gmra.mxu2 %v5311_v20  ;;  %v6165_v33 = vld [vmem:[%s13415_s1 + $0xa78] sm:$0xff]  ;;  %v6166_v20 = vld [vmem:[%s13415_s1 + $0x9f0] sm:$0xff] }
 0x197   : > { %2067 = vmatpush.msra.mxu1 %v6162_v60  ;;  %2038 = vmatpush.msra.mxu0 %v6164_v29  ;;  %v6168_v23 = vld [vmem:[%s13415_s1 + $0xa70] sm:$0xff]  ;;  %v6170_v60 = vld [vmem:[%s13415_s1 + $0x9e8] sm:$0xff]  ;;  %v5382_v15 = vld [vmem:[%s7239_s26 + $0x578] sm:$0x1] }
 0x198   : > { %2024 = vmatpush.msrb.mxu3 %v6163_v13  ;;  %2096 = vmatpush.msra.mxu2 %v6165_v33  ;;  %v6167_v13 = vld [vmem:[%s13415_s1 + $0x970] sm:$0xff]  ;;  %v6171_v29 = vld [vmem:[%s13415_s1 + $0x968] sm:$0xff]  ;;  %v5331_v33 = vld [vmem:[%s7239_s26 + $0x3e0] sm:$0xff] }
 0x199   : > { %2025 = vmatmul.f32.vlgmr.msrb.gmra.mxu3 %v5312_v63  ;;  %2068 = vmatpush.msra.mxu1 %v6166_v20  ;;  %v6169_v63 = vld [vmem:[%s13415_s1 + $0xa88] sm:$0xff] }
 0x19a   : > { %2039 = vmatpush.msra.mxu0 %v6167_v13  ;;  %v9297_v59 = vpop.f32.mrf.mxu2  ;;  %2097 = vmatpush.msra.mxu2 %v6168_v23  ;;  %v6172_v23 = vld [vmem:[%s13415_s1 + $0xa68] sm:$0xff] }
 0x19b   : > { %13511 = vst [vmem:[#allocation90_spill] sm:$0xff] %v9297_v59  ;;  %2139 = vmatpush.msra.mxu3 %v6169_v63  ;;  %2069 = vmatpush.msra.mxu1 %v6170_v60  ;;  %v5332_v63 = vld [vmem:[%s7239_s26 + $0x3e8] sm:$0xff]  ;;  %v5333_v59 = vld [vmem:[%s7239_s26 + $0x3f0] sm:$0xff]  ;;  %v6173_v60 = vld [vmem:[%s13415_s1 + $0xa80] sm:$0xff] }
 0x19c   : > { %2040 = vmatpush.msra.mxu0 %v6171_v29  ;;  %v9312_v20 = vpop.f32.mrf.mxu3  ;;  %v9314_v13 = vpop.f32.mrf.mxu0  ;;  %2098 = vmatpush.msra.mxu2 %v6172_v23  ;;  %v6174_v29 = vld [vmem:[%s13415_s1 + $0x9e0] sm:$0xff] }
 0x19d   : > { %13512 = vst [vmem:[#allocation91_spill] sm:$0xff] %v9312_v20  ;;  %v9321_v22 = vpop.f32.mrf.mxu1  ;;  %2140 = vmatpush.msra.mxu3 %v6173_v60  ;;  %2070 = vmatpush.msra.mxu1 %v6174_v29  ;;  %v6175_v20 = vld [vmem:[%s13415_s1 + $0x960] sm:$0xff]  ;;  %v6177_v60 = vld [vmem:[%s13415_s1 + $0x9d8] sm:$0xff] }
 0x19e   : > { %2041 = vmatpush.msra.mxu0 %v6175_v20  ;;  %v6176_v23 = vld [vmem:[%s13415_s1 + $0xa60] sm:$0xff]  ;;  %1970 = vmatmul.f32.gmra.mxu1 %v5332_v63  ;;  %v6178_v29 = vld [vmem:[%s13415_s1 + $0x958] sm:$0xff] }
 0x19f   : > { %2099 = vmatpush.msra.mxu2 %v6176_v23  ;;  %1941 = vmatmul.f32.gmra.mxu0 %v5331_v33  ;;  %v6179_v20 = vld [vmem:[%s13415_s1 + $0xa58] sm:$0xff]  ;;  %v6181_v33 = vld [vmem:[%s13415_s1 + $0x950] sm:$0xff] }
 0x1a0   : > { %1999 = vmatmul.f32.gmra.mxu2 %v5333_v59  ;;  %2071 = vmatpush.msra.mxu1 %v6177_v60  ;;  %v6180_v59 = vld [vmem:[%s13415_s1 + $0x9d0] sm:$0xff]  ;;  %v6184_v60 = vld [vmem:[%s13415_s1 + $0x9c8] sm:$0xff] }
 0x1a1   : > { %2042 = vmatpush.msra.mxu0 %v6178_v29  ;;  %2100 = vmatpush.msra.mxu2 %v6179_v20  ;;  %v6182_v23 = vld [vmem:[%s13415_s1 + $0xa50] sm:$0xff]  ;;  %v6185_v29 = vld [vmem:[%s13415_s1 + $0x948] sm:$0xff] }
 0x1a2   : > { %2028 = vmatmul.f32.gmra.mxu3 %v5334_v37  ;;  %2072 = vmatpush.msra.mxu1 %v6180_v59  ;;  %v6183_v37 = vld [vmem:[%s13415_s1 + $0x1f8] sm:$0xff]  ;;  %v5353_v20 = vld [vmem:[%s7239_s26 + $0x490] sm:$0xff] }
 0x1a3   : > { %2043 = vmatpush.msra.mxu0 %v6181_v33  ;;  %v9351_v63 = vpop.f32.mrf.mxu2  ;;  %2101 = vmatpush.msra.mxu2 %v6182_v23  ;;  %v6186_v33 = vld [vmem:[%s13415_s1 + $0xa48] sm:$0xff]  ;;  %v5354_v23 = vld [vmem:[%s7239_s26 + $0x498] sm:$0xff] }
 0x1a4   : > { %2350 = vmatpush.msrb.mxu3 %v6183_v37  ;;  %2073 = vmatpush.msra.mxu1 %v6184_v60  ;;  %v5355_v37 = vld [vmem:[%s7239_s26 + $0x4a0] sm:$0xff]  ;;  %v6187_v60 = vld [vmem:[%s13415_s1 + $0x1f0] sm:$0xff] }
 0x1a5   : > { %2044 = vmatpush.msra.mxu0 %v6185_v29  ;;  %v9366_v59 = vpop.f32.mrf.mxu0  ;;  %2102 = vmatpush.msra.mxu2 %v6186_v33  ;;  %v9375_v42 = vpop.f32.mrf.mxu3  ;;  %v6188_v29 = vld [vmem:[%s13415_s1 + $0x9c0] sm:$0xff] }
 0x1a6   : > { %13513 = vst [vmem:[#allocation92_spill] sm:$0xff] %v9366_v59  ;;  %v9373_v58 = vpop.f32.mrf.mxu1  ;;  %2351 = vmatpush.msrb.mxu3 %v6187_v60  ;;  %2074 = vmatpush.msra.mxu1 %v6188_v29  ;;  %v6189_v33 = vld [vmem:[%s13415_s1 + $0x940] sm:$0xff]  ;;  %v6191_v60 = vld [vmem:[%s13415_s1 + $0x9b8] sm:$0xff] }
 0x1a7   : > { %13514 = vst [vmem:[#allocation93_spill] sm:$0xff] %v9373_v58  ;;  %2045 = vmatpush.msra.mxu0 %v6189_v33  ;;  %2103 = vmatpush.msra.mxu2 %v6190_v3  ;;  %v6192_v29 = vld [vmem:[%s13415_s1 + $0x938] sm:$0xff]  ;;  %v6194_v3 = vld [vmem:[%s13415_s1 + $0x9b0] sm:$0xff] }
 0x1a8   : > { %1944 = vmatmul.f32.gmra.mxu0 %v5353_v20  ;;  %1973 = vmatmul.f32.gmra.mxu1 %v5354_v23  ;;  %v6193_v33 = vld [vmem:[%s13415_s1 + $0xa38] sm:$0xff]  ;;  %v6195_v20 = vld [vmem:[%s13415_s1 + $0x930] sm:$0xff] }
 0x1a9   : > { %2002 = vmatmul.f32.gmra.mxu2 %v5355_v37  ;;  %2075 = vmatpush.msra.mxu1 %v6191_v60  ;;  %v6196_v37 = vld [vmem:[%s13415_s1 + $0xa30] sm:$0xff]  ;;  %v6198_v60 = vld [vmem:[%s13415_s1 + $0x9a8] sm:$0xff]  ;;  %v11943_v59 = vld [vmem:[%s13415_s1 + $0xa58] sm:$0xff] }
 0x1aa   : > { %2046 = vmatpush.msra.mxu0 %v6192_v29  ;;  %2104 = vmatpush.msra.mxu2 %v6193_v33  ;;  %v6199_v29 = vld [vmem:[%s13415_s1 + $0x928] sm:$0xff]  ;;  %v5375_v33 = vld [vmem:[%s7239_s26 + $0x540] sm:$0x1] }
 0x1ab   : > { %2031 = vmatmul.f32.gmra.mxu3 %v5356_v18  ;;  %2076 = vmatpush.msra.mxu1 %v6194_v3  ;;  %v6197_v18 = vld [vmem:[%s13415_s1 + $0x1e8] sm:$0xff] }
 0x1ac   : > { %2047 = vmatpush.msra.mxu0 %v6195_v20  ;;  %v9405_v23 = vpop.f32.mrf.mxu2  ;;  %2105 = vmatpush.msra.mxu2 %v6196_v37  ;;  %v6200_v3 = vld [vmem:[%s13415_s1 + $0xa28] sm:$0xff]  ;;  %v5377_v37 = vld [vmem:[%s7239_s26 + $0x550] sm:$0x1] }
 0x1ad   : > { %13515 = vst [vmem:[#allocation94_spill] sm:$0xff] %v9405_v23  ;;  %2352 = vmatpush.msrb.mxu3 %v6197_v18  ;;  %2077 = vmatpush.msra.mxu1 %v6198_v60  ;;  %v5376_v20 = vld [vmem:[%s7239_s26 + $0x548] sm:$0x1]  ;;  %v6201_v18 = vld [vmem:[%s13415_s1 + $0x1e0] sm:$0xff] }
 0x1ae   : > { %2048 = vmatpush.msra.mxu0 %v6199_v29  ;;  %2106 = vmatpush.msra.mxu2 %v6200_v3  ;;  %v6202_v29 = vld [vmem:[%s13415_s1 + $0x9a0] sm:$0xff] }
 0x1af   : > { %2353 = vmatpush.msrb.mxu3 %v6201_v18  ;;  %v9428_v60 = vpop.f32.mrf.mxu0  ;;  %2078 = vmatpush.msra.mxu1 %v6202_v29  ;;  %v9436_v3 = vpop.f32.mrf.mxu1  ;;  %v6204_v18 = vld [vmem:[%s13415_s1 + $0xa20] sm:$0xff]  ;;  %v6205_v29 = vld [vmem:[%s13415_s1 + $0x998] sm:$0xff] }
 0x1b0   : > { %13516 = vst [vmem:[#allocation95_spill] sm:$0xff] %v9428_v60  ;;  %2049 = vmatpush.msra.mxu0 %v6203_v35  ;;  %v9438_v14 = vpop.f32.mrf.mxu3  ;;  %2107 = vmatpush.msra.mxu2 %v6204_v18  ;;  %v6206_v35 = vld [vmem:[%s13415_s1 + $0x918] sm:$0xff]  ;;  %v6212_v18 = vld [vmem:[%s13415_s1 + $0x988] sm:$0xff] }
 0x1b1   : > { %13517 = vst [vmem:[#allocation96_spill] sm:$0xff] %v9436_v3  ;;  %1947 = vmatmul.f32.gmra.mxu0 %v5375_v33  ;;  %1976 = vmatmul.f32.gmra.mxu1 %v5376_v20  ;;  %v6207_v3 = vld [vmem:[%s13415_s1 + $0xa18] sm:$0xff]  ;;  %v6208_v33 = vld [vmem:[%s13415_s1 + $0x990] sm:$0xff]  ;;  %v5360_v60 = vld [vmem:[%s7239_s26 + $0x4c8] sm:$0xff] }
 0x1b2   : > { %13518 = vst [vmem:[#allocation97_spill] sm:$0xff] %v9438_v14  ;;  %2005 = vmatmul.f32.gmra.mxu2 %v5377_v37  ;;  %2079 = vmatpush.msra.mxu1 %v6205_v29  ;;  %v6209_v20 = vld [vmem:[%s13415_s1 + $0x910] sm:$0xff]  ;;  %v6213_v29 = vld [vmem:[%s13415_s1 + $0x908] sm:$0xff] }
 0x1b3   : > { %2050 = vmatpush.msra.mxu0 %v6206_v35  ;;  %2108 = vmatpush.msra.mxu2 %v6207_v3  ;;  %v6210_v37 = vld [vmem:[%s13415_s1 + $0xa10] sm:$0xff] }
 0x1b4   : > { %2034 = vmatmul.f32.gmra.mxu3 %v5378_v12  ;;  %2080 = vmatpush.msra.mxu1 %v6208_v33  ;;  %v6211_v12 = vld [vmem:[%s13415_s1 + $0x1d8] sm:$0xff]  ;;  %v5313_v35 = vld [vmem:[%s7239_s26 + $0x350] sm:$0xff]  ;;  %v6214_v33 = vld [vmem:[%s13415_s1 + $0xa08] sm:$0xff] }
 0x1b5   : > { %2051 = vmatpush.msra.mxu0 %v6209_v20  ;;  %2109 = vmatpush.msra.mxu2 %v6210_v37  ;;  %v5314_v20 = vld [vmem:[%s7239_s26 + $0x358] sm:$0xff]  ;;  %v5315_v37 = vld [vmem:[%s7239_s26 + $0x360] sm:$0xff] }
 0x1b6   : > { %2354 = vmatpush.msrb.mxu3 %v6211_v12  ;;  %v9465_v3 = vpop.f32.mrf.mxu2  ;;  %2081 = vmatpush.msra.mxu1 %v6212_v18  ;;  %v6215_v12 = vld [vmem:[%s13415_s1 + $0x1d0] sm:$0xff]  ;;  %v6216_v18 = vld [vmem:[%s13415_s1 + $0x980] sm:$0xff] }
 0x1b7   : > { %13519 = vst [vmem:[#allocation98_spill] sm:$0xff] %v9465_v3  ;;  %2052 = vmatpush.msra.mxu0 %v6213_v29  ;;  %2110 = vmatpush.msra.mxu2 %v6214_v33  ;;  %v6217_v29 = vld [vmem:[%s13415_s1 + $0x900] sm:$0xff] }
 0x1b8   : > { %2355 = vmatpush.msrb.mxu3 %v6215_v12  ;;  %2082 = vmatpush.msra.mxu1 %v6216_v18  ;;  %v9488_v3 = vpop.f32.mrf.mxu0  ;;  %v6218_v33 = vld [vmem:[%s13415_s1 + $0xa00] sm:$0xff]  ;;  %v9496_v2 = vpop.f32.mrf.mxu3  ;;  %v6219_v18 = vld [vmem:[%s13415_s1 + $0xf8] sm:$0xff] }
 0x1b9   : > { %2053 = vmatpush.msra.mxu0 %v6217_v29  ;;  %13520 = vst [vmem:[#allocation99_spill] sm:$0xff] %v9488_v3  ;;  %2111 = vmatpush.msra.mxu2 %v6218_v33  ;;  %v9494_v12 = vpop.f32.mrf.mxu1  ;;  %v6220_v29 = vld [vmem:[%s13415_s1 + $0x78] sm:$0xff]  ;;  %v6224_v33 = vld [vmem:[%s13415_s1 + $0x170] sm:$0xff] }
 0x1ba   : > { %2054 = vmatmul.f32.vlgmr.msra.gmra.mxu0 %v5313_v35  ;;  %13521 = vst [vmem:[#allocation100_spill] sm:$0xff] %v9494_v12  ;;  %2083 = vmatmul.f32.vlgmr.msra.gmra.mxu1 %v5314_v20  ;;  %v6221_v35 = vld [vmem:[%s13415_s1 + $0x178] sm:$0xff]  ;;  %v6222_v20 = vld [vmem:[%s13415_s1 + $0xf0] sm:$0xff] }
 0x1bb   : > { %13522 = vst [vmem:[#allocation101_spill] sm:$0xff] %v9496_v2  ;;  %2112 = vmatmul.f32.vlgmr.msra.gmra.mxu2 %v5315_v37  ;;  %2292 = vmatpush.msrb.mxu1 %v6219_v18  ;;  %v6223_v37 = vld [vmem:[%s13415_s1 + $0x70] sm:$0xff]  ;;  %v6226_v18 = vld [vmem:[%s13415_s1 + $0xe8] sm:$0xff]  ;;  %v5338_v12 = vld [vmem:[%s7239_s26 + $0x418] sm:$0xff] }
 0x1bc   : > { %2263 = vmatpush.msrb.mxu0 %v6220_v29  ;;  %2321 = vmatpush.msrb.mxu2 %v6221_v35  ;;  %v6227_v29 = vld [vmem:[%s13415_s1 + $0x68] sm:$0xff]  ;;  %v5335_v35 = vld [vmem:[%s7239_s26 + $0x400] sm:$0xff] }
 0x1bd   : > { %5383 = vmatmul.msk.f32.vlgmr.msra.gmra.mxu3 %vm760_vm0, %v5316_v45  ;;  %2293 = vmatpush.msrb.mxu1 %v6222_v20  ;;  %v6225_v45 = vld [vmem:[%s13415_s1 + $0x1c8] sm:$0xff] }
 0x1be   : > { %2264 = vmatpush.msrb.mxu0 %v6223_v37  ;;  %2322 = vmatpush.msrb.mxu2 %v6224_v33  ;;  %v6228_v37 = vld [vmem:[%s13415_s1 + $0x168] sm:$0xff] }
 0x1bf   : > { %2356 = vmatpush.msrb.mxu3 %v6225_v45  ;;  %2294 = vmatpush.msrb.mxu1 %v6226_v18  ;;  %v9527_v20 = vpop.f32.mrf.mxu2  ;;  %v5336_v33 = vld [vmem:[%s7239_s26 + $0x408] sm:$0xff]  ;;  %v5337_v45 = vld [vmem:[%s7239_s26 + $0x410] sm:$0xff]  ;;  %v6229_v18 = vld [vmem:[%s13415_s1 + $0x1c0] sm:$0xff] }
 0x1c0   : > { %2265 = vmatpush.msrb.mxu0 %v6227_v29  ;;  %13523 = vst [vmem:[#allocation102_spill] sm:$0xff] %v9527_v20  ;;  %2323 = vmatpush.msrb.mxu2 %v6228_v37  ;;  %v6230_v29 = vld [vmem:[%s13415_s1 + $0xe0] sm:$0xff] }
 0x1c1   : > { %2357 = vmatpush.msrb.mxu3 %v6229_v18  ;;  %2295 = vmatpush.msrb.mxu1 %v6230_v29  ;;  %v6231_v20 = vld [vmem:[%s13415_s1 + $0x60] sm:$0xff]  ;;  %v6233_v29 = vld [vmem:[%s13415_s1 + $0xd8] sm:$0xff] }
 0x1c2   : > { %2266 = vmatpush.msrb.mxu0 %v6231_v20  ;;  %v6232_v37 = vld [vmem:[%s13415_s1 + $0x160] sm:$0xff]  ;;  %v9547_v3 = vpop.f32.mrf.mxu0  ;;  %2086 = vmatmul.f32.gmra.mxu1 %v5336_v33  ;;  %v9549_v18 = vpop.f32.mrf.mxu3  ;;  %v6234_v20 = vld [vmem:[%s13415_s1 + $0x58] sm:$0xff]  ;;  %v6236_v33 = vld [vmem:[%s13415_s1 + $0xd0] sm:$0xff] }
 0x1c3   : > { %2324 = vmatpush.msrb.mxu2 %v6232_v37  ;;  %2057 = vmatmul.f32.gmra.mxu0 %v5335_v35  ;;  %13524 = vst [vmem:[#allocation103_spill] sm:$0xff] %v9549_v18  ;;  %v9551_v2 = vpop.f32.mrf.mxu1  ;;  %v6235_v35 = vld [vmem:[%s13415_s1 + $0x158] sm:$0xff]  ;;  %v6238_v37 = vld [vmem:[%s13415_s1 + $0x150] sm:$0xff]  ;;  %v6245_v18 = vld [vmem:[%s13415_s1 + $0x40] sm:$0xff] }
 0x1c4   : > { %2115 = vmatmul.f32.gmra.mxu2 %v5337_v45  ;;  %13525 = vst [vmem:[#allocation104_spill] sm:$0xff] %v9551_v2  ;;  %2296 = vmatpush.msrb.mxu1 %v6233_v29  ;;  %v6237_v45 = vld [vmem:[%s13415_s1 + $0x50] sm:$0xff]  ;;  %v6240_v29 = vld [vmem:[%s13415_s1 + $0xc8] sm:$0xff] }
 0x1c5   : > { %2267 = vmatpush.msrb.mxu0 %v6234_v20  ;;  %2325 = vmatpush.msrb.mxu2 %v6235_v35  ;;  %v6241_v20 = vld [vmem:[%s13415_s1 + $0x48] sm:$0xff]  ;;  %v5357_v35 = vld [vmem:[%s7239_s26 + $0x4b0] sm:$0xff] }
 0x1c6   : > { %5384 = vmatmul.msk.f32.gmra.mxu3 %vm760_vm0, %v5338_v12  ;;  %2297 = vmatpush.msrb.mxu1 %v6236_v33  ;;  %v6239_v12 = vld [vmem:[%s13415_s1 + $0x1b8] sm:$0xff]  ;;  %v6242_v33 = vld [vmem:[%s13415_s1 + $0x148] sm:$0xff] }
 0x1c7   : > { %2268 = vmatpush.msrb.mxu0 %v6237_v45  ;;  %2326 = vmatpush.msrb.mxu2 %v6238_v37  ;;  %v5358_v45 = vld [vmem:[%s7239_s26 + $0x4b8] sm:$0xff]  ;;  %v5359_v37 = vld [vmem:[%s7239_s26 + $0x4c0] sm:$0xff] }
 0x1c8   : > { %2358 = vmatpush.msrb.mxu3 %v6239_v12  ;;  %2298 = vmatpush.msrb.mxu1 %v6240_v29  ;;  %v6243_v12 = vld [vmem:[%s13415_s1 + $0x1b0] sm:$0xff] }
 0x1c9   : > { %2269 = vmatpush.msrb.mxu0 %v6241_v20  ;;  %2327 = vmatpush.msrb.mxu2 %v6242_v33  ;;  %v9590_v29 = vpop.f32.mrf.mxu2  ;;  %v6244_v20 = vld [vmem:[%s13415_s1 + $0xc0] sm:$0xff] }
 0x1ca   : > { %2359 = vmatpush.msrb.mxu3 %v6243_v12  ;;  %13526 = vst [vmem:[#allocation105_spill] sm:$0xff] %v9590_v29  ;;  %2299 = vmatpush.msrb.mxu1 %v6244_v20  ;;  %v6246_v33 = vld [vmem:[%s13415_s1 + $0x140] sm:$0xff]  ;;  %v6247_v20 = vld [vmem:[%s13415_s1 + $0xb8] sm:$0xff] }
 0x1cb   : > { %2270 = vmatpush.msrb.mxu0 %v6245_v18  ;;  %2328 = vmatpush.msrb.mxu2 %v6246_v33  ;;  %v6248_v18 = vld [vmem:[%s13415_s1 + $0x38] sm:$0xff]  ;;  %v9610_v51 = vpop.f32.mrf.mxu1  ;;  %v6252_v33 = vld [vmem:[%s13415_s1 + $0x130] sm:$0xff] }
 0x1cc   : > { %2060 = vmatmul.f32.gmra.mxu0 %v5357_v35  ;;  %2089 = vmatmul.f32.gmra.mxu1 %v5358_v45  ;;  %13528 = vst [vmem:[#allocation107_spill] sm:$0xff] %v9610_v51  ;;  %v9612_v55 = vpop.f32.mrf.mxu3  ;;  %v6249_v35 = vld [vmem:[%s13415_s1 + $0x138] sm:$0xff]  ;;  %v6250_v45 = vld [vmem:[%s13415_s1 + $0xb0] sm:$0xff] }
 0x1cd   : > { %2118 = vmatmul.f32.gmra.mxu2 %v5359_v37  ;;  %v9602_v12 = vpop.f32.mrf.mxu0  ;;  %2300 = vmatpush.msrb.mxu1 %v6247_v20  ;;  %13529 = vst [vmem:[#allocation108_spill] sm:$0xff] %v9612_v55  ;;  %v6251_v37 = vld [vmem:[%s13415_s1 + $0x30] sm:$0xff]  ;;  %v6254_v20 = vld [vmem:[%s13415_s1 + $0xa8] sm:$0xff]  ;;  %v6517_v51 = vld [vmem:[%s13415_s1 + $0x818] sm:$0xff] }
 0x1ce   : > { %13527 = vst [vmem:[#allocation106_spill] sm:$0xff] %v9602_v12  ;;  %2271 = vmatpush.msrb.mxu0 %v6248_v18  ;;  %2329 = vmatpush.msrb.mxu2 %v6249_v35  ;;  %v6255_v18 = vld [vmem:[%s13415_s1 + $0x28] sm:$0xff]  ;;  %v5379_v35 = vld [vmem:[%s7239_s26 + $0x560] sm:$0x1]  ;;  %v5449_v12 = vld [vmem:[%s7239_s26 + $0x770] sm:$0xff] }
 0x1cf   : > { %5385 = vmatmul.msk.f32.gmra.mxu3 %vm760_vm0, %v5360_v60  ;;  %2301 = vmatpush.msrb.mxu1 %v6250_v45  ;;  %v6253_v60 = vld [vmem:[%s13415_s1 + $0x1a8] sm:$0xff]  ;;  %v6875_v55 = vld [vmem:[%s13415_s1 + $0x918] sm:$0xff] }
 0x1d0   : > { %2272 = vmatpush.msrb.mxu0 %v6251_v37  ;;  %2330 = vmatpush.msrb.mxu2 %v6252_v33  ;;  %v6256_v45 = vld [vmem:[%s13415_s1 + $0x128] sm:$0xff]  ;;  %v5381_v33 = vld [vmem:[%s7239_s26 + $0x570] sm:$0x1] }
 0x1d1   : > { %2360 = vmatpush.msrb.mxu3 %v6253_v60  ;;  %2302 = vmatpush.msrb.mxu1 %v6254_v20  ;;  %v5380_v37 = vld [vmem:[%s7239_s26 + $0x568] sm:$0x1]  ;;  %v6257_v60 = vld [vmem:[%s13415_s1 + $0x1a0] sm:$0xff] }
 0x1d2   : > { %2273 = vmatpush.msrb.mxu0 %v6255_v18  ;;  %2331 = vmatpush.msrb.mxu2 %v6256_v45  ;;  %v6258_v20 = vld [vmem:[%s13415_s1 + $0xa0] sm:$0xff] }
 0x1d3   : > { %2361 = vmatpush.msrb.mxu3 %v6257_v60  ;;  %2303 = vmatpush.msrb.mxu1 %v6258_v20  ;;  %v6259_v18 = vld [vmem:[%s13415_s1 + $0x20] sm:$0xff]  ;;  %v9651_v16 = vpop.f32.mrf.mxu2  ;;  %v6261_v60 = vld [vmem:[%s13415_s1 + $0x98] sm:$0xff] }
 0x1d4   : > { %2274 = vmatpush.msrb.mxu0 %v6259_v18  ;;  %13530 = vst [vmem:[#allocation109_spill] sm:$0xff] %v9651_v16  ;;  %v6260_v45 = vld [vmem:[%s13415_s1 + $0x120] sm:$0xff]  ;;  %2092 = vmatmul.f32.gmra.mxu1 %v5380_v37  ;;  %v6262_v20 = vld [vmem:[%s13415_s1 + $0x18] sm:$0xff] }
 0x1d5   : > { %2332 = vmatpush.msrb.mxu2 %v6260_v45  ;;  %2063 = vmatmul.f32.gmra.mxu0 %v5379_v35  ;;  %v6263_v45 = vld [vmem:[%s13415_s1 + $0x118] sm:$0xff]  ;;  %v6497_v16 = vld [vmem:[%s13415_s1 + $0x840] sm:$0xff] }
 0x1d6   : > { %2121 = vmatmul.f32.gmra.mxu2 %v5381_v33  ;;  %2304 = vmatpush.msrb.mxu1 %v6261_v60  ;;  %v9663_v18 = vpop.f32.mrf.mxu0  ;;  %v9671_v37 = vpop.f32.mrf.mxu3  ;;  %v6264_v33 = vld [vmem:[%s13415_s1 + $0x90] sm:$0xff] }
 0x1d7   : > { %2275 = vmatpush.msrb.mxu0 %v6262_v20  ;;  %13531 = vst [vmem:[#allocation110_spill] sm:$0xff] %v9663_v18  ;;  %2333 = vmatpush.msrb.mxu2 %v6263_v45  ;;  %v9669_v35 = vpop.f32.mrf.mxu1  ;;  %v6265_v60 = vld [vmem:[%s13415_s1 + $0x10] sm:$0xff]  ;;  %v6267_v20 = vld [vmem:[%s13415_s1 + $0x198] sm:$0xff]  ;;  %v6268_v45 = vld [vmem:[%s13415_s1 + $0x88] sm:$0xff] }
 0x1d8   : > { %5386 = vmatmul.msk.f32.gmra.mxu3 %vm760_vm0, %v5382_v15  ;;  %13532 = vst [vmem:[#allocation111_spill] sm:$0xff] %v9669_v35  ;;  %2305 = vmatpush.msrb.mxu1 %v6264_v33  ;;  %v6266_v15 = vld [vmem:[%s13415_s1 + $0x110] sm:$0xff]  ;;  %v6269_v33 = vld [vmem:[%s13415_s1 + $0x8] sm:$0xff] }
 0x1d9   : > { %13533 = vst [vmem:[#allocation112_spill] sm:$0xff] %v9671_v37  ;;  %2276 = vmatpush.msrb.mxu0 %v6265_v60  ;;  %2334 = vmatpush.msrb.mxu2 %v6266_v15  ;;  %v6270_v60 = vld [vmem:[%s13415_s1 + $0x108] sm:$0xff]  ;;  %v6271_v15 = vld [vmem:[%s13415_s1 + $0x190] sm:$0xff] }
 0x1da   : > { %2362 = vmatpush.msrb.mxu3 %v6267_v20  ;;  %2306 = vmatpush.msrb.mxu1 %v6268_v45  ;;  %v5387_v20 = vld [vmem:[%s7239_s26 + $0x580] sm:$0xff]  ;;  %v5388_v35 = vld [vmem:[%s7239_s26 + $0x588] sm:$0xff]  ;;  %v5389_v18 = vld [vmem:[%s7239_s26 + $0x590] sm:$0xff] }
 0x1db   : > { %2277 = vmatpush.msrb.mxu0 %v6269_v33  ;;  %2335 = vmatpush.msrb.mxu2 %v6270_v60  ;;  %v6272_v45 = vld [vmem:[%s13415_s1 + $0x80] sm:$0xff] }
 0x1dc   : > { %2363 = vmatpush.msrb.mxu3 %v6271_v15  ;;  %2307 = vmatpush.msrb.mxu1 %v6272_v45  ;;  %v6273_v33 = vld [vmem:[%s13415_s1] sm:$0xff]  ;;  %v6275_v15 = vld [vmem:[%s13415_s1 + $0x188] sm:$0xff]  ;;  %v5390_v45 = vld [vmem:[%s7239_s26 + $0x598] sm:$0xff] }
 0x1dd   : > { %2278 = vmatpush.msrb.mxu0 %v6273_v33  ;;  %v6274_v60 = vld [vmem:[%s13415_s1 + $0x100] sm:$0xff]  ;;  %v9712_v48 = vpop.f32.mrf.mxu2  ;;  %2308 = vmatmul.f32.vlgmr.msrb.gmra.mxu1 %v5388_v35  ;;  %v6276_v33 = vld [vmem:[%s13415_s1 + $0x2f8] sm:$0xff] }
 0x1de   : > { %2336 = vmatpush.msrb.mxu2 %v6274_v60  ;;  %2364 = vmatpush.msrb.mxu3 %v6275_v15  ;;  %13534 = vst [vmem:[#allocation113_spill] sm:$0xff] %v9712_v48  ;;  %v6277_v60 = vld [vmem:[%s13415_s1 + $0x180] sm:$0xff]  ;;  %v6278_v15 = vld [vmem:[%s13415_s1 + $0x278] sm:$0xff] }
 0x1df   : > { %2279 = vmatmul.f32.vlgmr.msrb.gmra.mxu0 %v5387_v20  ;;  %2337 = vmatmul.f32.vlgmr.msrb.gmra.mxu2 %v5389_v18  ;;  %v6279_v18 = vld [vmem:[%s13415_s1 + $0x378] sm:$0xff]  ;;  %v9729_v35 = vpop.f32.mrf.mxu1 }
 0x1e0   : > { %2408 = vmatpush.msra.mxu1 %v6276_v33  ;;  %2365 = vmatpush.msrb.mxu3 %v6277_v60  ;;  %13536 = vst [vmem:[#allocation115_spill] sm:$0xff] %v9729_v35  ;;  %v9731_v20 = vpop.f32.mrf.mxu3  ;;  %v6280_v33 = vld [vmem:[%s13415_s1 + $0x2f0] sm:$0xff]  ;;  %v5410_v35 = vld [vmem:[%s7239_s26 + $0x638] sm:$0xff] }
 0x1e1   : > { %2379 = vmatpush.msra.mxu0 %v6278_v15  ;;  %v9724_v48 = vpop.f32.mrf.mxu0  ;;  %2437 = vmatpush.msra.mxu2 %v6279_v18  ;;  %13537 = vst [vmem:[#allocation116_spill] sm:$0xff] %v9731_v20  ;;  %v6281_v60 = vld [vmem:[%s13415_s1 + $0x270] sm:$0xff]  ;;  %v6283_v15 = vld [vmem:[%s13415_s1 + $0x3f8] sm:$0xff]  ;;  %v6284_v18 = vld [vmem:[%s13415_s1 + $0x2e8] sm:$0xff] }
 0x1e2   : > { %13535 = vst [vmem:[#allocation114_spill] sm:$0xff] %v9724_v48  ;;  %2366 = vmatmul.f32.vlgmr.msrb.gmra.mxu3 %v5390_v45  ;;  %2409 = vmatpush.msra.mxu1 %v6280_v33  ;;  %v6282_v45 = vld [vmem:[%s13415_s1 + $0x370] sm:$0xff]  ;;  %v6285_v33 = vld [vmem:[%s13415_s1 + $0x268] sm:$0xff]  ;;  %v5411_v48 = vld [vmem:[%s7239_s26 + $0x640] sm:$0xff] }
 0x1e3   : > { %2380 = vmatpush.msra.mxu0 %v6281_v60  ;;  %2438 = vmatpush.msra.mxu2 %v6282_v45  ;;  %v6286_v60 = vld [vmem:[%s13415_s1 + $0x368] sm:$0xff]  ;;  %v6287_v45 = vld [vmem:[%s13415_s1 + $0x3f0] sm:$0xff] }
 0x1e4   : > { %2466 = vmatpush.msra.mxu3 %v6283_v15  ;;  %2410 = vmatpush.msra.mxu1 %v6284_v18  ;;  %v5409_v15 = vld [vmem:[%s7239_s26 + $0x630] sm:$0xff]  ;;  %v6288_v18 = vld [vmem:[%s13415_s1 + $0x2e0] sm:$0xff] }
 0x1e5   : > { %2381 = vmatpush.msra.mxu0 %v6285_v33  ;;  %2439 = vmatpush.msra.mxu2 %v6286_v60  ;;  %v6289_v33 = vld [vmem:[%s13415_s1 + $0x260] sm:$0xff] }
 0x1e6   : > { %2467 = vmatpush.msra.mxu3 %v6287_v45  ;;  %2411 = vmatpush.msra.mxu1 %v6288_v18  ;;  %v6290_v60 = vld [vmem:[%s13415_s1 + $0x360] sm:$0xff]  ;;  %v6291_v45 = vld [vmem:[%s13415_s1 + $0x3e8] sm:$0xff]  ;;  %v6292_v18 = vld [vmem:[%s13415_s1 + $0x2d8] sm:$0xff] }
 0x1e7   : > { %2382 = vmatpush.msra.mxu0 %v6289_v33  ;;  %2440 = vmatpush.msra.mxu2 %v6290_v60  ;;  %v9772_v20 = vpop.f32.mrf.mxu2  ;;  %v5412_v33 = vld [vmem:[%s7239_s26 + $0x648] sm:$0xff]  ;;  %v6293_v60 = vld [vmem:[%s13415_s1 + $0x258] sm:$0xff] }
 0x1e8   : > { %2468 = vmatpush.msra.mxu3 %v6291_v45  ;;  %13538 = vst [vmem:[#allocation117_spill] sm:$0xff] %v9772_v20  ;;  %2282 = vmatmul.f32.gmra.mxu0 %v5409_v15  ;;  %v6294_v45 = vld [vmem:[%s13415_s1 + $0x358] sm:$0xff] }
 0x1e9   : > { %2311 = vmatmul.f32.gmra.mxu1 %v5410_v35  ;;  %2340 = vmatmul.f32.gmra.mxu2 %v5411_v48  ;;  %v6295_v48 = vld [vmem:[%s13415_s1 + $0x3e0] sm:$0xff]  ;;  %v6296_v35 = vld [vmem:[%s13415_s1 + $0x2d0] sm:$0xff] }
 0x1ea   : > { %2412 = vmatpush.msra.mxu1 %v6292_v18  ;;  %2383 = vmatpush.msra.mxu0 %v6293_v60  ;;  %v9784_v20 = vpop.f32.mrf.mxu0  ;;  %v9792_v15 = vpop.f32.mrf.mxu3  ;;  %v6297_v60 = vld [vmem:[%s13415_s1 + $0x250] sm:$0xff] }
 0x1eb   : > { %2441 = vmatpush.msra.mxu2 %v6294_v45  ;;  %13539 = vst [vmem:[#allocation118_spill] sm:$0xff] %v9784_v20  ;;  %2469 = vmatpush.msra.mxu3 %v6295_v48  ;;  %v9794_v18 = vpop.f32.mrf.mxu1  ;;  %v6298_v45 = vld [vmem:[%s13415_s1 + $0x350] sm:$0xff]  ;;  %v6299_v48 = vld [vmem:[%s13415_s1 + $0x3d8] sm:$0xff] }
 0x1ec   : > { %2413 = vmatpush.msra.mxu1 %v6296_v35  ;;  %13540 = vst [vmem:[#allocation119_spill] sm:$0xff] %v9792_v15  ;;  %2369 = vmatmul.f32.gmra.mxu3 %v5412_v33  ;;  %v6300_v33 = vld [vmem:[%s13415_s1 + $0x2c8] sm:$0xff] }
 0x1ed   : > { %13541 = vst [vmem:[#allocation120_spill] sm:$0xff] %v9794_v18  ;;  %2384 = vmatpush.msra.mxu0 %v6297_v60  ;;  %2442 = vmatpush.msra.mxu2 %v6298_v45  ;;  %v6301_v35 = vld [vmem:[%s13415_s1 + $0x248] sm:$0xff]  ;;  %v6303_v45 = vld [vmem:[%s13415_s1 + $0x3d0] sm:$0xff] }
 0x1ee   : > { %2470 = vmatpush.msra.mxu3 %v6299_v48  ;;  %2414 = vmatpush.msra.mxu1 %v6300_v33  ;;  %v6302_v60 = vld [vmem:[%s13415_s1 + $0x348] sm:$0xff]  ;;  %v5431_v48 = vld [vmem:[%s7239_s26 + $0x6e0] sm:$0xff] }
 0x1ef   : > { %2385 = vmatpush.msra.mxu0 %v6301_v35  ;;  %2443 = vmatpush.msra.mxu2 %v6302_v60  ;;  %v5432_v15 = vld [vmem:[%s7239_s26 + $0x6e8] sm:$0xff]  ;;  %v6304_v33 = vld [vmem:[%s13415_s1 + $0x2c0] sm:$0xff] }
 0x1f0   : > { %2471 = vmatpush.msra.mxu3 %v6303_v45  ;;  %2415 = vmatpush.msra.mxu1 %v6304_v33  ;;  %v6305_v35 = vld [vmem:[%s13415_s1 + $0x240] sm:$0xff]  ;;  %v6307_v45 = vld [vmem:[%s13415_s1 + $0x3c8] sm:$0xff]  ;;  %v6308_v33 = vld [vmem:[%s13415_s1 + $0x2b8] sm:$0xff] }
 0x1f1   : > { %2386 = vmatpush.msra.mxu0 %v6305_v35  ;;  %v6306_v60 = vld [vmem:[%s13415_s1 + $0x340] sm:$0xff]  ;;  %v9832_v30 = vpop.f32.mrf.mxu2  ;;  %2314 = vmatmul.f32.gmra.mxu1 %v5432_v15  ;;  %v5434_v35 = vld [vmem:[%s7239_s26 + $0x6f8] sm:$0xff]  ;;  %v6312_v15 = vld [vmem:[%s13415_s1 + $0x2b0] sm:$0xff] }
 0x1f2   : > { %2444 = vmatpush.msra.mxu2 %v6306_v60  ;;  %2472 = vmatpush.msra.mxu3 %v6307_v45  ;;  %13542 = vst [vmem:[#allocation121_spill] sm:$0xff] %v9832_v30  ;;  %v6309_v60 = vld [vmem:[%s13415_s1 + $0x238] sm:$0xff] }
 0x1f3   : > { %2285 = vmatmul.f32.gmra.mxu0 %v5431_v48  ;;  %2343 = vmatmul.f32.gmra.mxu2 %v5433_v62  ;;  %v6310_v45 = vld [vmem:[%s13415_s1 + $0x338] sm:$0xff]  ;;  %v6311_v62 = vld [vmem:[%s13415_s1 + $0x3c0] sm:$0xff] }
 0x1f4   : > { %2416 = vmatpush.msra.mxu1 %v6308_v33  ;;  %2387 = vmatpush.msra.mxu0 %v6309_v60  ;;  %v9844_v25 = vpop.f32.mrf.mxu0  ;;  %v9854_v33 = vpop.f32.mrf.mxu3  ;;  %v6313_v60 = vld [vmem:[%s13415_s1 + $0x230] sm:$0xff]  ;;  %v6852_v30 = vld [vmem:[%s13415_s1 + $0x958] sm:$0xff] }
 0x1f5   : > { %2445 = vmatpush.msra.mxu2 %v6310_v45  ;;  %13543 = vst [vmem:[#allocation122_spill] sm:$0xff] %v9844_v25  ;;  %2473 = vmatpush.msra.mxu3 %v6311_v62  ;;  %v9852_v48 = vpop.f32.mrf.mxu1  ;;  %v6314_v45 = vld [vmem:[%s13415_s1 + $0x330] sm:$0xff]  ;;  %v6315_v62 = vld [vmem:[%s13415_s1 + $0x3b8] sm:$0xff] }
 0x1f6   : > { %2417 = vmatpush.msra.mxu1 %v6312_v15  ;;  %13544 = vst [vmem:[#allocation123_spill] sm:$0xff] %v9852_v48  ;;  %2372 = vmatmul.f32.gmra.mxu3 %v5434_v35  ;;  %v6316_v35 = vld [vmem:[%s13415_s1 + $0x2a8] sm:$0xff]  ;;  %v5455_v48 = vld [vmem:[%s7239_s26 + $0x7a0] sm:$0x1] }
 0x1f7   : > { %13545 = vst [vmem:[#allocation124_spill] sm:$0xff] %v9854_v33  ;;  %2388 = vmatpush.msra.mxu0 %v6313_v60  ;;  %2446 = vmatpush.msra.mxu2 %v6314_v45  ;;  %v6317_v15 = vld [vmem:[%s13415_s1 + $0x228] sm:$0xff]  ;;  %v6319_v45 = vld [vmem:[%s13415_s1 + $0x3b0] sm:$0xff] }
 0x1f8   : > { %2474 = vmatpush.msra.mxu3 %v6315_v62  ;;  %2418 = vmatpush.msra.mxu1 %v6316_v35  ;;  %v6318_v60 = vld [vmem:[%s13415_s1 + $0x328] sm:$0xff]  ;;  %v5453_v62 = vld [vmem:[%s7239_s26 + $0x790] sm:$0x1]  ;;  %v6320_v35 = vld [vmem:[%s13415_s1 + $0x2a0] sm:$0xff] }
 0x1f9   : > { %2389 = vmatpush.msra.mxu0 %v6317_v15  ;;  %2447 = vmatpush.msra.mxu2 %v6318_v60  ;;  %v6321_v15 = vld [vmem:[%s13415_s1 + $0x220] sm:$0xff] }
 0x1fa   : > { %2475 = vmatpush.msra.mxu3 %v6319_v45  ;;  %2419 = vmatpush.msra.mxu1 %v6320_v35  ;;  %v6322_v60 = vld [vmem:[%s13415_s1 + $0x320] sm:$0xff]  ;;  %v6323_v45 = vld [vmem:[%s13415_s1 + $0x3a8] sm:$0xff]  ;;  %v6324_v35 = vld [vmem:[%s13415_s1 + $0x298] sm:$0xff] }
 0x1fb   : > { %2390 = vmatpush.msra.mxu0 %v6321_v15  ;;  %2448 = vmatpush.msra.mxu2 %v6322_v60  ;;  %v9892_v0 = vpop.f32.mrf.mxu2  ;;  %v5456_v15 = vld [vmem:[%s7239_s26 + $0x7a8] sm:$0x1]  ;;  %v6325_v60 = vld [vmem:[%s13415_s1 + $0x218] sm:$0xff] }
 0x1fc   : > { %2476 = vmatpush.msra.mxu3 %v6323_v45  ;;  %13546 = vst [vmem:[#allocation125_spill] sm:$0xff] %v9892_v0  ;;  %2288 = vmatmul.f32.gmra.mxu0 %v5453_v62  ;;  %v6326_v45 = vld [vmem:[%s13415_s1 + $0x318] sm:$0xff] }
 0x1fd   : > { %2317 = vmatmul.f32.gmra.mxu1 %v5454_v9  ;;  %2346 = vmatmul.f32.gmra.mxu2 %v5455_v48  ;;  %v6327_v9 = vld [vmem:[%s13415_s1 + $0x3a0] sm:$0xff]  ;;  %v6328_v48 = vld [vmem:[%s13415_s1 + $0x290] sm:$0xff] }
 0x1fe   : > { %2420 = vmatpush.msra.mxu1 %v6324_v35  ;;  %2391 = vmatpush.msra.mxu0 %v6325_v60  ;;  %v9904_v0 = vpop.f32.mrf.mxu0  ;;  %v9914_v35 = vpop.f32.mrf.mxu3  ;;  %v6329_v60 = vld [vmem:[%s13415_s1 + $0x210] sm:$0xff] }
 0x1ff   : > { %2449 = vmatpush.msra.mxu2 %v6326_v45  ;;  %13547 = vst [vmem:[#allocation126_spill] sm:$0xff] %v9904_v0  ;;  %2477 = vmatpush.msra.mxu3 %v6327_v9  ;;  %v9912_v62 = vpop.f32.mrf.mxu1  ;;  %v6330_v45 = vld [vmem:[%s13415_s1 + $0x310] sm:$0xff]  ;;  %v6331_v9 = vld [vmem:[%s13415_s1 + $0x398] sm:$0xff] }
 0x200   : > { %2421 = vmatpush.msra.mxu1 %v6328_v48  ;;  %13548 = vst [vmem:[#allocation127_spill] sm:$0xff] %v9912_v62  ;;  %2375 = vmatmul.f32.gmra.mxu3 %v5456_v15  ;;  %v6332_v15 = vld [vmem:[%s13415_s1 + $0x288] sm:$0xff]  ;;  %v5393_v0 = vld [vmem:[%s7239_s26 + $0x5b0] sm:$0xff] }
 0x201   : > { %13549 = vst [vmem:[#allocation128_spill] sm:$0xff] %v9914_v35  ;;  %2392 = vmatpush.msra.mxu0 %v6329_v60  ;;  %2450 = vmatpush.msra.mxu2 %v6330_v45  ;;  %v6333_v48 = vld [vmem:[%s13415_s1 + $0x208] sm:$0xff]  ;;  %v6335_v45 = vld [vmem:[%s13415_s1 + $0x390] sm:$0xff] }
 0x202   : > { %2478 = vmatpush.msra.mxu3 %v6331_v9  ;;  %2422 = vmatpush.msra.mxu1 %v6332_v15  ;;  %v6334_v60 = vld [vmem:[%s13415_s1 + $0x308] sm:$0xff]  ;;  %v5391_v9 = vld [vmem:[%s7239_s26 + $0x5a0] sm:$0xff] }
 0x203   : > { %2393 = vmatpush.msra.mxu0 %v6333_v48  ;;  %2451 = vmatpush.msra.mxu2 %v6334_v60  ;;  %v5392_v62 = vld [vmem:[%s7239_s26 + $0x5a8] sm:$0xff]  ;;  %v6336_v15 = vld [vmem:[%s13415_s1 + $0x280] sm:$0xff] }
 0x204   : > { %2479 = vmatpush.msra.mxu3 %v6335_v45  ;;  %2423 = vmatpush.msra.mxu1 %v6336_v15  ;;  %v6337_v48 = vld [vmem:[%s13415_s1 + $0x200] sm:$0xff]  ;;  %v6339_v45 = vld [vmem:[%s13415_s1 + $0x388] sm:$0xff]  ;;  %v5394_v15 = vld [vmem:[%s7239_s26 + $0x5b8] sm:$0xff] }
 0x205   : > { %2394 = vmatpush.msra.mxu0 %v6337_v48  ;;  %v6338_v60 = vld [vmem:[%s13415_s1 + $0x300] sm:$0xff]  ;;  %v9952_v35 = vpop.f32.mrf.mxu2  ;;  %2424 = vmatmul.f32.vlgmr.msra.gmra.mxu1 %v5392_v62  ;;  %v6340_v48 = vld [vmem:[%s13415_s1 + $0x4f8] sm:$0xff] }
 0x206   : > { %2452 = vmatpush.msra.mxu2 %v6338_v60  ;;  %2480 = vmatpush.msra.mxu3 %v6339_v45  ;;  %13550 = vst [vmem:[#allocation129_spill] sm:$0xff] %v9952_v35  ;;  %v6341_v60 = vld [vmem:[%s13415_s1 + $0x380] sm:$0xff]  ;;  %v6342_v45 = vld [vmem:[%s13415_s1 + $0x478] sm:$0xff] }
 0x207   : > { %2395 = vmatmul.f32.vlgmr.msra.gmra.mxu0 %v5391_v9  ;;  %2453 = vmatmul.f32.vlgmr.msra.gmra.mxu2 %v5393_v0  ;;  %v6343_v0 = vld [vmem:[%s13415_s1 + $0x578] sm:$0xff] }
 0x208   : > { %2524 = vmatpush.msrb.mxu1 %v6340_v48  ;;  %2481 = vmatpush.msra.mxu3 %v6341_v60  ;;  %v9964_v35 = vpop.f32.mrf.mxu0  ;;  %v9971_v9 = vpop.f32.mrf.mxu3  ;;  %v6344_v48 = vld [vmem:[%s13415_s1 + $0x4f0] sm:$0xff] }
 0x209   : > { %2495 = vmatpush.msrb.mxu0 %v6342_v45  ;;  %13551 = vst [vmem:[#allocation130_spill] sm:$0xff] %v9964_v35  ;;  %2553 = vmatpush.msrb.mxu2 %v6343_v0  ;;  %v9969_v62 = vpop.f32.mrf.mxu1  ;;  %v6345_v60 = vld [vmem:[%s13415_s1 + $0x470] sm:$0xff]  ;;  %v6347_v45 = vld [vmem:[%s13415_s1 + $0x5f8] sm:$0xff]  ;;  %v6348_v0 = vld [vmem:[%s13415_s1 + $0x4e8] sm:$0xff] }
 0x20a   : > { %2482 = vmatmul.f32.vlgmr.msra.gmra.mxu3 %v5394_v15  ;;  %13552 = vst [vmem:[#allocation131_spill] sm:$0xff] %v9969_v62  ;;  %2525 = vmatpush.msrb.mxu1 %v6344_v48  ;;  %v6346_v15 = vld [vmem:[%s13415_s1 + $0x570] sm:$0xff]  ;;  %v6349_v48 = vld [vmem:[%s13415_s1 + $0x468] sm:$0xff]  ;;  %v5414_v62 = vld [vmem:[%s7239_s26 + $0x658] sm:$0xff] }
 0x20b   : > { %13553 = vst [vmem:[#allocation132_spill] sm:$0xff] %v9971_v9  ;;  %2496 = vmatpush.msrb.mxu0 %v6345_v60  ;;  %2554 = vmatpush.msrb.mxu2 %v6346_v15  ;;  %v6350_v60 = vld [vmem:[%s13415_s1 + $0x568] sm:$0xff]  ;;  %v6351_v15 = vld [vmem:[%s13415_s1 + $0x5f0] sm:$0xff]  ;;  %v5415_v35 = vld [vmem:[%s7239_s26 + $0x660] sm:$0xff] }
 0x20c   : > { %2582 = vmatpush.msrb.mxu3 %v6347_v45  ;;  %2526 = vmatpush.msrb.mxu1 %v6348_v0  ;;  %v5413_v45 = vld [vmem:[%s7239_s26 + $0x650] sm:$0xff]  ;;  %v6352_v0 = vld [vmem:[%s13415_s1 + $0x4e0] sm:$0xff] }
 0x20d   : > { %2497 = vmatpush.msrb.mxu0 %v6349_v48  ;;  %2555 = vmatpush.msrb.mxu2 %v6350_v60  ;;  %v6353_v48 = vld [vmem:[%s13415_s1 + $0x460] sm:$0xff] }
 0x20e   : > { %2583 = vmatpush.msrb.mxu3 %v6351_v15  ;;  %2527 = vmatpush.msrb.mxu1 %v6352_v0  ;;  %v6354_v60 = vld [vmem:[%s13415_s1 + $0x560] sm:$0xff]  ;;  %v6355_v15 = vld [vmem:[%s13415_s1 + $0x5e8] sm:$0xff]  ;;  %v6356_v0 = vld [vmem:[%s13415_s1 + $0x4d8] sm:$0xff] }
 0x20f   : > { %2498 = vmatpush.msrb.mxu0 %v6353_v48  ;;  %2556 = vmatpush.msrb.mxu2 %v6354_v60  ;;  %v10012_v9 = vpop.f32.mrf.mxu2  ;;  %v5416_v48 = vld [vmem:[%s7239_s26 + $0x668] sm:$0xff]  ;;  %v6357_v60 = vld [vmem:[%s13415_s1 + $0x458] sm:$0xff] }
 0x210   : > { %2584 = vmatpush.msrb.mxu3 %v6355_v15  ;;  %13554 = vst [vmem:[#allocation133_spill] sm:$0xff] %v10012_v9  ;;  %2398 = vmatmul.f32.gmra.mxu0 %v5413_v45  ;;  %v6358_v15 = vld [vmem:[%s13415_s1 + $0x558] sm:$0xff]  ;;  %v6360_v45 = vld [vmem:[%s13415_s1 + $0x4d0] sm:$0xff] }
 0x211   : > { %2427 = vmatmul.f32.gmra.mxu1 %v5414_v62  ;;  %2456 = vmatmul.f32.gmra.mxu2 %v5415_v35  ;;  %v6359_v35 = vld [vmem:[%s13415_s1 + $0x5e0] sm:$0xff] }
 0x212   : > { %2528 = vmatpush.msrb.mxu1 %v6356_v0  ;;  %2499 = vmatpush.msrb.mxu0 %v6357_v60  ;;  %v10024_v9 = vpop.f32.mrf.mxu3  ;;  %v10026_v62 = vpop.f32.mrf.mxu0  ;;  %v6361_v60 = vld [vmem:[%s13415_s1 + $0x450] sm:$0xff] }
 0x213   : > { %2557 = vmatpush.msrb.mxu2 %v6358_v15  ;;  %13555 = vst [vmem:[#allocation134_spill] sm:$0xff] %v10024_v9  ;;  %2585 = vmatpush.msrb.mxu3 %v6359_v35  ;;  %v10034_v0 = vpop.f32.mrf.mxu1  ;;  %v6362_v15 = vld [vmem:[%s13415_s1 + $0x550] sm:$0xff]  ;;  %v6363_v35 = vld [vmem:[%s13415_s1 + $0x5d8] sm:$0xff]  ;;  %v5436_v9 = vld [vmem:[%s7239_s26 + $0x708] sm:$0xff] }
 0x214   : > { %13556 = vst [vmem:[#allocation135_spill] sm:$0xff] %v10026_v62  ;;  %2529 = vmatpush.msrb.mxu1 %v6360_v45  ;;  %2485 = vmatmul.f32.gmra.mxu3 %v5416_v48  ;;  %v6364_v48 = vld [vmem:[%s13415_s1 + $0x4c8] sm:$0xff] }
 0x215   : > { %13557 = vst [vmem:[#allocation136_spill] sm:$0xff] %v10034_v0  ;;  %2500 = vmatpush.msrb.mxu0 %v6361_v60  ;;  %2558 = vmatpush.msrb.mxu2 %v6362_v15  ;;  %v6365_v45 = vld [vmem:[%s13415_s1 + $0x448] sm:$0xff]  ;;  %v6367_v15 = vld [vmem:[%s13415_s1 + $0x5d0] sm:$0xff]  ;;  %v6606_v0 = vld [vmem:[%s13415_s1 + $0x258] sm:$0xff] }
 0x216   : > { %2586 = vmatpush.msrb.mxu3 %v6363_v35  ;;  %2530 = vmatpush.msrb.mxu1 %v6364_v48  ;;  %v6366_v60 = vld [vmem:[%s13415_s1 + $0x548] sm:$0xff]  ;;  %v5435_v35 = vld [vmem:[%s7239_s26 + $0x700] sm:$0xff] }
 0x217   : > { %2501 = vmatpush.msrb.mxu0 %v6365_v45  ;;  %2559 = vmatpush.msrb.mxu2 %v6366_v60  ;;  %v6368_v48 = vld [vmem:[%s13415_s1 + $0x4c0] sm:$0xff] }
 0x218   : > { %2587 = vmatpush.msrb.mxu3 %v6367_v15  ;;  %2531 = vmatpush.msrb.mxu1 %v6368_v48  ;;  %v6369_v45 = vld [vmem:[%s13415_s1 + $0x440] sm:$0xff]  ;;  %v6371_v15 = vld [vmem:[%s13415_s1 + $0x5c8] sm:$0xff]  ;;  %v6372_v48 = vld [vmem:[%s13415_s1 + $0x4b8] sm:$0xff] }
 0x219   : > { %2502 = vmatpush.msrb.mxu0 %v6369_v45  ;;  %v6370_v60 = vld [vmem:[%s13415_s1 + $0x540] sm:$0xff]  ;;  %v10072_v25 = vpop.f32.mrf.mxu2  ;;  %2430 = vmatmul.f32.gmra.mxu1 %v5436_v9  ;;  %v5438_v45 = vld [vmem:[%s7239_s26 + $0x718] sm:$0xff] }
 0x21a   : > { %2560 = vmatpush.msrb.mxu2 %v6370_v60  ;;  %2588 = vmatpush.msrb.mxu3 %v6371_v15  ;;  %13558 = vst [vmem:[#allocation137_spill] sm:$0xff] %v10072_v25  ;;  %v6373_v60 = vld [vmem:[%s13415_s1 + $0x438] sm:$0xff]  ;;  %v6376_v15 = vld [vmem:[%s13415_s1 + $0x4b0] sm:$0xff] }
 0x21b   : > { %2401 = vmatmul.f32.gmra.mxu0 %v5435_v35  ;;  %2459 = vmatmul.f32.gmra.mxu2 %v5437_v26  ;;  %v6374_v9 = vld [vmem:[%s13415_s1 + $0x538] sm:$0xff]  ;;  %v10088_v26 = vpop.f32.mrf.mxu1  ;;  %v6375_v35 = vld [vmem:[%s13415_s1 + $0x5c0] sm:$0xff] }
 0x21c   : > { %2532 = vmatpush.msrb.mxu1 %v6372_v48  ;;  %v10078_v53 = vpop.f32.mrf.mxu0  ;;  %v10080_v36 = vpop.f32.mrf.mxu3  ;;  %2503 = vmatpush.msrb.mxu0 %v6373_v60  ;;  %13561 = vst [vmem:[#allocation140_spill] sm:$0xff] %v10088_v26  ;;  %v6377_v48 = vld [vmem:[%s13415_s1 + $0x430] sm:$0xff]  ;;  %v5459_v26 = vld [vmem:[%s7239_s26 + $0x7c0] sm:$0x1] }
 0x21d   : > { %13559 = vst [vmem:[#allocation138_spill] sm:$0xff] %v10078_v53  ;;  %2561 = vmatpush.msrb.mxu2 %v6374_v9  ;;  %2589 = vmatpush.msrb.mxu3 %v6375_v35  ;;  %v6378_v60 = vld [vmem:[%s13415_s1 + $0x530] sm:$0xff]  ;;  %v6379_v9 = vld [vmem:[%s13415_s1 + $0x5b8] sm:$0xff]  ;;  %v6381_v35 = vld [vmem:[%s13415_s1 + $0x428] sm:$0xff] }
 0x21e   : > { %13560 = vst [vmem:[#allocation139_spill] sm:$0xff] %v10080_v36  ;;  %2533 = vmatpush.msrb.mxu1 %v6376_v15  ;;  %2488 = vmatmul.f32.gmra.mxu3 %v5438_v45  ;;  %v6380_v45 = vld [vmem:[%s13415_s1 + $0x4a8] sm:$0xff]  ;;  %v5467_v36 = vld [vmem:[%s7239_s26 + $0x800] sm:$0x1] }
 0x21f   : > { %2504 = vmatpush.msrb.mxu0 %v6377_v48  ;;  %2562 = vmatpush.msrb.mxu2 %v6378_v60  ;;  %v6382_v15 = vld [vmem:[%s13415_s1 + $0x528] sm:$0xff]  ;;  %v6383_v48 = vld [vmem:[%s13415_s1 + $0x5b0] sm:$0xff] }
 0x220   : > { %2590 = vmatpush.msrb.mxu3 %v6379_v9  ;;  %2534 = vmatpush.msrb.mxu1 %v6380_v45  ;;  %v5457_v60 = vld [vmem:[%s7239_s26 + $0x7b0] sm:$0x1]  ;;  %v5458_v9 = vld [vmem:[%s7239_s26 + $0x7b8] sm:$0x1]  ;;  %v6384_v45 = vld [vmem:[%s13415_s1 + $0x4a0] sm:$0xff] }
 0x221   : > { %2505 = vmatpush.msrb.mxu0 %v6381_v35  ;;  %2563 = vmatpush.msrb.mxu2 %v6382_v15  ;;  %v6385_v35 = vld [vmem:[%s13415_s1 + $0x420] sm:$0xff]  ;;  %v6387_v53 = vld [vmem:[%s13415_s1 + $0x5a8] sm:$0xff] }
 0x222   : > { %2591 = vmatpush.msrb.mxu3 %v6383_v48  ;;  %2535 = vmatpush.msrb.mxu1 %v6384_v45  ;;  %v6386_v48 = vld [vmem:[%s13415_s1 + $0x520] sm:$0xff] }
 0x223   : > { %2506 = vmatpush.msrb.mxu0 %v6385_v35  ;;  %v10126_v15 = vpop.f32.mrf.mxu2  ;;  %2564 = vmatpush.msrb.mxu2 %v6386_v48  ;;  %v6388_v35 = vld [vmem:[%s13415_s1 + $0x498] sm:$0xff] }
 0x224   : > { %13562 = vst [vmem:[#allocation141_spill] sm:$0xff] %v10126_v15  ;;  %2592 = vmatpush.msrb.mxu3 %v6387_v53  ;;  %2404 = vmatmul.f32.gmra.mxu0 %v5457_v60  ;;  %v5460_v15 = vld [vmem:[%s7239_s26 + $0x7c8] sm:$0x1]  ;;  %v6389_v48 = vld [vmem:[%s13415_s1 + $0x418] sm:$0xff]  ;;  %v6392_v60 = vld [vmem:[%s13415_s1 + $0x490] sm:$0xff] }
 0x225   : > { %2433 = vmatmul.f32.gmra.mxu1 %v5458_v9  ;;  %v10134_v45 = vpop.f32.mrf.mxu0  ;;  %v10136_v37 = vpop.f32.mrf.mxu3  ;;  %2462 = vmatmul.f32.gmra.mxu2 %v5459_v26  ;;  %v6390_v53 = vld [vmem:[%s13415_s1 + $0x518] sm:$0xff]  ;;  %v6391_v26 = vld [vmem:[%s13415_s1 + $0x5a0] sm:$0xff]  ;;  %v6393_v9 = vld [vmem:[%s13415_s1 + $0x410] sm:$0xff] }
 0x226   : > { %13563 = vst [vmem:[#allocation142_spill] sm:$0xff] %v10134_v45  ;;  %2536 = vmatpush.msrb.mxu1 %v6388_v35  ;;  %v10142_v31 = vpop.f32.mrf.mxu1  ;;  %2507 = vmatpush.msrb.mxu0 %v6389_v48  ;;  %v6394_v35 = vld [vmem:[%s13415_s1 + $0x510] sm:$0xff]  ;;  %v6395_v48 = vld [vmem:[%s13415_s1 + $0x598] sm:$0xff] }
 0x227   : > { %13564 = vst [vmem:[#allocation143_spill] sm:$0xff] %v10136_v37  ;;  %2565 = vmatpush.msrb.mxu2 %v6390_v53  ;;  %2593 = vmatpush.msrb.mxu3 %v6391_v26  ;;  %v6397_v53 = vld [vmem:[%s13415_s1 + $0x408] sm:$0xff] }
 0x228   : > { %13565 = vst [vmem:[#allocation144_spill] sm:$0xff] %v10142_v31  ;;  %2537 = vmatpush.msrb.mxu1 %v6392_v60  ;;  %2491 = vmatmul.f32.gmra.mxu3 %v5460_v15  ;;  %v6396_v15 = vld [vmem:[%s13415_s1 + $0x488] sm:$0xff]  ;;  %v6399_v60 = vld [vmem:[%s13415_s1 + $0x590] sm:$0xff] }
 0x229   : > { %2508 = vmatpush.msrb.mxu0 %v6393_v9  ;;  %2566 = vmatpush.msrb.mxu2 %v6394_v35  ;;  %v6398_v26 = vld [vmem:[%s13415_s1 + $0x508] sm:$0xff]  ;;  %v5395_v9 = vld [vmem:[%s7239_s26 + $0x5c0] sm:$0xff] }
 0x22a   : > { %2594 = vmatpush.msrb.mxu3 %v6395_v48  ;;  %2538 = vmatpush.msrb.mxu1 %v6396_v15  ;;  %v5396_v35 = vld [vmem:[%s7239_s26 + $0x5c8] sm:$0xff]  ;;  %v6400_v15 = vld [vmem:[%s13415_s1 + $0x480] sm:$0xff] }
 0x22b   : > { %2509 = vmatpush.msrb.mxu0 %v6397_v53  ;;  %2567 = vmatpush.msrb.mxu2 %v6398_v26  ;;  %v6401_v53 = vld [vmem:[%s13415_s1 + $0x400] sm:$0xff]  ;;  %v5397_v26 = vld [vmem:[%s7239_s26 + $0x5d0] sm:$0xff] }
 0x22c   : > { %2595 = vmatpush.msrb.mxu3 %v6399_v60  ;;  %v10179_v48 = vpop.f32.mrf.mxu2  ;;  %2539 = vmatpush.msrb.mxu1 %v6400_v15  ;;  %v6402_v60 = vld [vmem:[%s13415_s1 + $0x500] sm:$0xff]  ;;  %v5398_v15 = vld [vmem:[%s7239_s26 + $0x5d8] sm:$0xff] }
 0x22d   : > { %13566 = vst [vmem:[#allocation145_spill] sm:$0xff] %v10179_v48  ;;  %2510 = vmatpush.msrb.mxu0 %v6401_v53  ;;  %2568 = vmatpush.msrb.mxu2 %v6402_v60  ;;  %v6403_v48 = vld [vmem:[%s13415_s1 + $0x588] sm:$0xff]  ;;  %v6404_v53 = vld [vmem:[%s13415_s1 + $0x6f8] sm:$0xff]  ;;  %v6405_v60 = vld [vmem:[%s13415_s1 + $0x580] sm:$0xff] }
 0x22e   : > { %2596 = vmatpush.msrb.mxu3 %v6403_v48  ;;  %v10194_v31 = vpop.f32.mrf.mxu0  ;;  %v10196_v45 = vpop.f32.mrf.mxu3  ;;  %2511 = vmatmul.f32.vlgmr.msrb.gmra.mxu0 %v5395_v9  ;;  %v6406_v48 = vld [vmem:[%s13415_s1 + $0x678] sm:$0xff] }
 0x22f   : > { %13567 = vst [vmem:[#allocation146_spill] sm:$0xff] %v10194_v31  ;;  %2540 = vmatmul.f32.vlgmr.msrb.gmra.mxu1 %v5396_v35  ;;  %v10199_v37 = vpop.f32.mrf.mxu1  ;;  %2569 = vmatmul.f32.vlgmr.msrb.gmra.mxu2 %v5397_v26  ;;  %v6407_v9 = vld [vmem:[%s13415_s1 + $0x778] sm:$0xff]  ;;  %v6408_v35 = vld [vmem:[%s13415_s1 + $0x6f0] sm:$0xff] }
 0x230   : > { %13568 = vst [vmem:[#allocation147_spill] sm:$0xff] %v10196_v45  ;;  %2640 = vmatpush.msra.mxu1 %v6404_v53  ;;  %2597 = vmatpush.msrb.mxu3 %v6405_v60  ;;  %v6409_v26 = vld [vmem:[%s13415_s1 + $0x670] sm:$0xff]  ;;  %v6412_v60 = vld [vmem:[%s13415_s1 + $0x6e8] sm:$0xff] }
 0x231   : > { %13569 = vst [vmem:[#allocation148_spill] sm:$0xff] %v10199_v37  ;;  %2611 = vmatpush.msra.mxu0 %v6406_v48  ;;  %2669 = vmatpush.msra.mxu2 %v6407_v9  ;;  %v6410_v53 = vld [vmem:[%s13415_s1 + $0x770] sm:$0xff]  ;;  %v6413_v48 = vld [vmem:[%s13415_s1 + $0x668] sm:$0xff] }
 0x232   : > { %2598 = vmatmul.f32.vlgmr.msrb.gmra.mxu3 %v5398_v15  ;;  %2641 = vmatpush.msra.mxu1 %v6408_v35  ;;  %v6411_v15 = vld [vmem:[%s13415_s1 + $0x7f8] sm:$0xff]  ;;  %v6414_v35 = vld [vmem:[%s13415_s1 + $0x768] sm:$0xff] }
 0x233   : > { %2612 = vmatpush.msra.mxu0 %v6409_v26  ;;  %2670 = vmatpush.msra.mxu2 %v6410_v53  ;;  %v6415_v26 = vld [vmem:[%s13415_s1 + $0x7f0] sm:$0xff] }
 0x234   : > { %2698 = vmatpush.msra.mxu3 %v6411_v15  ;;  %2642 = vmatpush.msra.mxu1 %v6412_v60  ;;  %v5417_v53 = vld [vmem:[%s7239_s26 + $0x670] sm:$0xff]  ;;  %v5418_v15 = vld [vmem:[%s7239_s26 + $0x678] sm:$0xff]  ;;  %v6416_v60 = vld [vmem:[%s13415_s1 + $0x6e0] sm:$0xff] }
 0x235   : > { %2613 = vmatpush.msra.mxu0 %v6413_v48  ;;  %v10231_v9 = vpop.f32.mrf.mxu2  ;;  %2671 = vmatpush.msra.mxu2 %v6414_v35  ;;  %v6417_v48 = vld [vmem:[%s13415_s1 + $0x660] sm:$0xff] }
 0x236   : > { %13570 = vst [vmem:[#allocation149_spill] sm:$0xff] %v10231_v9  ;;  %2699 = vmatpush.msra.mxu3 %v6415_v26  ;;  %2643 = vmatpush.msra.mxu1 %v6416_v60  ;;  %v5419_v9 = vld [vmem:[%s7239_s26 + $0x680] sm:$0xff]  ;;  %v6419_v60 = vld [vmem:[%s13415_s1 + $0x7e8] sm:$0xff] }
 0x237   : > { %2614 = vmatpush.msra.mxu0 %v6417_v48  ;;  %v10248_v35 = vpop.f32.mrf.mxu3  ;;  %v10250_v37 = vpop.f32.mrf.mxu0  ;;  %v6418_v26 = vld [vmem:[%s13415_s1 + $0x760] sm:$0xff]  ;;  %2543 = vmatmul.f32.gmra.mxu1 %v5418_v15  ;;  %v6420_v48 = vld [vmem:[%s13415_s1 + $0x6d8] sm:$0xff]  ;;  %v6425_v15 = vld [vmem:[%s13415_s1 + $0x650] sm:$0xff] }
 0x238   : > { %13571 = vst [vmem:[#allocation150_spill] sm:$0xff] %v10248_v35  ;;  %2672 = vmatpush.msra.mxu2 %v6418_v26  ;;  %2700 = vmatpush.msra.mxu3 %v6419_v60  ;;  %v10258_v31 = vpop.f32.mrf.mxu1  ;;  %v5420_v35 = vld [vmem:[%s7239_s26 + $0x688] sm:$0xff]  ;;  %v6421_v26 = vld [vmem:[%s13415_s1 + $0x658] sm:$0xff] }
 0x239   : > { %13572 = vst [vmem:[#allocation151_spill] sm:$0xff] %v10250_v37  ;;  %2514 = vmatmul.f32.gmra.mxu0 %v5417_v53  ;;  %2572 = vmatmul.f32.gmra.mxu2 %v5419_v9  ;;  %v6422_v60 = vld [vmem:[%s13415_s1 + $0x758] sm:$0xff]  ;;  %v6423_v9 = vld [vmem:[%s13415_s1 + $0x7e0] sm:$0xff]  ;;  %v6424_v53 = vld [vmem:[%s13415_s1 + $0x6d0] sm:$0xff] }
 0x23a   : > { %13573 = vst [vmem:[#allocation152_spill] sm:$0xff] %v10258_v31  ;;  %2644 = vmatpush.msra.mxu1 %v6420_v48  ;;  %2615 = vmatpush.msra.mxu0 %v6421_v26  ;;  %v6426_v48 = vld [vmem:[%s13415_s1 + $0x750] sm:$0xff]  ;;  %v6427_v26 = vld [vmem:[%s13415_s1 + $0x7d8] sm:$0xff]  ;;  %v5444_v37 = vld [vmem:[%s7239_s26 + $0x748] sm:$0xff] }
 0x23b   : > { %2673 = vmatpush.msra.mxu2 %v6422_v60  ;;  %2701 = vmatpush.msra.mxu3 %v6423_v9  ;;  %v6429_v9 = vld [vmem:[%s13415_s1 + $0x648] sm:$0xff] }
 0x23c   : > { %2645 = vmatpush.msra.mxu1 %v6424_v53  ;;  %2601 = vmatmul.f32.gmra.mxu3 %v5420_v35  ;;  %v6428_v35 = vld [vmem:[%s13415_s1 + $0x6c8] sm:$0xff] }
 0x23d   : > { %2616 = vmatpush.msra.mxu0 %v6425_v15  ;;  %2674 = vmatpush.msra.mxu2 %v6426_v48  ;;  %v6430_v53 = vld [vmem:[%s13415_s1 + $0x748] sm:$0xff]  ;;  %v6431_v15 = vld [vmem:[%s13415_s1 + $0x7d0] sm:$0xff]  ;;  %v5439_v48 = vld [vmem:[%s7239_s26 + $0x720] sm:$0xff] }
 0x23e   : > { %2702 = vmatpush.msra.mxu3 %v6427_v26  ;;  %v10285_v60 = vpop.f32.mrf.mxu2  ;;  %2646 = vmatpush.msra.mxu1 %v6428_v35  ;;  %v5440_v26 = vld [vmem:[%s7239_s26 + $0x728] sm:$0xff] }
 0x23f   : > { %13574 = vst [vmem:[#allocation153_spill] sm:$0xff] %v10285_v60  ;;  %2617 = vmatpush.msra.mxu0 %v6429_v9  ;;  %2675 = vmatpush.msra.mxu2 %v6430_v53  ;;  %v6432_v9 = vld [vmem:[%s13415_s1 + $0x6c0] sm:$0xff]  ;;  %v5441_v60 = vld [vmem:[%s7239_s26 + $0x730] sm:$0xff] }
 0x240   : > { %2703 = vmatpush.msra.mxu3 %v6431_v15  ;;  %v10301_v45 = vpop.f32.mrf.mxu0  ;;  %v10303_v35 = vpop.f32.mrf.mxu3  ;;  %2647 = vmatpush.msra.mxu1 %v6432_v9  ;;  %v6433_v53 = vld [vmem:[%s13415_s1 + $0x640] sm:$0xff]  ;;  %v6436_v9 = vld [vmem:[%s13415_s1 + $0x6b8] sm:$0xff] }
 0x241   : > { %13575 = vst [vmem:[#allocation154_spill] sm:$0xff] %v10301_v45  ;;  %2618 = vmatpush.msra.mxu0 %v6433_v53  ;;  %v10312_v31 = vpop.f32.mrf.mxu1  ;;  %v6434_v15 = vld [vmem:[%s13415_s1 + $0x740] sm:$0xff]  ;;  %v6435_v45 = vld [vmem:[%s13415_s1 + $0x7c8] sm:$0xff]  ;;  %2546 = vmatmul.f32.gmra.mxu1 %v5440_v26  ;;  %v5442_v53 = vld [vmem:[%s7239_s26 + $0x738] sm:$0xff] }
 0x242   : > { %13576 = vst [vmem:[#allocation155_spill] sm:$0xff] %v10303_v35  ;;  %2676 = vmatpush.msra.mxu2 %v6434_v15  ;;  %2704 = vmatpush.msra.mxu3 %v6435_v45  ;;  %v6438_v15 = vld [vmem:[%s13415_s1 + $0x738] sm:$0xff]  ;;  %v6439_v45 = vld [vmem:[%s13415_s1 + $0x7c0] sm:$0xff]  ;;  %v6442_v26 = vld [vmem:[%s13415_s1 + $0x730] sm:$0xff] }
 0x243   : > { %13577 = vst [vmem:[#allocation156_spill] sm:$0xff] %v10312_v31  ;;  %2517 = vmatmul.f32.gmra.mxu0 %v5439_v48  ;;  %2575 = vmatmul.f32.gmra.mxu2 %v5441_v60  ;;  %v6437_v31 = vld [vmem:[%s13415_s1 + $0x638] sm:$0xff]  ;;  %v6440_v60 = vld [vmem:[%s13415_s1 + $0x6b0] sm:$0xff]  ;;  %v5423_v35 = vld [vmem:[%s7239_s26 + $0x6a0] sm:$0xff] }
 0x244   : > { %2648 = vmatpush.msra.mxu1 %v6436_v9  ;;  %2619 = vmatpush.msra.mxu0 %v6437_v31  ;;  %v6441_v31 = vld [vmem:[%s13415_s1 + $0x630] sm:$0xff]  ;;  %v6443_v9 = vld [vmem:[%s13415_s1 + $0x7b8] sm:$0xff] }
 0x245   : > { %2677 = vmatpush.msra.mxu2 %v6438_v15  ;;  %2705 = vmatpush.msra.mxu3 %v6439_v45  ;;  %v6445_v15 = vld [vmem:[%s13415_s1 + $0x628] sm:$0xff] }
 0x246   : > { %2649 = vmatpush.msra.mxu1 %v6440_v60  ;;  %2604 = vmatmul.f32.gmra.mxu3 %v5442_v53  ;;  %v6444_v53 = vld [vmem:[%s13415_s1 + $0x6a8] sm:$0xff] }
 0x247   : > { %2620 = vmatpush.msra.mxu0 %v6441_v31  ;;  %v10339_v48 = vpop.f32.mrf.mxu2  ;;  %2678 = vmatpush.msra.mxu2 %v6442_v26  ;;  %v6446_v31 = vld [vmem:[%s13415_s1 + $0x728] sm:$0xff]  ;;  %v6447_v26 = vld [vmem:[%s13415_s1 + $0x7b0] sm:$0xff] }
 0x248   : > { %13578 = vst [vmem:[#allocation157_spill] sm:$0xff] %v10339_v48  ;;  %2706 = vmatpush.msra.mxu3 %v6443_v9  ;;  %2650 = vmatpush.msra.mxu1 %v6444_v53  ;;  %v5461_v9 = vld [vmem:[%s7239_s26 + $0x7d0] sm:$0x1]  ;;  %v5462_v53 = vld [vmem:[%s7239_s26 + $0x7d8] sm:$0x1] }
 0x249   : > { %2621 = vmatpush.msra.mxu0 %v6445_v15  ;;  %v10353_v45 = vpop.f32.mrf.mxu0  ;;  %v10355_v60 = vpop.f32.mrf.mxu3  ;;  %2679 = vmatpush.msra.mxu2 %v6446_v31  ;;  %v6448_v15 = vld [vmem:[%s13415_s1 + $0x6a0] sm:$0xff] }
 0x24a   : > { %13579 = vst [vmem:[#allocation158_spill] sm:$0xff] %v10353_v45  ;;  %2707 = vmatpush.msra.mxu3 %v6447_v26  ;;  %v10365_v48 = vpop.f32.mrf.mxu1  ;;  %2651 = vmatpush.msra.mxu1 %v6448_v15  ;;  %v6449_v45 = vld [vmem:[%s13415_s1 + $0x620] sm:$0xff]  ;;  %v6452_v15 = vld [vmem:[%s13415_s1 + $0x698] sm:$0xff] }
 0x24b   : > { %13580 = vst [vmem:[#allocation159_spill] sm:$0xff] %v10355_v60  ;;  %2622 = vmatpush.msra.mxu0 %v6449_v45  ;;  %v5463_v31 = vld [vmem:[%s7239_s26 + $0x7e0] sm:$0x1]  ;;  %2549 = vmatmul.f32.gmra.mxu1 %v5462_v53  ;;  %v5464_v45 = vld [vmem:[%s7239_s26 + $0x7e8] sm:$0x1]  ;;  %v6453_v60 = vld [vmem:[%s13415_s1 + $0x618] sm:$0xff] }
 0x24c   : > { %13581 = vst [vmem:[#allocation160_spill] sm:$0xff] %v10365_v48  ;;  %v6450_v26 = vld [vmem:[%s13415_s1 + $0x720] sm:$0xff]  ;;  %v6451_v48 = vld [vmem:[%s13415_s1 + $0x7a8] sm:$0xff]  ;;  %2520 = vmatmul.f32.gmra.mxu0 %v5461_v9  ;;  %2578 = vmatmul.f32.gmra.mxu2 %v5463_v31  ;;  %v6456_v9 = vld [vmem:[%s13415_s1 + $0x690] sm:$0xff] }
 0x24d   : > { %2680 = vmatpush.msra.mxu2 %v6450_v26  ;;  %2708 = vmatpush.msra.mxu3 %v6451_v48  ;;  %v6454_v26 = vld [vmem:[%s13415_s1 + $0x718] sm:$0xff]  ;;  %v6455_v48 = vld [vmem:[%s13415_s1 + $0x7a0] sm:$0xff]  ;;  %v6458_v31 = vld [vmem:[%s13415_s1 + $0x710] sm:$0xff] }
 0x24e   : > { %2652 = vmatpush.msra.mxu1 %v6452_v15  ;;  %2623 = vmatpush.msra.mxu0 %v6453_v60  ;;  %v6457_v60 = vld [vmem:[%s13415_s1 + $0x610] sm:$0xff]  ;;  %v6459_v15 = vld [vmem:[%s13415_s1 + $0x798] sm:$0xff] }
 0x24f   : > { %2681 = vmatpush.msra.mxu2 %v6454_v26  ;;  %2709 = vmatpush.msra.mxu3 %v6455_v48  ;;  %v6461_v48 = vld [vmem:[%s13415_s1 + $0x608] sm:$0xff] }
 0x250   : > { %2653 = vmatpush.msra.mxu1 %v6456_v9  ;;  %v10396_v53 = vpop.f32.mrf.mxu2  ;;  %2607 = vmatmul.f32.gmra.mxu3 %v5464_v45  ;;  %v6460_v45 = vld [vmem:[%s13415_s1 + $0x688] sm:$0xff] }
 0x251   : > { %13582 = vst [vmem:[#allocation161_spill] sm:$0xff] %v10396_v53  ;;  %2624 = vmatpush.msra.mxu0 %v6457_v60  ;;  %2682 = vmatpush.msra.mxu2 %v6458_v31  ;;  %v6462_v31 = vld [vmem:[%s13415_s1 + $0x708] sm:$0xff]  ;;  %v5402_v53 = vld [vmem:[%s7239_s26 + $0x5f8] sm:$0xff] }
 0x252   : > { %2710 = vmatpush.msra.mxu3 %v6459_v15  ;;  %v10407_v26 = vpop.f32.mrf.mxu0  ;;  %2654 = vmatpush.msra.mxu1 %v6460_v45  ;;  %v10415_v9 = vpop.f32.mrf.mxu1  ;;  %v6463_v15 = vld [vmem:[%s13415_s1 + $0x790] sm:$0xff]  ;;  %v5399_v45 = vld [vmem:[%s7239_s26 + $0x5e0] sm:$0xff] }
 0x253   : > { %13583 = vst [vmem:[#allocation162_spill] sm:$0xff] %v10407_v26  ;;  %2625 = vmatpush.msra.mxu0 %v6461_v48  ;;  %v10417_v60 = vpop.f32.mrf.mxu3  ;;  %2683 = vmatpush.msra.mxu2 %v6462_v31  ;;  %v5400_v26 = vld [vmem:[%s7239_s26 + $0x5e8] sm:$0xff]  ;;  %v6464_v48 = vld [vmem:[%s13415_s1 + $0x680] sm:$0xff] }
 0x254   : > { %13584 = vst [vmem:[#allocation163_spill] sm:$0xff] %v10415_v9  ;;  %2711 = vmatpush.msra.mxu3 %v6463_v15  ;;  %2655 = vmatpush.msra.mxu1 %v6464_v48  ;;  %v6465_v9 = vld [vmem:[%s13415_s1 + $0x600] sm:$0xff]  ;;  %v6467_v15 = vld [vmem:[%s13415_s1 + $0x788] sm:$0xff]  ;;  %v6468_v48 = vld [vmem:[%s13415_s1 + $0x8f8] sm:$0xff] }
 0x255   : > { %13585 = vst [vmem:[#allocation164_spill] sm:$0xff] %v10417_v60  ;;  %2626 = vmatpush.msra.mxu0 %v6465_v9  ;;  %v5401_v60 = vld [vmem:[%s7239_s26 + $0x5f0] sm:$0xff]  ;;  %v6466_v31 = vld [vmem:[%s13415_s1 + $0x700] sm:$0xff]  ;;  %2656 = vmatmul.f32.vlgmr.msra.gmra.mxu1 %v5400_v26  ;;  %v6471_v26 = vld [vmem:[%s13415_s1 + $0x978] sm:$0xff] }
 0x256   : > { %2684 = vmatpush.msra.mxu2 %v6466_v31  ;;  %2712 = vmatpush.msra.mxu3 %v6467_v15  ;;  %v6469_v9 = vld [vmem:[%s13415_s1 + $0x780] sm:$0xff]  ;;  %v6470_v31 = vld [vmem:[%s13415_s1 + $0x878] sm:$0xff] }
 0x257   : > { %2627 = vmatmul.f32.vlgmr.msra.gmra.mxu0 %v5399_v45  ;;  %2685 = vmatmul.f32.vlgmr.msra.gmra.mxu2 %v5401_v60  ;;  %v6472_v60 = vld [vmem:[%s13415_s1 + $0x8f0] sm:$0xff] }
 0x258   : > { %2756 = vmatpush.msrb.mxu1 %v6468_v48  ;;  %2713 = vmatpush.msra.mxu3 %v6469_v9  ;;  %v6473_v45 = vld [vmem:[%s13415_s1 + $0x870] sm:$0xff] }
 0x259   : > { %2727 = vmatpush.msrb.mxu0 %v6470_v31  ;;  %v10450_v15 = vpop.f32.mrf.mxu2  ;;  %2785 = vmatpush.msrb.mxu2 %v6471_v26  ;;  %v6474_v48 = vld [vmem:[%s13415_s1 + $0x970] sm:$0xff]  ;;  %v6476_v31 = vld [vmem:[%s13415_s1 + $0x8e8] sm:$0xff] }
 0x25a   : > { %13586 = vst [vmem:[#allocation165_spill] sm:$0xff] %v10450_v15  ;;  %2714 = vmatmul.f32.vlgmr.msra.gmra.mxu3 %v5402_v53  ;;  %2757 = vmatpush.msrb.mxu1 %v6472_v60  ;;  %v6475_v53 = vld [vmem:[%s13415_s1 + $0x9f8] sm:$0xff]  ;;  %v6477_v26 = vld [vmem:[%s13415_s1 + $0x868] sm:$0xff] }
 0x25b   : > { %2728 = vmatpush.msrb.mxu0 %v6473_v45  ;;  %2786 = vmatpush.msrb.mxu2 %v6474_v48  ;;  %v10475_v60 = vpop.f32.mrf.mxu3  ;;  %v10477_v45 = vpop.f32.mrf.mxu1  ;;  %v6478_v48 = vld [vmem:[%s13415_s1 + $0x968] sm:$0xff]  ;;  %v5422_v15 = vld [vmem:[%s7239_s26 + $0x698] sm:$0xff] }
 0x25c   : > { %2814 = vmatpush.msrb.mxu3 %v6475_v53  ;;  %v10467_v9 = vpop.f32.mrf.mxu0  ;;  %2758 = vmatpush.msrb.mxu1 %v6476_v31  ;;  %13587 = vst [vmem:[#allocation166_spill] sm:$0xff] %v10475_v60  ;;  %v6479_v53 = vld [vmem:[%s13415_s1 + $0x9f0] sm:$0xff]  ;;  %v6481_v60 = vld [vmem:[%s13415_s1 + $0x860] sm:$0xff] }
 0x25d   : > { %2729 = vmatpush.msrb.mxu0 %v6477_v26  ;;  %2787 = vmatpush.msrb.mxu2 %v6478_v48  ;;  %v5421_v31 = vld [vmem:[%s7239_s26 + $0x690] sm:$0xff]  ;;  %v6480_v26 = vld [vmem:[%s13415_s1 + $0x8e0] sm:$0xff] }
 0x25e   : > { %2815 = vmatpush.msrb.mxu3 %v6479_v53  ;;  %2759 = vmatpush.msrb.mxu1 %v6480_v26  ;;  %v6482_v48 = vld [vmem:[%s13415_s1 + $0x960] sm:$0xff]  ;;  %v6483_v53 = vld [vmem:[%s13415_s1 + $0x9e8] sm:$0xff]  ;;  %v6484_v26 = vld [vmem:[%s13415_s1 + $0x8d8] sm:$0xff] }
 0x25f   : > { %2730 = vmatpush.msrb.mxu0 %v6481_v60  ;;  %2788 = vmatpush.msrb.mxu2 %v6482_v48  ;;  %v5424_v60 = vld [vmem:[%s7239_s26 + $0x6a8] sm:$0xff]  ;;  %v6486_v48 = vld [vmem:[%s13415_s1 + $0x958] sm:$0xff] }
 0x260   : > { %2816 = vmatpush.msrb.mxu3 %v6483_v53  ;;  %2630 = vmatmul.f32.gmra.mxu0 %v5421_v31  ;;  %v6490_v31 = vld [vmem:[%s13415_s1 + $0x950] sm:$0xff] }
 0x261   : > { %2659 = vmatmul.f32.gmra.mxu1 %v5422_v15  ;;  %2688 = vmatmul.f32.gmra.mxu2 %v5423_v35  ;;  %v6487_v35 = vld [vmem:[%s13415_s1 + $0x9e0] sm:$0xff]  ;;  %v6488_v15 = vld [vmem:[%s13415_s1 + $0x8d0] sm:$0xff] }
 0x262   : > { %2760 = vmatpush.msrb.mxu1 %v6484_v26  ;;  %2731 = vmatpush.msrb.mxu0 %v6485_v32  ;;  %v10510_v53 = vpop.f32.mrf.mxu2  ;;  %v6489_v32 = vld [vmem:[%s13415_s1 + $0x850] sm:$0xff]  ;;  %v6491_v26 = vld [vmem:[%s13415_s1 + $0x9d8] sm:$0xff] }
 0x263   : > { %2789 = vmatpush.msrb.mxu2 %v6486_v48  ;;  %2817 = vmatpush.msrb.mxu3 %v6487_v35  ;;  %v6493_v35 = vld [vmem:[%s13415_s1 + $0x848] sm:$0xff] }
 0x264   : > { %2761 = vmatpush.msrb.mxu1 %v6488_v15  ;;  %2717 = vmatmul.f32.gmra.mxu3 %v5424_v60  ;;  %v6492_v60 = vld [vmem:[%s13415_s1 + $0x8c8] sm:$0xff] }
 0x265   : > { %2732 = vmatpush.msrb.mxu0 %v6489_v32  ;;  %2790 = vmatpush.msrb.mxu2 %v6490_v31  ;;  %v10527_v48 = vpop.f32.mrf.mxu0  ;;  %v10537_v32 = vpop.f32.mrf.mxu3  ;;  %v6494_v31 = vld [vmem:[%s13415_s1 + $0x948] sm:$0xff] }
 0x266   : > { %2818 = vmatpush.msrb.mxu3 %v6491_v26  ;;  %13588 = vst [vmem:[#allocation167_spill] sm:$0xff] %v10527_v48  ;;  %2762 = vmatpush.msrb.mxu1 %v6492_v60  ;;  %v10535_v15 = vpop.f32.mrf.mxu1  ;;  %v6495_v26 = vld [vmem:[%s13415_s1 + $0x9d0] sm:$0xff]  ;;  %v5443_v60 = vld [vmem:[%s7239_s26 + $0x740] sm:$0xff] }
 0x267   : > { %2733 = vmatpush.msrb.mxu0 %v6493_v35  ;;  %13589 = vst [vmem:[#allocation168_spill] sm:$0xff] %v10535_v15  ;;  %2791 = vmatpush.msrb.mxu2 %v6494_v31  ;;  %v6496_v35 = vld [vmem:[%s13415_s1 + $0x8c0] sm:$0xff] }
 0x268   : > { %2819 = vmatpush.msrb.mxu3 %v6495_v26  ;;  %2763 = vmatpush.msrb.mxu1 %v6496_v35  ;;  %v6498_v31 = vld [vmem:[%s13415_s1 + $0x940] sm:$0xff]  ;;  %v6499_v26 = vld [vmem:[%s13415_s1 + $0x9c8] sm:$0xff]  ;;  %v6500_v35 = vld [vmem:[%s13415_s1 + $0x8b8] sm:$0xff] }
 0x269   : > { %2734 = vmatpush.msrb.mxu0 %v6497_v16  ;;  %2792 = vmatpush.msrb.mxu2 %v6498_v31  ;;  %v5446_v16 = vld [vmem:[%s7239_s26 + $0x758] sm:$0xff]  ;;  %v6872_v48 = vld [vmem:[%s13415_s1 + $0x920] sm:$0xff] }
 0x26a   : > { %2820 = vmatpush.msrb.mxu3 %v6499_v26  ;;  %2633 = vmatmul.f32.gmra.mxu0 %v5443_v60  ;;  %v6502_v31 = vld [vmem:[%s13415_s1 + $0x938] sm:$0xff]  ;;  %v6506_v60 = vld [vmem:[%s13415_s1 + $0x930] sm:$0xff] }
 0x26b   : > { %2662 = vmatmul.f32.gmra.mxu1 %v5444_v37  ;;  %2691 = vmatmul.f32.gmra.mxu2 %v5445_v46  ;;  %v6503_v46 = vld [vmem:[%s13415_s1 + $0x9c0] sm:$0xff]  ;;  %v6504_v37 = vld [vmem:[%s13415_s1 + $0x8b0] sm:$0xff] }
 0x26c   : > { %2764 = vmatpush.msrb.mxu1 %v6500_v35  ;;  %2735 = vmatpush.msrb.mxu0 %v6501_v43  ;;  %v10570_v26 = vpop.f32.mrf.mxu2  ;;  %v6505_v43 = vld [vmem:[%s13415_s1 + $0x830] sm:$0xff]  ;;  %v6507_v35 = vld [vmem:[%s13415_s1 + $0x9b8] sm:$0xff] }
 0x26d   : > { %2793 = vmatpush.msrb.mxu2 %v6502_v31  ;;  %13590 = vst [vmem:[#allocation169_spill] sm:$0xff] %v10570_v26  ;;  %2821 = vmatpush.msrb.mxu3 %v6503_v46  ;;  %v6509_v46 = vld [vmem:[%s13415_s1 + $0x828] sm:$0xff]  ;;  %v6850_v26 = vld [vmem:[%s13415_s1 + $0x960] sm:$0xff] }
 0x26e   : > { %2765 = vmatpush.msrb.mxu1 %v6504_v37  ;;  %2720 = vmatmul.f32.gmra.mxu3 %v5446_v16  ;;  %v6508_v16 = vld [vmem:[%s13415_s1 + $0x8a8] sm:$0xff]  ;;  %v10595_v37 = vpop.f32.mrf.mxu1 }
 0x26f   : > { %2736 = vmatpush.msrb.mxu0 %v6505_v43  ;;  %2794 = vmatpush.msrb.mxu2 %v6506_v60  ;;  %13592 = vst [vmem:[#allocation171_spill] sm:$0xff] %v10595_v37  ;;  %v10597_v43 = vpop.f32.mrf.mxu3  ;;  %v6510_v60 = vld [vmem:[%s13415_s1 + $0x928] sm:$0xff]  ;;  %v6513_v37 = vld [vmem:[%s13415_s1 + $0x820] sm:$0xff] }
 0x270   : > { %2822 = vmatpush.msrb.mxu3 %v6507_v35  ;;  %v10587_v31 = vpop.f32.mrf.mxu0  ;;  %2766 = vmatpush.msrb.mxu1 %v6508_v16  ;;  %13593 = vst [vmem:[#allocation172_spill] sm:$0xff] %v10597_v43  ;;  %v6511_v35 = vld [vmem:[%s13415_s1 + $0x9b0] sm:$0xff] }
 0x271   : > { %13591 = vst [vmem:[#allocation170_spill] sm:$0xff] %v10587_v31  ;;  %2737 = vmatpush.msrb.mxu0 %v6509_v46  ;;  %2795 = vmatpush.msrb.mxu2 %v6510_v60  ;;  %v5465_v16 = vld [vmem:[%s7239_s26 + $0x7f0] sm:$0x1]  ;;  %v5466_v31 = vld [vmem:[%s7239_s26 + $0x7f8] sm:$0x1]  ;;  %v6512_v46 = vld [vmem:[%s13415_s1 + $0x8a0] sm:$0xff] }
 0x272   : > { %2823 = vmatpush.msrb.mxu3 %v6511_v35  ;;  %2767 = vmatpush.msrb.mxu1 %v6512_v46  ;;  %v6514_v60 = vld [vmem:[%s13415_s1 + $0x920] sm:$0xff]  ;;  %v6515_v35 = vld [vmem:[%s13415_s1 + $0x9a8] sm:$0xff]  ;;  %v6516_v46 = vld [vmem:[%s13415_s1 + $0x898] sm:$0xff] }
 0x273   : > { %2738 = vmatpush.msrb.mxu0 %v6513_v37  ;;  %2796 = vmatpush.msrb.mxu2 %v6514_v60  ;;  %v5468_v37 = vld [vmem:[%s7239_s26 + $0x808] sm:$0x1]  ;;  %v6518_v60 = vld [vmem:[%s13415_s1 + $0x918] sm:$0xff] }
 0x274   : > { %2824 = vmatpush.msrb.mxu3 %v6515_v35  ;;  %2636 = vmatmul.f32.gmra.mxu0 %v5465_v16  ;;  %v6522_v16 = vld [vmem:[%s13415_s1 + $0x910] sm:$0xff] }
 0x275   : > { %2665 = vmatmul.f32.gmra.mxu1 %v5466_v31  ;;  %2694 = vmatmul.f32.gmra.mxu2 %v5467_v36  ;;  %v6519_v36 = vld [vmem:[%s13415_s1 + $0x9a0] sm:$0xff]  ;;  %v6520_v31 = vld [vmem:[%s13415_s1 + $0x890] sm:$0xff] }
 0x276   : > { %2768 = vmatpush.msrb.mxu1 %v6516_v46  ;;  %2739 = vmatpush.msrb.mxu0 %v6517_v51  ;;  %v10630_v35 = vpop.f32.mrf.mxu2  ;;  %v6521_v51 = vld [vmem:[%s13415_s1 + $0x810] sm:$0xff]  ;;  %v6523_v46 = vld [vmem:[%s13415_s1 + $0x998] sm:$0xff] }
 0x277   : > { %2797 = vmatpush.msrb.mxu2 %v6518_v60  ;;  %13594 = vst [vmem:[#allocation173_spill] sm:$0xff] %v10630_v35  ;;  %2825 = vmatpush.msrb.mxu3 %v6519_v36  ;;  %v6525_v36 = vld [vmem:[%s13415_s1 + $0x808] sm:$0xff]  ;;  %v5406_v35 = vld [vmem:[%s7239_s26 + $0x618] sm:$0xff] }
 0x278   : > { %2769 = vmatpush.msrb.mxu1 %v6520_v31  ;;  %2723 = vmatmul.f32.gmra.mxu3 %v5468_v37  ;;  %v6524_v37 = vld [vmem:[%s13415_s1 + $0x888] sm:$0xff] }
 0x279   : > { %2740 = vmatpush.msrb.mxu0 %v6521_v51  ;;  %2798 = vmatpush.msrb.mxu2 %v6522_v16  ;;  %v10647_v60 = vpop.f32.mrf.mxu0  ;;  %v10657_v51 = vpop.f32.mrf.mxu3  ;;  %v6526_v16 = vld [vmem:[%s13415_s1 + $0x908] sm:$0xff] }
 0x27a   : > { %2826 = vmatpush.msrb.mxu3 %v6523_v46  ;;  %13595 = vst [vmem:[#allocation174_spill] sm:$0xff] %v10647_v60  ;;  %2770 = vmatpush.msrb.mxu1 %v6524_v37  ;;  %v10655_v31 = vpop.f32.mrf.mxu1  ;;  %v6527_v46 = vld [vmem:[%s13415_s1 + $0x990] sm:$0xff]  ;;  %v5403_v37 = vld [vmem:[%s7239_s26 + $0x600] sm:$0xff]  ;;  %v5404_v60 = vld [vmem:[%s7239_s26 + $0x608] sm:$0xff] }
 0x27b   : > { %2741 = vmatpush.msrb.mxu0 %v6525_v36  ;;  %13596 = vst [vmem:[#allocation175_spill] sm:$0xff] %v10655_v31  ;;  %2799 = vmatpush.msrb.mxu2 %v6526_v16  ;;  %v6528_v36 = vld [vmem:[%s13415_s1 + $0x880] sm:$0xff] }
 0x27c   : > { %13597 = vst [vmem:[#allocation176_spill] sm:$0xff] %v10657_v51  ;;  %2827 = vmatpush.msrb.mxu3 %v6527_v46  ;;  %2771 = vmatpush.msrb.mxu1 %v6528_v36  ;;  %v6529_v31 = vld [vmem:[%s13415_s1 + $0x800] sm:$0xff]  ;;  %v5405_v51 = vld [vmem:[%s7239_s26 + $0x610] sm:$0xff]  ;;  %v6531_v46 = vld [vmem:[%s13415_s1 + $0x988] sm:$0xff] }
 0x27d   : > { %2742 = vmatpush.msrb.mxu0 %v6529_v31  ;;  %v6530_v16 = vld [vmem:[%s13415_s1 + $0x900] sm:$0xff]  ;;  %2772 = vmatmul.f32.vlgmr.msrb.gmra.mxu1 %v5404_v60  ;;  %v6532_v36 = vld [vmem:[%s13415_s1 + $0xa88] sm:$0xff]  ;;  %v6535_v60 = vld [vmem:[%s13415_s1 + $0x78] sm:$0xff] }
 0x27e   : > { %2800 = vmatpush.msrb.mxu2 %v6530_v16  ;;  %2828 = vmatpush.msrb.mxu3 %v6531_v46  ;;  %v6533_v31 = vld [vmem:[%s13415_s1 + $0x980] sm:$0xff]  ;;  %v6534_v16 = vld [vmem:[%s13415_s1 + $0xa78] sm:$0xff] }
 0x27f   : > { %2743 = vmatmul.f32.vlgmr.msrb.gmra.mxu0 %v5403_v37  ;;  %2801 = vmatmul.f32.vlgmr.msrb.gmra.mxu2 %v5405_v51  ;;  %v6536_v51 = vld [vmem:[%s13415_s1 + $0xa70] sm:$0xff]  ;;  %v6537_v37 = vld [vmem:[%s13415_s1 + $0xf8] sm:$0xff] }
 0x280   : > { %2886 = vmatpush.msra.mxu1 %v6532_v36  ;;  %2829 = vmatpush.msrb.mxu3 %v6533_v31  ;;  %v10690_v46 = vpop.f32.mrf.mxu2  ;;  %v6538_v36 = vld [vmem:[%s13415_s1 + $0x70] sm:$0xff] }
 0x281   : > { %2843 = vmatpush.msra.mxu0 %v6534_v16  ;;  %13598 = vst [vmem:[#allocation177_spill] sm:$0xff] %v10690_v46  ;;  %3006 = vmatpush.msra.mxu2 %v6535_v60  ;;  %v6540_v16 = vld [vmem:[%s13415_s1 + $0xa68] sm:$0xff]  ;;  %v6541_v60 = vld [vmem:[%s13415_s1 + $0xf0] sm:$0xff]  ;;  %v5426_v46 = vld [vmem:[%s7239_s26 + $0x6b8] sm:$0xff] }
 0x282   : > { %2830 = vmatmul.f32.vlgmr.msrb.gmra.mxu3 %v5406_v35  ;;  %v6539_v35 = vld [vmem:[%s13415_s1 + $0xa80] sm:$0xff] }
 0x283   : > { %2844 = vmatpush.msra.mxu0 %v6536_v51  ;;  %3035 = vmatpush.msra.mxu3 %v6537_v37  ;;  %v5425_v51 = vld [vmem:[%s7239_s26 + $0x6b0] sm:$0xff]  ;;  %v10716_v37 = vpop.f32.mrf.mxu3 }
 0x284   : > { %3007 = vmatpush.msra.mxu2 %v6538_v36  ;;  %2887 = vmatpush.msra.mxu1 %v6539_v35  ;;  %v10707_v31 = vpop.f32.mrf.mxu0  ;;  %13599 = vst [vmem:[#allocation178_spill] sm:$0xff] %v10716_v37  ;;  %v10718_v36 = vpop.f32.mrf.mxu1  ;;  %v6542_v35 = vld [vmem:[%s13415_s1 + $0x68] sm:$0xff] }
 0x285   : > { %2845 = vmatpush.msra.mxu0 %v6540_v16  ;;  %3036 = vmatpush.msra.mxu3 %v6541_v60  ;;  %v6543_v16 = vld [vmem:[%s13415_s1 + $0x1f8] sm:$0xff]  ;;  %v6544_v60 = vld [vmem:[%s13415_s1 + $0xa60] sm:$0xff]  ;;  %v6545_v37 = vld [vmem:[%s13415_s1 + $0xe8] sm:$0xff] }
 0x286   : > { %3008 = vmatpush.msra.mxu2 %v6542_v35  ;;  %3093 = vmatpush.msrb.mxu1 %v6543_v16  ;;  %v6546_v35 = vld [vmem:[%s13415_s1 + $0x60] sm:$0xff]  ;;  %v6547_v16 = vld [vmem:[%s13415_s1 + $0xa58] sm:$0xff] }
 0x287   : > { %2846 = vmatpush.msra.mxu0 %v6544_v60  ;;  %3037 = vmatpush.msra.mxu3 %v6545_v37  ;;  %v6548_v60 = vld [vmem:[%s13415_s1 + $0x58] sm:$0xff]  ;;  %v6549_v37 = vld [vmem:[%s13415_s1 + $0xe0] sm:$0xff] }
 0x288   : > { %3009 = vmatpush.msra.mxu2 %v6546_v35  ;;  %2746 = vmatmul.f32.gmra.mxu0 %v5425_v51  ;;  %v6551_v51 = vld [vmem:[%s13415_s1 + $0xa50] sm:$0xff] }
 0x289   : > { %2775 = vmatmul.f32.gmra.mxu1 %v5426_v46  ;;  %2804 = vmatmul.f32.gmra.mxu2 %v5427_v7  ;;  %v6550_v7 = vld [vmem:[%s13415_s1 + $0x1f0] sm:$0xff] }
 0x28a   : > { %2847 = vmatpush.msra.mxu0 %v6547_v16  ;;  %3010 = vmatpush.msra.mxu2 %v6548_v60  ;;  %v10750_v46 = vpop.f32.mrf.mxu2  ;;  %v6552_v35 = vld [vmem:[%s13415_s1 + $0x50] sm:$0xff]  ;;  %v6553_v16 = vld [vmem:[%s13415_s1 + $0xd8] sm:$0xff]  ;;  %v6555_v60 = vld [vmem:[%s13415_s1 + $0x1e8] sm:$0xff] }
 0x28b   : > { %3038 = vmatpush.msra.mxu3 %v6549_v37  ;;  %3094 = vmatpush.msrb.mxu1 %v6550_v7  ;;  %13600 = vst [vmem:[#allocation179_spill] sm:$0xff] %v10750_v46  ;;  %v6556_v7 = vld [vmem:[%s13415_s1 + $0x48] sm:$0xff] }
 0x28c   : > { %2833 = vmatmul.f32.gmra.mxu3 %v5428_v21  ;;  %2848 = vmatpush.msra.mxu0 %v6551_v51  ;;  %v6554_v21 = vld [vmem:[%s13415_s1 + $0xa48] sm:$0xff]  ;;  %v6557_v51 = vld [vmem:[%s13415_s1 + $0xd0] sm:$0xff] }
 0x28d   : > { %3011 = vmatpush.msra.mxu2 %v6552_v35  ;;  %3039 = vmatpush.msra.mxu3 %v6553_v16  ;;  %v10767_v37 = vpop.f32.mrf.mxu0  ;;  %v5447_v35 = vld [vmem:[%s7239_s26 + $0x760] sm:$0xff]  ;;  %v5448_v16 = vld [vmem:[%s7239_s26 + $0x768] sm:$0xff]  ;;  %v10779_v25 = vpop.f32.mrf.mxu3 }
 0x28e   : > { %2849 = vmatpush.msra.mxu0 %v6554_v21  ;;  %3095 = vmatpush.msrb.mxu1 %v6555_v60  ;;  %13601 = vst [vmem:[#allocation180_spill] sm:$0xff] %v10767_v37  ;;  %v10777_v21 = vpop.f32.mrf.mxu1  ;;  %v6558_v60 = vld [vmem:[%s13415_s1 + $0xa40] sm:$0xff] }
 0x28f   : > { %3012 = vmatpush.msra.mxu2 %v6556_v7  ;;  %3040 = vmatpush.msra.mxu3 %v6557_v51  ;;  %13602 = vst [vmem:[#allocation181_spill] sm:$0xff] %v10777_v21  ;;  %v6559_v7 = vld [vmem:[%s13415_s1 + $0x1e0] sm:$0xff]  ;;  %v6561_v21 = vld [vmem:[%s13415_s1 + $0xc8] sm:$0xff] }
 0x290   : > { %13603 = vst [vmem:[#allocation182_spill] sm:$0xff] %v10779_v25  ;;  %2850 = vmatpush.msra.mxu0 %v6558_v60  ;;  %3096 = vmatpush.msrb.mxu1 %v6559_v7  ;;  %v6560_v51 = vld [vmem:[%s13415_s1 + $0x40] sm:$0xff]  ;;  %v6562_v60 = vld [vmem:[%s13415_s1 + $0xa38] sm:$0xff] }
 0x291   : > { %3013 = vmatpush.msra.mxu2 %v6560_v51  ;;  %3041 = vmatpush.msra.mxu3 %v6561_v21  ;;  %v6563_v7 = vld [vmem:[%s13415_s1 + $0x38] sm:$0xff]  ;;  %v6564_v51 = vld [vmem:[%s13415_s1 + $0xc0] sm:$0xff] }
 0x292   : > { %2749 = vmatmul.f32.gmra.mxu0 %v5447_v35  ;;  %2778 = vmatmul.f32.gmra.mxu1 %v5448_v16  ;;  %v6566_v16 = vld [vmem:[%s13415_s1 + $0x30] sm:$0xff]  ;;  %v6567_v21 = vld [vmem:[%s13415_s1 + $0xb8] sm:$0xff] }
 0x293   : > { %2807 = vmatmul.f32.gmra.mxu2 %v5449_v12  ;;  %2851 = vmatpush.msra.mxu0 %v6562_v60  ;;  %v6565_v12 = vld [vmem:[%s13415_s1 + $0xa30] sm:$0xff]  ;;  %v6569_v60 = vld [vmem:[%s13415_s1 + $0x1d8] sm:$0xff] }
 0x294   : > { %3014 = vmatpush.msra.mxu2 %v6563_v7  ;;  %3042 = vmatpush.msra.mxu3 %v6564_v51  ;;  %v10807_v35 = vpop.f32.mrf.mxu2  ;;  %v6570_v7 = vld [vmem:[%s13415_s1 + $0x28] sm:$0xff]  ;;  %v6571_v51 = vld [vmem:[%s13415_s1 + $0xb0] sm:$0xff]  ;;  %v5522_v25 = vld [vmem:[%s7239_s26 + $0x998] sm:$0xff] }
 0x295   : > { %2836 = vmatmul.f32.gmra.mxu3 %v5450_v19  ;;  %2852 = vmatpush.msra.mxu0 %v6565_v12  ;;  %13604 = vst [vmem:[#allocation183_spill] sm:$0xff] %v10807_v35  ;;  %v6568_v19 = vld [vmem:[%s13415_s1 + $0xa28] sm:$0xff]  ;;  %v5469_v12 = vld [vmem:[%s7239_s26 + $0x810] sm:$0x1] }
 0x296   : > { %3015 = vmatpush.msra.mxu2 %v6566_v16  ;;  %3043 = vmatpush.msra.mxu3 %v6567_v21  ;;  %v5470_v16 = vld [vmem:[%s7239_s26 + $0x818] sm:$0x1]  ;;  %v10838_v35 = vpop.f32.mrf.mxu1 }
 0x297   : > { %2853 = vmatpush.msra.mxu0 %v6568_v19  ;;  %3097 = vmatpush.msrb.mxu1 %v6569_v60  ;;  %v6572_v19 = vld [vmem:[%s13415_s1 + $0xa20] sm:$0xff]  ;;  %13606 = vst [vmem:[#allocation185_spill] sm:$0xff] %v10838_v35  ;;  %v10840_v5 = vpop.f32.mrf.mxu3  ;;  %v6577_v35 = vld [vmem:[%s13415_s1 + $0x18] sm:$0xff] }
 0x298   : > { %3016 = vmatpush.msra.mxu2 %v6570_v7  ;;  %3044 = vmatpush.msra.mxu3 %v6571_v51  ;;  %v10829_v21 = vpop.f32.mrf.mxu0  ;;  %v5471_v60 = vld [vmem:[%s7239_s26 + $0x820] sm:$0x1]  ;;  %v6573_v7 = vld [vmem:[%s13415_s1 + $0x1d0] sm:$0xff]  ;;  %13607 = vst [vmem:[#allocation186_spill] sm:$0xff] %v10840_v5 }
 0x299   : > { %13605 = vst [vmem:[#allocation184_spill] sm:$0xff] %v10829_v21  ;;  %2854 = vmatpush.msra.mxu0 %v6572_v19  ;;  %3098 = vmatpush.msrb.mxu1 %v6573_v7  ;;  %v6574_v51 = vld [vmem:[%s13415_s1 + $0x20] sm:$0xff]  ;;  %v6575_v21 = vld [vmem:[%s13415_s1 + $0xa8] sm:$0xff]  ;;  %v6576_v7 = vld [vmem:[%s13415_s1 + $0xa18] sm:$0xff] }
 0x29a   : > { %3017 = vmatpush.msra.mxu2 %v6574_v51  ;;  %3045 = vmatpush.msra.mxu3 %v6575_v21  ;;  %v5472_v19 = vld [vmem:[%s7239_s26 + $0x828] sm:$0x1]  ;;  %v6578_v51 = vld [vmem:[%s13415_s1 + $0xa0] sm:$0xff] }
 0x29b   : > { %2752 = vmatmul.f32.gmra.mxu0 %v5469_v12  ;;  %2781 = vmatmul.f32.gmra.mxu1 %v5470_v16  ;;  %v6579_v12 = vld [vmem:[%s13415_s1 + $0xa10] sm:$0xff] }
 0x29c   : > { %2810 = vmatmul.f32.gmra.mxu2 %v5471_v60  ;;  %2855 = vmatpush.msra.mxu0 %v6576_v7  ;;  %v6580_v16 = vld [vmem:[%s13415_s1 + $0x10] sm:$0xff]  ;;  %v6582_v60 = vld [vmem:[%s13415_s1 + $0xa08] sm:$0xff] }
 0x29d   : > { %3018 = vmatpush.msra.mxu2 %v6577_v35  ;;  %3046 = vmatpush.msra.mxu3 %v6578_v51  ;;  %v6581_v35 = vld [vmem:[%s13415_s1 + $0x98] sm:$0xff]  ;;  %v6584_v7 = vld [vmem:[%s13415_s1 + $0x8] sm:$0xff]  ;;  %v6585_v51 = vld [vmem:[%s13415_s1 + $0x90] sm:$0xff] }
 0x29e   : > { %2839 = vmatmul.f32.gmra.mxu3 %v5472_v19  ;;  %2856 = vmatpush.msra.mxu0 %v6579_v12  ;;  %v10867_v21 = vpop.f32.mrf.mxu2  ;;  %v6583_v19 = vld [vmem:[%s13415_s1 + $0x1c8] sm:$0xff]  ;;  %v5407_v12 = vld [vmem:[%s7239_s26 + $0x620] sm:$0xff] }
 0x29f   : > { %3019 = vmatpush.msra.mxu2 %v6580_v16  ;;  %3047 = vmatpush.msra.mxu3 %v6581_v35  ;;  %13608 = vst [vmem:[#allocation187_spill] sm:$0xff] %v10867_v21  ;;  %v5408_v16 = vld [vmem:[%s7239_s26 + $0x628] sm:$0xff]  ;;  %v6586_v35 = vld [vmem:[%s13415_s1 + $0xa00] sm:$0xff] }
 0x2a0   : > { %2857 = vmatpush.msra.mxu0 %v6582_v60  ;;  %3099 = vmatpush.msrb.mxu1 %v6583_v19  ;;  %v5479_v60 = vld [vmem:[%s7239_s26 + $0x840] sm:$0xff]  ;;  %v6589_v21 = vld [vmem:[%s13415_s1 + $0x88] sm:$0xff] }
 0x2a1   : > { %3020 = vmatpush.msra.mxu2 %v6584_v7  ;;  %3048 = vmatpush.msra.mxu3 %v6585_v51  ;;  %v6587_v19 = vld [vmem:[%s13415_s1 + $0x1c0] sm:$0xff]  ;;  %v10890_v7 = vpop.f32.mrf.mxu0 }
 0x2a2   : > { %2858 = vmatpush.msra.mxu0 %v6586_v35  ;;  %3100 = vmatpush.msrb.mxu1 %v6587_v19  ;;  %13609 = vst [vmem:[#allocation188_spill] sm:$0xff] %v10890_v7  ;;  %v6588_v51 = vld [vmem:[%s13415_s1] sm:$0xff]  ;;  %v10898_v5 = vpop.f32.mrf.mxu1  ;;  %v10900_v35 = vpop.f32.mrf.mxu3  ;;  %v5480_v19 = vld [vmem:[%s7239_s26 + $0x848] sm:$0xff] }
 0x2a3   : > { %3021 = vmatpush.msra.mxu2 %v6588_v51  ;;  %3049 = vmatpush.msra.mxu3 %v6589_v21  ;;  %13610 = vst [vmem:[#allocation189_spill] sm:$0xff] %v10898_v5  ;;  %v6590_v7 = vld [vmem:[%s13415_s1 + $0x80] sm:$0xff]  ;;  %v6591_v51 = vld [vmem:[%s13415_s1 + $0x178] sm:$0xff] }
 0x2a4   : > { %13611 = vst [vmem:[#allocation190_spill] sm:$0xff] %v10900_v35  ;;  %2859 = vmatmul.f32.vlgmr.msra.gmra.mxu0 %v5407_v12  ;;  %5475 = vmatmul.msk.f32.vlgmr.msra.gmra.mxu1 %vm760_vm0, %v5408_v16  ;;  %v6592_v21 = vld [vmem:[%s13415_s1 + $0x278] sm:$0xff]  ;;  %v6594_v16 = vld [vmem:[%s13415_s1 + $0x170] sm:$0xff] }
 0x2a5   : > { %3022 = vmatmul.f32.vlgmr.msra.gmra.mxu2 %v5479_v60  ;;  %3050 = vmatpush.msra.mxu3 %v6590_v7  ;;  %v6593_v12 = vld [vmem:[%s13415_s1 + $0x1b8] sm:$0xff]  ;;  %v6595_v60 = vld [vmem:[%s13415_s1 + $0x270] sm:$0xff] }
 0x2a6   : > { %3064 = vmatpush.msrb.mxu0 %v6591_v51  ;;  %3122 = vmatpush.msrb.mxu2 %v6592_v21  ;;  %v6596_v7 = vld [vmem:[%s13415_s1 + $0x2f8] sm:$0xff]  ;;  %v6598_v21 = vld [vmem:[%s13415_s1 + $0x168] sm:$0xff] }
 0x2a7   : > { %3051 = vmatmul.f32.vlgmr.msra.gmra.mxu3 %v5480_v19  ;;  %3101 = vmatpush.msrb.mxu1 %v6593_v12  ;;  %v6597_v19 = vld [vmem:[%s13415_s1 + $0x1b0] sm:$0xff]  ;;  %v6599_v12 = vld [vmem:[%s13415_s1 + $0x268] sm:$0xff] }
 0x2a8   : > { %3065 = vmatpush.msrb.mxu0 %v6594_v16  ;;  %3123 = vmatpush.msrb.mxu2 %v6595_v60  ;;  %v10928_v51 = vpop.f32.mrf.mxu2  ;;  %v5429_v16 = vld [vmem:[%s7239_s26 + $0x6d0] sm:$0xff] }
 0x2a9   : > { %3151 = vmatpush.msrb.mxu3 %v6596_v7  ;;  %3102 = vmatpush.msrb.mxu1 %v6597_v19  ;;  %13612 = vst [vmem:[#allocation191_spill] sm:$0xff] %v10928_v51  ;;  %v6600_v60 = vld [vmem:[%s13415_s1 + $0x2f0] sm:$0xff]  ;;  %v5430_v7 = vld [vmem:[%s7239_s26 + $0x6d8] sm:$0xff]  ;;  %v6601_v51 = vld [vmem:[%s13415_s1 + $0x1a8] sm:$0xff] }
 0x2aa   : > { %3066 = vmatpush.msrb.mxu0 %v6598_v21  ;;  %3124 = vmatpush.msrb.mxu2 %v6599_v12  ;;  %v5501_v19 = vld [vmem:[%s7239_s26 + $0x8f0] sm:$0xff]  ;;  %v6602_v21 = vld [vmem:[%s13415_s1 + $0x160] sm:$0xff] }
 0x2ab   : > { %3152 = vmatpush.msrb.mxu3 %v6600_v60  ;;  %3103 = vmatpush.msrb.mxu1 %v6601_v51  ;;  %v6603_v12 = vld [vmem:[%s13415_s1 + $0x260] sm:$0xff]  ;;  %v10951_v5 = vpop.f32.mrf.mxu0  ;;  %v6604_v60 = vld [vmem:[%s13415_s1 + $0x2e8] sm:$0xff]  ;;  %v10956_v35 = vpop.f32.mrf.mxu3 }
 0x2ac   : > { %3067 = vmatpush.msrb.mxu0 %v6602_v21  ;;  %3125 = vmatpush.msrb.mxu2 %v6603_v12  ;;  %13613 = vst [vmem:[#allocation192_spill] sm:$0xff] %v10951_v5  ;;  %v10958_v51 = vpop.f32.mrf.mxu1  ;;  %v5502_v21 = vld [vmem:[%s7239_s26 + $0x8f8] sm:$0xff] }
 0x2ad   : > { %3153 = vmatpush.msrb.mxu3 %v6604_v60  ;;  %2862 = vmatmul.f32.gmra.mxu0 %v5429_v16  ;;  %13614 = vst [vmem:[#allocation193_spill] sm:$0xff] %v10956_v35  ;;  %v6605_v12 = vld [vmem:[%s13415_s1 + $0x158] sm:$0xff]  ;;  %v6607_v16 = vld [vmem:[%s13415_s1 + $0x2e0] sm:$0xff]  ;;  %v6617_v35 = vld [vmem:[%s13415_s1 + $0x190] sm:$0xff] }
 0x2ae   : > { %13615 = vst [vmem:[#allocation194_spill] sm:$0xff] %v10958_v51  ;;  %5476 = vmatmul.msk.f32.gmra.mxu1 %vm760_vm0, %v5430_v7  ;;  %3025 = vmatmul.f32.gmra.mxu2 %v5501_v19  ;;  %v6608_v7 = vld [vmem:[%s13415_s1 + $0x1a0] sm:$0xff]  ;;  %v6609_v19 = vld [vmem:[%s13415_s1 + $0x150] sm:$0xff]  ;;  %v6611_v60 = vld [vmem:[%s13415_s1 + $0x2d8] sm:$0xff] }
 0x2af   : > { %3068 = vmatpush.msrb.mxu0 %v6605_v12  ;;  %3126 = vmatpush.msrb.mxu2 %v6606_v0  ;;  %v6610_v0 = vld [vmem:[%s13415_s1 + $0x250] sm:$0xff]  ;;  %v6613_v12 = vld [vmem:[%s13415_s1 + $0x198] sm:$0xff] }
 0x2b0   : > { %3154 = vmatpush.msrb.mxu3 %v6607_v16  ;;  %3104 = vmatpush.msrb.mxu1 %v6608_v7  ;;  %v6614_v7 = vld [vmem:[%s13415_s1 + $0x248] sm:$0xff]  ;;  %v5561_v51 = vld [vmem:[%s7239_s26 + $0xad0] sm:$0x1]  ;;  %v6885_v5 = vld [vmem:[%s13415_s1 + $0xa18] sm:$0xff] }
 0x2b1   : > { %3054 = vmatmul.f32.gmra.mxu3 %v5502_v21  ;;  %3069 = vmatpush.msrb.mxu0 %v6609_v19  ;;  %v6612_v21 = vld [vmem:[%s13415_s1 + $0x148] sm:$0xff]  ;;  %v6615_v19 = vld [vmem:[%s13415_s1 + $0x2d0] sm:$0xff] }
 0x2b2   : > { %3127 = vmatpush.msrb.mxu2 %v6610_v0  ;;  %3155 = vmatpush.msrb.mxu3 %v6611_v60  ;;  %v10989_v16 = vpop.f32.mrf.mxu2  ;;  %v5451_v0 = vld [vmem:[%s7239_s26 + $0x780] sm:$0xff]  ;;  %v5452_v60 = vld [vmem:[%s7239_s26 + $0x788] sm:$0xff] }
 0x2b3   : > { %3070 = vmatpush.msrb.mxu0 %v6612_v21  ;;  %3105 = vmatpush.msrb.mxu1 %v6613_v12  ;;  %13616 = vst [vmem:[#allocation195_spill] sm:$0xff] %v10989_v16  ;;  %v6616_v21 = vld [vmem:[%s13415_s1 + $0x140] sm:$0xff]  ;;  %v6862_v16 = vld [vmem:[%s13415_s1 + $0x9b8] sm:$0xff] }
 0x2b4   : > { %3128 = vmatpush.msrb.mxu2 %v6614_v7  ;;  %3156 = vmatpush.msrb.mxu3 %v6615_v19  ;;  %v5523_v12 = vld [vmem:[%s7239_s26 + $0x9a0] sm:$0xff]  ;;  %v6619_v19 = vld [vmem:[%s13415_s1 + $0x2c8] sm:$0xff]  ;;  %v11016_v37 = vpop.f32.mrf.mxu1 }
 0x2b5   : > { %3071 = vmatpush.msrb.mxu0 %v6616_v21  ;;  %3106 = vmatpush.msrb.mxu1 %v6617_v35  ;;  %v6618_v7 = vld [vmem:[%s13415_s1 + $0x240] sm:$0xff]  ;;  %v5524_v21 = vld [vmem:[%s7239_s26 + $0x9a8] sm:$0xff]  ;;  %13618 = vst [vmem:[#allocation197_spill] sm:$0xff] %v11016_v37  ;;  %v11018_v50 = vpop.f32.mrf.mxu3  ;;  %v6620_v35 = vld [vmem:[%s13415_s1 + $0x138] sm:$0xff] }
 0x2b6   : > { %3129 = vmatpush.msrb.mxu2 %v6618_v7  ;;  %3157 = vmatpush.msrb.mxu3 %v6619_v19  ;;  %v11012_v14 = vpop.f32.mrf.mxu0  ;;  %13619 = vst [vmem:[#allocation198_spill] sm:$0xff] %v11018_v50  ;;  %v6621_v7 = vld [vmem:[%s13415_s1 + $0x238] sm:$0xff]  ;;  %v6632_v37 = vld [vmem:[%s13415_s1 + $0x220] sm:$0xff] }
 0x2b7   : > { %13617 = vst [vmem:[#allocation196_spill] sm:$0xff] %v11012_v14  ;;  %2865 = vmatmul.f32.gmra.mxu0 %v5451_v0  ;;  %5477 = vmatmul.msk.f32.gmra.mxu1 %vm760_vm0, %v5452_v60  ;;  %v6622_v0 = vld [vmem:[%s13415_s1 + $0x2c0] sm:$0xff]  ;;  %v6623_v60 = vld [vmem:[%s13415_s1 + $0x130] sm:$0xff]  ;;  %v6625_v19 = vld [vmem:[%s13415_s1 + $0x2b8] sm:$0xff] }
 0x2b8   : > { %3028 = vmatmul.f32.gmra.mxu2 %v5523_v12  ;;  %3072 = vmatpush.msrb.mxu0 %v6620_v35  ;;  %v6624_v12 = vld [vmem:[%s13415_s1 + $0x230] sm:$0xff]  ;;  %v6627_v35 = vld [vmem:[%s13415_s1 + $0x188] sm:$0xff] }
 0x2b9   : > { %3130 = vmatpush.msrb.mxu2 %v6621_v7  ;;  %3158 = vmatpush.msrb.mxu3 %v6622_v0  ;;  %v6628_v7 = vld [vmem:[%s13415_s1 + $0x228] sm:$0xff]  ;;  %v6629_v0 = vld [vmem:[%s13415_s1 + $0x2b0] sm:$0xff] }
 0x2ba   : > { %3057 = vmatmul.f32.gmra.mxu3 %v5524_v21  ;;  %3073 = vmatpush.msrb.mxu0 %v6623_v60  ;;  %v6626_v21 = vld [vmem:[%s13415_s1 + $0x128] sm:$0xff]  ;;  %v5473_v60 = vld [vmem:[%s7239_s26 + $0x830] sm:$0x1] }
 0x2bb   : > { %3131 = vmatpush.msrb.mxu2 %v6624_v12  ;;  %3159 = vmatpush.msrb.mxu3 %v6625_v19  ;;  %v5474_v12 = vld [vmem:[%s7239_s26 + $0x838] sm:$0x1] }
 0x2bc   : > { %3074 = vmatpush.msrb.mxu0 %v6626_v21  ;;  %3107 = vmatpush.msrb.mxu1 %v6627_v35  ;;  %v11052_v19 = vpop.f32.mrf.mxu2  ;;  %v6630_v21 = vld [vmem:[%s13415_s1 + $0x120] sm:$0xff]  ;;  %v5545_v35 = vld [vmem:[%s7239_s26 + $0xa50] sm:$0x1] }
 0x2bd   : > { %3132 = vmatpush.msrb.mxu2 %v6628_v7  ;;  %3160 = vmatpush.msrb.mxu3 %v6629_v0  ;;  %13620 = vst [vmem:[#allocation199_spill] sm:$0xff] %v11052_v19  ;;  %v6631_v7 = vld [vmem:[%s13415_s1 + $0x180] sm:$0xff]  ;;  %v6633_v0 = vld [vmem:[%s13415_s1 + $0x2a8] sm:$0xff] }
 0x2be   : > { %3075 = vmatpush.msrb.mxu0 %v6630_v21  ;;  %3108 = vmatpush.msrb.mxu1 %v6631_v7  ;;  %v5546_v21 = vld [vmem:[%s7239_s26 + $0xa58] sm:$0x1]  ;;  %v11074_v14 = vpop.f32.mrf.mxu1 }
 0x2bf   : > { %3133 = vmatpush.msrb.mxu2 %v6632_v37  ;;  %3161 = vmatpush.msrb.mxu3 %v6633_v0  ;;  %v6634_v7 = vld [vmem:[%s13415_s1 + $0x118] sm:$0xff]  ;;  %13622 = vst [vmem:[#allocation201_spill] sm:$0xff] %v11074_v14  ;;  %v11076_v37 = vpop.f32.mrf.mxu3  ;;  %v5483_v14 = vld [vmem:[%s7239_s26 + $0x860] sm:$0xff] }
 0x2c0   : > { %2868 = vmatmul.f32.gmra.mxu0 %v5473_v60  ;;  %5478 = vmatmul.msk.f32.gmra.mxu1 %vm760_vm0, %v5474_v12  ;;  %v11069_v19 = vpop.f32.mrf.mxu0  ;;  %13623 = vst [vmem:[#allocation202_spill] sm:$0xff] %v11076_v37  ;;  %v6635_v0 = vld [vmem:[%s13415_s1 + $0x218] sm:$0xff]  ;;  %v6636_v60 = vld [vmem:[%s13415_s1 + $0x2a0] sm:$0xff]  ;;  %v6637_v12 = vld [vmem:[%s13415_s1 + $0x110] sm:$0xff] }
 0x2c1   : > { %13621 = vst [vmem:[#allocation200_spill] sm:$0xff] %v11069_v19  ;;  %3031 = vmatmul.f32.gmra.mxu2 %v5545_v35  ;;  %3076 = vmatpush.msrb.mxu0 %v6634_v7  ;;  %v6638_v35 = vld [vmem:[%s13415_s1 + $0x210] sm:$0xff]  ;;  %v6639_v7 = vld [vmem:[%s13415_s1 + $0x298] sm:$0xff]  ;;  %v6646_v19 = vld [vmem:[%s13415_s1 + $0x200] sm:$0xff] }
 0x2c2   : > { %3134 = vmatpush.msrb.mxu2 %v6635_v0  ;;  %3162 = vmatpush.msrb.mxu3 %v6636_v60  ;;  %v6641_v0 = vld [vmem:[%s13415_s1 + $0x3f8] sm:$0xff]  ;;  %v6642_v60 = vld [vmem:[%s13415_s1 + $0x208] sm:$0xff]  ;;  %v5527_v37 = vld [vmem:[%s7239_s26 + $0x9c0] sm:$0xff] }
 0x2c3   : > { %3060 = vmatmul.f32.gmra.mxu3 %v5546_v21  ;;  %3077 = vmatpush.msrb.mxu0 %v6637_v12  ;;  %v6640_v21 = vld [vmem:[%s13415_s1 + $0x108] sm:$0xff]  ;;  %v6643_v12 = vld [vmem:[%s13415_s1 + $0x290] sm:$0xff] }
 0x2c4   : > { %3135 = vmatpush.msrb.mxu2 %v6638_v35  ;;  %3163 = vmatpush.msrb.mxu3 %v6639_v7  ;;  %v5481_v35 = vld [vmem:[%s7239_s26 + $0x850] sm:$0xff]  ;;  %v5482_v7 = vld [vmem:[%s7239_s26 + $0x858] sm:$0xff] }
 0x2c5   : > { %3078 = vmatpush.msrb.mxu0 %v6640_v21  ;;  %3209 = vmatpush.msra.mxu1 %v6641_v0  ;;  %v6644_v21 = vld [vmem:[%s13415_s1 + $0x100] sm:$0xff]  ;;  %v6645_v0 = vld [vmem:[%s13415_s1 + $0x3f0] sm:$0xff] }
 0x2c6   : > { %3136 = vmatpush.msrb.mxu2 %v6642_v60  ;;  %3164 = vmatpush.msrb.mxu3 %v6643_v12  ;;  %v11114_v60 = vpop.f32.mrf.mxu2  ;;  %v6647_v12 = vld [vmem:[%s13415_s1 + $0x288] sm:$0xff] }
 0x2c7   : > { %3079 = vmatpush.msrb.mxu0 %v6644_v21  ;;  %3210 = vmatpush.msra.mxu1 %v6645_v0  ;;  %13624 = vst [vmem:[#allocation203_spill] sm:$0xff] %v11114_v60  ;;  %v5484_v21 = vld [vmem:[%s7239_s26 + $0x868] sm:$0xff]  ;;  %v6648_v0 = vld [vmem:[%s13415_s1 + $0x280] sm:$0xff] }
 0x2c8   : > { %3137 = vmatpush.msrb.mxu2 %v6646_v19  ;;  %3165 = vmatpush.msrb.mxu3 %v6647_v12  ;;  %v6649_v19 = vld [vmem:[%s13415_s1 + $0x378] sm:$0xff] }
 0x2c9   : > { %3080 = vmatmul.f32.vlgmr.msrb.gmra.mxu0 %v5481_v35  ;;  %3109 = vmatmul.f32.vlgmr.msrb.gmra.mxu1 %v5482_v7  ;;  %v11126_v60 = vpop.f32.mrf.mxu0  ;;  %v6650_v12 = vld [vmem:[%s13415_s1 + $0x478] sm:$0xff]  ;;  %v11134_v35 = vpop.f32.mrf.mxu1  ;;  %v6651_v7 = vld [vmem:[%s13415_s1 + $0x3e8] sm:$0xff] }
 0x2ca   : > { %3138 = vmatmul.f32.vlgmr.msrb.gmra.mxu2 %v5483_v14  ;;  %3166 = vmatpush.msrb.mxu3 %v6648_v0  ;;  %13625 = vst [vmem:[#allocation204_spill] sm:$0xff] %v11126_v60  ;;  %v11136_v14 = vpop.f32.mrf.mxu3  ;;  %v6652_v0 = vld [vmem:[%s13415_s1 + $0x370] sm:$0xff] }
 0x2cb   : > { %3180 = vmatpush.msra.mxu0 %v6649_v19  ;;  %3238 = vmatpush.msra.mxu2 %v6650_v12  ;;  %13626 = vst [vmem:[#allocation205_spill] sm:$0xff] %v11134_v35  ;;  %v6653_v19 = vld [vmem:[%s13415_s1 + $0x470] sm:$0xff]  ;;  %v6655_v12 = vld [vmem:[%s13415_s1 + $0x3e0] sm:$0xff]  ;;  %v5504_v35 = vld [vmem:[%s7239_s26 + $0x908] sm:$0xff] }
 0x2cc   : > { %13627 = vst [vmem:[#allocation206_spill] sm:$0xff] %v11136_v14  ;;  %3167 = vmatmul.f32.vlgmr.msrb.gmra.mxu3 %v5484_v21  ;;  %3211 = vmatpush.msra.mxu1 %v6651_v7  ;;  %v6654_v21 = vld [vmem:[%s13415_s1 + $0x4f8] sm:$0xff]  ;;  %v6656_v7 = vld [vmem:[%s13415_s1 + $0x368] sm:$0xff]  ;;  %v5505_v60 = vld [vmem:[%s7239_s26 + $0x910] sm:$0xff] }
 0x2cd   : > { %3181 = vmatpush.msra.mxu0 %v6652_v0  ;;  %3239 = vmatpush.msra.mxu2 %v6653_v19  ;;  %v6657_v0 = vld [vmem:[%s13415_s1 + $0x468] sm:$0xff]  ;;  %v5503_v19 = vld [vmem:[%s7239_s26 + $0x900] sm:$0xff] }
 0x2ce   : > { %3267 = vmatpush.msra.mxu3 %v6654_v21  ;;  %3212 = vmatpush.msra.mxu1 %v6655_v12  ;;  %v6658_v21 = vld [vmem:[%s13415_s1 + $0x4f0] sm:$0xff]  ;;  %v6659_v12 = vld [vmem:[%s13415_s1 + $0x3d8] sm:$0xff] }
 0x2cf   : > { %3182 = vmatpush.msra.mxu0 %v6656_v7  ;;  %3240 = vmatpush.msra.mxu2 %v6657_v0  ;;  %v6660_v7 = vld [vmem:[%s13415_s1 + $0x360] sm:$0xff]  ;;  %v11174_v14 = vpop.f32.mrf.mxu2 }
 0x2d0   : > { %3268 = vmatpush.msra.mxu3 %v6658_v21  ;;  %3213 = vmatpush.msra.mxu1 %v6659_v12  ;;  %v6661_v0 = vld [vmem:[%s13415_s1 + $0x460] sm:$0xff]  ;;  %13628 = vst [vmem:[#allocation207_spill] sm:$0xff] %v11174_v14  ;;  %v6662_v21 = vld [vmem:[%s13415_s1 + $0x4e8] sm:$0xff]  ;;  %v5506_v12 = vld [vmem:[%s7239_s26 + $0x918] sm:$0xff] }
 0x2d1   : > { %3183 = vmatpush.msra.mxu0 %v6660_v7  ;;  %3241 = vmatpush.msra.mxu2 %v6661_v0  ;;  %v6663_v7 = vld [vmem:[%s13415_s1 + $0x358] sm:$0xff] }
 0x2d2   : > { %3269 = vmatpush.msra.mxu3 %v6662_v21  ;;  %3083 = vmatmul.f32.gmra.mxu0 %v5503_v19  ;;  %v6664_v0 = vld [vmem:[%s13415_s1 + $0x458] sm:$0xff]  ;;  %v6665_v21 = vld [vmem:[%s13415_s1 + $0x4e0] sm:$0xff]  ;;  %v11196_v19 = vpop.f32.mrf.mxu1 }
 0x2d3   : > { %3112 = vmatmul.f32.gmra.mxu1 %v5504_v35  ;;  %3141 = vmatmul.f32.gmra.mxu2 %v5505_v60  ;;  %v6666_v60 = vld [vmem:[%s13415_s1 + $0x3d0] sm:$0xff]  ;;  %v11194_v35 = vpop.f32.mrf.mxu3  ;;  %13631 = vst [vmem:[#allocation210_spill] sm:$0xff] %v11196_v19 }
 0x2d4   : > { %3184 = vmatpush.msra.mxu0 %v6663_v7  ;;  %3242 = vmatpush.msra.mxu2 %v6664_v0  ;;  %v11186_v14 = vpop.f32.mrf.mxu0  ;;  %13630 = vst [vmem:[#allocation209_spill] sm:$0xff] %v11194_v35  ;;  %v6667_v7 = vld [vmem:[%s13415_s1 + $0x350] sm:$0xff]  ;;  %v5526_v35 = vld [vmem:[%s7239_s26 + $0x9b8] sm:$0xff] }
 0x2d5   : > { %13629 = vst [vmem:[#allocation208_spill] sm:$0xff] %v11186_v14  ;;  %3270 = vmatpush.msra.mxu3 %v6665_v21  ;;  %3214 = vmatpush.msra.mxu1 %v6666_v60  ;;  %v6668_v0 = vld [vmem:[%s13415_s1 + $0x450] sm:$0xff]  ;;  %v6669_v21 = vld [vmem:[%s13415_s1 + $0x4d8] sm:$0xff]  ;;  %v6671_v60 = vld [vmem:[%s13415_s1 + $0x348] sm:$0xff] }
 0x2d6   : > { %3170 = vmatmul.f32.gmra.mxu3 %v5506_v12  ;;  %3185 = vmatpush.msra.mxu0 %v6667_v7  ;;  %v6670_v12 = vld [vmem:[%s13415_s1 + $0x3c8] sm:$0xff]  ;;  %v6848_v14 = vld [vmem:[%s13415_s1 + $0x9e0] sm:$0xff] }
 0x2d7   : > { %3243 = vmatpush.msra.mxu2 %v6668_v0  ;;  %3271 = vmatpush.msra.mxu3 %v6669_v21  ;;  %v6672_v7 = vld [vmem:[%s13415_s1 + $0x448] sm:$0xff]  ;;  %v6673_v0 = vld [vmem:[%s13415_s1 + $0x4d0] sm:$0xff] }
 0x2d8   : > { %3215 = vmatpush.msra.mxu1 %v6670_v12  ;;  %3186 = vmatpush.msra.mxu0 %v6671_v60  ;;  %v5525_v21 = vld [vmem:[%s7239_s26 + $0x9b0] sm:$0xff]  ;;  %v6674_v12 = vld [vmem:[%s13415_s1 + $0x3c0] sm:$0xff] }
 0x2d9   : > { %3244 = vmatpush.msra.mxu2 %v6672_v7  ;;  %3272 = vmatpush.msra.mxu3 %v6673_v0  ;;  %v6675_v60 = vld [vmem:[%s13415_s1 + $0x340] sm:$0xff]  ;;  %v6677_v0 = vld [vmem:[%s13415_s1 + $0x4c8] sm:$0xff] }
 0x2da   : > { %3216 = vmatpush.msra.mxu1 %v6674_v12  ;;  %3187 = vmatpush.msra.mxu0 %v6675_v60  ;;  %v6676_v7 = vld [vmem:[%s13415_s1 + $0x440] sm:$0xff]  ;;  %v11234_v19 = vpop.f32.mrf.mxu2  ;;  %v6678_v12 = vld [vmem:[%s13415_s1 + $0x3b8] sm:$0xff]  ;;  %v5528_v60 = vld [vmem:[%s7239_s26 + $0x9c8] sm:$0xff] }
 0x2db   : > { %3245 = vmatpush.msra.mxu2 %v6676_v7  ;;  %3273 = vmatpush.msra.mxu3 %v6677_v0  ;;  %13632 = vst [vmem:[#allocation211_spill] sm:$0xff] %v11234_v19  ;;  %v6679_v7 = vld [vmem:[%s13415_s1 + $0x338] sm:$0xff] }
 0x2dc   : > { %3086 = vmatmul.f32.gmra.mxu0 %v5525_v21  ;;  %3115 = vmatmul.f32.gmra.mxu1 %v5526_v35  ;;  %v6680_v0 = vld [vmem:[%s13415_s1 + $0x438] sm:$0xff]  ;;  %v6682_v35 = vld [vmem:[%s13415_s1 + $0x3b0] sm:$0xff] }
 0x2dd   : > { %3144 = vmatmul.f32.gmra.mxu2 %v5527_v37  ;;  %3217 = vmatpush.msra.mxu1 %v6678_v12  ;;  %v11246_v19 = vpop.f32.mrf.mxu0  ;;  %v6681_v37 = vld [vmem:[%s13415_s1 + $0x4c0] sm:$0xff]  ;;  %v11256_v12 = vpop.f32.mrf.mxu3 }
 0x2de   : > { %3188 = vmatpush.msra.mxu0 %v6679_v7  ;;  %3246 = vmatpush.msra.mxu2 %v6680_v0  ;;  %13633 = vst [vmem:[#allocation212_spill] sm:$0xff] %v11246_v19  ;;  %v11254_v21 = vpop.f32.mrf.mxu1  ;;  %v6683_v7 = vld [vmem:[%s13415_s1 + $0x330] sm:$0xff] }
 0x2df   : > { %3274 = vmatpush.msra.mxu3 %v6681_v37  ;;  %3218 = vmatpush.msra.mxu1 %v6682_v35  ;;  %13634 = vst [vmem:[#allocation213_spill] sm:$0xff] %v11254_v21  ;;  %v6684_v0 = vld [vmem:[%s13415_s1 + $0x430] sm:$0xff]  ;;  %v6685_v37 = vld [vmem:[%s13415_s1 + $0x4b8] sm:$0xff]  ;;  %v6687_v35 = vld [vmem:[%s13415_s1 + $0x328] sm:$0xff] }
 0x2e0   : > { %13635 = vst [vmem:[#allocation214_spill] sm:$0xff] %v11256_v12  ;;  %3173 = vmatmul.f32.gmra.mxu3 %v5528_v60  ;;  %3189 = vmatpush.msra.mxu0 %v6683_v7  ;;  %v6686_v60 = vld [vmem:[%s13415_s1 + $0x3a8] sm:$0xff]  ;;  %v5549_v19 = vld [vmem:[%s7239_s26 + $0xa70] sm:$0x1] }
 0x2e1   : > { %3247 = vmatpush.msra.mxu2 %v6684_v0  ;;  %3275 = vmatpush.msra.mxu3 %v6685_v37  ;;  %v6688_v7 = vld [vmem:[%s13415_s1 + $0x428] sm:$0xff]  ;;  %v6689_v0 = vld [vmem:[%s13415_s1 + $0x4b0] sm:$0xff]  ;;  %v5547_v37 = vld [vmem:[%s7239_s26 + $0xa60] sm:$0x1] }
 0x2e2   : > { %3219 = vmatpush.msra.mxu1 %v6686_v60  ;;  %3190 = vmatpush.msra.mxu0 %v6687_v35  ;;  %v5548_v21 = vld [vmem:[%s7239_s26 + $0xa68] sm:$0x1]  ;;  %v6690_v60 = vld [vmem:[%s13415_s1 + $0x3a0] sm:$0xff] }
 0x2e3   : > { %3248 = vmatpush.msra.mxu2 %v6688_v7  ;;  %3276 = vmatpush.msra.mxu3 %v6689_v0  ;;  %v6691_v35 = vld [vmem:[%s13415_s1 + $0x320] sm:$0xff]  ;;  %v6693_v0 = vld [vmem:[%s13415_s1 + $0x4a8] sm:$0xff] }
 0x2e4   : > { %3220 = vmatpush.msra.mxu1 %v6690_v60  ;;  %3191 = vmatpush.msra.mxu0 %v6691_v35  ;;  %v6692_v7 = vld [vmem:[%s13415_s1 + $0x420] sm:$0xff]  ;;  %v11294_v12 = vpop.f32.mrf.mxu2  ;;  %v6694_v60 = vld [vmem:[%s13415_s1 + $0x398] sm:$0xff] }
 0x2e5   : > { %3249 = vmatpush.msra.mxu2 %v6692_v7  ;;  %3277 = vmatpush.msra.mxu3 %v6693_v0  ;;  %13636 = vst [vmem:[#allocation215_spill] sm:$0xff] %v11294_v12  ;;  %v5550_v35 = vld [vmem:[%s7239_s26 + $0xa78] sm:$0x1] }
 0x2e6   : > { %3089 = vmatmul.f32.gmra.mxu0 %v5547_v37  ;;  %3118 = vmatmul.f32.gmra.mxu1 %v5548_v21  ;;  %v6695_v7 = vld [vmem:[%s13415_s1 + $0x318] sm:$0xff]  ;;  %v6698_v21 = vld [vmem:[%s13415_s1 + $0x390] sm:$0xff] }
 0x2e7   : > { %3147 = vmatmul.f32.gmra.mxu2 %v5549_v19  ;;  %3221 = vmatpush.msra.mxu1 %v6694_v60  ;;  %v6696_v0 = vld [vmem:[%s13415_s1 + $0x418] sm:$0xff]  ;;  %v11306_v12 = vpop.f32.mrf.mxu0  ;;  %v6697_v19 = vld [vmem:[%s13415_s1 + $0x4a0] sm:$0xff]  ;;  %v11316_v60 = vpop.f32.mrf.mxu3 }
 0x2e8   : > { %3192 = vmatpush.msra.mxu0 %v6695_v7  ;;  %3250 = vmatpush.msra.mxu2 %v6696_v0  ;;  %13637 = vst [vmem:[#allocation216_spill] sm:$0xff] %v11306_v12  ;;  %v11314_v37 = vpop.f32.mrf.mxu1  ;;  %v6699_v7 = vld [vmem:[%s13415_s1 + $0x310] sm:$0xff]  ;;  %v5487_v12 = vld [vmem:[%s7239_s26 + $0x880] sm:$0xff] }
 0x2e9   : > { %3278 = vmatpush.msra.mxu3 %v6697_v19  ;;  %3222 = vmatpush.msra.mxu1 %v6698_v21  ;;  %13638 = vst [vmem:[#allocation217_spill] sm:$0xff] %v11314_v37  ;;  %v6700_v0 = vld [vmem:[%s13415_s1 + $0x410] sm:$0xff]  ;;  %v6701_v19 = vld [vmem:[%s13415_s1 + $0x498] sm:$0xff]  ;;  %v6703_v21 = vld [vmem:[%s13415_s1 + $0x308] sm:$0xff] }
 0x2ea   : > { %13639 = vst [vmem:[#allocation218_spill] sm:$0xff] %v11316_v60  ;;  %3176 = vmatmul.f32.gmra.mxu3 %v5550_v35  ;;  %3193 = vmatpush.msra.mxu0 %v6699_v7  ;;  %v6702_v35 = vld [vmem:[%s13415_s1 + $0x388] sm:$0xff]  ;;  %v5486_v37 = vld [vmem:[%s7239_s26 + $0x878] sm:$0xff] }
 0x2eb   : > { %3251 = vmatpush.msra.mxu2 %v6700_v0  ;;  %3279 = vmatpush.msra.mxu3 %v6701_v19  ;;  %v6704_v7 = vld [vmem:[%s13415_s1 + $0x408] sm:$0xff]  ;;  %v6705_v0 = vld [vmem:[%s13415_s1 + $0x490] sm:$0xff] }
 0x2ec   : > { %3223 = vmatpush.msra.mxu1 %v6702_v35  ;;  %3194 = vmatpush.msra.mxu0 %v6703_v21  ;;  %v5485_v19 = vld [vmem:[%s7239_s26 + $0x870] sm:$0xff]  ;;  %v6706_v35 = vld [vmem:[%s13415_s1 + $0x380] sm:$0xff] }
 0x2ed   : > { %3252 = vmatpush.msra.mxu2 %v6704_v7  ;;  %3280 = vmatpush.msra.mxu3 %v6705_v0  ;;  %v6707_v21 = vld [vmem:[%s13415_s1 + $0x300] sm:$0xff]  ;;  %v6709_v0 = vld [vmem:[%s13415_s1 + $0x488] sm:$0xff] }
 0x2ee   : > { %3224 = vmatpush.msra.mxu1 %v6706_v35  ;;  %3195 = vmatpush.msra.mxu0 %v6707_v21  ;;  %v6708_v7 = vld [vmem:[%s13415_s1 + $0x400] sm:$0xff]  ;;  %v11354_v60 = vpop.f32.mrf.mxu2  ;;  %v5488_v35 = vld [vmem:[%s7239_s26 + $0x888] sm:$0xff]  ;;  %v6710_v21 = vld [vmem:[%s13415_s1 + $0x5f8] sm:$0xff] }
 0x2ef   : > { %3253 = vmatpush.msra.mxu2 %v6708_v7  ;;  %3281 = vmatpush.msra.mxu3 %v6709_v0  ;;  %13640 = vst [vmem:[#allocation219_spill] sm:$0xff] %v11354_v60  ;;  %v6711_v7 = vld [vmem:[%s13415_s1 + $0x480] sm:$0xff]  ;;  %v6712_v0 = vld [vmem:[%s13415_s1 + $0x578] sm:$0xff] }
 0x2f0   : > { %3196 = vmatmul.f32.vlgmr.msra.gmra.mxu0 %v5485_v19  ;;  %3225 = vmatmul.f32.vlgmr.msra.gmra.mxu1 %v5486_v37 }
 0x2f1   : > { %3254 = vmatmul.f32.vlgmr.msra.gmra.mxu2 %v5487_v12  ;;  %3325 = vmatpush.msrb.mxu1 %v6710_v21  ;;  %v11366_v60 = vpop.f32.mrf.mxu0  ;;  %v6713_v12 = vld [vmem:[%s13415_s1 + $0x678] sm:$0xff]  ;;  %v11373_v19 = vpop.f32.mrf.mxu3  ;;  %v6714_v21 = vld [vmem:[%s13415_s1 + $0x5f0] sm:$0xff] }
 0x2f2   : > { %3282 = vmatpush.msra.mxu3 %v6711_v7  ;;  %3296 = vmatpush.msrb.mxu0 %v6712_v0  ;;  %13641 = vst [vmem:[#allocation220_spill] sm:$0xff] %v11366_v60  ;;  %v11371_v37 = vpop.f32.mrf.mxu1  ;;  %v6715_v7 = vld [vmem:[%s13415_s1 + $0x570] sm:$0xff]  ;;  %v6717_v0 = vld [vmem:[%s13415_s1 + $0x6f8] sm:$0xff] }
 0x2f3   : > { %3354 = vmatpush.msrb.mxu2 %v6713_v12  ;;  %3283 = vmatmul.f32.vlgmr.msra.gmra.mxu3 %v5488_v35  ;;  %13642 = vst [vmem:[#allocation221_spill] sm:$0xff] %v11371_v37  ;;  %v6716_v35 = vld [vmem:[%s13415_s1 + $0x670] sm:$0xff]  ;;  %v6718_v12 = vld [vmem:[%s13415_s1 + $0x5e8] sm:$0xff] }
 0x2f4   : > { %13643 = vst [vmem:[#allocation222_spill] sm:$0xff] %v11373_v19  ;;  %3326 = vmatpush.msrb.mxu1 %v6714_v21  ;;  %3297 = vmatpush.msrb.mxu0 %v6715_v7  ;;  %v6719_v21 = vld [vmem:[%s13415_s1 + $0x568] sm:$0xff]  ;;  %v5509_v60 = vld [vmem:[%s7239_s26 + $0x930] sm:$0xff] }
 0x2f5   : > { %3355 = vmatpush.msrb.mxu2 %v6716_v35  ;;  %3383 = vmatpush.msrb.mxu3 %v6717_v0  ;;  %v6720_v7 = vld [vmem:[%s13415_s1 + $0x668] sm:$0xff]  ;;  %v6721_v35 = vld [vmem:[%s13415_s1 + $0x6f0] sm:$0xff]  ;;  %v5507_v0 = vld [vmem:[%s7239_s26 + $0x920] sm:$0xff] }
 0x2f6   : > { %3327 = vmatpush.msrb.mxu1 %v6718_v12  ;;  %3298 = vmatpush.msrb.mxu0 %v6719_v21  ;;  %v5508_v37 = vld [vmem:[%s7239_s26 + $0x928] sm:$0xff]  ;;  %v6722_v12 = vld [vmem:[%s13415_s1 + $0x5e0] sm:$0xff] }
 0x2f7   : > { %3356 = vmatpush.msrb.mxu2 %v6720_v7  ;;  %3384 = vmatpush.msrb.mxu3 %v6721_v35  ;;  %v6723_v21 = vld [vmem:[%s13415_s1 + $0x560] sm:$0xff]  ;;  %v6725_v35 = vld [vmem:[%s13415_s1 + $0x6e8] sm:$0xff] }
 0x2f8   : > { %3328 = vmatpush.msrb.mxu1 %v6722_v12  ;;  %3299 = vmatpush.msrb.mxu0 %v6723_v21  ;;  %v6724_v7 = vld [vmem:[%s13415_s1 + $0x660] sm:$0xff]  ;;  %v11414_v19 = vpop.f32.mrf.mxu2  ;;  %v6726_v12 = vld [vmem:[%s13415_s1 + $0x5d8] sm:$0xff] }
 0x2f9   : > { %3357 = vmatpush.msrb.mxu2 %v6724_v7  ;;  %3385 = vmatpush.msrb.mxu3 %v6725_v35  ;;  %13644 = vst [vmem:[#allocation223_spill] sm:$0xff] %v11414_v19  ;;  %v5510_v21 = vld [vmem:[%s7239_s26 + $0x938] sm:$0xff] }
 0x2fa   : > { %3199 = vmatmul.f32.gmra.mxu0 %v5507_v0  ;;  %3228 = vmatmul.f32.gmra.mxu1 %v5508_v37  ;;  %v6727_v7 = vld [vmem:[%s13415_s1 + $0x558] sm:$0xff]  ;;  %v6730_v0 = vld [vmem:[%s13415_s1 + $0x5d0] sm:$0xff] }
 0x2fb   : > { %3257 = vmatmul.f32.gmra.mxu2 %v5509_v60  ;;  %3329 = vmatpush.msrb.mxu1 %v6726_v12  ;;  %v6728_v35 = vld [vmem:[%s13415_s1 + $0x658] sm:$0xff]  ;;  %v11426_v19 = vpop.f32.mrf.mxu3  ;;  %v6729_v60 = vld [vmem:[%s13415_s1 + $0x6e0] sm:$0xff]  ;;  %v11436_v12 = vpop.f32.mrf.mxu1 }
 0x2fc   : > { %3300 = vmatpush.msrb.mxu0 %v6727_v7  ;;  %3358 = vmatpush.msrb.mxu2 %v6728_v35  ;;  %13645 = vst [vmem:[#allocation224_spill] sm:$0xff] %v11426_v19  ;;  %v11428_v37 = vpop.f32.mrf.mxu0  ;;  %v6731_v7 = vld [vmem:[%s13415_s1 + $0x550] sm:$0xff]  ;;  %v5530_v19 = vld [vmem:[%s7239_s26 + $0x9d8] sm:$0xff] }
 0x2fd   : > { %13646 = vst [vmem:[#allocation225_spill] sm:$0xff] %v11428_v37  ;;  %3386 = vmatpush.msrb.mxu3 %v6729_v60  ;;  %3330 = vmatpush.msrb.mxu1 %v6730_v0  ;;  %v6732_v35 = vld [vmem:[%s13415_s1 + $0x650] sm:$0xff]  ;;  %v6733_v60 = vld [vmem:[%s13415_s1 + $0x6d8] sm:$0xff]  ;;  %v6735_v0 = vld [vmem:[%s13415_s1 + $0x548] sm:$0xff] }
 0x2fe   : > { %13647 = vst [vmem:[#allocation226_spill] sm:$0xff] %v11436_v12  ;;  %3286 = vmatmul.f32.gmra.mxu3 %v5510_v21  ;;  %3301 = vmatpush.msrb.mxu0 %v6731_v7  ;;  %v6734_v21 = vld [vmem:[%s13415_s1 + $0x5c8] sm:$0xff]  ;;  %v5531_v12 = vld [vmem:[%s7239_s26 + $0x9e0] sm:$0xff] }
 0x2ff   : > { %3359 = vmatpush.msrb.mxu2 %v6732_v35  ;;  %3387 = vmatpush.msrb.mxu3 %v6733_v60  ;;  %v6736_v7 = vld [vmem:[%s13415_s1 + $0x648] sm:$0xff]  ;;  %v6737_v35 = vld [vmem:[%s13415_s1 + $0x6d0] sm:$0xff] }
 0x300   : > { %3331 = vmatpush.msrb.mxu1 %v6734_v21  ;;  %3302 = vmatpush.msrb.mxu0 %v6735_v0  ;;  %v5529_v60 = vld [vmem:[%s7239_s26 + $0x9d0] sm:$0xff]  ;;  %v6738_v21 = vld [vmem:[%s13415_s1 + $0x5c0] sm:$0xff] }
 0x301   : > { %3360 = vmatpush.msrb.mxu2 %v6736_v7  ;;  %3388 = vmatpush.msrb.mxu3 %v6737_v35  ;;  %v6739_v0 = vld [vmem:[%s13415_s1 + $0x540] sm:$0xff]  ;;  %v6741_v35 = vld [vmem:[%s13415_s1 + $0x6c8] sm:$0xff] }
 0x302   : > { %3332 = vmatpush.msrb.mxu1 %v6738_v21  ;;  %3303 = vmatpush.msrb.mxu0 %v6739_v0  ;;  %v6740_v7 = vld [vmem:[%s13415_s1 + $0x640] sm:$0xff]  ;;  %v11474_v37 = vpop.f32.mrf.mxu2  ;;  %v6742_v21 = vld [vmem:[%s13415_s1 + $0x5b8] sm:$0xff]  ;;  %v5532_v0 = vld [vmem:[%s7239_s26 + $0x9e8] sm:$0xff] }
 0x303   : > { %3361 = vmatpush.msrb.mxu2 %v6740_v7  ;;  %3389 = vmatpush.msrb.mxu3 %v6741_v35  ;;  %13648 = vst [vmem:[#allocation227_spill] sm:$0xff] %v11474_v37  ;;  %v6743_v7 = vld [vmem:[%s13415_s1 + $0x538] sm:$0xff] }
 0x304   : > { %3202 = vmatmul.f32.gmra.mxu0 %v5529_v60  ;;  %3231 = vmatmul.f32.gmra.mxu1 %v5530_v19  ;;  %v6744_v35 = vld [vmem:[%s13415_s1 + $0x638] sm:$0xff]  ;;  %v6745_v60 = vld [vmem:[%s13415_s1 + $0x6c0] sm:$0xff] }
 0x305   : > { %3260 = vmatmul.f32.gmra.mxu2 %v5531_v12  ;;  %3333 = vmatpush.msrb.mxu1 %v6742_v21  ;;  %v11480_v62 = vpop.f32.mrf.mxu0  ;;  %v11490_v12 = vpop.f32.mrf.mxu3  ;;  %v6746_v21 = vld [vmem:[%s13415_s1 + $0x5b0] sm:$0xff] }
 0x306   : > { %13649 = vst [vmem:[#allocation228_spill] sm:$0xff] %v11480_v62  ;;  %3304 = vmatpush.msrb.mxu0 %v6743_v7  ;;  %3362 = vmatpush.msrb.mxu2 %v6744_v35  ;;  %v11488_v19 = vpop.f32.mrf.mxu1  ;;  %v6747_v7 = vld [vmem:[%s13415_s1 + $0x530] sm:$0xff] }
 0x307   : > { %13650 = vst [vmem:[#allocation229_spill] sm:$0xff] %v11488_v19  ;;  %3390 = vmatpush.msrb.mxu3 %v6745_v60  ;;  %3334 = vmatpush.msrb.mxu1 %v6746_v21  ;;  %v6748_v35 = vld [vmem:[%s13415_s1 + $0x630] sm:$0xff]  ;;  %v6749_v60 = vld [vmem:[%s13415_s1 + $0x6b8] sm:$0xff]  ;;  %v6751_v21 = vld [vmem:[%s13415_s1 + $0x528] sm:$0xff] }
 0x308   : > { %13651 = vst [vmem:[#allocation230_spill] sm:$0xff] %v11490_v12  ;;  %3289 = vmatmul.f32.gmra.mxu3 %v5532_v0  ;;  %3305 = vmatpush.msrb.mxu0 %v6747_v7  ;;  %v6750_v0 = vld [vmem:[%s13415_s1 + $0x5a8] sm:$0xff]  ;;  %v5553_v62 = vld [vmem:[%s7239_s26 + $0xa90] sm:$0x1] }
 0x309   : > { %3363 = vmatpush.msrb.mxu2 %v6748_v35  ;;  %3391 = vmatpush.msrb.mxu3 %v6749_v60  ;;  %v6752_v7 = vld [vmem:[%s13415_s1 + $0x628] sm:$0xff]  ;;  %v6753_v35 = vld [vmem:[%s13415_s1 + $0x6b0] sm:$0xff]  ;;  %v5551_v60 = vld [vmem:[%s7239_s26 + $0xa80] sm:$0x1] }
 0x30a   : > { %3335 = vmatpush.msrb.mxu1 %v6750_v0  ;;  %3306 = vmatpush.msrb.mxu0 %v6751_v21  ;;  %v5552_v19 = vld [vmem:[%s7239_s26 + $0xa88] sm:$0x1]  ;;  %v6754_v0 = vld [vmem:[%s13415_s1 + $0x5a0] sm:$0xff] }
 0x30b   : > { %3364 = vmatpush.msrb.mxu2 %v6752_v7  ;;  %3392 = vmatpush.msrb.mxu3 %v6753_v35  ;;  %v6755_v21 = vld [vmem:[%s13415_s1 + $0x520] sm:$0xff]  ;;  %v6757_v12 = vld [vmem:[%s13415_s1 + $0x6a8] sm:$0xff] }
 0x30c   : > { %3336 = vmatpush.msrb.mxu1 %v6754_v0  ;;  %3307 = vmatpush.msrb.mxu0 %v6755_v21  ;;  %v11528_v7 = vpop.f32.mrf.mxu2  ;;  %v6756_v35 = vld [vmem:[%s13415_s1 + $0x620] sm:$0xff]  ;;  %v6758_v0 = vld [vmem:[%s13415_s1 + $0x598] sm:$0xff] }
 0x30d   : > { %13652 = vst [vmem:[#allocation231_spill] sm:$0xff] %v11528_v7  ;;  %3365 = vmatpush.msrb.mxu2 %v6756_v35  ;;  %3393 = vmatpush.msrb.mxu3 %v6757_v12  ;;  %v5554_v21 = vld [vmem:[%s7239_s26 + $0xa98] sm:$0x1]  ;;  %v6761_v12 = vld [vmem:[%s13415_s1 + $0x6a0] sm:$0xff] }
 0x30e   : > { %3205 = vmatmul.f32.gmra.mxu0 %v5551_v60  ;;  %3234 = vmatmul.f32.gmra.mxu1 %v5552_v19  ;;  %v6759_v35 = vld [vmem:[%s13415_s1 + $0x518] sm:$0xff]  ;;  %v6762_v60 = vld [vmem:[%s13415_s1 + $0x590] sm:$0xff] }
 0x30f   : > { %3263 = vmatmul.f32.gmra.mxu2 %v5553_v62  ;;  %3337 = vmatpush.msrb.mxu1 %v6758_v0  ;;  %v11540_v7 = vpop.f32.mrf.mxu0  ;;  %v11542_v37 = vpop.f32.mrf.mxu1  ;;  %v6760_v19 = vld [vmem:[%s13415_s1 + $0x618] sm:$0xff]  ;;  %v6763_v0 = vld [vmem:[%s13415_s1 + $0x510] sm:$0xff] }
 0x310   : > { %13653 = vst [vmem:[#allocation232_spill] sm:$0xff] %v11540_v7  ;;  %3308 = vmatpush.msrb.mxu0 %v6759_v35  ;;  %3366 = vmatpush.msrb.mxu2 %v6760_v19  ;;  %v11550_v62 = vpop.f32.mrf.mxu3  ;;  %v6764_v35 = vld [vmem:[%s13415_s1 + $0x610] sm:$0xff]  ;;  %v6765_v19 = vld [vmem:[%s13415_s1 + $0x698] sm:$0xff]  ;;  %v6772_v7 = vld [vmem:[%s13415_s1 + $0x600] sm:$0xff] }
 0x311   : > { %13654 = vst [vmem:[#allocation233_spill] sm:$0xff] %v11542_v37  ;;  %3394 = vmatpush.msrb.mxu3 %v6761_v12  ;;  %3338 = vmatpush.msrb.mxu1 %v6762_v60  ;;  %v6767_v12 = vld [vmem:[%s13415_s1 + $0x508] sm:$0xff]  ;;  %v5491_v37 = vld [vmem:[%s7239_s26 + $0x8a0] sm:$0xff] }
 0x312   : > { %13655 = vst [vmem:[#allocation234_spill] sm:$0xff] %v11550_v62  ;;  %3292 = vmatmul.f32.gmra.mxu3 %v5554_v21  ;;  %3309 = vmatpush.msrb.mxu0 %v6763_v0  ;;  %v6766_v21 = vld [vmem:[%s13415_s1 + $0x588] sm:$0xff]  ;;  %v6769_v0 = vld [vmem:[%s13415_s1 + $0x690] sm:$0xff] }
 0x313   : > { %3367 = vmatpush.msrb.mxu2 %v6764_v35  ;;  %3395 = vmatpush.msrb.mxu3 %v6765_v19  ;;  %v6768_v60 = vld [vmem:[%s13415_s1 + $0x608] sm:$0xff]  ;;  %v5489_v35 = vld [vmem:[%s7239_s26 + $0x890] sm:$0xff]  ;;  %v5490_v19 = vld [vmem:[%s7239_s26 + $0x898] sm:$0xff] }
 0x314   : > { %3339 = vmatpush.msrb.mxu1 %v6766_v21  ;;  %3310 = vmatpush.msrb.mxu0 %v6767_v12  ;;  %v6770_v21 = vld [vmem:[%s13415_s1 + $0x580] sm:$0xff] }
 0x315   : > { %3368 = vmatpush.msrb.mxu2 %v6768_v60  ;;  %3396 = vmatpush.msrb.mxu3 %v6769_v0  ;;  %v6771_v12 = vld [vmem:[%s13415_s1 + $0x500] sm:$0xff]  ;;  %v6773_v0 = vld [vmem:[%s13415_s1 + $0x688] sm:$0xff] }
 0x316   : > { %3340 = vmatpush.msrb.mxu1 %v6770_v21  ;;  %3311 = vmatpush.msrb.mxu0 %v6771_v12  ;;  %v11588_v60 = vpop.f32.mrf.mxu2  ;;  %v5492_v21 = vld [vmem:[%s7239_s26 + $0x8a8] sm:$0xff]  ;;  %v6774_v12 = vld [vmem:[%s13415_s1 + $0x7f8] sm:$0xff] }
 0x317   : > { %13656 = vst [vmem:[#allocation235_spill] sm:$0xff] %v11588_v60  ;;  %3369 = vmatpush.msrb.mxu2 %v6772_v7  ;;  %3397 = vmatpush.msrb.mxu3 %v6773_v0  ;;  %v6775_v7 = vld [vmem:[%s13415_s1 + $0x680] sm:$0xff]  ;;  %v6779_v0 = vld [vmem:[%s13415_s1 + $0x770] sm:$0xff] }
 0x318   : > { %3312 = vmatmul.f32.vlgmr.msrb.gmra.mxu0 %v5489_v35  ;;  %3341 = vmatmul.f32.vlgmr.msrb.gmra.mxu1 %v5490_v19  ;;  %v11597_v62 = vpop.f32.mrf.mxu0  ;;  %v11599_v23 = vpop.f32.mrf.mxu1  ;;  %v6776_v35 = vld [vmem:[%s13415_s1 + $0x778] sm:$0xff]  ;;  %v6778_v19 = vld [vmem:[%s13415_s1 + $0x7f0] sm:$0xff] }
 0x319   : > { %13657 = vst [vmem:[#allocation236_spill] sm:$0xff] %v11597_v62  ;;  %3370 = vmatmul.f32.vlgmr.msrb.gmra.mxu2 %v5491_v37  ;;  %3441 = vmatpush.msra.mxu1 %v6774_v12  ;;  %v11604_v60 = vpop.f32.mrf.mxu3  ;;  %v6777_v37 = vld [vmem:[%s13415_s1 + $0x878] sm:$0xff]  ;;  %v6780_v12 = vld [vmem:[%s13415_s1 + $0x870] sm:$0xff] }
 0x31a   : > { %13658 = vst [vmem:[#allocation237_spill] sm:$0xff] %v11599_v23  ;;  %3398 = vmatpush.msrb.mxu3 %v6775_v7  ;;  %3412 = vmatpush.msra.mxu0 %v6776_v35  ;;  %v6782_v7 = vld [vmem:[%s13415_s1 + $0x7e8] sm:$0xff] }
 0x31b   : > { %13659 = vst [vmem:[#allocation238_spill] sm:$0xff] %v11604_v60  ;;  %3470 = vmatpush.msra.mxu2 %v6777_v37  ;;  %3399 = vmatmul.f32.vlgmr.msrb.gmra.mxu3 %v5492_v21  ;;  %v6781_v21 = vld [vmem:[%s13415_s1 + $0x8f8] sm:$0xff]  ;;  %v6783_v35 = vld [vmem:[%s13415_s1 + $0x768] sm:$0xff] }
 0x31c   : > { %3442 = vmatpush.msra.mxu1 %v6778_v19  ;;  %3413 = vmatpush.msra.mxu0 %v6779_v0  ;;  %v6784_v37 = vld [vmem:[%s13415_s1 + $0x868] sm:$0xff]  ;;  %v6785_v19 = vld [vmem:[%s13415_s1 + $0x8f0] sm:$0xff]  ;;  %v5511_v0 = vld [vmem:[%s7239_s26 + $0x940] sm:$0xff] }
 0x31d   : > { %3471 = vmatpush.msra.mxu2 %v6780_v12  ;;  %3499 = vmatpush.msra.mxu3 %v6781_v21  ;;  %v5512_v12 = vld [vmem:[%s7239_s26 + $0x948] sm:$0xff]  ;;  %v6791_v60 = vld [vmem:[%s13415_s1 + $0x758] sm:$0xff] }
 0x31e   : > { %3443 = vmatpush.msra.mxu1 %v6782_v7  ;;  %3414 = vmatpush.msra.mxu0 %v6783_v35  ;;  %v6786_v7 = vld [vmem:[%s13415_s1 + $0x7e0] sm:$0xff] }
 0x31f   : > { %3472 = vmatpush.msra.mxu2 %v6784_v37  ;;  %3500 = vmatpush.msra.mxu3 %v6785_v19  ;;  %v11641_v21 = vpop.f32.mrf.mxu2  ;;  %v6787_v35 = vld [vmem:[%s13415_s1 + $0x760] sm:$0xff]  ;;  %v5513_v37 = vld [vmem:[%s7239_s26 + $0x950] sm:$0xff] }
 0x320   : > { %13660 = vst [vmem:[#allocation239_spill] sm:$0xff] %v11641_v21  ;;  %3444 = vmatpush.msra.mxu1 %v6786_v7  ;;  %3415 = vmatpush.msra.mxu0 %v6787_v35  ;;  %v6788_v19 = vld [vmem:[%s13415_s1 + $0x860] sm:$0xff]  ;;  %v6789_v21 = vld [vmem:[%s13415_s1 + $0x8e8] sm:$0xff]  ;;  %v6790_v35 = vld [vmem:[%s13415_s1 + $0x7d8] sm:$0xff] }
 0x321   : > { %3473 = vmatpush.msra.mxu2 %v6788_v19  ;;  %3501 = vmatpush.msra.mxu3 %v6789_v21  ;;  %v11656_v23 = vpop.f32.mrf.mxu3  ;;  %v11658_v7 = vpop.f32.mrf.mxu0  ;;  %v5514_v19 = vld [vmem:[%s7239_s26 + $0x958] sm:$0xff] }
 0x322   : > { %13661 = vst [vmem:[#allocation240_spill] sm:$0xff] %v11656_v23  ;;  %3315 = vmatmul.f32.gmra.mxu0 %v5511_v0  ;;  %3344 = vmatmul.f32.gmra.mxu1 %v5512_v12  ;;  %v11660_v62 = vpop.f32.mrf.mxu1  ;;  %v6792_v21 = vld [vmem:[%s13415_s1 + $0x858] sm:$0xff]  ;;  %v6793_v0 = vld [vmem:[%s13415_s1 + $0x8e0] sm:$0xff]  ;;  %v6794_v12 = vld [vmem:[%s13415_s1 + $0x7d0] sm:$0xff] }
 0x323   : > { %13662 = vst [vmem:[#allocation241_spill] sm:$0xff] %v11658_v7  ;;  %3373 = vmatmul.f32.gmra.mxu2 %v5513_v37  ;;  %3445 = vmatpush.msra.mxu1 %v6790_v35  ;;  %v6796_v37 = vld [vmem:[%s13415_s1 + $0x850] sm:$0xff]  ;;  %v6797_v35 = vld [vmem:[%s13415_s1 + $0x8d8] sm:$0xff]  ;;  %v5535_v23 = vld [vmem:[%s7239_s26 + $0xa00] sm:$0xff] }
 0x324   : > { %13663 = vst [vmem:[#allocation242_spill] sm:$0xff] %v11660_v62  ;;  %3416 = vmatpush.msra.mxu0 %v6791_v60  ;;  %3474 = vmatpush.msra.mxu2 %v6792_v21  ;;  %v6795_v60 = vld [vmem:[%s13415_s1 + $0x750] sm:$0xff]  ;;  %v6799_v21 = vld [vmem:[%s13415_s1 + $0x748] sm:$0xff] }
 0x325   : > { %3502 = vmatpush.msra.mxu3 %v6793_v0  ;;  %3446 = vmatpush.msra.mxu1 %v6794_v12  ;;  %v6800_v12 = vld [vmem:[%s13415_s1 + $0x848] sm:$0xff] }
 0x326   : > { %3402 = vmatmul.f32.gmra.mxu3 %v5514_v19  ;;  %3417 = vmatpush.msra.mxu0 %v6795_v60  ;;  %v6798_v19 = vld [vmem:[%s13415_s1 + $0x7c8] sm:$0xff]  ;;  %v6801_v60 = vld [vmem:[%s13415_s1 + $0x8d0] sm:$0xff] }
 0x327   : > { %3475 = vmatpush.msra.mxu2 %v6796_v37  ;;  %3503 = vmatpush.msra.mxu3 %v6797_v35  ;;  %v5533_v37 = vld [vmem:[%s7239_s26 + $0x9f0] sm:$0xff]  ;;  %v5534_v35 = vld [vmem:[%s7239_s26 + $0x9f8] sm:$0xff]  ;;  %v6805_v62 = vld [vmem:[%s13415_s1 + $0x8c8] sm:$0xff] }
 0x328   : > { %3447 = vmatpush.msra.mxu1 %v6798_v19  ;;  %3418 = vmatpush.msra.mxu0 %v6799_v21  ;;  %v11693_v0 = vpop.f32.mrf.mxu2  ;;  %v6802_v19 = vld [vmem:[%s13415_s1 + $0x7c0] sm:$0xff] }
 0x329   : > { %3476 = vmatpush.msra.mxu2 %v6800_v12  ;;  %3504 = vmatpush.msra.mxu3 %v6801_v60  ;;  %v6803_v21 = vld [vmem:[%s13415_s1 + $0x740] sm:$0xff] }
 0x32a   : > { %3448 = vmatpush.msra.mxu1 %v6802_v19  ;;  %3419 = vmatpush.msra.mxu0 %v6803_v21  ;;  %v11710_v12 = vpop.f32.mrf.mxu0  ;;  %v6804_v60 = vld [vmem:[%s13415_s1 + $0x840] sm:$0xff]  ;;  %v11720_v7 = vpop.f32.mrf.mxu3  ;;  %v6806_v21 = vld [vmem:[%s13415_s1 + $0x7b8] sm:$0xff] }
 0x32b   : > { %13664 = vst [vmem:[#allocation243_spill] sm:$0xff] %v11710_v12  ;;  %3477 = vmatpush.msra.mxu2 %v6804_v60  ;;  %3505 = vmatpush.msra.mxu3 %v6805_v62  ;;  %v11718_v19 = vpop.f32.mrf.mxu1  ;;  %v5536_v12 = vld [vmem:[%s7239_s26 + $0xa08] sm:$0xff]  ;;  %v6807_v60 = vld [vmem:[%s13415_s1 + $0x738] sm:$0xff] }
 0x32c   : > { %13665 = vst [vmem:[#allocation244_spill] sm:$0xff] %v11718_v19  ;;  %3318 = vmatmul.f32.gmra.mxu0 %v5533_v37  ;;  %3347 = vmatmul.f32.gmra.mxu1 %v5534_v35  ;;  %v6808_v62 = vld [vmem:[%s13415_s1 + $0x838] sm:$0xff]  ;;  %v6810_v37 = vld [vmem:[%s13415_s1 + $0x7b0] sm:$0xff] }
 0x32d   : > { %3376 = vmatmul.f32.gmra.mxu2 %v5535_v23  ;;  %3449 = vmatpush.msra.mxu1 %v6806_v21  ;;  %v6809_v23 = vld [vmem:[%s13415_s1 + $0x8c0] sm:$0xff]  ;;  %v6811_v35 = vld [vmem:[%s13415_s1 + $0x730] sm:$0xff] }
 0x32e   : > { %3420 = vmatpush.msra.mxu0 %v6807_v60  ;;  %3478 = vmatpush.msra.mxu2 %v6808_v62  ;;  %v6812_v21 = vld [vmem:[%s13415_s1 + $0x830] sm:$0xff]  ;;  %v6813_v60 = vld [vmem:[%s13415_s1 + $0x8b8] sm:$0xff] }
 0x32f   : > { %3506 = vmatpush.msra.mxu3 %v6809_v23  ;;  %3450 = vmatpush.msra.mxu1 %v6810_v37  ;;  %v6815_v23 = vld [vmem:[%s13415_s1 + $0x728] sm:$0xff]  ;;  %v5557_v19 = vld [vmem:[%s7239_s26 + $0xab0] sm:$0x1] }
 0x330   : > { %3405 = vmatmul.f32.gmra.mxu3 %v5536_v12  ;;  %3421 = vmatpush.msra.mxu0 %v6811_v35  ;;  %v6814_v12 = vld [vmem:[%s13415_s1 + $0x7a8] sm:$0xff]  ;;  %v6817_v35 = vld [vmem:[%s13415_s1 + $0x8b0] sm:$0xff] }
 0x331   : > { %3479 = vmatpush.msra.mxu2 %v6812_v21  ;;  %3507 = vmatpush.msra.mxu3 %v6813_v60  ;;  %v11747_v62 = vpop.f32.mrf.mxu2  ;;  %v6816_v37 = vld [vmem:[%s13415_s1 + $0x828] sm:$0xff]  ;;  %v5555_v21 = vld [vmem:[%s7239_s26 + $0xaa0] sm:$0x1] }
 0x332   : > { %3451 = vmatpush.msra.mxu1 %v6814_v12  ;;  %3422 = vmatpush.msra.mxu0 %v6815_v23  ;;  %v5556_v60 = vld [vmem:[%s7239_s26 + $0xaa8] sm:$0x1]  ;;  %v6818_v12 = vld [vmem:[%s13415_s1 + $0x7a0] sm:$0xff] }
 0x333   : > { %3480 = vmatpush.msra.mxu2 %v6816_v37  ;;  %3508 = vmatpush.msra.mxu3 %v6817_v35  ;;  %v6819_v23 = vld [vmem:[%s13415_s1 + $0x720] sm:$0xff] }
 0x334   : > { %3452 = vmatpush.msra.mxu1 %v6818_v12  ;;  %3423 = vmatpush.msra.mxu0 %v6819_v23  ;;  %v11770_v37 = vpop.f32.mrf.mxu0  ;;  %v11772_v61 = vpop.f32.mrf.mxu1  ;;  %v6820_v35 = vld [vmem:[%s13415_s1 + $0x820] sm:$0xff]  ;;  %v6821_v12 = vld [vmem:[%s13415_s1 + $0x8a8] sm:$0xff]  ;;  %v6822_v23 = vld [vmem:[%s13415_s1 + $0x798] sm:$0xff] }
 0x335   : > { %13666 = vst [vmem:[#allocation245_spill] sm:$0xff] %v11770_v37  ;;  %3481 = vmatpush.msra.mxu2 %v6820_v35  ;;  %3509 = vmatpush.msra.mxu3 %v6821_v12  ;;  %v11780_v43 = vpop.f32.mrf.mxu3  ;;  %v6823_v35 = vld [vmem:[%s13415_s1 + $0x718] sm:$0xff] }
 0x336   : > { %13667 = vst [vmem:[#allocation246_spill] sm:$0xff] %v11772_v61  ;;  %3321 = vmatmul.f32.gmra.mxu0 %v5555_v21  ;;  %3350 = vmatmul.f32.gmra.mxu1 %v5556_v60  ;;  %v5558_v61 = vld [vmem:[%s7239_s26 + $0xab8] sm:$0x1]  ;;  %v6826_v21 = vld [vmem:[%s13415_s1 + $0x790] sm:$0xff] }
 0x337   : > { %3379 = vmatmul.f32.gmra.mxu2 %v5557_v19  ;;  %3453 = vmatpush.msra.mxu1 %v6822_v23  ;;  %v6824_v12 = vld [vmem:[%s13415_s1 + $0x818] sm:$0xff]  ;;  %v6825_v19 = vld [vmem:[%s13415_s1 + $0x8a0] sm:$0xff]  ;;  %v6827_v60 = vld [vmem:[%s13415_s1 + $0x710] sm:$0xff] }
 0x338   : > { %3424 = vmatpush.msra.mxu0 %v6823_v35  ;;  %3482 = vmatpush.msra.mxu2 %v6824_v12  ;;  %v6828_v23 = vld [vmem:[%s13415_s1 + $0x810] sm:$0xff]  ;;  %v6829_v35 = vld [vmem:[%s13415_s1 + $0x898] sm:$0xff] }
 0x339   : > { %3510 = vmatpush.msra.mxu3 %v6825_v19  ;;  %3454 = vmatpush.msra.mxu1 %v6826_v21  ;;  %v6831_v19 = vld [vmem:[%s13415_s1 + $0x708] sm:$0xff] }
 0x33a   : > { %3408 = vmatmul.f32.gmra.mxu3 %v5558_v61  ;;  %3425 = vmatpush.msra.mxu0 %v6827_v60  ;;  %v6830_v61 = vld [vmem:[%s13415_s1 + $0x788] sm:$0xff]  ;;  %v6833_v60 = vld [vmem:[%s13415_s1 + $0x890] sm:$0xff] }
 0x33b   : > { %3483 = vmatpush.msra.mxu2 %v6828_v23  ;;  %3511 = vmatpush.msra.mxu3 %v6829_v35  ;;  %v11807_v12 = vpop.f32.mrf.mxu2  ;;  %v6832_v21 = vld [vmem:[%s13415_s1 + $0x808] sm:$0xff]  ;;  %v5493_v23 = vld [vmem:[%s7239_s26 + $0x8b0] sm:$0xff]  ;;  %v5494_v35 = vld [vmem:[%s7239_s26 + $0x8b8] sm:$0xff] }
 0x33c   : > { %3455 = vmatpush.msra.mxu1 %v6830_v61  ;;  %3426 = vmatpush.msra.mxu0 %v6831_v19  ;;  %v6834_v19 = vld [vmem:[%s13415_s1 + $0x780] sm:$0xff] }
 0x33d   : > { %3484 = vmatpush.msra.mxu2 %v6832_v21  ;;  %3512 = vmatpush.msra.mxu3 %v6833_v60  ;;  %v11823_v37 = vpop.f32.mrf.mxu0  ;;  %v11825_v61 = vpop.f32.mrf.mxu1  ;;  %v6835_v21 = vld [vmem:[%s13415_s1 + $0x700] sm:$0xff] }
 0x33e   : > { %13668 = vst [vmem:[#allocation247_spill] sm:$0xff] %v11823_v37  ;;  %3456 = vmatpush.msra.mxu1 %v6834_v19  ;;  %3427 = vmatpush.msra.mxu0 %v6835_v21  ;;  %v11834_v33 = vpop.f32.mrf.mxu3  ;;  %v6836_v60 = vld [vmem:[%s13415_s1 + $0x800] sm:$0xff]  ;;  %v5496_v19 = vld [vmem:[%s7239_s26 + $0x8c8] sm:$0xff]  ;;  %v6838_v21 = vld [vmem:[%s13415_s1 + $0x9f8] sm:$0xff] }
 0x33f   : > { %13669 = vst [vmem:[#allocation248_spill] sm:$0xff] %v11825_v61  ;;  %3485 = vmatpush.msra.mxu2 %v6836_v60  ;;  %v6837_v61 = vld [vmem:[%s13415_s1 + $0x888] sm:$0xff]  ;;  %3428 = vmatmul.f32.vlgmr.msra.gmra.mxu0 %v5493_v23  ;;  %v6839_v37 = vld [vmem:[%s13415_s1 + $0x880] sm:$0xff]  ;;  %v6840_v60 = vld [vmem:[%s13415_s1 + $0x978] sm:$0xff] }
 0x340   : > { %3513 = vmatpush.msra.mxu3 %v6837_v61  ;;  %3457 = vmatmul.f32.vlgmr.msra.gmra.mxu1 %v5494_v35  ;;  %v6842_v23 = vld [vmem:[%s13415_s1 + $0x970] sm:$0xff]  ;;  %v6844_v61 = vld [vmem:[%s13415_s1 + $0x9e8] sm:$0xff] }
 0x341   : > { %3486 = vmatmul.f32.vlgmr.msra.gmra.mxu2 %v5495_v47  ;;  %3557 = vmatpush.msrb.mxu1 %v6838_v21  ;;  %v6841_v47 = vld [vmem:[%s13415_s1 + $0x9f0] sm:$0xff]  ;;  %v11873_v21 = vld [vmem:[%s13415_s1 + $0xa88] sm:$0xff] }
 0x342   : > { %3514 = vmatpush.msra.mxu3 %v6839_v37  ;;  %3528 = vmatpush.msrb.mxu0 %v6840_v60  ;;  %v11861_v37 = vld [vmem:[%s13415_s1 + $0xa78] sm:$0xff]  ;;  %v6846_v60 = vld [vmem:[%s13415_s1 + $0x968] sm:$0xff] }
 0x343   : > { %3515 = vmatmul.f32.vlgmr.msra.gmra.mxu3 %v5496_v19  ;;  %3558 = vmatpush.msrb.mxu1 %v6841_v47  ;;  %v5516_v19 = vld [vmem:[%s7239_s26 + $0x968] sm:$0xff]  ;;  %v5515_v47 = vld [vmem:[%s7239_s26 + $0x960] sm:$0xff] }
 0x344   : > { %3529 = vmatpush.msrb.mxu0 %v6842_v23  ;;  %5816 = vmatpush.msrb.mxu2 %v11861_v37  ;;  %v11864_v35 = vpop.f32.mrf.mxu2  ;;  %v5517_v23 = vld [vmem:[%s7239_s26 + $0x970] sm:$0xff] }
 0x345   : > { %3559 = vmatpush.msrb.mxu1 %v6844_v61  ;;  %5832 = vmatpush.msrb.mxu3 %v11873_v21  ;;  %v11884_v61 = vld [vmem:[%s13415_s1 + $0xa70] sm:$0xff] }
 0x346   : > { %3530 = vmatpush.msrb.mxu0 %v6846_v60  ;;  %5817 = vmatpush.msrb.mxu2 %v11884_v61  ;;  %v11887_v58 = vpop.f32.mrf.mxu3  ;;  %v11889_v52 = vpop.f32.mrf.mxu0  ;;  %v11899_v60 = vld [vmem:[%s13415_s1 + $0xa80] sm:$0xff] }
 0x347   : > { %3560 = vmatpush.msrb.mxu1 %v6848_v14  ;;  %v11894_v50 = vpop.f32.mrf.mxu1  ;;  %5833 = vmatpush.msrb.mxu3 %v11899_v60  ;;  %v6851_v14 = vld [vmem:[%s13415_s1 + $0x9d8] sm:$0xff] }
 0x348   : > { %3531 = vmatpush.msrb.mxu0 %v6850_v26  ;;  %3460 = vmatmul.f32.gmra.mxu1 %v5516_v19  ;;  %v11915_v26 = vld [vmem:[%s13415_s1 + $0xa68] sm:$0xff]  ;;  %v6854_v19 = vld [vmem:[%s13415_s1 + $0x9d0] sm:$0xff] }
 0x349   : > { %3431 = vmatmul.f32.gmra.mxu0 %v5515_v47  ;;  %3489 = vmatmul.f32.gmra.mxu2 %v5517_v23  ;;  %v6855_v47 = vld [vmem:[%s13415_s1 + $0x950] sm:$0xff]  ;;  %v6857_v23 = vld [vmem:[%s13415_s1 + $0x9c8] sm:$0xff] }
 0x34a   : > { %3561 = vmatpush.msrb.mxu1 %v6851_v14  ;;  %3532 = vmatpush.msrb.mxu0 %v6852_v30  ;;  %v6858_v14 = vld [vmem:[%s13415_s1 + $0x948] sm:$0xff] }
 0x34b   : > { %3518 = vmatmul.f32.gmra.mxu3 %v5518_v40  ;;  %5818 = vmatpush.msrb.mxu2 %v11915_v26  ;;  %v11927_v40 = vld [vmem:[%s13415_s1 + $0xa60] sm:$0xff] }
 0x34c   : > { %3562 = vmatpush.msrb.mxu1 %v6854_v19  ;;  %3533 = vmatpush.msrb.mxu0 %v6855_v47  ;;  %v5537_v19 = vld [vmem:[%s7239_s26 + $0xa10] sm:$0xff]  ;;  %v5538_v47 = vld [vmem:[%s7239_s26 + $0xa18] sm:$0xff] }
 0x34d   : > { %5819 = vmatpush.msrb.mxu2 %v11927_v40  ;;  %v11930_v30 = vpop.f32.mrf.mxu2 }
 0x34e   : > { %13670 = vst [vmem:[#allocation249_spill] sm:$0xff] %v11930_v30  ;;  %3563 = vmatpush.msrb.mxu1 %v6857_v23  ;;  %3534 = vmatpush.msrb.mxu0 %v6858_v14  ;;  %v6860_v23 = vld [vmem:[%s13415_s1 + $0x9c0] sm:$0xff] }
 0x34f   : > { %5820 = vmatpush.msrb.mxu2 %v11943_v59  ;;  %v11947_v15 = vpop.f32.mrf.mxu0  ;;  %v6861_v14 = vld [vmem:[%s13415_s1 + $0x940] sm:$0xff]  ;;  %v11957_v18 = vpop.f32.mrf.mxu3 }
 0x350   : > { %3564 = vmatpush.msrb.mxu1 %v6860_v23  ;;  %3535 = vmatpush.msrb.mxu0 %v6861_v14  ;;  %v11955_v39 = vpop.f32.mrf.mxu1  ;;  %13671 = vst [vmem:[#allocation250_spill] sm:$0xff] %v11957_v18  ;;  %v6863_v23 = vld [vmem:[%s13415_s1 + $0x938] sm:$0xff]  ;;  %v11969_v14 = vld [vmem:[%s13415_s1 + $0xa50] sm:$0xff] }
 0x351   : > { %3434 = vmatmul.f32.gmra.mxu0 %v5537_v19  ;;  %3463 = vmatmul.f32.gmra.mxu1 %v5538_v47  ;;  %v11981_v19 = vld [vmem:[%s13415_s1 + $0xa48] sm:$0xff] }
 0x352   : > { %3492 = vmatmul.f32.gmra.mxu2 %v5539_v41  ;;  %3565 = vmatpush.msrb.mxu1 %v6862_v16  ;;  %v6865_v41 = vld [vmem:[%s13415_s1 + $0x9b0] sm:$0xff] }
 0x353   : > { %3536 = vmatpush.msrb.mxu0 %v6863_v23  ;;  %5821 = vmatpush.msrb.mxu2 %v11969_v14  ;;  %v6866_v16 = vld [vmem:[%s13415_s1 + $0x930] sm:$0xff]  ;;  %v6869_v23 = vld [vmem:[%s13415_s1 + $0x928] sm:$0xff] }
 0x354   : > { %3521 = vmatmul.f32.gmra.mxu3 %v5540_v27  ;;  %3566 = vmatpush.msrb.mxu1 %v6865_v41  ;;  %v6868_v27 = vld [vmem:[%s13415_s1 + $0x9a8] sm:$0xff]  ;;  %v11995_v41 = vld [vmem:[%s13415_s1 + $0xa40] sm:$0xff] }
 0x355   : > { %3537 = vmatpush.msrb.mxu0 %v6866_v16  ;;  %5822 = vmatpush.msrb.mxu2 %v11981_v19  ;;  %v5559_v16 = vld [vmem:[%s7239_s26 + $0xac0] sm:$0x1] }
 0x356   : > { %3567 = vmatpush.msrb.mxu1 %v6868_v27  ;;  %v11987_v47 = vpop.f32.mrf.mxu2  ;;  %v6871_v27 = vld [vmem:[%s13415_s1 + $0x9a0] sm:$0xff] }
 0x357   : > { %3538 = vmatpush.msrb.mxu0 %v6869_v23  ;;  %5823 = vmatpush.msrb.mxu2 %v11995_v41  ;;  %v12010_v23 = vld [vmem:[%s13415_s1 + $0xa38] sm:$0xff] }
 0x358   : > { %3568 = vmatpush.msrb.mxu1 %v6871_v27 }
 0x359   : > { %3539 = vmatpush.msrb.mxu0 %v6872_v48  ;;  %5824 = vmatpush.msrb.mxu2 %v12010_v23  ;;  %v12013_v20 = vpop.f32.mrf.mxu0  ;;  %v12016_v24 = vpop.f32.mrf.mxu1  ;;  %v6874_v48 = vld [vmem:[%s13415_s1 + $0x998] sm:$0xff] }
 0x35a   : > { %3437 = vmatmul.f32.gmra.mxu0 %v5559_v16  ;;  %3466 = vmatmul.f32.gmra.mxu1 %v5560_v8  ;;  %v12018_v27 = vpop.f32.mrf.mxu3  ;;  %v12029_v8 = vld [vmem:[%s13415_s1 + $0xa30] sm:$0xff] }
 0x35b   : > { %3495 = vmatmul.f32.gmra.mxu2 %v5561_v51  ;;  %3569 = vmatpush.msrb.mxu1 %v6874_v48  ;;  %v6877_v51 = vld [vmem:[%s13415_s1 + $0x990] sm:$0xff]  ;;  %v6881_v48 = vld [vmem:[%s13415_s1 + $0x908] sm:$0xff] }
 0x35c   : > { %3540 = vmatpush.msrb.mxu0 %v6875_v55  ;;  %5825 = vmatpush.msrb.mxu2 %v12029_v8  ;;  %v6878_v16 = vld [vmem:[%s13415_s1 + $0x910] sm:$0xff]  ;;  %v12041_v55 = vld [vmem:[%s13415_s1 + $0xa28] sm:$0xff] }
 0x35d   : > { %3524 = vmatmul.f32.gmra.mxu3 %v5562_v11  ;;  %3570 = vmatpush.msrb.mxu1 %v6877_v51  ;;  %v6880_v11 = vld [vmem:[%s13415_s1 + $0x988] sm:$0xff]  ;;  %v12053_v51 = vld [vmem:[%s13415_s1 + $0xa20] sm:$0xff] }
 0x35e   : > { %3541 = vmatpush.msrb.mxu0 %v6878_v16  ;;  %5826 = vmatpush.msrb.mxu2 %v12041_v55  ;;  %v5497_v16 = vld [vmem:[%s7239_s26 + $0x8d0] sm:$0xff] }
 0x35f   : > { %3571 = vmatpush.msrb.mxu1 %v6880_v11  ;;  %v6883_v11 = vld [vmem:[%s13415_s1 + $0x980] sm:$0xff] }
 0x360   : > { %3542 = vmatpush.msrb.mxu0 %v6881_v48  ;;  %5827 = vmatpush.msrb.mxu2 %v12053_v51  ;;  %v12058_v54 = vpop.f32.mrf.mxu2  ;;  %v6884_v48 = vld [vmem:[%s13415_s1 + $0x900] sm:$0xff] }
 0x361   : > { %3572 = vmatpush.msrb.mxu1 %v6883_v11  ;;  %v6886_v11 = vld [vmem:[%s13415_s1 + $0xa10] sm:$0xff] }
 0x362   : > { %3543 = vmatpush.msrb.mxu0 %v6884_v48  ;;  %5828 = vmatpush.msrb.mxu2 %v6885_v5 }
 0x363   : > { %3544 = vmatmul.f32.vlgmr.msrb.gmra.mxu0 %v5497_v16  ;;  %3573 = vmatmul.f32.vlgmr.msrb.gmra.mxu1 %v5498_v10  ;;  %v12070_v29 = vpop.f32.mrf.mxu0  ;;  %v12076_v48 = vpop.f32.mrf.mxu1  ;;  %v6887_v10 = vld [vmem:[%s13415_s1 + $0xa08] sm:$0xff]  ;;  %v6888_v16 = vld [vmem:[%s13415_s1 + $0xa00] sm:$0xff] }
 0x364   : > { %3586 = vmatpush.msra.mxu1 %v11861_v37  ;;  %5829 = vmatpush.msrb.mxu2 %v6886_v11  ;;  %v12078_v49 = vpop.f32.mrf.mxu3  ;;  %v5521_v37 = vld [vmem:[%s7239_s26 + $0x990] sm:$0xff] }
 0x365   : > { %3629 = vmatpush.msra.mxu0 %v11873_v21  ;;  %5568 = vmatmul.msk.f32.vlgmr.msrb.gmra.mxu3 %vm760_vm0, %v5522_v25  ;;  %v5519_v21 = vld [vmem:[%s7239_s26 + $0x980] sm:$0xff]  ;;  %v5520_v25 = vld [vmem:[%s7239_s26 + $0x988] sm:$0xff] }
 0x366   : > { %3587 = vmatpush.msra.mxu1 %v11884_v61  ;;  %5830 = vmatpush.msrb.mxu2 %v6887_v10  ;;  %v5544_v61 = vld [vmem:[%s7239_s26 + $0xa48] sm:$0xff] }
 0x367   : > { %3630 = vmatpush.msra.mxu0 %v11899_v60 }
 0x368   : > { %3588 = vmatpush.msra.mxu1 %v11915_v26  ;;  %5831 = vmatpush.msrb.mxu2 %v6888_v16  ;;  %v5543_v26 = vld [vmem:[%s7239_s26 + $0xa40] sm:$0xff] }
 0x369   : > { %3605 = vmatmul.f32.vlgmr.msrb.gmra.mxu2 %v5521_v37 }
 0x36a   : > { %3589 = vmatpush.msra.mxu1 %v11927_v40  ;;  %v12096_v18 = vpop.f32.mrf.mxu2  ;;  %v5541_v40 = vld [vmem:[%s7239_s26 + $0xa30] sm:$0xff] }
 0x36b   : > { %3547 = vmatmul.f32.gmra.mxu0 %v5519_v21  ;;  %3576 = vmatmul.f32.gmra.mxu1 %v5520_v25  ;;  %v5542_v21 = vld [vmem:[%s7239_s26 + $0xa38] sm:$0xff]  ;;  %v5565_v25 = vld [vmem:[%s7239_s26 + $0xaf0] sm:$0x1] }
 0x36c   : > { %3590 = vmatpush.msra.mxu1 %v11943_v59  ;;  %v5566_v59 = vld [vmem:[%s7239_s26 + $0xaf8] sm:$0x1] }
 0x36d   : > { %5569 = vmatmul.msk.f32.gmra.mxu3 %vm760_vm0, %v5544_v61  ;;  %v12100_v60 = vpop.f32.mrf.mxu0  ;;  %v12104_v2 = vpop.f32.mrf.mxu3  ;;  %v5563_v61 = vld [vmem:[%s7239_s26 + $0xae0] sm:$0x1] }
 0x36e   : > { %13672 = vst [vmem:[#allocation251_spill] sm:$0xff] %v12100_v60  ;;  %3591 = vmatpush.msra.mxu1 %v11969_v14  ;;  %v12106_v37 = vpop.f32.mrf.mxu1 }
 0x36f   : > { %13673 = vst [vmem:[#allocation252_spill] sm:$0xff] %v12106_v37 }
 0x370   : > { %3592 = vmatpush.msra.mxu1 %v11981_v19 }
 0x371   : > { %3608 = vmatmul.f32.gmra.mxu2 %v5543_v26 }
 0x372   : > { %3593 = vmatpush.msra.mxu1 %v11995_v41  ;;  %v5564_v41 = vld [vmem:[%s7239_s26 + $0xae8] sm:$0x1] }
 0x373   : > { %3550 = vmatmul.f32.gmra.mxu0 %v5541_v40  ;;  %3579 = vmatmul.f32.gmra.mxu1 %v5542_v21  ;;  %v5500_v21 = vld [vmem:[%s7239_s26 + $0x8e8] sm:$0xff] }
 0x374   : > { %3594 = vmatpush.msra.mxu1 %v12010_v23  ;;  %v12114_v14 = vpop.f32.mrf.mxu2 }
 0x375   : > { %13674 = vst [vmem:[#allocation253_spill] sm:$0xff] %v12114_v14  ;;  %5570 = vmatmul.msk.f32.gmra.mxu3 %vm760_vm0, %v5566_v59 }
 0x376   : > { %3595 = vmatpush.msra.mxu1 %v12029_v8  ;;  %v12126_v40 = vpop.f32.mrf.mxu3  ;;  %v5499_v8 = vld [vmem:[%s7239_s26 + $0x8e0] sm:$0xff]  ;;  %s6910_s26 = scalar_lea.hbm %s13423_s9, 2 }
 0x377   : > { %v12119_v19 = vpop.f32.mrf.mxu0  ;;  %v12124_v26 = vpop.f32.mrf.mxu1  ;;  %13675 = vst [vmem:[#allocation254_spill] sm:$0xff] %v12126_v40  ;;  %p6912_p1 = scmp.lt.s32.totalorder %s6910_s26, %s6906_s23 }
 0x378   : > { %3596 = vmatpush.msra.mxu1 %v12041_v55 }
 0x379   : > { %3611 = vmatmul.f32.gmra.mxu2 %v5565_v25  ;;  %p6913_p2 = por %p6912_p1, %p6911_p0 }
 0x37a   : > { %3597 = vmatpush.msra.mxu1 %v12053_v51  ;;  %v12137_v51 = vld [vmem:[%s13416_s2] ss:$0 sm:$0xff] }
 0x37b   : > { %3553 = vmatmul.f32.gmra.mxu0 %v5563_v61  ;;  %3582 = vmatmul.f32.gmra.mxu1 %v5564_v41  ;;  %p6914_p3 = pnand %p6913_p2, %p6909_p13 }
 0x37c   : > { %3598 = vmatpush.msra.mxu1 %v6885_v5  ;;  %v3030_v5 = vadd.f32 %v12137_v51, %v11807_v12 }
 0x37e   : > { %3599 = vmatpush.msra.mxu1 %v6886_v11  ;;  %v12129_v23 = vpop.f32.mrf.mxu2  ;;  %v3059_v61 = vadd.f32 %v11834_v33, %v3030_v5  ;;  %v3027_v33 = vadd.f32 %v12137_v51, %v11747_v62 }
 0x380   : > { %3600 = vmatpush.msra.mxu1 %v6887_v10  ;;  %v3088_v41 = vadd.f32 %v12013_v20, %v3059_v61  ;;  %v3056_v61 = vadd.f32 %v11780_v43, %v3027_v33 }
 0x381   : > { %v3203_v59 = vpop.f32.mrf.mxu0  ;;  %v3232_v55 = vpop.f32.mrf.mxu1 }
 0x382   : > { %3601 = vmatpush.msra.mxu1 %v6888_v16  ;;  %v3287_v14 = vpop.f32.mrf.mxu3  ;;  %v3117_v6 = vadd.f32 %v12016_v24, %v3088_v41 }
 0x383   : > { %3602 = vmatmul.f32.vlgmr.msra.gmra.mxu1 %v5499_v8  ;;  %5567 = vmatmul.msk.f32.vlgmr.msra.gmra.mxu0 %vm760_vm0, %v5500_v21  ;;  %v3033_v8 = vadd.f32 %v12137_v51, %v11864_v35 }
 0x384   : > { %v3146_v46 = vadd.f32 %v12058_v54, %v3117_v6 }
 0x385   : > { %v3062_v12 = vadd.f32 %v11887_v58, %v3033_v8  ;;  %v3085_v58 = vadd.f32 %v11947_v15, %v3056_v61 }
 0x386   : > { %v3175_v35 = vadd.f32 %v12078_v49, %v3146_v46 }
 0x387   : > { %v3091_v5 = vadd.f32 %v12070_v29, %v3062_v12  ;;  %v3114_v49 = vadd.f32 %v11955_v39, %v3085_v58 }
 0x388   : > { %v3261_v40 = vpop.f32.mrf.mxu2 }
 0x389   : > { %v3143_v43 = vadd.f32 %v11987_v47, %v3114_v49 }
 0x38b   : > { %v3206_v11 = vpop.f32.mrf.mxu0  ;;  %v3235_v10 = vpop.f32.mrf.mxu1 }
 0x38c   : > { %v3290_v25 = vpop.f32.mrf.mxu3 }
 0x392   : > { %v3264_v16 = vpop.f32.mrf.mxu2 }
 0x395   : > { %v12145_v21 = vpop.f32.mrf.mxu0  ;;  %v3293_v37 = vpop.f32.mrf.mxu3 }
 0x396   : > { %13676 = vst [vmem:[#allocation255_spill] sm:$0xff] %v12145_v21  ;;  %v12147_v60 = vpop.f32.mrf.mxu1  ;;  %v3204_v21 = vadd.f32 %v3203_v59, %v3175_v35 }
 0x397   : > { %13677 = vst [vmem:[#allocation256_spill] sm:$0xff] %v12147_v60  ;;  %v3120_v60 = vadd.f32 %v12076_v48, %v3091_v5 }
 0x398   : > { %v3233_v54 = vadd.f32 %v3232_v55, %v3204_v21 }
 0x399   : > { %v3149_v6 = vadd.f32 %v12096_v18, %v3120_v60  ;;  %v3172_v18 = vadd.f32 %v12018_v27, %v3143_v43 }
 0x39a   : > { %v3262_v62 = vadd.f32 %v3261_v40, %v3233_v54 }
 0x39b   : > { %v3178_v29 = vadd.f32 %v12104_v2, %v3149_v6  ;;  %v3201_v15 = vadd.f32 %v12119_v19, %v3172_v18  ;;  %v1534_v19 = vadd.f32 %v12137_v51, %v9129_v57  ;;  %v3024_v57 = vadd.f32 %v12137_v51, %v11693_v0 }
 0x39c   : > { %v12155_v20 = vpop.f32.mrf.mxu2  ;;  %v3291_v59 = vadd.f32 %v3290_v25, %v3262_v62 }
 0x39d   : > { %v3207_v46 = vadd.f32 %v3206_v11, %v3178_v29  ;;  %v3230_v39 = vadd.f32 %v12124_v26, %v3201_v15 }
 0x39e   : > { %v12160_v41 = vpop.f32.mrf.mxu3 }
 0x39f   : > { %v3316_v30 = vpop.f32.mrf.mxu0  ;;  %v3345_v24 = vpop.f32.mrf.mxu1  ;;  %v3236_v35 = vadd.f32 %v3235_v10, %v3207_v46  ;;  %v3259_v6 = vadd.f32 %v12129_v23, %v3230_v39  ;;  %v791_v46 = vadd.f32 %v12137_v51, %v7923_v1  ;;  %v1563_v23 = vadd.f32 %v9156_v44, %v1534_v19  ;;  %v13685_v19 = vld [vmem:[#allocation182_spill] sm:$0xff] }
 0x3a1   : > { %v3265_v60 = vadd.f32 %v3264_v16, %v3236_v35  ;;  %v3288_v10 = vadd.f32 %v3287_v14, %v3259_v6  ;;  %v820_v14 = vadd.f32 %v7931_v4, %v791_v46  ;;  %v3053_v4 = vadd.f32 %v11720_v7, %v3024_v57  ;;  %v13686_v46 = vld [vmem:[#allocation251_spill] sm:$0xff] }
 0x3a3   : > { %v3294_v21 = vadd.f32 %v3293_v37, %v3265_v60  ;;  %v3317_v27 = vadd.f32 %v3316_v30, %v3288_v10  ;;  %v2281_v30 = vadd.f32 %v12137_v51, %v10467_v9 }
 0x3a5   : > { %v3346_v43 = vadd.f32 %v3345_v24, %v3317_v27  ;;  %v2310_v1 = vadd.f32 %v10477_v45, %v2281_v30  ;;  %v13687_v30 = vld [vmem:[#allocation192_spill] sm:$0xff] }
 0x3a6   : > { %v3374_v8 = vpop.f32.mrf.mxu2 }
 0x3a7   : > { %v2339_v9 = vadd.f32 %v10510_v53, %v2310_v1 }
 0x3a9   : > { %v3319_v12 = vpop.f32.mrf.mxu0  ;;  %v3348_v48 = vpop.f32.mrf.mxu1  ;;  %v2368_v45 = vadd.f32 %v10537_v32, %v2339_v9 }
 0x3aa   : > { %v3403_v33 = vpop.f32.mrf.mxu3  ;;  %v3320_v5 = vadd.f32 %v3319_v12, %v3291_v59  ;;  %v3375_v59 = vadd.f32 %v3374_v8, %v3346_v43 }
 0x3ab   : > { %v2397_v53 = vadd.f32 %v10707_v31, %v2368_v45  ;;  %v13678_v31 = vld [vmem:[#allocation249_spill] sm:$0xff]  ;;  %v5579_v45 = vld [vmem:[%s13417_s3 + $0x70] sm:$0xff] }
 0x3ac   : > { %v3349_v40 = vadd.f32 %v3348_v48, %v3320_v5  ;;  %v849_v48 = vadd.f32 %v7961_v17, %v820_v14  ;;  %v1592_v5 = vadd.f32 %v9314_v13, %v1563_v23  ;;  %v3404_v35 = vadd.f32 %v3403_v33, %v3375_v59  ;;  %3740 = vmatpush.msra.mxu2 %v5579_v45 }
 0x3ad   : > { %v3082_v33 = vadd.f32 %v11889_v52, %v3053_v4  ;;  %v2426_v39 = vadd.f32 %v10718_v36, %v2397_v53  ;;  %v13684_v36 = vld [vmem:[#allocation105_spill] sm:$0xff] }
 0x3ae   : > { %v878_v0 = vadd.f32 %v7991_v28, %v849_v48  ;;  %v1621_v60 = vadd.f32 %v9321_v22, %v1592_v5  ;;  %v13688_v48 = vld [vmem:[#allocation31_spill] sm:$0xff]  ;;  %v13692_v4 = vld [vmem:[#allocation5_spill] sm:$0xff] }
 0x3af   : > { %v5577_v53 = vld [vmem:[%s13417_s3 + $0x60] sm:$0xff] }
 0x3b0   : > { %v3377_v55 = vpop.f32.mrf.mxu2  ;;  %v907_v17 = vadd.f32 %v8149_v34, %v878_v0  ;;  %v1650_v13 = vadd.f32 %v9351_v63, %v1621_v60  ;;  %v3111_v34 = vadd.f32 %v11894_v50, %v3082_v33  ;;  %v13682_v50 = vld [vmem:[#allocation250_spill] sm:$0xff]  ;;  %v794_v0 = vadd.f32 %v12137_v51, %v13692_v4  ;;  %v13693_v60 = vld [vmem:[#allocation32_spill] sm:$0xff]  ;;  %3741 = vmatpush.msra.mxu2 %v5577_v53 }
 0x3b1   : > { %v3378_v2 = vadd.f32 %v3377_v55, %v3349_v40  ;;  %v5578_v33 = vld [vmem:[%s13417_s3 + $0x68] sm:$0xff]  ;;  %v5576_v4 = vld [vmem:[%s13417_s3 + $0x58] sm:$0xff] }
 0x3b2   : > { %v936_v28 = vadd.f32 %v8157_v38, %v907_v17  ;;  %v1679_v22 = vadd.f32 %v9375_v42, %v1650_v13  ;;  %v13680_v38 = vld [vmem:[#allocation19_spill] sm:$0xff]  ;;  %v13681_v42 = vld [vmem:[#allocation104_spill] sm:$0xff] }
 0x3b3   : > { %v3322_v11 = vpop.f32.mrf.mxu0  ;;  %v3351_v47 = vpop.f32.mrf.mxu1 }
 0x3b4   : > { %v3323_v61 = vadd.f32 %v3322_v11, %v3294_v21  ;;  %v3406_v25 = vpop.f32.mrf.mxu3  ;;  %v965_v63 = vadd.f32 %v8192_v56, %v936_v28  ;;  %v1708_v32 = vadd.f32 %v9547_v3, %v1679_v22  ;;  %v3140_v11 = vadd.f32 %v13678_v31, %v3111_v34  ;;  %v5580_v56 = vld [vmem:[%s13417_s3 + $0x78] sm:$0xff]  ;;  %v13696_v28 = vld [vmem:[#allocation194_spill] sm:$0xff] }
 0x3b5   : > { %v3407_v58 = vadd.f32 %v3406_v25, %v3378_v2  ;;  %3760 = vmatpush.msra.mxu3 %v5580_v56 }
 0x3b6   : > { %v3352_v54 = vadd.f32 %v3351_v47, %v3323_v61  ;;  %v13679_v61 = vld [vmem:[#allocation179_spill] sm:$0xff]  ;;  %v994_v25 = vadd.f32 %v13680_v38, %v965_v63  ;;  %v1737_v6 = vadd.f32 %v13681_v42, %v1708_v32  ;;  %v3169_v3 = vadd.f32 %v13682_v50, %v3140_v11  ;;  %v13698_v32 = vld [vmem:[#allocation85_spill] sm:$0xff] }
 0x3b7   : > { %v2455_v47 = vadd.f32 %v13679_v61, %v2426_v39  ;;  %3761 = vmatpush.msra.mxu3 %v5578_v33  ;;  %v13699_v11 = vld [vmem:[#allocation195_spill] sm:$0xff]  ;;  %v13714_v33 = vld [vmem:[#allocation93_spill] sm:$0xff] }
 0x3b8   : > { %v3198_v43 = vadd.f32 %v13686_v46, %v3169_v3  ;;  %v13706_v46 = vld [vmem:[#allocation92_spill] sm:$0xff] }
 0x3b9   : > { %3762 = vmatpush.msra.mxu3 %v5576_v4 }
 0x3ba   : > { %v3380_v62 = vpop.f32.mrf.mxu2 }
 0x3bb   : > { %v3381_v16 = vadd.f32 %v3380_v62, %v3352_v54  ;;  %v13683_v54 = vld [vmem:[#allocation29_spill] sm:$0xff]  ;;  %v1766_v62 = vadd.f32 %v13684_v36, %v1737_v6  ;;  %v13701_v6 = vld [vmem:[#allocation120_spill] sm:$0xff] }
 0x3bc   : > { %v12173_v49 = vpop.f32.mrf.mxu0  ;;  %v1023_v10 = vadd.f32 %v13683_v54, %v994_v25  ;;  %v13700_v25 = vld [vmem:[#allocation6_spill] sm:$0xff]  ;;  %v13702_v54 = vld [vmem:[#allocation35_spill] sm:$0xff]  ;;  %v13703_v36 = vld [vmem:[#allocation168_spill] sm:$0xff] }
 0x3bd   : > { %v3409_v29 = vpop.f32.mrf.mxu3  ;;  %v12175_v26 = vpop.f32.mrf.mxu1  ;;  %v823_v42 = vadd.f32 %v13700_v25, %v794_v0  ;;  %v13712_v0 = vld [vmem:[#allocation208_spill] sm:$0xff]  ;;  %v13720_v25 = vld [vmem:[#allocation94_spill] sm:$0xff] }
 0x3be   : > { %v3410_v37 = vadd.f32 %v3409_v29, %v3381_v16  ;;  %v2484_v29 = vadd.f32 %v13685_v19, %v2455_v47  ;;  %v1052_v5 = vadd.f32 %v13688_v48, %v1023_v10  ;;  %v13705_v19 = vld [vmem:[#allocation7_spill] sm:$0xff]  ;;  %v13709_v48 = vld [vmem:[#allocation169_spill] sm:$0xff] }
 0x3c0   : > { %v2513_v14 = vadd.f32 %v13687_v30, %v2484_v29  ;;  %v1081_v17 = vadd.f32 %v13693_v60, %v1052_v5  ;;  %v852_v29 = vadd.f32 %v13705_v19, %v823_v42 }
 0x3c2   : > { %v2542_v22 = vadd.f32 %v13696_v28, %v2513_v14  ;;  %v1110_v10 = vadd.f32 %v13702_v54, %v1081_v17  ;;  %v13708_v14 = vld [vmem:[#allocation45_spill] sm:$0xff]  ;;  %v13716_v28 = vld [vmem:[#allocation47_spill] sm:$0xff] }
 0x3c3   : > { %v3661_v17 = vld [vmem:[%s13417_s3 + $0x20] sm:$0xff] }
 0x3c4   : > { %v12185_v12 = vpop.f32.mrf.mxu2  ;;  %v2571_v61 = vadd.f32 %v13699_v11, %v2542_v22  ;;  %v3660_v11 = vld [vmem:[%s13417_s3 + $0x18] sm:$0xff] }
 0x3c5   : > { %v3461_v44 = vpop.f32.mrf.mxu1 }
 0x3c6   : > { %v3432_v24 = vpop.f32.mrf.mxu0  ;;  %v12190_v18 = vpop.f32.mrf.mxu3 }
 0x3c7   : > { %v3433_v8 = vadd.f32 %v3432_v24, %v3404_v35  ;;  %v13689_v35 = vld [vmem:[#allocation82_spill] sm:$0xff]  ;;  %v13690_v24 = vld [vmem:[#allocation108_spill] sm:$0xff] }
 0x3c8   : > { %v1537_v1 = vadd.f32 %v12137_v51, %v13689_v35  ;;  %v13710_v35 = vld [vmem:[#allocation198_spill] sm:$0xff] }
 0x3c9   : > { %v12196_v15 = vadd.f32 %v3461_v44, %v3433_v8  ;;  %v1795_v44 = vadd.f32 %v13690_v24, %v1766_v62  ;;  %v13691_v8 = vld [vmem:[#allocation252_spill] sm:$0xff]  ;;  %v13711_v24 = vld [vmem:[#allocation255_spill] sm:$0xff] }
 0x3ca   : > { %v3227_v9 = vadd.f32 %v13691_v8, %v3198_v43  ;;  %v1566_v39 = vadd.f32 %v13698_v32, %v1537_v1  ;;  %v2600_v1 = vadd.f32 %v13710_v35, %v2571_v61  ;;  %v3663_v8 = vld [vmem:[%s13417_s3 + $0x30] sm:$0xff]  ;;  %v13719_v61 = vld [vmem:[#allocation17_spill] sm:$0xff] }
 0x3cb   : > { %3681 = vmatpush.msrb.mxu0 %v3663_v8 }
 0x3cc   : > { %v12202_v40 = vpop.f32.mrf.mxu2  ;;  %v1595_v43 = vadd.f32 %v13706_v46, %v1566_v39  ;;  %v2629_v60 = vadd.f32 %v13712_v0, %v2600_v1  ;;  %v5575_v46 = vld [vmem:[%s13417_s3 + $0x50] sm:$0xff]  ;;  %v13727_v1 = vld [vmem:[#allocation136_spill] sm:$0xff]  ;;  %v13730_v0 = vld [vmem:[#allocation181_spill] sm:$0xff] }
 0x3cd   : > { %3682 = vmatpush.msrb.mxu0 %v3661_v17  ;;  %3742 = vmatpush.msra.mxu2 %v5575_v46  ;;  %v13738_v46 = vld [vmem:[#allocation107_spill] sm:$0xff] }
 0x3ce   : > { %v3435_v55 = vpop.f32.mrf.mxu0  ;;  %v3464_v7 = vpop.f32.mrf.mxu1  ;;  %v1624_v53 = vadd.f32 %v13714_v33, %v1595_v43  ;;  %v5574_v43 = vld [vmem:[%s13417_s3 + $0x48] sm:$0xff] }
 0x3cf   : > { %v3436_v2 = vadd.f32 %v3435_v55, %v3407_v58  ;;  %v12207_v21 = vpop.f32.mrf.mxu3  ;;  %v13695_v55 = vld [vmem:[#allocation167_spill] sm:$0xff]  ;;  %3763 = vmatpush.msra.mxu3 %v5574_v43  ;;  %v13731_v33 = vld [vmem:[#allocation106_spill] sm:$0xff] }
 0x3d0   : > { %v1653_v42 = vadd.f32 %v13720_v25, %v1624_v53  ;;  %v5596_v25 = vld [vmem:[%s13417_s3 + $0xd8] sm:$0xff] }
 0x3d1   : > { %v12212_v52 = vadd.f32 %v3464_v7, %v3436_v2  ;;  %v2284_v7 = vadd.f32 %v12137_v51, %v13695_v55  ;;  %v13697_v2 = vld [vmem:[#allocation253_spill] sm:$0xff]  ;;  %v13715_v55 = vld [vmem:[#allocation124_spill] sm:$0xff] }
 0x3d2   : > { %v3256_v34 = vadd.f32 %v13697_v2, %v3227_v9  ;;  %v3664_v9 = vld [vmem:[%s13417_s3 + $0x38] sm:$0xff] }
 0x3d3   : > { %v2313_v62 = vadd.f32 %v13703_v36, %v2284_v7  ;;  %3701 = vmatpush.msrb.mxu1 %v3664_v9  ;;  %v13717_v2 = vld [vmem:[#allocation172_spill] sm:$0xff]  ;;  %v13729_v9 = vld [vmem:[#allocation51_spill] sm:$0xff] }
 0x3d5   : > { %v12219_v58 = vpop.f32.mrf.mxu2  ;;  %v2342_v5 = vadd.f32 %v13709_v48, %v2313_v62  ;;  %v13723_v62 = vld [vmem:[#allocation180_spill] sm:$0xff] }
 0x3d7   : > { %v3438_v27 = vpop.f32.mrf.mxu0  ;;  %v3467_v16 = vpop.f32.mrf.mxu1 }
 0x3d8   : > { %v3439_v23 = vadd.f32 %v3438_v27, %v3410_v37  ;;  %v12229_v59 = vpop.f32.mrf.mxu3  ;;  %v13694_v37 = vld [vmem:[#allocation118_spill] sm:$0xff] }
 0x3d9   : > { %v1824_v13 = vadd.f32 %v13694_v37, %v1795_v44  ;;  %v13704_v27 = vld [vmem:[#allocation254_spill] sm:$0xff] }
 0x3da   : > { %v3468_v57 = vadd.f32 %v3467_v16, %v3439_v23  ;;  %v3285_v16 = vadd.f32 %v13704_v27, %v3256_v34  ;;  %v13707_v23 = vld [vmem:[#allocation121_spill] sm:$0xff]  ;;  %v2371_v34 = vadd.f32 %v13717_v2, %v2342_v5  ;;  %v5589_v5 = vld [vmem:[%s13417_s3 + $0xb0] sm:$0xff] }
 0x3db   : > { %v1853_v56 = vadd.f32 %v13701_v6, %v1824_v13  ;;  %v3662_v37 = vld [vmem:[%s13417_s3 + $0x28] sm:$0xff]  ;;  %v13721_v6 = vld [vmem:[#allocation135_spill] sm:$0xff] }
 0x3dc   : > { %v3314_v44 = vadd.f32 %v13711_v24, %v3285_v16  ;;  %v13713_v13 = vld [vmem:[#allocation10_spill] sm:$0xff]  ;;  %3702 = vmatpush.msrb.mxu1 %v3662_v37  ;;  %v2400_v27 = vadd.f32 %v13723_v62, %v2371_v34  ;;  %v5600_v37 = vld [vmem:[%s13417_s3 + $0xf8] sm:$0xff]  ;;  %v5583_v62 = vld [vmem:[%s13417_s3 + $0x80] sm:$0xff] }
 0x3dd   : > { %v1882_v30 = vadd.f32 %v13707_v23, %v1853_v56  ;;  %v881_v45 = vadd.f32 %v13713_v13, %v852_v29  ;;  %v13724_v16 = vld [vmem:[#allocation210_spill] sm:$0xff]  ;;  %v5573_v23 = vld [vmem:[%s13417_s3 + $0x40] sm:$0xff]  ;;  %3876 = vmatpush.msrb.mxu3 %v5600_v37  ;;  %v13733_v34 = vld [vmem:[#allocation183_spill] sm:$0xff] }
 0x3de   : > { %v3496_v63 = vpop.f32.mrf.mxu2  ;;  %3703 = vmatpush.msrb.mxu1 %v3660_v11  ;;  %v2658_v19 = vadd.f32 %v13724_v16, %v2629_v60  ;;  %3743 = vmatpush.msra.mxu2 %v5573_v23  ;;  %v2429_v60 = vadd.f32 %v13730_v0, %v2400_v27  ;;  %v5587_v13 = vld [vmem:[%s13417_s3 + $0xa0] sm:$0xff]  ;;  %v5585_v2 = vld [vmem:[%s13417_s3 + $0x90] sm:$0xff]  ;;  %v5584_v27 = vld [vmem:[%s13417_s3 + $0x88] sm:$0xff] }
 0x3df   : > { %v3497_v31 = vadd.f32 %v3496_v63, %v3468_v57  ;;  %v1139_v57 = vadd.f32 %v13708_v14, %v1110_v10  ;;  %v1911_v7 = vadd.f32 %v13715_v55, %v1882_v30  ;;  %v13718_v63 = vld [vmem:[#allocation256_spill] sm:$0xff]  ;;  %v3494_v30 = vadd.f32 %v12219_v58, %v12212_v52  ;;  %v3658_v14 = vld [vmem:[%s13417_s3 + $0x8] sm:$0xff]  ;;  %v5595_v16 = vld [vmem:[%s13417_s3 + $0xd0] sm:$0xff] }
 0x3e0   : > { %v3525_v47 = vpop.f32.mrf.mxu3  ;;  %v12256_v38 = vpop.f32.mrf.mxu0  ;;  %v3343_v32 = vadd.f32 %v13718_v63, %v3314_v44  ;;  %v13722_v10 = vld [vmem:[#allocation48_spill] sm:$0xff]  ;;  %3704 = vmatpush.msrb.mxu1 %v3658_v14  ;;  %v13726_v58 = vld [vmem:[#allocation97_spill] sm:$0xff]  ;;  %v13728_v44 = vld [vmem:[#allocation18_spill] sm:$0xff]  ;;  %v2458_v63 = vadd.f32 %v13733_v34, %v2429_v60 }
 0x3e1   : > { %v12260_v50 = vadd.f32 %v3525_v47, %v3497_v31  ;;  %v12262_v3 = vpop.f32.mrf.mxu1  ;;  %v1168_v22 = vadd.f32 %v13716_v28, %v1139_v57  ;;  %v3659_v31 = vld [vmem:[%s13417_s3 + $0x10] sm:$0xff]  ;;  %v910_v47 = vadd.f32 %v13719_v61, %v881_v45  ;;  %v1940_v56 = vadd.f32 %v13721_v6, %v1911_v7  ;;  %v5590_v52 = vld [vmem:[%s13417_s3 + $0xb8] sm:$0xff]  ;;  %v5588_v45 = vld [vmem:[%s13417_s3 + $0xa8] sm:$0xff] }
 0x3e2   : > { %3683 = vmatpush.msrb.mxu0 %v3659_v31  ;;  %v3372_v29 = vadd.f32 %v12155_v20, %v3343_v32  ;;  %v3657_v20 = vld [vmem:[%s13417_s3] sm:$0xff]  ;;  %v13725_v57 = vld [vmem:[#allocation211_spill] sm:$0xff]  ;;  %v1682_v35 = vadd.f32 %v13726_v58, %v1653_v42  ;;  %3818 = vmatpush.msra.mxu1 %v5590_v52  ;;  %v3523_v28 = vadd.f32 %v12229_v59, %v3494_v30  ;;  %v13734_v32 = vld [vmem:[#allocation214_spill] sm:$0xff] }
 0x3e3   : > { %v1197_v36 = vadd.f32 %v13722_v10, %v1168_v22  ;;  %v2687_v48 = vadd.f32 %v13725_v57, %v2658_v19  ;;  %v1969_v24 = vadd.f32 %v13727_v1, %v1940_v56  ;;  %v939_v8 = vadd.f32 %v13728_v44, %v910_v47  ;;  %v13732_v55 = vld [vmem:[#allocation137_spill] sm:$0xff]  ;;  %v5586_v61 = vld [vmem:[%s13417_s3 + $0x98] sm:$0xff]  ;;  %v13736_v56 = vld [vmem:[#allocation62_spill] sm:$0xff] }
 0x3e4   : > { %3684 = vmatpush.msrb.mxu0 %v3657_v20  ;;  %v3401_v17 = vadd.f32 %v12160_v41, %v3372_v29  ;;  %v1711_v53 = vadd.f32 %v13731_v33, %v1682_v35  ;;  %v5599_v41 = vld [vmem:[%s13417_s3 + $0xf0] sm:$0xff]  ;;  %v5598_v22 = vld [vmem:[%s13417_s3 + $0xe8] sm:$0xff]  ;;  %3819 = vmatpush.msra.mxu1 %v5588_v45  ;;  %v5597_v47 = vld [vmem:[%s13417_s3 + $0xe0] sm:$0xff] }
 0x3e5   : > { %v1226_v4 = vadd.f32 %v13729_v9, %v1197_v36  ;;  %v1998_v7 = vadd.f32 %v13732_v55, %v1969_v24  ;;  %v2716_v31 = vadd.f32 %v13734_v32, %v2687_v48  ;;  %3856 = vmatpush.msrb.mxu2 %v5599_v41  ;;  %v13735_v42 = vld [vmem:[#allocation20_spill] sm:$0xff]  ;;  %3877 = vmatpush.msrb.mxu3 %v5598_v22  ;;  %v13737_v19 = vld [vmem:[#allocation225_spill] sm:$0xff]  ;;  %v13739_v30 = vld [vmem:[#allocation139_spill] sm:$0xff] }
 0x3e6   : > { %3798 = vmatpush.msra.mxu0 %v5589_v5  ;;  %v3430_v59 = vadd.f32 %v12173_v49, %v3401_v17  ;;  %v968_v6 = vadd.f32 %v13735_v42, %v939_v8  ;;  %3820 = vmatpush.msra.mxu1 %v5586_v61  ;;  %v1740_v43 = vadd.f32 %v13738_v46, %v1711_v53  ;;  %v13740_v14 = vld [vmem:[#allocation186_spill] sm:$0xff]  ;;  %v5593_v52 = vld [vmem:[%s13417_s3 + $0xc0] sm:$0xff]  ;;  %v13741_v58 = vld [vmem:[#allocation23_spill] sm:$0xff] }
 0x3e7   : > { %v1255_v10 = vadd.f32 %v13736_v56, %v1226_v4  ;;  %v2745_v29 = vadd.f32 %v13737_v19, %v2716_v31  ;;  %3857 = vmatpush.msrb.mxu2 %v5597_v47  ;;  %3878 = vmatpush.msrb.mxu3 %v5596_v25  ;;  %v2027_v20 = vadd.f32 %v13739_v30, %v1998_v7  ;;  %v5594_v5 = vld [vmem:[%s13417_s3 + $0xc8] sm:$0xff]  ;;  %v13742_v1 = vld [vmem:[#allocation63_spill] sm:$0xff]  ;;  %v13748_v33 = vld [vmem:[#allocation64_spill] sm:$0xff] }
 0x3e8   : > { %v12296_v39 = vpop.f32.mrf.mxu0  ;;  %3799 = vmatpush.msra.mxu0 %v5587_v13  ;;  %v2487_v57 = vadd.f32 %v13740_v14, %v2458_v63  ;;  %v3459_v48 = vadd.f32 %v12175_v26, %v3430_v59  ;;  %3821 = vmatpush.msra.mxu1 %v5584_v27  ;;  %v997_v35 = vadd.f32 %v13741_v58, %v968_v6  ;;  %v13743_v44 = vld [vmem:[#allocation109_spill] sm:$0xff]  ;;  %v13744_v9 = vld [vmem:[#allocation151_spill] sm:$0xff]  ;;  %v13745_v26 = vld [vmem:[#allocation196_spill] sm:$0xff] }
 0x3e9   : > { %v12307_v54 = vpop.f32.mrf.mxu1  ;;  %3858 = vmatpush.msrb.mxu2 %v5595_v16  ;;  %v1284_v24 = vadd.f32 %v13742_v1, %v1255_v10  ;;  %v1769_v8 = vadd.f32 %v13743_v44, %v1740_v43  ;;  %3879 = vmatpush.msrb.mxu3 %v5594_v5  ;;  %v2056_v4 = vadd.f32 %v13744_v9, %v2027_v20  ;;  %v13746_v60 = vld [vmem:[#allocation226_spill] sm:$0xff]  ;;  %v13747_v13 = vld [vmem:[#allocation33_spill] sm:$0xff]  ;;  %v13749_v55 = vld [vmem:[#allocation227_spill] sm:$0xff] }
 0x3ea   : > { %3800 = vmatpush.msra.mxu0 %v5585_v2  ;;  %v2516_v0 = vadd.f32 %v13745_v26, %v2487_v57  ;;  %v2774_v17 = vadd.f32 %v13746_v60, %v2745_v29  ;;  %v3488_v37 = vadd.f32 %v12185_v12, %v3459_v48  ;;  %v1026_v45 = vadd.f32 %v13747_v13, %v997_v35  ;;  %v13750_v41 = vld [vmem:[#allocation112_spill] sm:$0xff]  ;;  %v13752_v31 = vld [vmem:[#allocation197_spill] sm:$0xff]  ;;  %v13753_v12 = vld [vmem:[#allocation34_spill] sm:$0xff] }
 0x3eb   : > { %3859 = vmatpush.msrb.mxu2 %v5593_v52  ;;  %v1313_v53 = vadd.f32 %v13748_v33, %v1284_v24  ;;  %v1798_v22 = vadd.f32 %v13750_v41, %v1769_v8  ;;  %v13751_v63 = vld [vmem:[#allocation152_spill] sm:$0xff]  ;;  %v13754_v47 = vld [vmem:[#allocation67_spill] sm:$0xff]  ;;  %v13755_v42 = vld [vmem:[#allocation122_spill] sm:$0xff] }
 0x3ec   : > { %3801 = vmatpush.msra.mxu0 %v5583_v62  ;;  %v2803_v7 = vadd.f32 %v13749_v55, %v2774_v17  ;;  %v2085_v32 = vadd.f32 %v13751_v63, %v2056_v4  ;;  %v2545_v59 = vadd.f32 %v13752_v31, %v2516_v0  ;;  %v1055_v61 = vadd.f32 %v13753_v12, %v1026_v45  ;;  %v13756_v10 = vld [vmem:[#allocation153_spill] sm:$0xff]  ;;  %v13759_v19 = vld [vmem:[#allocation78_spill] sm:$0xff]  ;;  %v13760_v46 = vld [vmem:[#allocation36_spill] sm:$0xff] }
 0x3ed   : > { %v1342_v25 = vadd.f32 %v13754_v47, %v1313_v53  ;;  %v1827_v6 = vadd.f32 %v13755_v42, %v1798_v22  ;;  %v13761_v43 = vld [vmem:[#allocation241_spill] sm:$0xff]  ;;  %v13762_v20 = vld [vmem:[#allocation123_spill] sm:$0xff]  ;;  %v13764_v5 = vld [vmem:[#allocation202_spill] sm:$0xff] }
 0x3ee   : > { %v13763_v57 = vld [vmem:[#allocation155_spill] sm:$0xff]  ;;  %v13766_v24 = vld [vmem:[#allocation125_spill] sm:$0xff]  ;;  %v13768_v26 = vld [vmem:[#allocation212_spill] sm:$0xff] }
 0x3ef   : > { %v1371_v29 = vadd.f32 %v13759_v19, %v1342_v25  ;;  %v1856_v14 = vadd.f32 %v13762_v20, %v1827_v6  ;;  %v13765_v35 = vld [vmem:[#allocation79_spill] sm:$0xff]  ;;  %v13769_v60 = vld [vmem:[#allocation242_spill] sm:$0xff]  ;;  %v13771_v33 = vld [vmem:[#allocation49_spill] sm:$0xff] }
 0x3f0   : > { %v3551_v11 = vpop.f32.mrf.mxu0  ;;  %v13767_v9 = vld [vmem:[#allocation39_spill] sm:$0xff]  ;;  %v13770_v13 = vld [vmem:[#allocation86_spill] sm:$0xff]  ;;  %v13776_v12 = vld [vmem:[#allocation89_spill] sm:$0xff] }
 0x3f1   : > { %v3552_v49 = vadd.f32 %v3551_v11, %v3523_v28  ;;  %v3580_v36 = vpop.f32.mrf.mxu1  ;;  %v3517_v11 = vadd.f32 %v12190_v18, %v3488_v37  ;;  %v1084_v18 = vadd.f32 %v13760_v46, %v1055_v61  ;;  %v1400_v1 = vadd.f32 %v13765_v35, %v1371_v29  ;;  %v13773_v22 = vld [vmem:[#allocation170_spill] sm:$0xff] }
 0x3f2   : > { %v1885_v44 = vadd.f32 %v13766_v24, %v1856_v14  ;;  %v1540_v45 = vadd.f32 %v12137_v51, %v13770_v13  ;;  %v13777_v47 = vld [vmem:[#allocation138_spill] sm:$0xff]  ;;  %v3491_v29 = vadd.f32 %v12202_v40, %v12196_v15  ;;  %v13783_v14 = vld [vmem:[#allocation95_spill] sm:$0xff]  ;;  %v5607_v24 = vld [vmem:[%s13417_s3 + $0x120] sm:$0xff] }
 0x3f3   : > { %v12389_v23 = vadd.f32 %v3580_v36, %v3552_v49  ;;  %v2114_v49 = vadd.f32 %v13756_v10, %v2085_v32  ;;  %v13757_v36 = vld [vmem:[#allocation199_spill] sm:$0xff]  ;;  %v3546_v16 = vadd.f32 %v12256_v38, %v3517_v11  ;;  %v1113_v4 = vadd.f32 %v13767_v9, %v1084_v18  ;;  %v13778_v42 = vld [vmem:[#allocation50_spill] sm:$0xff] }
 0x3f4   : > { %v2574_v62 = vadd.f32 %v13757_v36, %v2545_v59  ;;  %v13775_v59 = vld [vmem:[#allocation8_spill] sm:$0xff]  ;;  %v1569_v61 = vadd.f32 %v13776_v12, %v1540_v45  ;;  %v5609_v18 = vld [vmem:[%s13417_s3 + $0x130] sm:$0xff]  ;;  %v3520_v13 = vadd.f32 %v12207_v21, %v3491_v29  ;;  %v5618_v45 = vld [vmem:[%s13417_s3 + $0x168] sm:$0xff] }
 0x3f5   : > { %v2143_v48 = vadd.f32 %v13763_v57, %v2114_v49  ;;  %v3575_v58 = vadd.f32 %v12262_v3, %v3546_v16  ;;  %v1142_v53 = vadd.f32 %v13771_v33, %v1113_v4  ;;  %v797_v11 = vadd.f32 %v12137_v51, %v13775_v59  ;;  %v13779_v49 = vld [vmem:[#allocation215_spill] sm:$0xff]  ;;  %v13786_v35 = vld [vmem:[#allocation218_spill] sm:$0xff] }
 0x3f6   : > { %v2603_v52 = vadd.f32 %v13764_v5, %v2574_v62  ;;  %v13781_v16 = vld [vmem:[#allocation171_spill] sm:$0xff]  ;;  %v1598_v57 = vadd.f32 %v13783_v14, %v1569_v61  ;;  %v5608_v4 = vld [vmem:[%s13417_s3 + $0x128] sm:$0xff]  ;;  %v5613_v14 = vld [vmem:[%s13417_s3 + $0x140] sm:$0xff] }
 0x3f7   : > { %v2154_v55 = vmax.f32 %v2143_v48, 0.0  ;;  %v1171_v6 = vadd.f32 %v13778_v42, %v1142_v53  ;;  %v13784_v48 = vld [vmem:[#allocation140_spill] sm:$0xff]  ;;  %v5605_v33 = vld [vmem:[%s13417_s3 + $0x110] sm:$0xff] }
 0x3f8   : > { %v3554_v28 = vpop.f32.mrf.mxu0  ;;  %v2632_v0 = vadd.f32 %v13768_v26, %v2603_v52  ;;  %v13785_v52 = vld [vmem:[#allocation173_spill] sm:$0xff]  ;;  %v5619_v26 = vld [vmem:[%s13417_s3 + $0x170] sm:$0xff]  ;;  %v13791_v53 = vld [vmem:[#allocation96_spill] sm:$0xff] }
 0x3f9   : > { %v3555_v2 = vadd.f32 %v3554_v28, %v12260_v50  ;;  %v3583_v34 = vpop.f32.mrf.mxu1  ;;  %v13758_v50 = vld [vmem:[#allocation230_spill] sm:$0xff]  ;;  %v13772_v28 = vld [vmem:[#allocation128_spill] sm:$0xff]  ;;  %v13796_v12 = vld [vmem:[#allocation143_spill] sm:$0xff] }
 0x3fa   : > { %v2832_v27 = vadd.f32 %v13758_v50, %v2803_v7  ;;  %v1411_v7 = vmax.f32 %v1400_v1, 0.0  ;;  %v1914_v41 = vadd.f32 %v13772_v28, %v1885_v44  ;;  %v13780_v50 = vld [vmem:[#allocation52_spill] sm:$0xff]  ;;  %v13787_v44 = vld [vmem:[#allocation11_spill] sm:$0xff]  ;;  %v13795_v59 = vld [vmem:[#allocation98_spill] sm:$0xff] }
 0x3fb   : > { %v12418_v56 = vadd.f32 %v3583_v34, %v3555_v2  ;;  %v2287_v2 = vadd.f32 %v12137_v51, %v13773_v22  ;;  %v13774_v34 = vld [vmem:[#allocation213_spill] sm:$0xff]  ;;  %v5620_v1 = vld [vmem:[%s13417_s3 + $0x178] sm:$0xff] }
 0x3fc   : > { %v2861_v30 = vadd.f32 %v13761_v43, %v2832_v27  ;;  %v2661_v63 = vadd.f32 %v13774_v34, %v2632_v0  ;;  %v1943_v25 = vadd.f32 %v13777_v47, %v1914_v41  ;;  %v2158_v10 = vmax.f32 %v1411_v7, %v2154_v55  ;;  %v5610_v43 = vld [vmem:[%s13417_s3 + $0x138] sm:$0xff]  ;;  %v13792_v7 = vld [vmem:[#allocation65_spill] sm:$0xff] }
 0x3fd   : > { %v1200_v27 = vadd.f32 %v13780_v50, %v1171_v6  ;;  %v2316_v19 = vadd.f32 %v13781_v16, %v2287_v2  ;;  %v13789_v0 = vld [vmem:[#allocation55_spill] sm:$0xff]  ;;  %v1627_v55 = vadd.f32 %v13791_v53, %v1598_v57  ;;  %v13793_v41 = vld [vmem:[#allocation176_spill] sm:$0xff]  ;;  %v3549_v2 = vadd.f32 %v12296_v39, %v3520_v13  ;;  %v13800_v50 = vld [vmem:[#allocation154_spill] sm:$0xff] }
 0x3fe   : > { %v2890_v17 = vadd.f32 %v13769_v60, %v2861_v30  ;;  %v2690_v36 = vadd.f32 %v13779_v49, %v2661_v63  ;;  %v13782_v30 = vld [vmem:[#allocation9_spill] sm:$0xff]  ;;  %v1972_v5 = vadd.f32 %v13784_v48, %v1943_v25  ;;  %v5606_v21 = vld [vmem:[%s13417_s3 + $0x118] sm:$0xff]  ;;  %v5615_v49 = vld [vmem:[%s13417_s3 + $0x150] sm:$0xff] }
 0x3ff   : > { %v826_v20 = vadd.f32 %v13782_v30, %v797_v11  ;;  %v1229_v60 = vadd.f32 %v13789_v0, %v1200_v27  ;;  %v5616_v34 = vld [vmem:[%s13417_s3 + $0x158] sm:$0xff]  ;;  %v5603_v63 = vld [vmem:[%s13417_s3 + $0x100] sm:$0xff]  ;;  %v1656_v11 = vadd.f32 %v13795_v59, %v1627_v55  ;;  %v13801_v16 = vld [vmem:[#allocation66_spill] sm:$0xff] }
 0x400   : > { %v3632_v38 = vpop.f32.mrf.mxu0  ;;  %v2901_v32 = vmax.f32 %v2890_v17, 0.0  ;;  %v2719_v15 = vadd.f32 %v13786_v35, %v2690_v36  ;;  %v13790_v17 = vld [vmem:[#allocation228_spill] sm:$0xff]  ;;  %v13798_v25 = vld [vmem:[#allocation229_spill] sm:$0xff]  ;;  %v13802_v29 = vld [vmem:[#allocation231_spill] sm:$0xff] }
 0x401   : > { %v3603_v8 = vpop.f32.mrf.mxu1  ;;  %v1258_v28 = vadd.f32 %v13792_v7, %v1229_v60  ;;  %v13797_v47 = vld [vmem:[#allocation184_spill] sm:$0xff]  ;;  %v13799_v36 = vld [vmem:[#allocation21_spill] sm:$0xff]  ;;  %v13810_v13 = vld [vmem:[#allocation234_spill] sm:$0xff]  ;;  %v3635_v7 = vpop.f32.mrf.mxu3 }
 0x402   : > { %v3604_v37 = vadd.f32 %v3603_v8, %v3575_v58  ;;  %v2345_v58 = vadd.f32 %v13785_v52, %v2316_v19  ;;  %v855_v8 = vadd.f32 %v13787_v44, %v826_v20  ;;  %v5614_v20 = vld [vmem:[%s13417_s3 + $0x148] sm:$0xff]  ;;  %v5630_v52 = vld [vmem:[%s13417_s3 + $0x1b8] sm:$0xff]  ;;  %v5627_v0 = vld [vmem:[%s13417_s3 + $0x1a0] sm:$0xff] }
 0x403   : > { %v1287_v19 = vadd.f32 %v13801_v16, %v1258_v28  ;;  %v13803_v57 = vld [vmem:[#allocation101_spill] sm:$0xff]  ;;  %v13806_v44 = vld [vmem:[#allocation22_spill] sm:$0xff]  ;;  %v13812_v28 = vld [vmem:[#allocation71_spill] sm:$0xff] }
 0x404   : > { %v3633_v3 = vadd.f32 %v3632_v38, %v3604_v37  ;;  %v13788_v38 = vld [vmem:[#allocation141_spill] sm:$0xff]  ;;  %v2748_v37 = vadd.f32 %v13790_v17, %v2719_v15  ;;  %v2374_v22 = vadd.f32 %v13793_v41, %v2345_v58  ;;  %v1685_v48 = vadd.f32 %v13803_v57, %v1656_v11  ;;  %v13804_v58 = vld [vmem:[#allocation68_spill] sm:$0xff]  ;;  %v13809_v17 = vld [vmem:[#allocation187_spill] sm:$0xff] }
 0x405   : > { %v2001_v9 = vadd.f32 %v13788_v38, %v1972_v5  ;;  %v3606_v5 = vpop.f32.mrf.mxu2  ;;  %v1316_v35 = vadd.f32 %v13804_v58, %v1287_v19  ;;  %v13805_v15 = vld [vmem:[#allocation185_spill] sm:$0xff]  ;;  %v13807_v38 = vld [vmem:[#allocation110_spill] sm:$0xff]  ;;  %v5626_v59 = vld [vmem:[%s13417_s3 + $0x198] sm:$0xff] }
 0x406   : > { %v3644_v31 = vmax.f32 %v3633_v3, 0.0  ;;  %v5617_v3 = vld [vmem:[%s13417_s3 + $0x160] sm:$0xff]  ;;  %v2403_v39 = vadd.f32 %v13797_v47, %v2374_v22  ;;  %v2777_v42 = vadd.f32 %v13798_v25, %v2748_v37  ;;  %v5628_v60 = vld [vmem:[%s13417_s3 + $0x1a8] sm:$0xff]  ;;  %v13815_v11 = vld [vmem:[#allocation111_spill] sm:$0xff] }
 0x407   : > { %v2030_v61 = vadd.f32 %v13796_v12, %v2001_v9  ;;  %v1714_v9 = vadd.f32 %v13807_v38, %v1685_v48  ;;  %v5638_v53 = vld [vmem:[%s13417_s3 + $0x1e8] sm:$0xff]  ;;  %v5637_v55 = vld [vmem:[%s13417_s3 + $0x1e0] sm:$0xff]  ;;  %v1345_v41 = vadd.f32 %v13812_v28, %v1316_v35  ;;  %v5635_v19 = vld [vmem:[%s13417_s3 + $0x1d0] sm:$0xff] }
 0x408   : > { %v3648_v62 = vmax.f32 %v2901_v32, %v3644_v31  ;;  %v13794_v32 = vld [vmem:[#allocation14_spill] sm:$0xff]  ;;  %v13813_v22 = vld [vmem:[#allocation157_spill] sm:$0xff]  ;;  %v5650_v58 = vld [vmem:[%s13417_s3 + $0x238] sm:$0xff] }
 0x409   : > { %v884_v31 = vadd.f32 %v13794_v32, %v855_v8  ;;  %v2059_v27 = vadd.f32 %v13800_v50, %v2030_v61  ;;  %v1743_v12 = vadd.f32 %v13815_v11, %v1714_v9  ;;  %v13816_v61 = vld [vmem:[#allocation80_spill] sm:$0xff]  ;;  %v13819_v50 = vld [vmem:[#allocation113_spill] sm:$0xff]  ;;  %v5649_v48 = vld [vmem:[%s13417_s3 + $0x230] sm:$0xff] }
 0x40a   : > { %v12453_v46 = vmax.f32 %v2158_v10, %v3648_v62  ;;  %v5604_v10 = vld [vmem:[%s13417_s3 + $0x108] sm:$0xff]  ;;  %v1374_v47 = vadd.f32 %v13816_v61, %v1345_v41  ;;  %v5645_v41 = vld [vmem:[%s13417_s3 + $0x210] sm:$0xff] }
 0x40b   : > { %v913_v62 = vadd.f32 %v13799_v36, %v884_v31  ;;  %v5625_v31 = vld [vmem:[%s13417_s3 + $0x190] sm:$0xff]  ;;  %v5624_v16 = vld [vmem:[%s13417_s3 + $0x188] sm:$0xff] }
 0x40c   : > { %5571 = vmatmul.msk.f32.vlgmr.msrb.gmra.mxu0 %vm3665_vm1, %v12453_v46  ;;  %5572 = vmatmul.msk.f32.vlgmr.msrb.gmra.mxu1 %vm3665_vm1, %v12453_v46  ;;  %v3725_v40 = vrot.slane %v12453_v46, 1  ;;  %v3783_v6 = vrot.slane %v12453_v46, 2  ;;  %v3841_v30 = vrot.slane %v12453_v46, 3  ;;  %v3899_v32 = vrot.slane %v12453_v46, 4  ;;  %v13818_v36 = vld [vmem:[#allocation27_spill] sm:$0xff]  ;;  %v5634_v57 = vld [vmem:[%s13417_s3 + $0x1c8] sm:$0xff] }
 0x40d   : > { %3914 = vmatpush.msrb.mxu0 %v5609_v18  ;;  %3934 = vmatpush.msrb.mxu1 %v5610_v43  ;;  %v2806_v18 = vadd.f32 %v13802_v29, %v2777_v42  ;;  %v3578_v43 = vadd.f32 %v12307_v54, %v3549_v2  ;;  %v5629_v54 = vld [vmem:[%s13417_s3 + $0x1b0] sm:$0xff]  ;;  %v942_v8 = vadd.f32 %v13806_v44, %v913_v62  ;;  %v13824_v35 = vld [vmem:[#allocation81_spill] sm:$0xff]  ;;  %v13825_v44 = vld [vmem:[#allocation116_spill] sm:$0xff] }
 0x40e   : > { %5581 = vmatmul.msk.f32.vlgmr.msra.gmra.mxu2 %vm3665_vm1, %v3725_v40  ;;  %5582 = vmatmul.msk.f32.vlgmr.msra.gmra.mxu3 %vm3665_vm1, %v3725_v40  ;;  %v2432_v40 = vadd.f32 %v13805_v15, %v2403_v39  ;;  %v13817_v39 = vld [vmem:[#allocation190_spill] sm:$0xff]  ;;  %v13820_v29 = vld [vmem:[#allocation159_spill] sm:$0xff]  ;;  %v1403_v15 = vadd.f32 %v13824_v35, %v1374_v47  ;;  %v13826_v9 = vld [vmem:[#allocation201_spill] sm:$0xff] }
 0x40f   : > { %3992 = vmatpush.msra.mxu3 %v5620_v1  ;;  %3915 = vmatpush.msrb.mxu0 %v5607_v24  ;;  %v5640_v1 = vld [vmem:[%s13417_s3 + $0x1f8] sm:$0xff]  ;;  %v5639_v24 = vld [vmem:[%s13417_s3 + $0x1f0] sm:$0xff]  ;;  %v5658_v28 = vld [vmem:[%s13417_s3 + $0x268] sm:$0xff] }
 0x410   : > { %3935 = vmatpush.msrb.mxu1 %v5608_v4  ;;  %3972 = vmatpush.msra.mxu2 %v5619_v26  ;;  %v13808_v4 = vld [vmem:[#allocation156_spill] sm:$0xff]  ;;  %v2461_v37 = vadd.f32 %v13809_v17, %v2432_v40  ;;  %v5659_v17 = vld [vmem:[%s13417_s3 + $0x270] sm:$0xff] }
 0x411   : > { %3993 = vmatpush.msra.mxu3 %v5618_v45  ;;  %3916 = vmatpush.msrb.mxu0 %v5605_v33  ;;  %v2088_v26 = vadd.f32 %v13808_v4, %v2059_v27  ;;  %v2835_v45 = vadd.f32 %v13810_v13, %v2806_v18  ;;  %v3607_v33 = vadd.f32 %v3606_v5, %v3578_v43  ;;  %v13821_v43 = vld [vmem:[#allocation200_spill] sm:$0xff]  ;;  %v13823_v5 = vld [vmem:[#allocation37_spill] sm:$0xff]  ;;  %v5655_v61 = vld [vmem:[%s13417_s3 + $0x250] sm:$0xff] }
 0x412   : > { %3936 = vmatpush.msrb.mxu1 %v5606_v21  ;;  %3973 = vmatpush.msra.mxu2 %v5617_v3  ;;  %v13811_v21 = vld [vmem:[#allocation24_spill] sm:$0xff]  ;;  %v2490_v25 = vadd.f32 %v13817_v39, %v2461_v37  ;;  %v1772_v27 = vadd.f32 %v13819_v50, %v1743_v12  ;;  %v13827_v37 = vld [vmem:[#allocation38_spill] sm:$0xff] }
 0x413   : > { %3994 = vmatpush.msra.mxu3 %v5616_v34  ;;  %3917 = vmatpush.msrb.mxu0 %v5603_v63  ;;  %v971_v3 = vadd.f32 %v13811_v21, %v942_v8  ;;  %v2117_v2 = vadd.f32 %v13813_v22, %v2088_v26  ;;  %v13814_v34 = vld [vmem:[#allocation243_spill] sm:$0xff]  ;;  %v3636_v42 = vadd.f32 %v3635_v7, %v3607_v33  ;;  %v4073_v7 = vrot.slane %v12453_v46, 7  ;;  %v5644_v12 = vld [vmem:[%s13417_s3 + $0x208] sm:$0xff]  ;;  %v13835_v50 = vld [vmem:[#allocation216_spill] sm:$0xff] }
 0x414   : > { %5591 = vmatmul.msk.f32.vlgmr.msra.gmra.mxu0 %vm3665_vm1, %v3783_v6  ;;  %5592 = vmatmul.msk.f32.vlgmr.msra.gmra.mxu1 %vm3665_vm1, %v3783_v6  ;;  %v2864_v63 = vadd.f32 %v13814_v34, %v2835_v45  ;;  %v3957_v6 = vrot.slane %v12453_v46, 5  ;;  %v1801_v8 = vadd.f32 %v13825_v44, %v1772_v27  ;;  %v13828_v45 = vld [vmem:[#allocation126_spill] sm:$0xff]  ;;  %v5646_v22 = vld [vmem:[%s13417_s3 + $0x218] sm:$0xff] }
 0x415   : > { %3937 = vmatpush.msrb.mxu1 %v5604_v10  ;;  %3974 = vmatpush.msra.mxu2 %v5615_v49  ;;  %v5636_v10 = vld [vmem:[%s13417_s3 + $0x1d8] sm:$0xff]  ;;  %v5623_v49 = vld [vmem:[%s13417_s3 + $0x180] sm:$0xff]  ;;  %v1000_v62 = vadd.f32 %v13818_v36, %v971_v3  ;;  %v2146_v18 = vadd.f32 %v13820_v29, %v2117_v2  ;;  %v3645_v40 = vmax.f32 %v3636_v42, 0.0  ;;  %v13832_v47 = vld [vmem:[#allocation206_spill] sm:$0xff] }
 0x416   : > { %5601 = vmatmul.msk.f32.vlgmr.msrb.gmra.mxu2 %vm3665_vm1, %v3841_v30  ;;  %5602 = vmatmul.msk.f32.vlgmr.msrb.gmra.mxu3 %vm3665_vm1, %v3841_v30  ;;  %v2519_v30 = vadd.f32 %v13821_v43, %v2490_v25  ;;  %v1830_v33 = vadd.f32 %v13828_v45, %v1801_v8  ;;  %v5657_v2 = vld [vmem:[%s13417_s3 + $0x260] sm:$0xff]  ;;  %v5654_v42 = vld [vmem:[%s13417_s3 + $0x248] sm:$0xff]  ;;  %v13834_v36 = vld [vmem:[#allocation43_spill] sm:$0xff] }
 0x417   : > { %3995 = vmatpush.msra.mxu3 %v5614_v20  ;;  %3975 = vmatpush.msra.mxu2 %v5613_v14  ;;  %v13822_v20 = vld [vmem:[#allocation244_spill] sm:$0xff]  ;;  %v2155_v38 = vmax.f32 %v2146_v18, 0.0  ;;  %v13836_v29 = vld [vmem:[#allocation90_spill] sm:$0xff]  ;;  %v13837_v43 = vld [vmem:[#allocation53_spill] sm:$0xff] }
 0x418   : > { %4030 = vmatpush.msra.mxu0 %v5629_v54  ;;  %4050 = vmatpush.msra.mxu1 %v5630_v52  ;;  %v2893_v14 = vadd.f32 %v13822_v20, %v2864_v63  ;;  %v1029_v54 = vadd.f32 %v13823_v5, %v1000_v62  ;;  %v5633_v52 = vld [vmem:[%s13417_s3 + $0x1c0] sm:$0xff]  ;;  %v2548_v4 = vadd.f32 %v13826_v9, %v2519_v30  ;;  %v5668_v5 = vld [vmem:[%s13417_s3 + $0x2a8] sm:$0xff] }
 0x419   : > { %4108 = vmatpush.msrb.mxu3 %v5640_v1  ;;  %4088 = vmatpush.msrb.mxu2 %v5639_v24  ;;  %v5660_v1 = vld [vmem:[%s13417_s3 + $0x278] sm:$0xff]  ;;  %v5647_v24 = vld [vmem:[%s13417_s3 + $0x220] sm:$0xff]  ;;  %v1543_v18 = vadd.f32 %v12137_v51, %v13836_v29 }
 0x41a   : > { %4031 = vmatpush.msra.mxu0 %v5627_v0  ;;  %4051 = vmatpush.msra.mxu1 %v5628_v60  ;;  %v2902_v26 = vmax.f32 %v2893_v14, 0.0  ;;  %v4015_v0 = vrot.slane %v12453_v46, 6  ;;  %v5648_v60 = vld [vmem:[%s13417_s3 + $0x228] sm:$0xff]  ;;  %v1058_v13 = vadd.f32 %v13827_v37, %v1029_v54  ;;  %v13830_v34 = vld [vmem:[#allocation40_spill] sm:$0xff]  ;;  %v5679_v54 = vld [vmem:[%s13417_s3 + $0x2f0] sm:$0xff] }
 0x41b   : > { %4109 = vmatpush.msrb.mxu3 %v5638_v53  ;;  %4089 = vmatpush.msrb.mxu2 %v5637_v55  ;;  %v1412_v53 = vmax.f32 %v1403_v15, 0.0  ;;  %v13829_v55 = vld [vmem:[#allocation203_spill] sm:$0xff]  ;;  %v5667_v51 = vld [vmem:[%s13417_s3 + $0x2a0] sm:$0xff] }
 0x41c   : > { %5611 = vmatmul.msk.f32.vlgmr.msrb.gmra.mxu0 %vm3665_vm1, %v3899_v32  ;;  %5612 = vmatmul.msk.f32.vlgmr.msrb.gmra.mxu1 %vm3665_vm1, %v3899_v32  ;;  %v2577_v21 = vadd.f32 %v13829_v55, %v2548_v4  ;;  %v3649_v3 = vmax.f32 %v2902_v26, %v3645_v40  ;;  %v1087_v46 = vadd.f32 %v13830_v34, %v1058_v13  ;;  %v5656_v32 = vld [vmem:[%s13417_s3 + $0x258] sm:$0xff]  ;;  %v13840_v15 = vld [vmem:[#allocation217_spill] sm:$0xff]  ;;  %v13843_v4 = vld [vmem:[#allocation142_spill] sm:$0xff] }
 0x41d   : > { %4032 = vmatpush.msra.mxu0 %v5625_v31  ;;  %4052 = vmatpush.msra.mxu1 %v5626_v59  ;;  %v2159_v63 = vmax.f32 %v1412_v53, %v2155_v38  ;;  %v5643_v31 = vld [vmem:[%s13417_s3 + $0x200] sm:$0xff]  ;;  %v13831_v59 = vld [vmem:[#allocation127_spill] sm:$0xff]  ;;  %v5664_v55 = vld [vmem:[%s13417_s3 + $0x288] sm:$0xff] }
 0x41e   : > { %5621 = vmatmul.msk.f32.vlgmr.msra.gmra.mxu2 %vm3665_vm1, %v3957_v6  ;;  %5622 = vmatmul.msk.f32.vlgmr.msra.gmra.mxu3 %vm3665_vm1, %v3957_v6  ;;  %v1859_v11 = vadd.f32 %v13831_v59, %v1830_v33  ;;  %v2606_v39 = vadd.f32 %v13832_v47, %v2577_v21  ;;  %v5669_v6 = vld [vmem:[%s13417_s3 + $0x2b0] sm:$0xff]  ;;  %v1116_v62 = vadd.f32 %v13834_v36, %v1087_v46  ;;  %v5680_v14 = vld [vmem:[%s13417_s3 + $0x2f8] sm:$0xff]  ;;  %v5663_v53 = vld [vmem:[%s13417_s3 + $0x280] sm:$0xff] }
 0x41f   : > { %4110 = vmatpush.msrb.mxu3 %v5636_v10  ;;  %4033 = vmatpush.msra.mxu0 %v5623_v49  ;;  %v12672_v25 = vmax.f32 %v2159_v63, %v3649_v3  ;;  %v13833_v10 = vld [vmem:[#allocation129_spill] sm:$0xff]  ;;  %v13841_v44 = vld [vmem:[#allocation12_spill] sm:$0xff]  ;;  %v13842_v38 = vld [vmem:[#allocation91_spill] sm:$0xff] }
 0x420   : > { %4053 = vmatpush.msra.mxu1 %v5624_v16  ;;  %4090 = vmatpush.msrb.mxu2 %v5635_v19  ;;  %v1888_v49 = vadd.f32 %v13833_v10, %v1859_v11  ;;  %v2635_v27 = vadd.f32 %v13835_v50, %v2606_v39  ;;  %v5653_v16 = vld [vmem:[%s13417_s3 + $0x240] sm:$0xff]  ;;  %v5670_v19 = vld [vmem:[%s13417_s3 + $0x2b8] sm:$0xff]  ;;  %v1145_v30 = vadd.f32 %v13837_v43, %v1116_v62  ;;  %v5675_v21 = vld [vmem:[%s13417_s3 + $0x2d0] sm:$0xff] }
 0x421   : > { %4111 = vmatpush.msrb.mxu3 %v5634_v57  ;;  %4146 = vmatpush.msrb.mxu0 %v5649_v48  ;;  %v4189_v20 = vrot.slane %v12672_v25, 1  ;;  %v13838_v57 = vld [vmem:[#allocation132_spill] sm:$0xff]  ;;  %v1572_v9 = vadd.f32 %v13842_v38, %v1543_v18  ;;  %v13845_v13 = vld [vmem:[#allocation219_spill] sm:$0xff]  ;;  %v5674_v59 = vld [vmem:[%s13417_s3 + $0x2c8] sm:$0xff]  ;;  %v4305_v29 = vrot.slane %v12672_v25, 3 }
 0x422   : > { %4091 = vmatpush.msrb.mxu2 %v5633_v52  ;;  %4166 = vmatpush.msrb.mxu1 %v5650_v58  ;;  %v1917_v48 = vadd.f32 %v13838_v57, %v1888_v49  ;;  %v6889_v52 = vld [vmem:[%s13416_s2] ss:$0 sm:$0xff]  ;;  %v13839_v58 = vld [vmem:[#allocation174_spill] sm:$0xff]  ;;  %v2664_v40 = vadd.f32 %v13840_v15, %v2635_v27  ;;  %v5676_v33 = vld [vmem:[%s13417_s3 + $0x2d8] sm:$0xff] }
 0x423   : > { %4224 = vmatpush.msra.mxu3 %v5660_v1  ;;  %4147 = vmatpush.msrb.mxu0 %v5647_v24  ;;  %v2290_v35 = vadd.f32 %v6889_v52, %v13839_v58  ;;  %v5678_v1 = vld [vmem:[%s13417_s3 + $0x2e8] sm:$0xff]  ;;  %v5665_v24 = vld [vmem:[%s13417_s3 + $0x290] sm:$0xff]  ;;  %v800_v8 = vadd.f32 %v6889_v52, %v13841_v44  ;;  %v13846_v3 = vld [vmem:[#allocation56_spill] sm:$0xff] }
 0x424   : > { %5631 = vmatmul.msk.f32.vlgmr.msra.gmra.mxu0 %vm3665_vm1, %v4015_v0  ;;  %5632 = vmatmul.msk.f32.vlgmr.msra.gmra.mxu1 %vm3665_vm1, %v4015_v0  ;;  %v1946_v26 = vadd.f32 %v13843_v4, %v1917_v48  ;;  %v5666_v0 = vld [vmem:[%s13417_s3 + $0x298] sm:$0xff]  ;;  %v2693_v45 = vadd.f32 %v13845_v13, %v2664_v40  ;;  %v5673_v11 = vld [vmem:[%s13417_s3 + $0x2c0] sm:$0xff]  ;;  %v13852_v47 = vld [vmem:[#allocation222_spill] sm:$0xff] }
 0x425   : > { %4167 = vmatpush.msrb.mxu1 %v5648_v60  ;;  %4204 = vmatpush.msra.mxu2 %v5659_v17  ;;  %v5677_v60 = vld [vmem:[%s13417_s3 + $0x2e0] sm:$0xff]  ;;  %v13844_v17 = vld [vmem:[#allocation54_spill] sm:$0xff]  ;;  %v13849_v34 = vld [vmem:[#allocation99_spill] sm:$0xff] }
 0x426   : > { %5641 = vmatmul.msk.f32.vlgmr.msrb.gmra.mxu2 %vm3665_vm1, %v4073_v7  ;;  %5642 = vmatmul.msk.f32.vlgmr.msrb.gmra.mxu3 %vm3665_vm1, %v4073_v7  ;;  %v1174_v37 = vadd.f32 %v13844_v17, %v1145_v30  ;;  %v1601_v46 = vadd.f32 %v13849_v34, %v1572_v9  ;;  %v13850_v63 = vld [vmem:[#allocation144_spill] sm:$0xff]  ;;  %v2722_v39 = vadd.f32 %v13852_v47, %v2693_v45  ;;  %v13853_v10 = vld [vmem:[#allocation15_spill] sm:$0xff]  ;;  %v13854_v36 = vld [vmem:[#allocation145_spill] sm:$0xff]  ;;  %v4363_v34 = vrot.slane %v12672_v25, 4 }
 0x427   : > { %4225 = vmatpush.msra.mxu3 %v5658_v28  ;;  %4148 = vmatpush.msrb.mxu0 %v5645_v41  ;;  %v13847_v28 = vld [vmem:[#allocation175_spill] sm:$0xff]  ;;  %v5687_v43 = vld [vmem:[%s13417_s3 + $0x320] sm:$0xff]  ;;  %v5698_v52 = vld [vmem:[%s13417_s3 + $0x368] sm:$0xff] }
 0x428   : > { %4168 = vmatpush.msrb.mxu1 %v5646_v22  ;;  %4205 = vmatpush.msra.mxu2 %v5657_v2  ;;  %v1203_v7 = vadd.f32 %v13846_v3, %v1174_v37  ;;  %v2319_v41 = vadd.f32 %v13847_v28, %v2290_v35  ;;  %v13848_v22 = vld [vmem:[#allocation13_spill] sm:$0xff]  ;;  %v13855_v50 = vld [vmem:[#allocation59_spill] sm:$0xff]  ;;  %v13857_v30 = vld [vmem:[#allocation100_spill] sm:$0xff] }
 0x429   : > { %4226 = vmatpush.msra.mxu3 %v5656_v32  ;;  %4149 = vmatpush.msrb.mxu0 %v5643_v31  ;;  %v829_v2 = vadd.f32 %v13848_v22, %v800_v8  ;;  %v1975_v32 = vadd.f32 %v13850_v63, %v1946_v26  ;;  %v4247_v31 = vrot.slane %v12672_v25, 2  ;;  %v5700_v18 = vld [vmem:[%s13417_s3 + $0x378] sm:$0xff]  ;;  %v13858_v57 = vld [vmem:[#allocation69_spill] sm:$0xff]  ;;  %v5685_v58 = vld [vmem:[%s13417_s3 + $0x310] sm:$0xff] }
 0x42a   : > { %4169 = vmatpush.msrb.mxu1 %v5644_v12  ;;  %4206 = vmatpush.msra.mxu2 %v5655_v61  ;;  %v13851_v12 = vld [vmem:[#allocation177_spill] sm:$0xff]  ;;  %v1232_v27 = vadd.f32 %v13855_v50, %v1203_v7  ;;  %v13860_v35 = vld [vmem:[#allocation16_spill] sm:$0xff]  ;;  %v13861_v40 = vld [vmem:[#allocation102_spill] sm:$0xff] }
 0x42b   : > { %4227 = vmatpush.msra.mxu3 %v5654_v42  ;;  %4262 = vmatpush.msra.mxu0 %v5669_v6  ;;  %v2348_v61 = vadd.f32 %v13851_v12, %v2319_v41  ;;  %v5689_v42 = vld [vmem:[%s13417_s3 + $0x330] sm:$0xff]  ;;  %v5690_v6 = vld [vmem:[%s13417_s3 + $0x338] sm:$0xff]  ;;  %v858_v49 = vadd.f32 %v13853_v10, %v829_v2  ;;  %v2004_v62 = vadd.f32 %v13854_v36, %v1975_v32  ;;  %v5697_v38 = vld [vmem:[%s13417_s3 + $0x360] sm:$0xff]  ;;  %v3609_v2 = vpop.f32.mrf.mxu2 }
 0x42c   : > { %5651 = vmatmul.msk.f32.vlgmr.msrb.gmra.mxu0 %vm3665_vm1, %v12672_v25  ;;  %5652 = vmatmul.msk.f32.vlgmr.msrb.gmra.mxu1 %vm3665_vm1, %v12672_v25  ;;  %v1261_v48 = vadd.f32 %v13858_v57, %v1232_v27  ;;  %v5686_v8 = vld [vmem:[%s13417_s3 + $0x318] sm:$0xff]  ;;  %v13864_v26 = vld [vmem:[#allocation233_spill] sm:$0xff]  ;;  %v13866_v45 = vld [vmem:[#allocation158_spill] sm:$0xff] }
 0x42d   : > { %4207 = vmatpush.msra.mxu2 %v5653_v16  ;;  %4282 = vmatpush.msra.mxu1 %v5670_v19  ;;  %v13856_v16 = vld [vmem:[#allocation232_spill] sm:$0xff]  ;;  %v887_v15 = vadd.f32 %v13860_v35, %v858_v49  ;;  %v13865_v37 = vld [vmem:[#allocation25_spill] sm:$0xff]  ;;  %v13868_v7 = vld [vmem:[#allocation235_spill] sm:$0xff] }
 0x42e   : > { %5661 = vmatmul.msk.f32.vlgmr.msra.gmra.mxu2 %vm3665_vm1, %v4189_v20  ;;  %5662 = vmatmul.msk.f32.vlgmr.msra.gmra.mxu3 %vm3665_vm1, %v4189_v20  ;;  %v2751_v19 = vadd.f32 %v13856_v16, %v2722_v39  ;;  %v1630_v20 = vadd.f32 %v13857_v30, %v1601_v46  ;;  %v13863_v9 = vld [vmem:[#allocation188_spill] sm:$0xff]  ;;  %v13869_v41 = vld [vmem:[#allocation103_spill] sm:$0xff]  ;;  %v5694_v46 = vld [vmem:[%s13417_s3 + $0x348] sm:$0xff]  ;;  %v3610_v16 = vadd.f32 %v3609_v2, %v12389_v23  ;;  %v4479_v2 = vrot.slane %v12672_v25, 6 }
 0x42f   : > { %4340 = vmatpush.msrb.mxu3 %v5680_v14  ;;  %4263 = vmatpush.msra.mxu0 %v5667_v51  ;;  %v5688_v14 = vld [vmem:[%s13417_s3 + $0x328] sm:$0xff]  ;;  %v5699_v51 = vld [vmem:[%s13417_s3 + $0x370] sm:$0xff]  ;;  %v5683_v17 = vld [vmem:[%s13417_s3 + $0x300] sm:$0xff]  ;;  %v916_v13 = vadd.f32 %v13865_v37, %v887_v15 }
 0x430   : > { %4283 = vmatpush.msra.mxu1 %v5668_v5  ;;  %4320 = vmatpush.msrb.mxu2 %v5679_v54  ;;  %v13859_v5 = vld [vmem:[#allocation178_spill] sm:$0xff]  ;;  %v5693_v63 = vld [vmem:[%s13417_s3 + $0x340] sm:$0xff]  ;;  %v13875_v36 = vld [vmem:[#allocation191_spill] sm:$0xff] }
 0x431   : > { %4341 = vmatpush.msrb.mxu3 %v5678_v1  ;;  %4264 = vmatpush.msra.mxu0 %v5665_v24  ;;  %v2377_v54 = vadd.f32 %v13859_v5, %v2348_v61  ;;  %v1659_v1 = vadd.f32 %v13861_v40, %v1630_v20  ;;  %v13862_v24 = vld [vmem:[#allocation147_spill] sm:$0xff]  ;;  %v13870_v32 = vld [vmem:[#allocation72_spill] sm:$0xff]  ;;  %v13872_v47 = vld [vmem:[#allocation26_spill] sm:$0xff]  ;;  %v3638_v20 = vpop.f32.mrf.mxu3 }
 0x432   : > { %4284 = vmatpush.msra.mxu1 %v5666_v0  ;;  %4321 = vmatpush.msrb.mxu2 %v5677_v60  ;;  %v2033_v44 = vadd.f32 %v13862_v24, %v2004_v62  ;;  %v2780_v0 = vadd.f32 %v13864_v26, %v2751_v19  ;;  %v5696_v60 = vld [vmem:[%s13417_s3 + $0x358] sm:$0xff]  ;;  %v5709_v12 = vld [vmem:[%s13417_s3 + $0x3b0] sm:$0xff]  ;;  %v945_v39 = vadd.f32 %v13872_v47, %v916_v13  ;;  %v4421_v19 = vrot.slane %v12672_v25, 5  ;;  %v5708_v23 = vld [vmem:[%s13417_s3 + $0x3a8] sm:$0xff] }
 0x433   : > { %4342 = vmatpush.msrb.mxu3 %v5676_v33  ;;  %4265 = vmatpush.msra.mxu0 %v5663_v53  ;;  %v2406_v4 = vadd.f32 %v13863_v9, %v2377_v54  ;;  %v5684_v53 = vld [vmem:[%s13417_s3 + $0x308] sm:$0xff]  ;;  %v1688_v22 = vadd.f32 %v13869_v41, %v1659_v1  ;;  %v5710_v61 = vld [vmem:[%s13417_s3 + $0x3b8] sm:$0xff]  ;;  %v5705_v35 = vld [vmem:[%s13417_s3 + $0x390] sm:$0xff] }
 0x434   : > { %4285 = vmatpush.msra.mxu1 %v5664_v55  ;;  %4322 = vmatpush.msrb.mxu2 %v5675_v21  ;;  %v2062_v33 = vadd.f32 %v13866_v45, %v2033_v44  ;;  %v5695_v55 = vld [vmem:[%s13417_s3 + $0x350] sm:$0xff]  ;;  %v2809_v28 = vadd.f32 %v13868_v7, %v2780_v0  ;;  %v13874_v10 = vld [vmem:[#allocation160_spill] sm:$0xff]  ;;  %v13880_v54 = vld [vmem:[#allocation245_spill] sm:$0xff] }
 0x435   : > { %5671 = vmatmul.msk.f32.vlgmr.msra.gmra.mxu0 %vm3665_vm1, %v4247_v31  ;;  %5672 = vmatmul.msk.f32.vlgmr.msra.gmra.mxu1 %vm3665_vm1, %v4247_v31  ;;  %v13867_v21 = vld [vmem:[#allocation70_spill] sm:$0xff]  ;;  %v13881_v15 = vld [vmem:[#allocation115_spill] sm:$0xff]  ;;  %v5717_v24 = vld [vmem:[%s13417_s3 + $0x3e0] sm:$0xff] }
 0x436   : > { %4343 = vmatpush.msrb.mxu3 %v5674_v59  ;;  %4323 = vmatpush.msrb.mxu2 %v5673_v11  ;;  %v1290_v3 = vadd.f32 %v13867_v21, %v1261_v48  ;;  %v13871_v59 = vld [vmem:[#allocation189_spill] sm:$0xff]  ;;  %v2091_v49 = vadd.f32 %v13874_v10, %v2062_v33  ;;  %v13876_v50 = vld [vmem:[#allocation238_spill] sm:$0xff]  ;;  %v5706_v1 = vld [vmem:[%s13417_s3 + $0x398] sm:$0xff]  ;;  %v4537_v10 = vrot.slane %v12672_v25, 7 }
 0x437   : > { %4378 = vmatpush.msrb.mxu0 %v5689_v42  ;;  %4398 = vmatpush.msrb.mxu1 %v5690_v6  ;;  %v2435_v11 = vadd.f32 %v13871_v59, %v2406_v4  ;;  %v13873_v42 = vld [vmem:[#allocation114_spill] sm:$0xff]  ;;  %v2838_v27 = vadd.f32 %v13876_v50, %v2809_v28  ;;  %v13879_v48 = vld [vmem:[#allocation161_spill] sm:$0xff]  ;;  %v13882_v44 = vld [vmem:[#allocation83_spill] sm:$0xff]  ;;  %v3639_v4 = vadd.f32 %v3638_v20, %v3610_v16 }
 0x438   : > { %5681 = vmatmul.msk.f32.vlgmr.msrb.gmra.mxu2 %vm3665_vm1, %v4305_v29  ;;  %5682 = vmatmul.msk.f32.vlgmr.msrb.gmra.mxu3 %vm3665_vm1, %v4305_v29  ;;  %v1319_v31 = vadd.f32 %v13870_v32, %v1290_v3  ;;  %v1717_v6 = vadd.f32 %v13873_v42, %v1688_v22  ;;  %v5720_v29 = vld [vmem:[%s13417_s3 + $0x3f8] sm:$0xff]  ;;  %v2120_v5 = vadd.f32 %v13879_v48, %v2091_v49  ;;  %v5703_v0 = vld [vmem:[%s13417_s3 + $0x380] sm:$0xff]  ;;  %v5704_v45 = vld [vmem:[%s13417_s3 + $0x388] sm:$0xff] }
 0x439   : > { %4456 = vmatpush.msra.mxu3 %v5700_v18  ;;  %4379 = vmatpush.msrb.mxu0 %v5687_v43  ;;  %v2464_v62 = vadd.f32 %v13875_v36, %v2435_v11  ;;  %v5707_v18 = vld [vmem:[%s13417_s3 + $0x3a0] sm:$0xff]  ;;  %v5716_v26 = vld [vmem:[%s13417_s3 + $0x3d8] sm:$0xff]  ;;  %v5715_v33 = vld [vmem:[%s13417_s3 + $0x3d0] sm:$0xff] }
 0x43a   : > { %4399 = vmatpush.msrb.mxu1 %v5688_v14  ;;  %4436 = vmatpush.msra.mxu2 %v5699_v51  ;;  %v13877_v43 = vld [vmem:[#allocation28_spill] sm:$0xff]  ;;  %v5719_v14 = vld [vmem:[%s13417_s3 + $0x3f0] sm:$0xff]  ;;  %v1746_v40 = vadd.f32 %v13881_v15, %v1717_v6  ;;  %v13885_v37 = vld [vmem:[#allocation117_spill] sm:$0xff] }
 0x43b   : > { %4457 = vmatpush.msra.mxu3 %v5698_v52  ;;  %4380 = vmatpush.msrb.mxu0 %v5685_v58  ;;  %v974_v30 = vadd.f32 %v13877_v43, %v945_v39  ;;  %v13878_v51 = vld [vmem:[#allocation75_spill] sm:$0xff]  ;;  %v2867_v52 = vadd.f32 %v13880_v54, %v2838_v27  ;;  %v5718_v58 = vld [vmem:[%s13417_s3 + $0x3e8] sm:$0xff]  ;;  %v13887_v21 = vld [vmem:[#allocation204_spill] sm:$0xff] }
 0x43c   : > { %4400 = vmatpush.msrb.mxu1 %v5686_v8  ;;  %4437 = vmatpush.msra.mxu2 %v5697_v38  ;;  %v1348_v57 = vadd.f32 %v13878_v51, %v1319_v31  ;;  %v13883_v38 = vld [vmem:[#allocation193_spill] sm:$0xff]  ;;  %v1775_v13 = vadd.f32 %v13885_v37, %v1746_v40  ;;  %v13888_v7 = vld [vmem:[#allocation246_spill] sm:$0xff]  ;;  %v3646_v31 = vmax.f32 %v3639_v4, 0.0  ;;  %v5730_v11 = vld [vmem:[%s13417_s3 + $0x438] sm:$0xff] }
 0x43d   : > { %4458 = vmatpush.msra.mxu3 %v5696_v60  ;;  %4381 = vmatpush.msrb.mxu0 %v5683_v17  ;;  %v2493_v9 = vadd.f32 %v13883_v38, %v2464_v62  ;;  %v13884_v60 = vld [vmem:[#allocation30_spill] sm:$0xff]  ;;  %v2896_v28 = vadd.f32 %v13888_v7, %v2867_v52  ;;  %v13889_v41 = vld [vmem:[#allocation41_spill] sm:$0xff]  ;;  %v5740_v49 = vld [vmem:[%s13417_s3 + $0x478] sm:$0xff] }
 0x43e   : > { %4401 = vmatpush.msrb.mxu1 %v5684_v53  ;;  %4438 = vmatpush.msra.mxu2 %v5695_v55  ;;  %v1377_v8 = vadd.f32 %v13882_v44, %v1348_v57  ;;  %v1003_v17 = vadd.f32 %v13884_v60, %v974_v30  ;;  %v13886_v53 = vld [vmem:[#allocation164_spill] sm:$0xff]  ;;  %v5729_v59 = vld [vmem:[%s13417_s3 + $0x430] sm:$0xff]  ;;  %v13892_v39 = vld [vmem:[#allocation205_spill] sm:$0xff] }
 0x43f   : > { %5691 = vmatmul.msk.f32.vlgmr.msrb.gmra.mxu0 %vm3665_vm1, %v4363_v34  ;;  %5692 = vmatmul.msk.f32.vlgmr.msrb.gmra.mxu1 %vm3665_vm1, %v4363_v34  ;;  %v2149_v55 = vadd.f32 %v13886_v53, %v2120_v5  ;;  %v2522_v3 = vadd.f32 %v13887_v21, %v2493_v9  ;;  %v5714_v34 = vld [vmem:[%s13417_s3 + $0x3c8] sm:$0xff]  ;;  %v2903_v6 = vmax.f32 %v2896_v28, 0.0  ;;  %v5727_v36 = vld [vmem:[%s13417_s3 + $0x420] sm:$0xff]  ;;  %v5739_v25 = vld [vmem:[%s13417_s3 + $0x470] sm:$0xff] }
 0x440   : > { %4459 = vmatpush.msra.mxu3 %v5694_v46  ;;  %4439 = vmatpush.msra.mxu2 %v5693_v63  ;;  %v1032_v22 = vadd.f32 %v13889_v41, %v1003_v17  ;;  %v5713_v46 = vld [vmem:[%s13417_s3 + $0x3c0] sm:$0xff]  ;;  %v13893_v62 = vld [vmem:[#allocation42_spill] sm:$0xff]  ;;  %v5736_v54 = vld [vmem:[%s13417_s3 + $0x458] sm:$0xff] }
 0x441   : > { %4494 = vmatpush.msra.mxu0 %v5709_v12  ;;  %4514 = vmatpush.msra.mxu1 %v5710_v61  ;;  %v13890_v63 = vld [vmem:[#allocation84_spill] sm:$0xff]  ;;  %v13891_v12 = vld [vmem:[#allocation119_spill] sm:$0xff]  ;;  %v2156_v47 = vmax.f32 %v2149_v55, 0.0  ;;  %v2551_v42 = vadd.f32 %v13892_v39, %v2522_v3  ;;  %v5728_v27 = vld [vmem:[%s13417_s3 + $0x428] sm:$0xff]  ;;  %v3650_v30 = vmax.f32 %v2903_v6, %v3646_v31 }
 0x442   : > { %5701 = vmatmul.msk.f32.vlgmr.msra.gmra.mxu2 %vm3665_vm1, %v4421_v19  ;;  %5702 = vmatmul.msk.f32.vlgmr.msra.gmra.mxu3 %vm3665_vm1, %v4421_v19  ;;  %v1406_v32 = vadd.f32 %v13890_v63, %v1377_v8  ;;  %v1804_v61 = vadd.f32 %v13891_v12, %v1775_v13  ;;  %v1061_v50 = vadd.f32 %v13893_v62, %v1032_v22  ;;  %v13894_v19 = vld [vmem:[#allocation130_spill] sm:$0xff]  ;;  %v5737_v51 = vld [vmem:[%s13417_s3 + $0x460] sm:$0xff]  ;;  %v13897_v15 = vld [vmem:[#allocation131_spill] sm:$0xff] }
 0x443   : > { %4572 = vmatpush.msrb.mxu3 %v5720_v29  ;;  %4495 = vmatpush.msra.mxu0 %v5707_v18  ;;  %v13895_v18 = vld [vmem:[#allocation207_spill] sm:$0xff]  ;;  %v5738_v20 = vld [vmem:[%s13417_s3 + $0x468] sm:$0xff]  ;;  %v13896_v57 = vld [vmem:[#allocation44_spill] sm:$0xff] }
 0x444   : > { %4515 = vmatpush.msra.mxu1 %v5708_v23  ;;  %4552 = vmatpush.msrb.mxu2 %v5719_v14  ;;  %v1413_v16 = vmax.f32 %v1406_v32, 0.0  ;;  %v1833_v29 = vadd.f32 %v13894_v19, %v1804_v61  ;;  %v2580_v43 = vadd.f32 %v13895_v18, %v2551_v42  ;;  %v5725_v23 = vld [vmem:[%s13417_s3 + $0x410] sm:$0xff]  ;;  %v5726_v14 = vld [vmem:[%s13417_s3 + $0x418] sm:$0xff]  ;;  %v1090_v48 = vadd.f32 %v13896_v57, %v1061_v50  ;;  %v5723_v52 = vld [vmem:[%s13417_s3 + $0x400] sm:$0xff] }
 0x445   : > { %4573 = vmatpush.msrb.mxu3 %v5718_v58  ;;  %4496 = vmatpush.msra.mxu0 %v5705_v35  ;;  %v5724_v58 = vld [vmem:[%s13417_s3 + $0x408] sm:$0xff]  ;;  %v5735_v35 = vld [vmem:[%s13417_s3 + $0x450] sm:$0xff]  ;;  %v5733_v38 = vld [vmem:[%s13417_s3 + $0x440] sm:$0xff] }
 0x446   : > { %4516 = vmatpush.msra.mxu1 %v5706_v1  ;;  %4553 = vmatpush.msrb.mxu2 %v5717_v24  ;;  %v2160_v5 = vmax.f32 %v1413_v16, %v2156_v47  ;;  %v1862_v40 = vadd.f32 %v13897_v15, %v1833_v29  ;;  %v13898_v1 = vld [vmem:[#allocation209_spill] sm:$0xff]  ;;  %v13899_v9 = vld [vmem:[#allocation46_spill] sm:$0xff]  ;;  %v13901_v60 = vld [vmem:[#allocation220_spill] sm:$0xff] }
 0x447   : > { %4574 = vmatpush.msrb.mxu3 %v5716_v26  ;;  %4497 = vmatpush.msra.mxu0 %v5703_v0  ;;  %v2609_v24 = vadd.f32 %v13898_v1, %v2580_v43  ;;  %v5734_v8 = vld [vmem:[%s13417_s3 + $0x448] sm:$0xff]  ;;  %v1119_v4 = vadd.f32 %v13899_v9, %v1090_v48  ;;  %v5749_v37 = vld [vmem:[%s13417_s3 + $0x4b0] sm:$0xff]  ;;  %v5750_v13 = vld [vmem:[%s13417_s3 + $0x4b8] sm:$0xff] }
 0x448   : > { %4517 = vmatpush.msra.mxu1 %v5704_v45  ;;  %4554 = vmatpush.msrb.mxu2 %v5715_v33  ;;  %v12962_v44 = vmax.f32 %v2160_v5, %v3650_v30  ;;  %v13900_v26 = vld [vmem:[#allocation133_spill] sm:$0xff]  ;;  %v5760_v55 = vld [vmem:[%s13417_s3 + $0x4f8] sm:$0xff]  ;;  %v5759_v7 = vld [vmem:[%s13417_s3 + $0x4f0] sm:$0xff] }
 0x449   : > { %5711 = vmatmul.msk.f32.vlgmr.msra.gmra.mxu0 %vm3665_vm1, %v4479_v2  ;;  %5712 = vmatmul.msk.f32.vlgmr.msra.gmra.mxu1 %vm3665_vm1, %v4479_v2  ;;  %v1891_v0 = vadd.f32 %v13900_v26, %v1862_v40  ;;  %v2638_v17 = vadd.f32 %v13901_v60, %v2609_v24  ;;  %v13902_v45 = vld [vmem:[#allocation57_spill] sm:$0xff]  ;;  %v13903_v28 = vld [vmem:[#allocation134_spill] sm:$0xff]  ;;  %v5746_v63 = vld [vmem:[%s13417_s3 + $0x498] sm:$0xff] }
 0x44a   : > { %4575 = vmatpush.msrb.mxu3 %v5714_v34  ;;  %4555 = vmatpush.msrb.mxu2 %v5713_v46  ;;  %v1148_v33 = vadd.f32 %v13902_v45, %v1119_v4  ;;  %v4653_v53 = vrot.slane %v12962_v44, 1  ;;  %v5747_v21 = vld [vmem:[%s13417_s3 + $0x4a0] sm:$0xff]  ;;  %v5748_v3 = vld [vmem:[%s13417_s3 + $0x4a8] sm:$0xff]  ;;  %v5745_v46 = vld [vmem:[%s13417_s3 + $0x490] sm:$0xff]  ;;  %v4711_v62 = vrot.slane %v12962_v44, 2  ;;  %v4769_v48 = vrot.slane %v12962_v44, 3 }
 0x44b   : > { %4610 = vmatpush.msrb.mxu0 %v5729_v59  ;;  %4630 = vmatpush.msrb.mxu1 %v5730_v11  ;;  %v1920_v41 = vadd.f32 %v13903_v28, %v1891_v0  ;;  %v13904_v22 = vld [vmem:[#allocation221_spill] sm:$0xff]  ;;  %v13905_v31 = vld [vmem:[#allocation58_spill] sm:$0xff]  ;;  %v13907_v61 = vld [vmem:[#allocation223_spill] sm:$0xff] }
 0x44c   : > { %5721 = vmatmul.msk.f32.vlgmr.msrb.gmra.mxu2 %vm3665_vm1, %v4537_v10  ;;  %5722 = vmatmul.msk.f32.vlgmr.msrb.gmra.mxu3 %vm3665_vm1, %v4537_v10  ;;  %v2667_v2 = vadd.f32 %v13904_v22, %v2638_v17  ;;  %v5758_v34 = vld [vmem:[%s13417_s3 + $0x4e8] sm:$0xff]  ;;  %v5757_v32 = vld [vmem:[%s13417_s3 + $0x4e0] sm:$0xff]  ;;  %v1177_v59 = vadd.f32 %v13905_v31, %v1148_v33  ;;  %v5756_v39 = vld [vmem:[%s13417_s3 + $0x4d8] sm:$0xff] }
 0x44d   : > { %4688 = vmatpush.msra.mxu3 %v5740_v49  ;;  %4611 = vmatpush.msrb.mxu0 %v5727_v36  ;;  %v13906_v11 = vld [vmem:[#allocation146_spill] sm:$0xff]  ;;  %v5743_v42 = vld [vmem:[%s13417_s3 + $0x480] sm:$0xff]  ;;  %v5770_v43 = vld [vmem:[%s13417_s3 + $0x538] sm:$0xff] }
 0x44e   : > { %4631 = vmatpush.msrb.mxu1 %v5728_v27  ;;  %4668 = vmatpush.msra.mxu2 %v5739_v25  ;;  %v1949_v12 = vadd.f32 %v13906_v11, %v1920_v41  ;;  %v2696_v47 = vadd.f32 %v13907_v61, %v2667_v2  ;;  %v5744_v6 = vld [vmem:[%s13417_s3 + $0x488] sm:$0xff]  ;;  %v5755_v10 = vld [vmem:[%s13417_s3 + $0x4d0] sm:$0xff]  ;;  %v13908_v49 = vld [vmem:[#allocation60_spill] sm:$0xff] }
 0x44f   : > { %4689 = vmatpush.msra.mxu3 %v5738_v20  ;;  %4612 = vmatpush.msrb.mxu0 %v5725_v23  ;;  %v1206_v36 = vadd.f32 %v13908_v49, %v1177_v59  ;;  %v5754_v50 = vld [vmem:[%s13417_s3 + $0x4c8] sm:$0xff]  ;;  %v5753_v27 = vld [vmem:[%s13417_s3 + $0x4c0] sm:$0xff]  ;;  %v5769_v18 = vld [vmem:[%s13417_s3 + $0x530] sm:$0xff] }
 0x450   : > { %4632 = vmatpush.msrb.mxu1 %v5726_v14  ;;  %4669 = vmatpush.msra.mxu2 %v5737_v51  ;;  %v13909_v25 = vld [vmem:[#allocation148_spill] sm:$0xff]  ;;  %v13911_v30 = vld [vmem:[#allocation61_spill] sm:$0xff]  ;;  %v5765_v1 = vld [vmem:[%s13417_s3 + $0x510] sm:$0xff] }
 0x451   : > { %4690 = vmatpush.msra.mxu3 %v5736_v54  ;;  %4613 = vmatpush.msrb.mxu0 %v5723_v52  ;;  %v1978_v16 = vadd.f32 %v13909_v25, %v1949_v12  ;;  %v13910_v19 = vld [vmem:[#allocation224_spill] sm:$0xff]  ;;  %v1235_v20 = vadd.f32 %v13911_v30, %v1206_v36  ;;  %v13912_v23 = vld [vmem:[#allocation149_spill] sm:$0xff]  ;;  %v13918_v33 = vld [vmem:[#allocation162_spill] sm:$0xff]  ;;  %v4885_v12 = vrot.slane %v12962_v44, 5 }
 0x452   : > { %4633 = vmatpush.msrb.mxu1 %v5724_v58  ;;  %4670 = vmatpush.msra.mxu2 %v5735_v35  ;;  %v2725_v29 = vadd.f32 %v13910_v19, %v2696_v47  ;;  %v13913_v51 = vld [vmem:[#allocation236_spill] sm:$0xff]  ;;  %v5768_v52 = vld [vmem:[%s13417_s3 + $0x528] sm:$0xff]  ;;  %v5779_v58 = vld [vmem:[%s13417_s3 + $0x570] sm:$0xff] }
 0x453   : > { %5731 = vmatmul.msk.f32.vlgmr.msrb.gmra.mxu0 %vm3665_vm1, %v12962_v44  ;;  %5732 = vmatmul.msk.f32.vlgmr.msrb.gmra.mxu1 %vm3665_vm1, %v12962_v44  ;;  %v2007_v14 = vadd.f32 %v13912_v23, %v1978_v16  ;;  %v5780_v5 = vld [vmem:[%s13417_s3 + $0x578] sm:$0xff]  ;;  %v5767_v54 = vld [vmem:[%s13417_s3 + $0x520] sm:$0xff]  ;;  %v5778_v40 = vld [vmem:[%s13417_s3 + $0x568] sm:$0xff] }
 0x454   : > { %4691 = vmatpush.msra.mxu3 %v5734_v8  ;;  %4671 = vmatpush.msra.mxu2 %v5733_v38  ;;  %v2754_v57 = vadd.f32 %v13913_v51, %v2725_v29  ;;  %v13914_v35 = vld [vmem:[#allocation73_spill] sm:$0xff]  ;;  %v5766_v24 = vld [vmem:[%s13417_s3 + $0x518] sm:$0xff]  ;;  %v13915_v38 = vld [vmem:[#allocation150_spill] sm:$0xff] }
 0x455   : > { %4726 = vmatpush.msra.mxu0 %v5749_v37  ;;  %4746 = vmatpush.msra.mxu1 %v5750_v13  ;;  %v1264_v15 = vadd.f32 %v13914_v35, %v1235_v20  ;;  %v5777_v8 = vld [vmem:[%s13417_s3 + $0x560] sm:$0xff]  ;;  %v2036_v9 = vadd.f32 %v13915_v38, %v2007_v14  ;;  %v5776_v0 = vld [vmem:[%s13417_s3 + $0x558] sm:$0xff]  ;;  %v5764_v17 = vld [vmem:[%s13417_s3 + $0x508] sm:$0xff] }
 0x456   : > { %5741 = vmatmul.msk.f32.vlgmr.msra.gmra.mxu2 %vm3665_vm1, %v4653_v53  ;;  %5742 = vmatmul.msk.f32.vlgmr.msra.gmra.mxu3 %vm3665_vm1, %v4653_v53  ;;  %v13916_v4 = vld [vmem:[#allocation237_spill] sm:$0xff]  ;;  %v5775_v37 = vld [vmem:[%s13417_s3 + $0x550] sm:$0xff]  ;;  %v13920_v22 = vld [vmem:[#allocation76_spill] sm:$0xff] }
 0x457   : > { %4804 = vmatpush.msrb.mxu3 %v5760_v55  ;;  %4727 = vmatpush.msra.mxu0 %v5747_v21  ;;  %v2783_v26 = vadd.f32 %v13916_v4, %v2754_v57  ;;  %v5763_v60 = vld [vmem:[%s13417_s3 + $0x500] sm:$0xff]  ;;  %v13917_v13 = vld [vmem:[#allocation74_spill] sm:$0xff]  ;;  %v2065_v53 = vadd.f32 %v13918_v33, %v2036_v9  ;;  %v13919_v55 = vld [vmem:[#allocation239_spill] sm:$0xff]  ;;  %v5001_v9 = vrot.slane %v12962_v44, 7 }
 0x458   : > { %4747 = vmatpush.msra.mxu1 %v5748_v3  ;;  %4784 = vmatpush.msrb.mxu2 %v5759_v7  ;;  %v1293_v45 = vadd.f32 %v13917_v13, %v1264_v15  ;;  %v3612_v3 = vpop.f32.mrf.mxu2  ;;  %v4827_v7 = vrot.slane %v12962_v44, 4  ;;  %v5774_v28 = vld [vmem:[%s13417_s3 + $0x548] sm:$0xff]  ;;  %v5773_v41 = vld [vmem:[%s13417_s3 + $0x540] sm:$0xff]  ;;  %v5800_v61 = vld [vmem:[%s13417_s3 + $0x5f8] sm:$0xff] }
 0x459   : > { %4805 = vmatpush.msrb.mxu3 %v5758_v34  ;;  %4728 = vmatpush.msra.mxu0 %v5745_v46  ;;  %v2812_v21 = vadd.f32 %v13919_v55, %v2783_v26  ;;  %v5789_v34 = vld [vmem:[%s13417_s3 + $0x5b0] sm:$0xff]  ;;  %v5790_v46 = vld [vmem:[%s13417_s3 + $0x5b8] sm:$0xff]  ;;  %v3613_v11 = vadd.f32 %v3612_v3, %v12418_v56  ;;  %v5787_v47 = vld [vmem:[%s13417_s3 + $0x5a0] sm:$0xff] }
 0x45a   : > { %4748 = vmatpush.msra.mxu1 %v5746_v63  ;;  %4785 = vmatpush.msrb.mxu2 %v5757_v32  ;;  %v1322_v2 = vadd.f32 %v13920_v22, %v1293_v45  ;;  %v13921_v63 = vld [vmem:[#allocation163_spill] sm:$0xff]  ;;  %v13922_v31 = vld [vmem:[#allocation240_spill] sm:$0xff]  ;;  %v13924_v49 = vld [vmem:[#allocation165_spill] sm:$0xff] }
 0x45b   : > { %4806 = vmatpush.msrb.mxu3 %v5756_v39  ;;  %4729 = vmatpush.msra.mxu0 %v5743_v42  ;;  %v2094_v32 = vadd.f32 %v13921_v63, %v2065_v53  ;;  %v2841_v59 = vadd.f32 %v13922_v31, %v2812_v21  ;;  %v3641_v39 = vpop.f32.mrf.mxu3  ;;  %v5788_v42 = vld [vmem:[%s13417_s3 + $0x5a8] sm:$0xff]  ;;  %v5799_v56 = vld [vmem:[%s13417_s3 + $0x5f0] sm:$0xff]  ;;  %v5786_v16 = vld [vmem:[%s13417_s3 + $0x598] sm:$0xff] }
 0x45c   : > { %4749 = vmatpush.msra.mxu1 %v5744_v6  ;;  %4786 = vmatpush.msrb.mxu2 %v5755_v10  ;;  %v13923_v6 = vld [vmem:[#allocation77_spill] sm:$0xff]  ;;  %v5785_v25 = vld [vmem:[%s13417_s3 + $0x590] sm:$0xff]  ;;  %v5796_v30 = vld [vmem:[%s13417_s3 + $0x5d8] sm:$0xff] }
 0x45d   : > { %5751 = vmatmul.msk.f32.vlgmr.msra.gmra.mxu0 %vm3665_vm1, %v4711_v62  ;;  %5752 = vmatmul.msk.f32.vlgmr.msra.gmra.mxu1 %vm3665_vm1, %v4711_v62  ;;  %v1351_v10 = vadd.f32 %v13923_v6, %v1322_v2  ;;  %v2123_v36 = vadd.f32 %v13924_v49, %v2094_v32  ;;  %v13925_v62 = vld [vmem:[#allocation247_spill] sm:$0xff]  ;;  %v5797_v19 = vld [vmem:[%s13417_s3 + $0x5e0] sm:$0xff]  ;;  %v5784_v23 = vld [vmem:[%s13417_s3 + $0x588] sm:$0xff] }
 0x45e   : > { %4807 = vmatpush.msrb.mxu3 %v5754_v50  ;;  %4787 = vmatpush.msrb.mxu2 %v5753_v27  ;;  %v2870_v50 = vadd.f32 %v13925_v62, %v2841_v59  ;;  %v5798_v27 = vld [vmem:[%s13417_s3 + $0x5e8] sm:$0xff]  ;;  %v13926_v29 = vld [vmem:[#allocation87_spill] sm:$0xff]  ;;  %v5783_v20 = vld [vmem:[%s13417_s3 + $0x580] sm:$0xff] }
 0x45f   : > { %4842 = vmatpush.msrb.mxu0 %v5769_v18  ;;  %4862 = vmatpush.msrb.mxu1 %v5770_v43  ;;  %v1380_v18 = vadd.f32 %v13926_v29, %v1351_v10  ;;  %v3642_v43 = vadd.f32 %v3641_v39, %v3613_v11  ;;  %v5795_v14 = vld [vmem:[%s13417_s3 + $0x5d0] sm:$0xff]  ;;  %v13929_v35 = vld [vmem:[#allocation88_spill] sm:$0xff]  ;;  %v5808_v26 = vld [vmem:[%s13417_s3 + $0x628] sm:$0xff] }
 0x460   : > { %5761 = vmatmul.msk.f32.vlgmr.msrb.gmra.mxu2 %vm3665_vm1, %v4769_v48  ;;  %5762 = vmatmul.msk.f32.vlgmr.msrb.gmra.mxu3 %vm3665_vm1, %v4769_v48  ;;  %v13927_v51 = vld [vmem:[#allocation166_spill] sm:$0xff]  ;;  %v13928_v48 = vld [vmem:[#allocation248_spill] sm:$0xff] }
 0x461   : > { %4920 = vmatpush.msra.mxu3 %v5780_v5  ;;  %4843 = vmatpush.msrb.mxu0 %v5767_v54  ;;  %v2152_v57 = vadd.f32 %v13927_v51, %v2123_v36  ;;  %v2899_v5 = vadd.f32 %v13928_v48, %v2870_v50  ;;  %v4943_v54 = vrot.slane %v12962_v44, 6  ;;  %v1409_v15 = vadd.f32 %v13929_v35, %v1380_v18  ;;  %v5807_v4 = vld [vmem:[%s13417_s3 + $0x620] sm:$0xff]  ;;  %v5805_v44 = vld [vmem:[%s13417_s3 + $0x610] sm:$0xff]  ;;  %v5804_v45 = vld [vmem:[%s13417_s3 + $0x608] sm:$0xff] }
 0x462   : > { %4863 = vmatpush.msrb.mxu1 %v5768_v52  ;;  %4900 = vmatpush.msra.mxu2 %v5779_v58  ;;  %v5794_v52 = vld [vmem:[%s13417_s3 + $0x5c8] sm:$0xff]  ;;  %v5793_v58 = vld [vmem:[%s13417_s3 + $0x5c0] sm:$0xff]  ;;  %v5124_v48 = vld [vmem:[%s13419_s5 + $0x78] sm:$0xff] }
 0x463   : > { %4921 = vmatpush.msra.mxu3 %v5778_v40  ;;  %4844 = vmatpush.msrb.mxu0 %v5765_v1  ;;  %v3647_v40 = vmax.f32 %v3642_v43, 0.0  ;;  %v5809_v1 = vld [vmem:[%s13417_s3 + $0x630] sm:$0xff]  ;;  %v2904_v38 = vmax.f32 %v2899_v5, 0.0  ;;  %v5803_v13 = vld [vmem:[%s13417_s3 + $0x600] sm:$0xff]  ;;  %v5140_v5 = vld [vmem:[%s13419_s5 + $0xf8] sm:$0xff] }
 0x464   : > { %4864 = vmatpush.msrb.mxu1 %v5766_v24  ;;  %4901 = vmatpush.msra.mxu2 %v5777_v8  ;;  %v5810_v24 = vld [vmem:[%s13417_s3 + $0x638] sm:$0xff]  ;;  %v2157_v8 = vmax.f32 %v2152_v57, 0.0  ;;  %v3656_v10 = vld [vmem:[%s13418_s4] sm:$0x3] }
 0x465   : > { %4922 = vmatpush.msra.mxu3 %v5776_v0  ;;  %4845 = vmatpush.msrb.mxu0 %v5763_v60  ;;  %v1414_v0 = vmax.f32 %v1409_v15, 0.0  ;;  %v3651_v60 = vmax.f32 %v2904_v38, %v3647_v40 }
 0x466   : > { %4865 = vmatpush.msrb.mxu1 %v5764_v17  ;;  %4902 = vmatpush.msra.mxu2 %v5775_v37  ;;  %v5806_v17 = vld [vmem:[%s13417_s3 + $0x618] sm:$0xff] }
 0x467   : > { %5771 = vmatmul.msk.f32.vlgmr.msrb.gmra.mxu0 %vm3665_vm1, %v4827_v7  ;;  %5772 = vmatmul.msk.f32.vlgmr.msrb.gmra.mxu1 %vm3665_vm1, %v4827_v7  ;;  %v2161_v37 = vmax.f32 %v1414_v0, %v2157_v8 }
 0x468   : > { %4923 = vmatpush.msra.mxu3 %v5774_v28  ;;  %4903 = vmatpush.msra.mxu2 %v5773_v41 }
 0x469   : > { %4958 = vmatpush.msra.mxu0 %v5789_v34  ;;  %4978 = vmatpush.msra.mxu1 %v5790_v46  ;;  %v3655_v33 = vmax.f32 %v2161_v37, %v3651_v60  ;;  %v5121_v37 = vld [vmem:[%s13419_s5 + $0x60] sm:$0xff] }
 0x46a   : > { %5781 = vmatmul.msk.f32.vlgmr.msra.gmra.mxu2 %vm3665_vm1, %v4885_v12  ;;  %5782 = vmatmul.msk.f32.vlgmr.msra.gmra.mxu3 %vm3665_vm1, %v4885_v12 }
 0x46b   : > { %5036 = vmatpush.msrb.mxu3 %v5800_v61  ;;  %4959 = vmatpush.msra.mxu0 %v5787_v47 }
 0x46c   : > { %4979 = vmatpush.msra.mxu1 %v5788_v42  ;;  %5016 = vmatpush.msrb.mxu2 %v5799_v56 }
 0x46d   : > { %5037 = vmatpush.msrb.mxu3 %v5798_v27  ;;  %4960 = vmatpush.msra.mxu0 %v5785_v25 }
 0x46e   : > { %4980 = vmatpush.msra.mxu1 %v5786_v16  ;;  %5017 = vmatpush.msrb.mxu2 %v5797_v19 }
 0x46f   : > { %5038 = vmatpush.msrb.mxu3 %v5796_v30  ;;  %4961 = vmatpush.msra.mxu0 %v5783_v20 }
 0x470   : > { %4981 = vmatpush.msra.mxu1 %v5784_v23  ;;  %5018 = vmatpush.msrb.mxu2 %v5795_v14 }
 0x471   : > { %5791 = vmatmul.msk.f32.vlgmr.msra.gmra.mxu0 %vm3665_vm1, %v4943_v54  ;;  %5792 = vmatmul.msk.f32.vlgmr.msra.gmra.mxu1 %vm3665_vm1, %v4943_v54  ;;  %v5123_v54 = vld [vmem:[%s13419_s5 + $0x70] sm:$0xff] }
 0x472   : > { %5039 = vmatpush.msrb.mxu3 %v5794_v52  ;;  %5019 = vmatpush.msrb.mxu2 %v5793_v58  ;;  %v5139_v52 = vld [vmem:[%s13419_s5 + $0xf0] sm:$0xff] }
 0x473   : > { %5074 = vmatpush.msrb.mxu0 %v5809_v1  ;;  %5094 = vmatpush.msrb.mxu1 %v5810_v24 }
 0x474   : > { %5801 = vmatmul.msk.f32.vlgmr.msrb.gmra.mxu2 %vm3665_vm1, %v5001_v9  ;;  %5802 = vmatmul.msk.f32.vlgmr.msrb.gmra.mxu3 %vm3665_vm1, %v5001_v9 }
 0x475   : > { %5075 = vmatpush.msrb.mxu0 %v5807_v4  ;;  %5095 = vmatpush.msrb.mxu1 %v5808_v26  ;;  %v5122_v4 = vld [vmem:[%s13419_s5 + $0x68] sm:$0xff] }
 0x476   : > { %5147 = vmatpush.msra.mxu2 %v5124_v48  ;;  %5167 = vmatpush.msra.mxu3 %v5140_v5  ;;  %v5138_v26 = vld [vmem:[%s13419_s5 + $0xe8] sm:$0xff]  ;;  %v5128_v5 = vld [vmem:[%s13419_s5 + $0x98] sm:$0xff] }
 0x477   : > { %5076 = vmatpush.msrb.mxu0 %v5805_v44  ;;  %5096 = vmatpush.msrb.mxu1 %v5806_v17 }
 0x478   : > { %5148 = vmatpush.msra.mxu2 %v5123_v54  ;;  %5168 = vmatpush.msra.mxu3 %v5139_v52 }
 0x479   : > { %5077 = vmatpush.msrb.mxu0 %v5803_v13  ;;  %5097 = vmatpush.msrb.mxu1 %v5804_v45  ;;  %v5137_v13 = vld [vmem:[%s13419_s5 + $0xe0] sm:$0xff]  ;;  %v5120_v45 = vld [vmem:[%s13419_s5 + $0x58] sm:$0xff] }
 0x47a   : > { %5811 = vmatmul.msk.f32.vlgmr.msrb.gmra.mxu0 %vm3665_vm1, %v3655_v33  ;;  %5812 = vmatmul.msk.f32.vlgmr.msrb.gmra.mxu1 %vm3665_vm1, %v3655_v33 }
 0x47b   : > { %5149 = vmatpush.msra.mxu2 %v5122_v4  ;;  %5169 = vmatpush.msra.mxu3 %v5138_v26 }
 0x47d   : > { %5150 = vmatpush.msra.mxu2 %v5121_v37  ;;  %5170 = vmatpush.msra.mxu3 %v5137_v13 }
 0x47f   : > { %5151 = vmatpush.msra.mxu2 %v5120_v45 }
 0x489   : > { %v3686_v53 = vpop.f32.mrf.mxu0  ;;  %v3706_v55 = vpop.f32.mrf.mxu1 }
 0x48a   : > { %v3711_v47 = vrot.slane %v3706_v55, 7  ;;  %v5136_v55 = vld [vmem:[%s13419_s5 + $0xd8] sm:$0xff] }
 0x48b   : > { %5171 = vmatpush.msra.mxu3 %v5136_v55 }
 0x48c   : > { %v3713_v49 = vsel %vm3712_vm2, %v3686_v53, %v3711_v47 }
 0x48d   : > { %v3715_v50 = vadd.f32 %v3713_v49, %v3656_v10  ;;  %v5131_v49 = vld [vmem:[%s13419_s5 + $0xb0] sm:$0xff] }
 0x491   : > { %v3745_v21 = vpop.f32.mrf.mxu2  ;;  %v3765_v3 = vpop.f32.mrf.mxu3 }
 0x492   : > { %v3803_v7 = vpop.f32.mrf.mxu0  ;;  %v3823_v28 = vpop.f32.mrf.mxu1  ;;  %v3770_v42 = vrot.slane %v3765_v3, 7  ;;  %v5119_v3 = vld [vmem:[%s13419_s5 + $0x50] sm:$0xff] }
 0x493   : > { %v3828_v27 = vrot.slane %v3823_v28, 7  ;;  %5152 = vmatpush.msra.mxu2 %v5119_v3 }
 0x494   : > { %v3771_v62 = vsel %vm3712_vm2, %v3745_v21, %v3770_v42  ;;  %v5132_v42 = vld [vmem:[%s13419_s5 + $0xb8] sm:$0xff] }
 0x495   : > { %v3773_v16 = vadd.f32 %v3771_v62, %v3715_v50  ;;  %v3829_v29 = vsel %vm3712_vm2, %v3803_v7, %v3828_v27  ;;  %v5135_v7 = vld [vmem:[%s13419_s5 + $0xd0] sm:$0xff] }
 0x496   : > { %5172 = vmatpush.msra.mxu3 %v5135_v7 }
 0x497   : > { %v3831_v30 = vadd.f32 %v3829_v29, %v3773_v16  ;;  %v5130_v16 = vld [vmem:[%s13419_s5 + $0xa8] sm:$0xff] }
 0x499   : > { %v3861_v41 = vpop.f32.mrf.mxu2  ;;  %v3881_v22 = vpop.f32.mrf.mxu3 }
 0x49a   : > { %v3919_v2 = vpop.f32.mrf.mxu0  ;;  %v3939_v34 = vpop.f32.mrf.mxu1  ;;  %v3886_v25 = vrot.slane %v3881_v22, 7 }
 0x49b   : > { %v3944_v23 = vrot.slane %v3939_v34, 7  ;;  %v5118_v34 = vld [vmem:[%s13419_s5 + $0x48] sm:$0xff] }
 0x49c   : > { %v3887_v18 = vsel %vm3712_vm2, %v3861_v41, %v3886_v25  ;;  %5153 = vmatpush.msra.mxu2 %v5118_v34 }
 0x49d   : > { %v3889_v51 = vadd.f32 %v3887_v18, %v3831_v30  ;;  %v3945_v58 = vsel %vm3712_vm2, %v3919_v2, %v3944_v23  ;;  %v5113_v30 = vld [vmem:[%s13419_s5 + $0x20] sm:$0xff] }
 0x49f   : > { %v3947_v15 = vadd.f32 %v3945_v58, %v3889_v51  ;;  %v5111_v58 = vld [vmem:[%s13419_s5 + $0x10] sm:$0xff] }
 0x4a1   : > { %v3977_v46 = vpop.f32.mrf.mxu2  ;;  %v3997_v63 = vpop.f32.mrf.mxu3 }
 0x4a2   : > { %v4035_v32 = vpop.f32.mrf.mxu0  ;;  %v4055_v31 = vpop.f32.mrf.mxu1  ;;  %v4002_v14 = vrot.slane %v3997_v63, 7 }
 0x4a3   : > { %v4060_v40 = vrot.slane %v4055_v31, 7 }
 0x4a4   : > { %v4003_v35 = vsel %vm3712_vm2, %v3977_v46, %v4002_v14  ;;  %v5134_v46 = vld [vmem:[%s13419_s5 + $0xc8] sm:$0xff] }
 0x4a5   : > { %v4005_v24 = vadd.f32 %v4003_v35, %v3947_v15  ;;  %v4061_v0 = vsel %vm3712_vm2, %v4035_v32, %v4060_v40  ;;  %5173 = vmatpush.msra.mxu3 %v5134_v46  ;;  %v5127_v35 = vld [vmem:[%s13419_s5 + $0x90] sm:$0xff] }
 0x4a7   : > { %v4063_v44 = vadd.f32 %v4061_v0, %v4005_v24  ;;  %v5126_v24 = vld [vmem:[%s13419_s5 + $0x88] sm:$0xff] }
 0x4a9   : > { %v4093_v59 = vpop.f32.mrf.mxu2  ;;  %v4113_v11 = vpop.f32.mrf.mxu3 }
 0x4aa   : > { %v13197_v12 = vpop.f32.mrf.mxu1  ;;  %v13199_v61 = vpop.f32.mrf.mxu0  ;;  %v4118_v1 = vrot.slane %v4113_v11, 7 }
 0x4ab   : > { %v4176_v33 = vrot.slane %v13197_v12, 7  ;;  %v5117_v12 = vld [vmem:[%s13419_s5 + $0x40] sm:$0xff] }
 0x4ac   : > { %v4119_v60 = vsel %vm3712_vm2, %v4093_v59, %v4118_v1  ;;  %5154 = vmatpush.msra.mxu2 %v5117_v12  ;;  %v5110_v1 = vld [vmem:[%s13419_s5 + $0x8] sm:$0xff] }
 0x4ad   : > { %v4121_v21 = vadd.f32 %v4119_v60, %v4063_v44  ;;  %v4177_v28 = vsel %vm3712_vm2, %v13199_v61, %v4176_v33  ;;  %v5133_v61 = vld [vmem:[%s13419_s5 + $0xc0] sm:$0xff]  ;;  %v5191_v44 = vld [vmem:[%s13421_s7 + $0x18] sm:$0xff] }
 0x4ae   : > { %5174 = vmatpush.msra.mxu3 %v5133_v61  ;;  %5208 = vmatpush.msra.mxu0 %v5191_v44 }
 0x4af   : > { %v4179_v22 = vadd.f32 %v4177_v28, %v4121_v21 }
 0x4b0   : > { %5175 = vmatpush.msra.mxu3 %v5132_v42 }
 0x4b1   : > { %v13201_v39 = vpop.f32.mrf.mxu3  ;;  %v4209_v6 = vpop.f32.mrf.mxu2 }
 0x4b2   : > { %v13203_v56 = vpop.f32.mrf.mxu1  ;;  %v13209_v36 = vpop.f32.mrf.mxu0  ;;  %v4234_v53 = vrot.slane %v13201_v39, 7  ;;  %v5116_v39 = vld [vmem:[%s13419_s5 + $0x38] sm:$0xff]  ;;  %5176 = vmatpush.msra.mxu3 %v5131_v49 }
 0x4b3   : > { %v4292_v63 = vrot.slane %v13203_v56, 7  ;;  %v5115_v56 = vld [vmem:[%s13419_s5 + $0x30] sm:$0xff]  ;;  %5155 = vmatpush.msra.mxu2 %v5116_v39 }
 0x4b4   : > { %v4235_v41 = vsel %vm3712_vm2, %v4209_v6, %v4234_v53  ;;  %5177 = vmatpush.msra.mxu3 %v5130_v16 }
 0x4b5   : > { %v4237_v59 = vadd.f32 %v4235_v41, %v4179_v22  ;;  %v4293_v6 = vsel %vm3712_vm2, %v13209_v36, %v4292_v63  ;;  %5156 = vmatpush.msra.mxu2 %v5115_v56  ;;  %v5114_v36 = vld [vmem:[%s13419_s5 + $0x28] sm:$0xff] }
 0x4b7   : > { %v4295_v62 = vadd.f32 %v4293_v6, %v4237_v59  ;;  %5157 = vmatpush.msra.mxu2 %v5114_v36 }
 0x4b9   : > { %5158 = vmatpush.msra.mxu2 %v5113_v30  ;;  %v5189_v30 = vld [vmem:[%s13421_s7 + $0x8] sm:$0xff] }
 0x4bb   : > { %v13212_v19 = vpop.f32.mrf.mxu3  ;;  %v13218_v20 = vpop.f32.mrf.mxu2 }
 0x4bc   : > { %v13216_v43 = vpop.f32.mrf.mxu1  ;;  %v13220_v57 = vpop.f32.mrf.mxu0  ;;  %v4350_v32 = vrot.slane %v13212_v19, 7 }
 0x4bd   : > { %v4408_v50 = vrot.slane %v13216_v43, 7 }
 0x4be   : > { %v4351_v10 = vsel %vm3712_vm2, %v13218_v20, %v4350_v32  ;;  %v5129_v20 = vld [vmem:[%s13419_s5 + $0xa0] sm:$0xff] }
 0x4bf   : > { %v4353_v25 = vadd.f32 %v4351_v10, %v4295_v62  ;;  %v4409_v29 = vsel %vm3712_vm2, %v13220_v57, %v4408_v50  ;;  %5178 = vmatpush.msra.mxu3 %v5129_v20  ;;  %v5112_v57 = vld [vmem:[%s13419_s5 + $0x18] sm:$0xff]  ;;  %v5188_v20 = vld [vmem:[%s13421_s7] sm:$0xff] }
 0x4c0   : > { %5159 = vmatpush.msra.mxu2 %v5112_v57 }
 0x4c1   : > { %v4411_v23 = vadd.f32 %v4409_v29, %v4353_v25  ;;  %5179 = vmatpush.msra.mxu3 %v5128_v5 }
 0x4c2   : > { %5160 = vmatpush.msra.mxu2 %v5111_v58 }
 0x4c3   : > { %5180 = vmatpush.msra.mxu3 %v5127_v35 }
 0x4c4   : > { %5161 = vmatpush.msra.mxu2 %v5110_v1 }
 0x4c5   : > { %v13236_v8 = vpop.f32.mrf.mxu3  ;;  %v13240_v9 = vpop.f32.mrf.mxu2  ;;  %5181 = vmatpush.msra.mxu3 %v5126_v24 }
 0x4c6   : > { %v13238_v38 = vpop.f32.mrf.mxu1  ;;  %v13250_v17 = vpop.f32.mrf.mxu0  ;;  %v4466_v27 = vrot.slane %v13236_v8, 7 }
 0x4c7   : > { %v4524_v51 = vrot.slane %v13238_v38, 7  ;;  %v5109_v38 = vld [vmem:[%s13419_s5] sm:$0xff] }
 0x4c8   : > { %v4467_v18 = vsel %vm3712_vm2, %v13240_v9, %v4466_v27  ;;  %v5125_v9 = vld [vmem:[%s13419_s5 + $0x80] sm:$0xff]  ;;  %5162 = vmatpush.msra.mxu2 %v5109_v38 }
 0x4c9   : > { %v4469_v54 = vadd.f32 %v4467_v18, %v4411_v23  ;;  %v4525_v15 = vsel %vm3712_vm2, %v13250_v17, %v4524_v51  ;;  %5182 = vmatpush.msra.mxu3 %v5125_v9  ;;  %v5141_v23 = vld [vmem:[%s13420_s6] sm:$0x1] }
 0x4cb   : > { %v4527_v8 = vadd.f32 %v4525_v15, %v4469_v54  ;;  %v5192_v54 = vld [vmem:[%s13422_s8] sm:$0x1] }
 0x4cf   : > { %v4577_v2 = vpop.f32.mrf.mxu3  ;;  %v4557_v11 = vpop.f32.mrf.mxu2 }
 0x4d0   : > { %v13283_v31 = vpop.f32.mrf.mxu1  ;;  %v4615_v47 = vpop.f32.mrf.mxu0  ;;  %v4582_v48 = vrot.slane %v4577_v2, 7 }
 0x4d1   : > { %v4640_v4 = vrot.slane %v13283_v31, 7 }
 0x4d2   : > { %v4583_v40 = vsel %vm3712_vm2, %v4557_v11, %v4582_v48 }
 0x4d3   : > { %v4585_v0 = vadd.f32 %v4583_v40, %v4527_v8  ;;  %v4641_v13 = vsel %vm3712_vm2, %v4615_v47, %v4640_v4 }
 0x4d5   : > { %v4643_v33 = vadd.f32 %v4641_v13, %v4585_v0 }
 0x4d9   : > { %v4693_v19 = vpop.f32.mrf.mxu3  ;;  %v4673_v14 = vpop.f32.mrf.mxu2 }
 0x4da   : > { %v4751_v43 = vpop.f32.mrf.mxu1  ;;  %v4731_v52 = vpop.f32.mrf.mxu0  ;;  %v4698_v26 = vrot.slane %v4693_v19, 7 }
 0x4db   : > { %v4756_v55 = vrot.slane %v4751_v43, 7  ;;  %v5190_v43 = vld [vmem:[%s13421_s7 + $0x10] sm:$0xff] }
 0x4dc   : > { %v4699_v45 = vsel %vm3712_vm2, %v4673_v14, %v4698_v26  ;;  %5209 = vmatpush.msra.mxu0 %v5190_v43 }
 0x4dd   : > { %v4701_v3 = vadd.f32 %v4699_v45, %v4643_v33  ;;  %v4757_v7 = vsel %vm3712_vm2, %v4731_v52, %v4756_v55 }
 0x4de   : > { %5210 = vmatpush.msra.mxu0 %v5189_v30 }
 0x4df   : > { %v4759_v41 = vadd.f32 %v4757_v7, %v4701_v3 }
 0x4e0   : > { %5211 = vmatpush.msra.mxu0 %v5188_v20 }
 0x4e3   : > { %v4809_v60 = vpop.f32.mrf.mxu3  ;;  %v4789_v37 = vpop.f32.mrf.mxu2 }
 0x4e4   : > { %v4867_v17 = vpop.f32.mrf.mxu1  ;;  %v4847_v53 = vpop.f32.mrf.mxu0  ;;  %v4814_v21 = vrot.slane %v4809_v60, 7 }
 0x4e5   : > { %v4872_v2 = vrot.slane %v4867_v17, 7 }
 0x4e6   : > { %v4815_v28 = vsel %vm3712_vm2, %v4789_v37, %v4814_v21 }
 0x4e7   : > { %v4817_v63 = vadd.f32 %v4815_v28, %v4759_v41  ;;  %v4873_v59 = vsel %vm3712_vm2, %v4847_v53, %v4872_v2 }
 0x4e9   : > { %v4875_v12 = vadd.f32 %v4873_v59, %v4817_v63 }
 0x4ed   : > { %v4925_v22 = vpop.f32.mrf.mxu3  ;;  %v4905_v32 = vpop.f32.mrf.mxu2 }
 0x4ee   : > { %v4930_v34 = vrot.slane %v4925_v22, 7  ;;  %v4983_v46 = vpop.f32.mrf.mxu1  ;;  %v4963_v31 = vpop.f32.mrf.mxu0 }
 0x4ef   : > { %v4988_v61 = vrot.slane %v4983_v46, 7 }
 0x4f0   : > { %v4931_v11 = vsel %vm3712_vm2, %v4905_v32, %v4930_v34 }
 0x4f1   : > { %v4933_v47 = vadd.f32 %v4931_v11, %v4875_v12  ;;  %v4989_v42 = vsel %vm3712_vm2, %v4963_v31, %v4988_v61 }
 0x4f3   : > { %v4991_v10 = vadd.f32 %v4989_v42, %v4933_v47 }
 0x4f7   : > { %v5041_v39 = vpop.f32.mrf.mxu3  ;;  %v5099_v6 = vpop.f32.mrf.mxu1 }
 0x4f8   : > { %v5046_v56 = vrot.slane %v5041_v39, 7  ;;  %v5021_v49 = vpop.f32.mrf.mxu2  ;;  %v5104_v62 = vrot.slane %v5099_v6, 7  ;;  %v5079_v25 = vpop.f32.mrf.mxu0 }
 0x4fa   : > { %v5047_v50 = vsel %vm3712_vm2, %v5021_v49, %v5046_v56  ;;  %v5105_v36 = vsel %vm3712_vm2, %v5079_v25, %v5104_v62 }
 0x4fb   : > { %v5049_v27 = vadd.f32 %v5047_v50, %v4991_v10 }
 0x4fd   : > { %v5107_v16 = vadd.f32 %v5105_v36, %v5049_v27 }
 0x4ff   : > { %v5108_v19 = vmax.f32 %v5107_v16, 0.0 }
 0x501   : > { %v5143_v29 = vperm.slane %v5108_v19, 0  ;;  %v5144_v18 = vperm.slane %v5108_v19, 1 }
 0x503   : > { %5163 = vmatmul.f32.vlgmr.msra.gmra.mxu2 %v5143_v29  ;;  %5183 = vmatmul.f32.vlgmr.msra.gmra.mxu3 %v5144_v18 }
 0x586   : > { %v5164_v14 = vpop.f32.mrf.mxu2  ;;  %v5184_v48 = vpop.f32.mrf.mxu3 }
 0x587   : > { %v5165_v51 = vadd.f32 %v5164_v14, %v5141_v23 }
 0x589   : > { %v5185_v57 = vadd.f32 %v5184_v48, %v5165_v51 }
 0x58b   : > { %v5187_v5 = vmax.f32 %v5185_v57, 0.0 }
 0x58d   : > { %5813 = vmatmul.msk.f32.vlgmr.msra.gmra.mxu0 %vm3665_vm1, %v5187_v5 }
 0x60a   : > { %v5213_v52 = vpop.f32.mrf.mxu0 }
 0x60b   : > { %v5214_v58 = vadd.f32 %v5213_v52, %v5192_v54 }
 0x60d   : > { %5217 = vst.msk [vmem:[%s324_s29] sm:$0x1] %vm5216_vm3, %v5214_v58 }
 0x60e   : > { %6917 = shalt.err (!%p6914_p3)
}
 0x60f   : > { %5835 = dma.vmem_to_hbm [thread:$0]  (%p7042_p5), %s5230_s21, 16, %s5232_s22, %s5219_s24  }
 0x610 PF: > { %p5841_p4 = scmp.ge.s32.totalorder %s6952_s12, 2  ;;  %s5243_s27 = sand.u32 1, %s6940_s30  }
 0x611   : > { %s5244_s17 = scalar_lea.sflag [#allocation3], %s5243_s27 }
 0x612   : > { %p5838_p7 = pnand %p5841_p4, %p7046_p6 }
 0x614   : > { %p5839_p8 = pneg %p5838_p7 }
 0x616   : > { %6935 = dma.done.wait (%p5839_p8), %s5244_s17, 16  }
 0x617   : > { %6937 = vsyncadd (%p5839_p8), %s5244_s17, 4294967280  ;;  %p19_p9 = scmp.ge.s32.totalorder %s7029_s15, 4   ;;  %s13930_s30 = smov %s6944_s10 }
 0x618   : > { %s13931_s10 = smov %s6948_s11  ;;  %s13932_s11 = smov %s7040_s18 }
 0x619   : > { %s13933_s12 = smov %s7029_s15  ;;  %21 = sbr.rel (!%p19_p9) target bundleno = 3 (0x3), region = 118 }
 0x61e   :  { %5249 = vsyncpa [#allocation3], 1 }
 0x61f   :  { %5251 = vsyncpa [#allocation3 + $0x1], 1 }

</bundles_post_ra>
